<compile_context>
chip_gen: v5e
topology: v5e:2x2
jax: 0.10.0
libtpu: 0.0.40
codegen_flags: <defaults>
</compile_context>

<pallas_src>
import functools

import jax
import jax.numpy as jnp
import numpy as np
from jax import lax
from jax.experimental import pallas as pl
from jax.experimental.pallas import tpu as pltpu


# ---------------------------------------------------------------------------
# Pallas kernel: hoisted layer-0 input matmul + interleaved 2-layer recurrence
# (fully unrolled, gate-aligned slabs) + head.
# ---------------------------------------------------------------------------
def pinball_gru_kernel(
    x_ref,                      # (Bt*T, F)   flattened batch-first input (f32)
    wih0_ref,                   # (F, 3HP)    layer-0 input weights (MXU dtype)
    whh0_ref,                   # (HP, 3HP)   layer-0 hidden weights
    bg0_ref,                    # (1, 3HP)    layer-0 folded gate biases (f32)
    bn0_ref,                    # (1, HP)     layer-0 bhh_n (f32)
    w1f_ref,                    # (2HP, 4HP)  layer-1 fused [Wih1|Whh1] slab
    b1f_ref,                    # (1, 4HP)    layer-1 fused biases (f32)
    ln_g_ref, ln_b_ref,         # (1, H)      LayerNorm gamma/beta
    w1_ref, b1_ref,             # (H, Hh), (1, Hh)
    w2_ref, b2_ref,             # (Hh, NQP), (1, NQP)   lane-dense padded output
    out_ref,                    # (Bt, NQP)
    gi_ref,                     # scratch (Bt, T, 3HP) f32  (layer-0 input gates)
    *, hidden: int,
):
    Bt, T, threeHP = gi_ref.shape
    HP = threeHP // 3
    H = hidden
    mxu = wih0_ref.dtype        # bf16 (or f32) inputs to the MXU, f32 accumulation

    # ---- layer-0 input path: one big (Bt*T, F) @ (F, 3HP) matmul, biases folded.
    gi0 = jnp.dot(x_ref[...].astype(mxu), wih0_ref[...],
                  preferred_element_type=jnp.float32)
    gi_ref[...] = gi0.reshape(Bt, T, 3 * HP) + bg0_ref[...]

    # ---- loop-invariant values hoisted (JAX does not CSE broadcast_in_dim).
    whh0 = whh0_ref[...]
    w1f = w1f_ref[...]
    bn0_b = jnp.broadcast_to(bn0_ref[...], (Bt, HP))
    b1f_b = jnp.broadcast_to(b1f_ref[...], (Bt, 4 * HP))

    h0 = jnp.zeros((Bt, HP), jnp.float32)
    h1 = jnp.zeros((Bt, HP), jnp.float32)

    # ---- interleaved 2-layer recurrence (fully unrolled; T is small & static).
    # Padding columns [H:HP) of h0/h1 provably stay exactly 0 through the update.
    # TODO(synk): hold whh0/w1f in MXU weight staging (matmul_push_rhs/acc/pop)
    #             across the unrolled steps instead of re-pushing the RHS per dot.
    # TODO(synk): for long T, time-chunk gi_ref via an inner fori_loop so the
    #             f32 (Bt,T,3HP) slab stays within v7x's 64 MiB VMEM.
    for t in range(T):
        gi_t = gi_ref[:, t, :]                                       # (Bt, 3HP)
        gh0 = jnp.dot(h0.astype(mxu), whh0,
                      preferred_element_type=jnp.float32)            # (Bt, 3HP)
        r0 = jax.nn.sigmoid(gi_t[:, 0:HP] + gh0[:, 0:HP])
        z0 = jax.nn.sigmoid(gi_t[:, HP:2 * HP] + gh0[:, HP:2 * HP])
        n0 = jnp.tanh(gi_t[:, 2 * HP:3 * HP]
                      + r0 * (gh0[:, 2 * HP:3 * HP] + bn0_b))
        h0 = n0 + z0 * (h0 - n0)                                     # f32 carry

        # layer-1: single fused MXU push per step -> [rz | gi_n | gh_n]
        hcat = jnp.concatenate([h0.astype(mxu), h1.astype(mxu)], axis=1)
        g1 = jnp.dot(hcat, w1f, preferred_element_type=jnp.float32) + b1f_b
        r1 = jax.nn.sigmoid(g1[:, 0:HP])
        z1 = jax.nn.sigmoid(g1[:, HP:2 * HP])
        n1 = jnp.tanh(g1[:, 2 * HP:3 * HP] + r1 * g1[:, 3 * HP:4 * HP])
        h1 = n1 + z1 * (h1 - n1)

    # ---- head: LayerNorm -> Linear -> ReLU -> Linear (elementwise math in f32).
    hlast = h1[:, :H]
    mean = jnp.mean(hlast, axis=-1, keepdims=True)
    var = jnp.mean((hlast - mean) ** 2, axis=-1, keepdims=True)
    y = (hlast - mean) * lax.rsqrt(var + 1e-5) * ln_g_ref[...] + ln_b_ref[...]
    a1 = jnp.maximum(
        jnp.dot(y.astype(mxu), w1_ref[...], preferred_element_type=jnp.float32)
        + b1_ref[...], 0.0)
    out_ref[...] = (
        jnp.dot(a1.astype(mxu), w2_ref[...], preferred_element_type=jnp.float32)
        + b2_ref[...])


# ---------------------------------------------------------------------------
# Wrapper
# ---------------------------------------------------------------------------
def pinball_gru_forward(x, params, *, mxu_dtype=jnp.bfloat16, batch_tile=None):
    """x: (B, T, F) float32, batch_first exactly like the PyTorch module."""
    x = x.astype(jnp.float32)
    B, T, F = x.shape
    H = params["whh0"].shape[0]
    Hh = params["w1"].shape[1]
    n_q = params["w2"].shape[1]
    HP = ((H + 127) // 128) * 128          # 128-lane aligned gate slabs
    NQP = ((n_q + 127) // 128) * 128       # lane-dense (unmasked) output store
    f32 = jnp.float32

    # ---- gate-aligned weight/bias packing (gate g at cols [g*HP, g*HP+H)).
    def pad_gate_cols(w):                  # (rows, 3H) -> (rows, 3HP)
        out = jnp.zeros((w.shape[0], 3 * HP), f32)
        for g in range(3):
            out = out.at[:, g * HP:g * HP + H].set(w[:, g * H:(g + 1) * H])
        return out

    bih0, bhh0 = params["bih0"][0], params["bhh0"][0]
    bih1, bhh1 = params["bih1"][0], params["bhh1"][0]

    wih0p = pad_gate_cols(params["wih0"]).astype(mxu_dtype)            # (F, 3HP)
    whh0p = (jnp.zeros((HP, 3 * HP), f32)
             .at[:H, :].set(pad_gate_cols(params["whh0"]))).astype(mxu_dtype)

    bg0 = jnp.zeros((1, 3 * HP), f32)                                  # r/z folded
    bg0 = bg0.at[0, 0:H].set(bih0[0:H] + bhh0[0:H])
    bg0 = bg0.at[0, HP:HP + H].set(bih0[H:2 * H] + bhh0[H:2 * H])
    bg0 = bg0.at[0, 2 * HP:2 * HP + H].set(bih0[2 * H:3 * H])
    bn0 = jnp.zeros((1, HP), f32).at[0, :H].set(bhh0[2 * H:3 * H])

    # layer-1 fused slab: rows [0,HP) take h0_t, rows [HP,2HP) take h1_{t-1};
    # cols = [ r | z | gi_n | gh_n ], each HP wide.
    wih1, whh1 = params["wih1"], params["whh1"]
    w1f = jnp.zeros((2 * HP, 4 * HP), f32)
    w1f = w1f.at[:H, 0:H].set(wih1[:, 0:H])
    w1f = w1f.at[:H, HP:HP + H].set(wih1[:, H:2 * H])
    w1f = w1f.at[:H, 2 * HP:2 * HP + H].set(wih1[:, 2 * H:3 * H])
    w1f = w1f.at[HP:HP + H, 0:H].set(whh1[:, 0:H])
    w1f = w1f.at[HP:HP + H, HP:HP + H].set(whh1[:, H:2 * H])
    w1f = w1f.at[HP:HP + H, 3 * HP:3 * HP + H].set(whh1[:, 2 * H:3 * H])
    w1f = w1f.astype(mxu_dtype)

    b1f = jnp.zeros((1, 4 * HP), f32)
    b1f = b1f.at[0, 0:H].set(bih1[0:H] + bhh1[0:H])
    b1f = b1f.at[0, HP:HP + H].set(bih1[H:2 * H] + bhh1[H:2 * H])
    b1f = b1f.at[0, 2 * HP:2 * HP + H].set(bih1[2 * H:3 * H])
    b1f = b1f.at[0, 3 * HP:3 * HP + H].set(bhh1[2 * H:3 * H])

    w2p = jnp.zeros((Hh, NQP), f32).at[:, :n_q].set(params["w2"]).astype(mxu_dtype)
    b2p = jnp.zeros((1, NQP), f32).at[:, :n_q].set(params["b2"])
    w1 = params["w1"].astype(mxu_dtype)
    b1 = params["b1"].astype(f32)
    ln_g = params["ln_g"].astype(f32)
    ln_b = params["ln_b"].astype(f32)

    # ---- batch tiling matched to the TensorCore count.
    # v5e/v6e (1 TC): single grid step, whole batch per step (grid is a serial
    # loop there; splitting just re-pays the serial recurrence).
    # v7x (2 TCs): exactly two "parallel" grid steps when the tile stays legal.
    if batch_tile is None:
        batch_tile = B
        try:
            kind = jax.devices()[0].device_kind.lower()
        except Exception:
            kind = ""
        if ("v7" in kind or "7x" in kind) and B % 2 == 0 and (B // 2) % 8 == 0:
            batch_tile = B // 2
    assert B % batch_tile == 0, "batch must divide evenly into batch tiles"
    assert batch_tile == B or batch_tile % 8 == 0, \
        "batch_tile must equal B or be a multiple of 8 (8x128 block rule)"
    grid = (B // batch_tile,)

    # Flatten x to 2-D rows so there is no 3-D, 4-lane-wide x tile in VMEM.
    x_flat = x.reshape(B * T, F)

    weights = (wih0p, whh0p, bg0, bn0, w1f, b1f, ln_g, ln_b, w1, b1, w2p, b2p)

    def full_spec(shape):
        # whole-array block, constant index map (fetched once across the grid)
        # TODO(synk): pipeline_mode=pl.Buffered(1) here would drop the weights'
        #             double-buffer copy once that knob is universally supported.
        return pl.BlockSpec(shape, lambda i: (0,) * len(shape))

    in_specs = [pl.BlockSpec((batch_tile * T, F), lambda i: (i, 0))]
    in_specs += [full_spec(w.shape) for w in weights]
    out_spec = pl.BlockSpec((batch_tile, NQP), lambda i: (i, 0))

    # ---- VMEM budget (lane/sublane-padded) and hardware-clamped limit.
    def tile_bytes(shape, dtype):
        s = list(shape)
        s[-1] = ((s[-1] + 127) // 128) * 128
        if len(s) >= 2:
            s[-2] = ((s[-2] + 7) // 8) * 8
        return int(np.prod(s)) * jnp.dtype(dtype).itemsize

    w_bytes = sum(tile_bytes(w.shape, w.dtype) for w in weights)
    x_tile_b = tile_bytes((batch_tile * T, F), f32)
    o_tile_b = tile_bytes((batch_tile, NQP), f32)
    gi_b = tile_bytes((batch_tile * T, 3 * HP), f32)
    vmem_need = 2 * (x_tile_b + o_tile_b) + 2 * w_bytes + gi_b

    try:
        hw_vmem = int(getattr(pltpu.get_tpu_info(), "vmem_capacity_bytes",
                              64 * 1024 * 1024))
    except Exception:
        hw_vmem = 64 * 1024 * 1024
    vmem_limit = int(min(hw_vmem - 8 * 1024 * 1024,
                         max(2 * vmem_need, 16 * 1024 * 1024)))

    flops = int(2 * B * T * (F * 3 * HP + HP * 3 * HP + 2 * HP * 4 * HP)
                + 2 * B * (H * Hh + Hh * NQP))
    transcend = int(6 * B * T * HP + B)
    bytes_accessed = int(x.size * 4 + B * NQP * 4 + w_bytes)

    out = pl.pallas_call(
        functools.partial(pinball_gru_kernel, hidden=H),
        out_shape=jax.ShapeDtypeStruct((B, NQP), jnp.float32),
        grid=grid,
        in_specs=in_specs,
        out_specs=out_spec,
        scratch_shapes=[pltpu.VMEM((batch_tile, T, 3 * HP), jnp.float32)],
        compiler_params=pltpu.CompilerParams(
            dimension_semantics=("parallel",),
            vmem_limit_bytes=vmem_limit),
        cost_estimate=pl.CostEstimate(
            flops=flops, transcendentals=transcend,
            bytes_accessed=bytes_accessed),
    )(x_flat, *weights)
    return out[:, :n_q]


# ---------------------------------------------------------------------------
# Deterministic parameter init (shapes match nn.GRU / nn.Linear / nn.LayerNorm,
# weights stored pre-transposed as (in, out)).
# ---------------------------------------------------------------------------
def init_params(key, n_feat, hidden, n_q):
    H, Hh = hidden, hidden // 2
    k_gru = 1.0 / np.sqrt(H)

    def unif(k, shape, bound):
        return jax.random.uniform(k, shape, jnp.float32, -bound, bound)

    keys = jax.random.split(key, 12)
    return {
        "wih0": unif(keys[0], (n_feat, 3 * H), k_gru),
        "whh0": unif(keys[1], (H, 3 * H), k_gru),
        "bih0": unif(keys[2], (1, 3 * H), k_gru),
        "bhh0": unif(keys[3], (1, 3 * H), k_gru),
        "wih1": unif(keys[4], (H, 3 * H), k_gru),
        "whh1": unif(keys[5], (H, 3 * H), k_gru),
        "bih1": unif(keys[6], (1, 3 * H), k_gru),
        "bhh1": unif(keys[7], (1, 3 * H), k_gru),
        "ln_g": jnp.ones((1, H), jnp.float32),
        "ln_b": jnp.zeros((1, H), jnp.float32),
        "w1": unif(keys[8], (H, Hh), 1.0 / np.sqrt(H)),
        "b1": unif(keys[9], (1, Hh), 1.0 / np.sqrt(H)),
        "w2": unif(keys[10], (Hh, n_q), 1.0 / np.sqrt(Hh)),
        "b2": unif(keys[11], (1, n_q), 1.0 / np.sqrt(Hh)),
    }


# ---------------------------------------------------------------------------
# Pure-JAX reference (PyTorch gate formula, same MXU-input dtype as requested)
# ---------------------------------------------------------------------------
def reference_forward(x, params, mxu_dtype=jnp.float32):
    B, T, _ = x.shape
    H = params["whh0"].shape[0]

    def mm(a, w):
        return jnp.dot(a.astype(mxu_dtype), w.astype(mxu_dtype),
                       preferred_element_type=jnp.float32)

    def cell(x_t, h, wih, whh, bih, bhh):
        gi = mm(x_t, wih) + bih
        gh = mm(h, whh) + bhh
        r = jax.nn.sigmoid(gi[:, :H] + gh[:, :H])
        z = jax.nn.sigmoid(gi[:, H:2 * H] + gh[:, H:2 * H])
        n = jnp.tanh(gi[:, 2 * H:] + r * gh[:, 2 * H:])
        return (1.0 - z) * n + z * h

    h0 = jnp.zeros((B, H), jnp.float32)
    h1 = jnp.zeros((B, H), jnp.float32)
    for t in range(T):
        h0 = cell(x[:, t, :], h0, params["wih0"], params["whh0"],
                  params["bih0"], params["bhh0"])
        h1 = cell(h0, h1, params["wih1"], params["whh1"],
                  params["bih1"], params["bhh1"])
    mean = h1.mean(-1, keepdims=True)
    var = ((h1 - mean) ** 2).mean(-1, keepdims=True)
    y = (h1 - mean) / jnp.sqrt(var + 1e-5) * params["ln_g"] + params["ln_b"]
    z1 = jnp.maximum(mm(y, params["w1"]) + params["b1"], 0.0)
    return mm(z1, params["w2"]) + params["b2"]


if __name__ == "__main__":
    cfg = {"hidden": 32, "dropout": 0.1}   # dropout inactive in eval/forward path
    n_feat, n_q = 4, 3
    B, T = 2, 8

    root = jax.random.PRNGKey(0)
    k_params, k_x = jax.random.split(root)
    params = init_params(k_params, n_feat, cfg["hidden"], n_q)
    x = jax.random.normal(k_x, (B, T, n_feat), jnp.float32)

    # 1) f32 MXU path: validates the gate-padded / interleaved restructuring
    #    against the plain reference.
    out_f32 = jax.block_until_ready(
        pinball_gru_forward(x, params, mxu_dtype=jnp.float32))
    ref_f32 = jax.block_until_ready(
        reference_forward(x, params, mxu_dtype=jnp.float32))
    np.testing.assert_allclose(np.asarray(out_f32), np.asarray(ref_f32),
                               rtol=1e-2, atol=1e-3)

    # 2) default bf16-MXU path (v6e/v7x fast path), checked against a reference
    #    that applies the same bf16 casts at the MXU inputs (f32 accumulation).
    #    Note: this intentionally differs slightly from a pure-f32 PyTorch forward.
    out_bf16 = jax.block_until_ready(pinball_gru_forward(x, params))
    ref_bf16 = jax.block_until_ready(
        reference_forward(x, params, mxu_dtype=jnp.bfloat16))
    np.testing.assert_allclose(np.asarray(out_bf16), np.asarray(ref_bf16),
                               rtol=1e-2, atol=1e-3)

    assert out_bf16.shape == (B, n_q)
    print("KERNEL_OK")
</pallas_src>

<mosaic_0001>
module attributes {stable_mosaic.version = 11 : i64} {
  func.func @pinball_gru_kernel(%arg0: i32, %arg1: memref<16x4xf32, #tpu.memory_space<vmem>>, %arg2: memref<4x384xf32, #tpu.memory_space<vmem>>, %arg3: memref<128x384xf32, #tpu.memory_space<vmem>>, %arg4: memref<1x384xf32, #tpu.memory_space<vmem>>, %arg5: memref<1x128xf32, #tpu.memory_space<vmem>>, %arg6: memref<256x512xf32, #tpu.memory_space<vmem>>, %arg7: memref<1x512xf32, #tpu.memory_space<vmem>>, %arg8: memref<1x32xf32, #tpu.memory_space<vmem>>, %arg9: memref<1x32xf32, #tpu.memory_space<vmem>>, %arg10: memref<32x16xf32, #tpu.memory_space<vmem>>, %arg11: memref<1x16xf32, #tpu.memory_space<vmem>>, %arg12: memref<16x128xf32, #tpu.memory_space<vmem>>, %arg13: memref<1x128xf32, #tpu.memory_space<vmem>>, %arg14: memref<2x128xf32, #tpu.memory_space<vmem>>, %arg15: memref<2x8x384xf32, #tpu.memory_space<vmem>>) attributes {dimension_semantics = [#tpu.dimension_semantics<parallel>], iteration_bounds = array<i64: 1>, scalar_prefetch = 0 : i64, scratch_operands = 1 : i64, tpu.core_type = #tpu.core_type<tc>, window_params = [{transform_indices = @transform_0, window_bounds = array<i64: 16, 4>}, {pipeline_mode = #tpu.pipeline_mode<synchronous>, transform_indices = @transform_1, window_bounds = array<i64: 4, 384>}, {pipeline_mode = #tpu.pipeline_mode<synchronous>, transform_indices = @transform_2, window_bounds = array<i64: 128, 384>}, {pipeline_mode = #tpu.pipeline_mode<synchronous>, transform_indices = @transform_3, window_bounds = array<i64: 1, 384>}, {pipeline_mode = #tpu.pipeline_mode<synchronous>, transform_indices = @transform_4, window_bounds = array<i64: 1, 128>}, {pipeline_mode = #tpu.pipeline_mode<synchronous>, transform_indices = @transform_5, window_bounds = array<i64: 256, 512>}, {pipeline_mode = #tpu.pipeline_mode<synchronous>, transform_indices = @transform_6, window_bounds = array<i64: 1, 512>}, {pipeline_mode = #tpu.pipeline_mode<synchronous>, transform_indices = @transform_7, window_bounds = array<i64: 1, 32>}, {pipeline_mode = #tpu.pipeline_mode<synchronous>, transform_indices = @transform_8, window_bounds = array<i64: 1, 32>}, {pipeline_mode = #tpu.pipeline_mode<synchronous>, transform_indices = @transform_9, window_bounds = array<i64: 32, 16>}, {pipeline_mode = #tpu.pipeline_mode<synchronous>, transform_indices = @transform_10, window_bounds = array<i64: 1, 16>}, {pipeline_mode = #tpu.pipeline_mode<synchronous>, transform_indices = @transform_11, window_bounds = array<i64: 16, 128>}, {pipeline_mode = #tpu.pipeline_mode<synchronous>, transform_indices = @transform_12, window_bounds = array<i64: 1, 128>}, {transform_indices = @transform_13, window_bounds = array<i64: 2, 128>}]} {
    %c0 = arith.constant 0 : index
    %c0_0 = arith.constant 0 : index
    %0 = vector.load %arg1[%c0, %c0_0] : memref<16x4xf32, #tpu.memory_space<vmem>>, vector<16x4xf32>
    %c0_1 = arith.constant 0 : index
    %c0_2 = arith.constant 0 : index
    %1 = vector.load %arg2[%c0_1, %c0_2] : memref<4x384xf32, #tpu.memory_space<vmem>>, vector<4x384xf32>
    %cst = arith.constant dense<0.000000e+00> : vector<16x384xf32>
    %2 = tpu.matmul %0, %1, %cst {dimension_numbers = #tpu.dot_dimension_numbers<[1], [0], [0], [1], [0, 0, 1, 1], [], []>} : vector<16x4xf32>, vector<4x384xf32>, vector<16x384xf32> -> vector<16x384xf32>
    %3 = vector.shape_cast %2 : vector<16x384xf32> to vector<2x8x384xf32>
    %c0_3 = arith.constant 0 : index
    %c0_4 = arith.constant 0 : index
    %4 = vector.load %arg4[%c0_3, %c0_4] : memref<1x384xf32, #tpu.memory_space<vmem>>, vector<1x384xf32>
    %5 = vector.shape_cast %4 : vector<1x384xf32> to vector<1x1x384xf32>
    %6 = vector.broadcast %5 : vector<1x1x384xf32> to vector<2x8x384xf32>
    %7 = arith.addf %3, %6 : vector<2x8x384xf32>
    %c0_5 = arith.constant 0 : index
    %c0_6 = arith.constant 0 : index
    %c0_7 = arith.constant 0 : index
    %8 = vector.load %arg15[%c0_5, %c0_6, %c0_7] : memref<2x8x384xf32, #tpu.memory_space<vmem>>, vector<2x8x384xf32>
    tpu.vector_store %arg15[%c0_5, %c0_6, %c0_7], %7 {strides = array<i32>} : memref<2x8x384xf32, #tpu.memory_space<vmem>>, vector<2x8x384xf32>,
    %c0_8 = arith.constant 0 : index
    %c0_9 = arith.constant 0 : index
    %9 = vector.load %arg3[%c0_8, %c0_9] : memref<128x384xf32, #tpu.memory_space<vmem>>, vector<128x384xf32>
    %c0_10 = arith.constant 0 : index
    %c0_11 = arith.constant 0 : index
    %10 = vector.load %arg6[%c0_10, %c0_11] : memref<256x512xf32, #tpu.memory_space<vmem>>, vector<256x512xf32>
    %c0_12 = arith.constant 0 : index
    %c0_13 = arith.constant 0 : index
    %11 = vector.load %arg5[%c0_12, %c0_13] : memref<1x128xf32, #tpu.memory_space<vmem>>, vector<1x128xf32>
    %12 = vector.shape_cast %11 : vector<1x128xf32> to vector<1x128xf32>
    %13 = vector.broadcast %12 : vector<1x128xf32> to vector<2x128xf32>
    %c0_14 = arith.constant 0 : index
    %c0_15 = arith.constant 0 : index
    %14 = vector.load %arg7[%c0_14, %c0_15] : memref<1x512xf32, #tpu.memory_space<vmem>>, vector<1x512xf32>
    %15 = vector.shape_cast %14 : vector<1x512xf32> to vector<1x512xf32>
    %16 = vector.broadcast %15 : vector<1x512xf32> to vector<2x512xf32>
    %cst_16 = arith.constant 0.000000e+00 : f32
    %17 = vector.broadcast %cst_16 : f32 to vector<2x128xf32>
    %cst_17 = arith.constant 0.000000e+00 : f32
    %18 = vector.broadcast %cst_17 : f32 to vector<2x128xf32>
    %c0_18 = arith.constant 0 : index
    %c0_19 = arith.constant 0 : index
    %c0_20 = arith.constant 0 : index
    %19 = vector.load %arg15[%c0_18, %c0_19, %c0_20] : memref<2x8x384xf32, #tpu.memory_space<vmem>>, vector<2x1x384xf32>
    %20 = vector.shape_cast %19 : vector<2x1x384xf32> to vector<2x384xf32>
    %cst_21 = arith.constant dense<0.000000e+00> : vector<2x384xf32>
    %21 = tpu.matmul %17, %9, %cst_21 {dimension_numbers = #tpu.dot_dimension_numbers<[1], [0], [0], [1], [0, 0, 1, 1], [], []>} : vector<2x128xf32>, vector<128x384xf32>, vector<2x384xf32> -> vector<2x384xf32>
    %22 = vector.extract_strided_slice %20 {offsets = [0, 0], sizes = [2, 128], strides = [1, 1]} : vector<2x384xf32> to vector<2x128xf32>
    %23 = vector.extract_strided_slice %21 {offsets = [0, 0], sizes = [2, 128], strides = [1, 1]} : vector<2x384xf32> to vector<2x128xf32>
    %24 = arith.addf %22, %23 : vector<2x128xf32>
    %25 = arith.negf %24 : vector<2x128xf32>
    %26 = math.exp %25 : vector<2x128xf32>
    %cst_22 = arith.constant 1.000000e+00 : f32
    %27 = vector.broadcast %cst_22 : f32 to vector<2x128xf32>
    %28 = arith.addf %27, %26 : vector<2x128xf32>
    %29 = arith.divf %27, %28 : vector<2x128xf32>
    %30 = vector.extract_strided_slice %20 {offsets = [0, 128], sizes = [2, 128], strides = [1, 1]} : vector<2x384xf32> to vector<2x128xf32>
    %31 = vector.extract_strided_slice %21 {offsets = [0, 128], sizes = [2, 128], strides = [1, 1]} : vector<2x384xf32> to vector<2x128xf32>
    %32 = arith.addf %30, %31 : vector<2x128xf32>
    %33 = arith.negf %32 : vector<2x128xf32>
    %34 = math.exp %33 : vector<2x128xf32>
    %cst_23 = arith.constant 1.000000e+00 : f32
    %35 = vector.broadcast %cst_23 : f32 to vector<2x128xf32>
    %36 = arith.addf %35, %34 : vector<2x128xf32>
    %37 = arith.divf %35, %36 : vector<2x128xf32>
    %38 = vector.extract_strided_slice %20 {offsets = [0, 256], sizes = [2, 128], strides = [1, 1]} : vector<2x384xf32> to vector<2x128xf32>
    %39 = vector.extract_strided_slice %21 {offsets = [0, 256], sizes = [2, 128], strides = [1, 1]} : vector<2x384xf32> to vector<2x128xf32>
    %40 = arith.addf %39, %13 : vector<2x128xf32>
    %41 = arith.mulf %29, %40 : vector<2x128xf32>
    %42 = arith.addf %38, %41 : vector<2x128xf32>
    %43 = math.tanh %42 : vector<2x128xf32>
    %44 = arith.subf %17, %43 : vector<2x128xf32>
    %45 = arith.mulf %37, %44 : vector<2x128xf32>
    %46 = arith.addf %43, %45 : vector<2x128xf32>
    %47 = tpu.concatenate %46, %18 in 1 : vector<2x128xf32>, vector<2x128xf32> -> vector<2x256xf32>
    %cst_24 = arith.constant dense<0.000000e+00> : vector<2x512xf32>
    %48 = tpu.matmul %47, %10, %cst_24 {dimension_numbers = #tpu.dot_dimension_numbers<[1], [0], [0], [1], [0, 0, 1, 1], [], []>} : vector<2x256xf32>, vector<256x512xf32>, vector<2x512xf32> -> vector<2x512xf32>
    %49 = arith.addf %48, %16 : vector<2x512xf32>
    %50 = vector.extract_strided_slice %49 {offsets = [0, 0], sizes = [2, 128], strides = [1, 1]} : vector<2x512xf32> to vector<2x128xf32>
    %51 = arith.negf %50 : vector<2x128xf32>
    %52 = math.exp %51 : vector<2x128xf32>
    %cst_25 = arith.constant 1.000000e+00 : f32
    %53 = vector.broadcast %cst_25 : f32 to vector<2x128xf32>
    %54 = arith.addf %53, %52 : vector<2x128xf32>
    %55 = arith.divf %53, %54 : vector<2x128xf32>
    %56 = vector.extract_strided_slice %49 {offsets = [0, 128], sizes = [2, 128], strides = [1, 1]} : vector<2x512xf32> to vector<2x128xf32>
    %57 = arith.negf %56 : vector<2x128xf32>
    %58 = math.exp %57 : vector<2x128xf32>
    %cst_26 = arith.constant 1.000000e+00 : f32
    %59 = vector.broadcast %cst_26 : f32 to vector<2x128xf32>
    %60 = arith.addf %59, %58 : vector<2x128xf32>
    %61 = arith.divf %59, %60 : vector<2x128xf32>
    %62 = vector.extract_strided_slice %49 {offsets = [0, 256], sizes = [2, 128], strides = [1, 1]} : vector<2x512xf32> to vector<2x128xf32>
    %63 = vector.extract_strided_slice %49 {offsets = [0, 384], sizes = [2, 128], strides = [1, 1]} : vector<2x512xf32> to vector<2x128xf32>
    %64 = arith.mulf %55, %63 : vector<2x128xf32>
    %65 = arith.addf %62, %64 : vector<2x128xf32>
    %66 = math.tanh %65 : vector<2x128xf32>
    %67 = arith.subf %18, %66 : vector<2x128xf32>
    %68 = arith.mulf %61, %67 : vector<2x128xf32>
    %69 = arith.addf %66, %68 : vector<2x128xf32>
    %c0_27 = arith.constant 0 : index
    %c1 = arith.constant 1 : index
    %c0_28 = arith.constant 0 : index
    %70 = vector.load %arg15[%c0_27, %c1, %c0_28] : memref<2x8x384xf32, #tpu.memory_space<vmem>>, vector<2x1x384xf32>
    %71 = vector.shape_cast %70 : vector<2x1x384xf32> to vector<2x384xf32>
    %cst_29 = arith.constant dense<0.000000e+00> : vector<2x384xf32>
    %72 = tpu.matmul %46, %9, %cst_29 {dimension_numbers = #tpu.dot_dimension_numbers<[1], [0], [0], [1], [0, 0, 1, 1], [], []>} : vector<2x128xf32>, vector<128x384xf32>, vector<2x384xf32> -> vector<2x384xf32>
    %73 = vector.extract_strided_slice %71 {offsets = [0, 0], sizes = [2, 128], strides = [1, 1]} : vector<2x384xf32> to vector<2x128xf32>
    %74 = vector.extract_strided_slice %72 {offsets = [0, 0], sizes = [2, 128], strides = [1, 1]} : vector<2x384xf32> to vector<2x128xf32>
    %75 = arith.addf %73, %74 : vector<2x128xf32>
    %76 = arith.negf %75 : vector<2x128xf32>
    %77 = math.exp %76 : vector<2x128xf32>
    %cst_30 = arith.constant 1.000000e+00 : f32
    %78 = vector.broadcast %cst_30 : f32 to vector<2x128xf32>
    %79 = arith.addf %78, %77 : vector<2x128xf32>
    %80 = arith.divf %78, %79 : vector<2x128xf32>
    %81 = vector.extract_strided_slice %71 {offsets = [0, 128], sizes = [2, 128], strides = [1, 1]} : vector<2x384xf32> to vector<2x128xf32>
    %82 = vector.extract_strided_slice %72 {offsets = [0, 128], sizes = [2, 128], strides = [1, 1]} : vector<2x384xf32> to vector<2x128xf32>
    %83 = arith.addf %81, %82 : vector<2x128xf32>
    %84 = arith.negf %83 : vector<2x128xf32>
    %85 = math.exp %84 : vector<2x128xf32>
    %cst_31 = arith.constant 1.000000e+00 : f32
    %86 = vector.broadcast %cst_31 : f32 to vector<2x128xf32>
    %87 = arith.addf %86, %85 : vector<2x128xf32>
    %88 = arith.divf %86, %87 : vector<2x128xf32>
    %89 = vector.extract_strided_slice %71 {offsets = [0, 256], sizes = [2, 128], strides = [1, 1]} : vector<2x384xf32> to vector<2x128xf32>
    %90 = vector.extract_strided_slice %72 {offsets = [0, 256], sizes = [2, 128], strides = [1, 1]} : vector<2x384xf32> to vector<2x128xf32>
    %91 = arith.addf %90, %13 : vector<2x128xf32>
    %92 = arith.mulf %80, %91 : vector<2x128xf32>
    %93 = arith.addf %89, %92 : vector<2x128xf32>
    %94 = math.tanh %93 : vector<2x128xf32>
    %95 = arith.subf %46, %94 : vector<2x128xf32>
    %96 = arith.mulf %88, %95 : vector<2x128xf32>
    %97 = arith.addf %94, %96 : vector<2x128xf32>
    %98 = tpu.concatenate %97, %69 in 1 : vector<2x128xf32>, vector<2x128xf32> -> vector<2x256xf32>
    %cst_32 = arith.constant dense<0.000000e+00> : vector<2x512xf32>
    %99 = tpu.matmul %98, %10, %cst_32 {dimension_numbers = #tpu.dot_dimension_numbers<[1], [0], [0], [1], [0, 0, 1, 1], [], []>} : vector<2x256xf32>, vector<256x512xf32>, vector<2x512xf32> -> vector<2x512xf32>
    %100 = arith.addf %99, %16 : vector<2x512xf32>
    %101 = vector.extract_strided_slice %100 {offsets = [0, 0], sizes = [2, 128], strides = [1, 1]} : vector<2x512xf32> to vector<2x128xf32>
    %102 = arith.negf %101 : vector<2x128xf32>
    %103 = math.exp %102 : vector<2x128xf32>
    %cst_33 = arith.constant 1.000000e+00 : f32
    %104 = vector.broadcast %cst_33 : f32 to vector<2x128xf32>
    %105 = arith.addf %104, %103 : vector<2x128xf32>
    %106 = arith.divf %104, %105 : vector<2x128xf32>
    %107 = vector.extract_strided_slice %100 {offsets = [0, 128], sizes = [2, 128], strides = [1, 1]} : vector<2x512xf32> to vector<2x128xf32>
    %108 = arith.negf %107 : vector<2x128xf32>
    %109 = math.exp %108 : vector<2x128xf32>
    %cst_34 = arith.constant 1.000000e+00 : f32
    %110 = vector.broadcast %cst_34 : f32 to vector<2x128xf32>
    %111 = arith.addf %110, %109 : vector<2x128xf32>
    %112 = arith.divf %110, %111 : vector<2x128xf32>
    %113 = vector.extract_strided_slice %100 {offsets = [0, 256], sizes = [2, 128], strides = [1, 1]} : vector<2x512xf32> to vector<2x128xf32>
    %114 = vector.extract_strided_slice %100 {offsets = [0, 384], sizes = [2, 128], strides = [1, 1]} : vector<2x512xf32> to vector<2x128xf32>
    %115 = arith.mulf %106, %114 : vector<2x128xf32>
    %116 = arith.addf %113, %115 : vector<2x128xf32>
    %117 = math.tanh %116 : vector<2x128xf32>
    %118 = arith.subf %69, %117 : vector<2x128xf32>
    %119 = arith.mulf %112, %118 : vector<2x128xf32>
    %120 = arith.addf %117, %119 : vector<2x128xf32>
    %c0_35 = arith.constant 0 : index
    %c2 = arith.constant 2 : index
    %c0_36 = arith.constant 0 : index
    %121 = vector.load %arg15[%c0_35, %c2, %c0_36] : memref<2x8x384xf32, #tpu.memory_space<vmem>>, vector<2x1x384xf32>
    %122 = vector.shape_cast %121 : vector<2x1x384xf32> to vector<2x384xf32>
    %cst_37 = arith.constant dense<0.000000e+00> : vector<2x384xf32>
    %123 = tpu.matmul %97, %9, %cst_37 {dimension_numbers = #tpu.dot_dimension_numbers<[1], [0], [0], [1], [0, 0, 1, 1], [], []>} : vector<2x128xf32>, vector<128x384xf32>, vector<2x384xf32> -> vector<2x384xf32>
    %124 = vector.extract_strided_slice %122 {offsets = [0, 0], sizes = [2, 128], strides = [1, 1]} : vector<2x384xf32> to vector<2x128xf32>
    %125 = vector.extract_strided_slice %123 {offsets = [0, 0], sizes = [2, 128], strides = [1, 1]} : vector<2x384xf32> to vector<2x128xf32>
    %126 = arith.addf %124, %125 : vector<2x128xf32>
    %127 = arith.negf %126 : vector<2x128xf32>
    %128 = math.exp %127 : vector<2x128xf32>
    %cst_38 = arith.constant 1.000000e+00 : f32
    %129 = vector.broadcast %cst_38 : f32 to vector<2x128xf32>
    %130 = arith.addf %129, %128 : vector<2x128xf32>
    %131 = arith.divf %129, %130 : vector<2x128xf32>
    %132 = vector.extract_strided_slice %122 {offsets = [0, 128], sizes = [2, 128], strides = [1, 1]} : vector<2x384xf32> to vector<2x128xf32>
    %133 = vector.extract_strided_slice %123 {offsets = [0, 128], sizes = [2, 128], strides = [1, 1]} : vector<2x384xf32> to vector<2x128xf32>
    %134 = arith.addf %132, %133 : vector<2x128xf32>
    %135 = arith.negf %134 : vector<2x128xf32>
    %136 = math.exp %135 : vector<2x128xf32>
    %cst_39 = arith.constant 1.000000e+00 : f32
    %137 = vector.broadcast %cst_39 : f32 to vector<2x128xf32>
    %138 = arith.addf %137, %136 : vector<2x128xf32>
    %139 = arith.divf %137, %138 : vector<2x128xf32>
    %140 = vector.extract_strided_slice %122 {offsets = [0, 256], sizes = [2, 128], strides = [1, 1]} : vector<2x384xf32> to vector<2x128xf32>
    %141 = vector.extract_strided_slice %123 {offsets = [0, 256], sizes = [2, 128], strides = [1, 1]} : vector<2x384xf32> to vector<2x128xf32>
    %142 = arith.addf %141, %13 : vector<2x128xf32>
    %143 = arith.mulf %131, %142 : vector<2x128xf32>
    %144 = arith.addf %140, %143 : vector<2x128xf32>
    %145 = math.tanh %144 : vector<2x128xf32>
    %146 = arith.subf %97, %145 : vector<2x128xf32>
    %147 = arith.mulf %139, %146 : vector<2x128xf32>
    %148 = arith.addf %145, %147 : vector<2x128xf32>
    %149 = tpu.concatenate %148, %120 in 1 : vector<2x128xf32>, vector<2x128xf32> -> vector<2x256xf32>
    %cst_40 = arith.constant dense<0.000000e+00> : vector<2x512xf32>
    %150 = tpu.matmul %149, %10, %cst_40 {dimension_numbers = #tpu.dot_dimension_numbers<[1], [0], [0], [1], [0, 0, 1, 1], [], []>} : vector<2x256xf32>, vector<256x512xf32>, vector<2x512xf32> -> vector<2x512xf32>
    %151 = arith.addf %150, %16 : vector<2x512xf32>
    %152 = vector.extract_strided_slice %151 {offsets = [0, 0], sizes = [2, 128], strides = [1, 1]} : vector<2x512xf32> to vector<2x128xf32>
    %153 = arith.negf %152 : vector<2x128xf32>
    %154 = math.exp %153 : vector<2x128xf32>
    %cst_41 = arith.constant 1.000000e+00 : f32
    %155 = vector.broadcast %cst_41 : f32 to vector<2x128xf32>
    %156 = arith.addf %155, %154 : vector<2x128xf32>
    %157 = arith.divf %155, %156 : vector<2x128xf32>
    %158 = vector.extract_strided_slice %151 {offsets = [0, 128], sizes = [2, 128], strides = [1, 1]} : vector<2x512xf32> to vector<2x128xf32>
    %159 = arith.negf %158 : vector<2x128xf32>
    %160 = math.exp %159 : vector<2x128xf32>
    %cst_42 = arith.constant 1.000000e+00 : f32
    %161 = vector.broadcast %cst_42 : f32 to vector<2x128xf32>
    %162 = arith.addf %161, %160 : vector<2x128xf32>
    %163 = arith.divf %161, %162 : vector<2x128xf32>
    %164 = vector.extract_strided_slice %151 {offsets = [0, 256], sizes = [2, 128], strides = [1, 1]} : vector<2x512xf32> to vector<2x128xf32>
    %165 = vector.extract_strided_slice %151 {offsets = [0, 384], sizes = [2, 128], strides = [1, 1]} : vector<2x512xf32> to vector<2x128xf32>
    %166 = arith.mulf %157, %165 : vector<2x128xf32>
    %167 = arith.addf %164, %166 : vector<2x128xf32>
    %168 = math.tanh %167 : vector<2x128xf32>
    %169 = arith.subf %120, %168 : vector<2x128xf32>
    %170 = arith.mulf %163, %169 : vector<2x128xf32>
    %171 = arith.addf %168, %170 : vector<2x128xf32>
    %c0_43 = arith.constant 0 : index
    %c3 = arith.constant 3 : index
    %c0_44 = arith.constant 0 : index
    %172 = vector.load %arg15[%c0_43, %c3, %c0_44] : memref<2x8x384xf32, #tpu.memory_space<vmem>>, vector<2x1x384xf32>
    %173 = vector.shape_cast %172 : vector<2x1x384xf32> to vector<2x384xf32>
    %cst_45 = arith.constant dense<0.000000e+00> : vector<2x384xf32>
    %174 = tpu.matmul %148, %9, %cst_45 {dimension_numbers = #tpu.dot_dimension_numbers<[1], [0], [0], [1], [0, 0, 1, 1], [], []>} : vector<2x128xf32>, vector<128x384xf32>, vector<2x384xf32> -> vector<2x384xf32>
    %175 = vector.extract_strided_slice %173 {offsets = [0, 0], sizes = [2, 128], strides = [1, 1]} : vector<2x384xf32> to vector<2x128xf32>
    %176 = vector.extract_strided_slice %174 {offsets = [0, 0], sizes = [2, 128], strides = [1, 1]} : vector<2x384xf32> to vector<2x128xf32>
    %177 = arith.addf %175, %176 : vector<2x128xf32>
    %178 = arith.negf %177 : vector<2x128xf32>
    %179 = math.exp %178 : vector<2x128xf32>
    %cst_46 = arith.constant 1.000000e+00 : f32
    %180 = vector.broadcast %cst_46 : f32 to vector<2x128xf32>
    %181 = arith.addf %180, %179 : vector<2x128xf32>
    %182 = arith.divf %180, %181 : vector<2x128xf32>
    %183 = vector.extract_strided_slice %173 {offsets = [0, 128], sizes = [2, 128], strides = [1, 1]} : vector<2x384xf32> to vector<2x128xf32>
    %184 = vector.extract_strided_slice %174 {offsets = [0, 128], sizes = [2, 128], strides = [1, 1]} : vector<2x384xf32> to vector<2x128xf32>
    %185 = arith.addf %183, %184 : vector<2x128xf32>
    %186 = arith.negf %185 : vector<2x128xf32>
    %187 = math.exp %186 : vector<2x128xf32>
    %cst_47 = arith.constant 1.000000e+00 : f32
    %188 = vector.broadcast %cst_47 : f32 to vector<2x128xf32>
    %189 = arith.addf %188, %187 : vector<2x128xf32>
    %190 = arith.divf %188, %189 : vector<2x128xf32>
    %191 = vector.extract_strided_slice %173 {offsets = [0, 256], sizes = [2, 128], strides = [1, 1]} : vector<2x384xf32> to vector<2x128xf32>
    %192 = vector.extract_strided_slice %174 {offsets = [0, 256], sizes = [2, 128], strides = [1, 1]} : vector<2x384xf32> to vector<2x128xf32>
    %193 = arith.addf %192, %13 : vector<2x128xf32>
    %194 = arith.mulf %182, %193 : vector<2x128xf32>
    %195 = arith.addf %191, %194 : vector<2x128xf32>
    %196 = math.tanh %195 : vector<2x128xf32>
    %197 = arith.subf %148, %196 : vector<2x128xf32>
    %198 = arith.mulf %190, %197 : vector<2x128xf32>
    %199 = arith.addf %196, %198 : vector<2x128xf32>
    %200 = tpu.concatenate %199, %171 in 1 : vector<2x128xf32>, vector<2x128xf32> -> vector<2x256xf32>
    %cst_48 = arith.constant dense<0.000000e+00> : vector<2x512xf32>
    %201 = tpu.matmul %200, %10, %cst_48 {dimension_numbers = #tpu.dot_dimension_numbers<[1], [0], [0], [1], [0, 0, 1, 1], [], []>} : vector<2x256xf32>, vector<256x512xf32>, vector<2x512xf32> -> vector<2x512xf32>
    %202 = arith.addf %201, %16 : vector<2x512xf32>
    %203 = vector.extract_strided_slice %202 {offsets = [0, 0], sizes = [2, 128], strides = [1, 1]} : vector<2x512xf32> to vector<2x128xf32>
    %204 = arith.negf %203 : vector<2x128xf32>
    %205 = math.exp %204 : vector<2x128xf32>
    %cst_49 = arith.constant 1.000000e+00 : f32
    %206 = vector.broadcast %cst_49 : f32 to vector<2x128xf32>
    %207 = arith.addf %206, %205 : vector<2x128xf32>
    %208 = arith.divf %206, %207 : vector<2x128xf32>
    %209 = vector.extract_strided_slice %202 {offsets = [0, 128], sizes = [2, 128], strides = [1, 1]} : vector<2x512xf32> to vector<2x128xf32>
    %210 = arith.negf %209 : vector<2x128xf32>
    %211 = math.exp %210 : vector<2x128xf32>
    %cst_50 = arith.constant 1.000000e+00 : f32
    %212 = vector.broadcast %cst_50 : f32 to vector<2x128xf32>
    %213 = arith.addf %212, %211 : vector<2x128xf32>
    %214 = arith.divf %212, %213 : vector<2x128xf32>
    %215 = vector.extract_strided_slice %202 {offsets = [0, 256], sizes = [2, 128], strides = [1, 1]} : vector<2x512xf32> to vector<2x128xf32>
    %216 = vector.extract_strided_slice %202 {offsets = [0, 384], sizes = [2, 128], strides = [1, 1]} : vector<2x512xf32> to vector<2x128xf32>
    %217 = arith.mulf %208, %216 : vector<2x128xf32>
    %218 = arith.addf %215, %217 : vector<2x128xf32>
    %219 = math.tanh %218 : vector<2x128xf32>
    %220 = arith.subf %171, %219 : vector<2x128xf32>
    %221 = arith.mulf %214, %220 : vector<2x128xf32>
    %222 = arith.addf %219, %221 : vector<2x128xf32>
    %c0_51 = arith.constant 0 : index
    %c4 = arith.constant 4 : index
    %c0_52 = arith.constant 0 : index
    %223 = vector.load %arg15[%c0_51, %c4, %c0_52] : memref<2x8x384xf32, #tpu.memory_space<vmem>>, vector<2x1x384xf32>
    %224 = vector.shape_cast %223 : vector<2x1x384xf32> to vector<2x384xf32>
    %cst_53 = arith.constant dense<0.000000e+00> : vector<2x384xf32>
    %225 = tpu.matmul %199, %9, %cst_53 {dimension_numbers = #tpu.dot_dimension_numbers<[1], [0], [0], [1], [0, 0, 1, 1], [], []>} : vector<2x128xf32>, vector<128x384xf32>, vector<2x384xf32> -> vector<2x384xf32>
    %226 = vector.extract_strided_slice %224 {offsets = [0, 0], sizes = [2, 128], strides = [1, 1]} : vector<2x384xf32> to vector<2x128xf32>
    %227 = vector.extract_strided_slice %225 {offsets = [0, 0], sizes = [2, 128], strides = [1, 1]} : vector<2x384xf32> to vector<2x128xf32>
    %228 = arith.addf %226, %227 : vector<2x128xf32>
    %229 = arith.negf %228 : vector<2x128xf32>
    %230 = math.exp %229 : vector<2x128xf32>
    %cst_54 = arith.constant 1.000000e+00 : f32
    %231 = vector.broadcast %cst_54 : f32 to vector<2x128xf32>
    %232 = arith.addf %231, %230 : vector<2x128xf32>
    %233 = arith.divf %231, %232 : vector<2x128xf32>
    %234 = vector.extract_strided_slice %224 {offsets = [0, 128], sizes = [2, 128], strides = [1, 1]} : vector<2x384xf32> to vector<2x128xf32>
    %235 = vector.extract_strided_slice %225 {offsets = [0, 128], sizes = [2, 128], strides = [1, 1]} : vector<2x384xf32> to vector<2x128xf32>
    %236 = arith.addf %234, %235 : vector<2x128xf32>
    %237 = arith.negf %236 : vector<2x128xf32>
    %238 = math.exp %237 : vector<2x128xf32>
    %cst_55 = arith.constant 1.000000e+00 : f32
    %239 = vector.broadcast %cst_55 : f32 to vector<2x128xf32>
    %240 = arith.addf %239, %238 : vector<2x128xf32>
    %241 = arith.divf %239, %240 : vector<2x128xf32>
    %242 = vector.extract_strided_slice %224 {offsets = [0, 256], sizes = [2, 128], strides = [1, 1]} : vector<2x384xf32> to vector<2x128xf32>
    %243 = vector.extract_strided_slice %225 {offsets = [0, 256], sizes = [2, 128], strides = [1, 1]} : vector<2x384xf32> to vector<2x128xf32>
    %244 = arith.addf %243, %13 : vector<2x128xf32>
    %245 = arith.mulf %233, %244 : vector<2x128xf32>
    %246 = arith.addf %242, %245 : vector<2x128xf32>
    %247 = math.tanh %246 : vector<2x128xf32>
    %248 = arith.subf %199, %247 : vector<2x128xf32>
    %249 = arith.mulf %241, %248 : vector<2x128xf32>
    %250 = arith.addf %247, %249 : vector<2x128xf32>
    %251 = tpu.concatenate %250, %222 in 1 : vector<2x128xf32>, vector<2x128xf32> -> vector<2x256xf32>
    %cst_56 = arith.constant dense<0.000000e+00> : vector<2x512xf32>
    %252 = tpu.matmul %251, %10, %cst_56 {dimension_numbers = #tpu.dot_dimension_numbers<[1], [0], [0], [1], [0, 0, 1, 1], [], []>} : vector<2x256xf32>, vector<256x512xf32>, vector<2x512xf32> -> vector<2x512xf32>
    %253 = arith.addf %252, %16 : vector<2x512xf32>
    %254 = vector.extract_strided_slice %253 {offsets = [0, 0], sizes = [2, 128], strides = [1, 1]} : vector<2x512xf32> to vector<2x128xf32>
    %255 = arith.negf %254 : vector<2x128xf32>
    %256 = math.exp %255 : vector<2x128xf32>
    %cst_57 = arith.constant 1.000000e+00 : f32
    %257 = vector.broadcast %cst_57 : f32 to vector<2x128xf32>
    %258 = arith.addf %257, %256 : vector<2x128xf32>
    %259 = arith.divf %257, %258 : vector<2x128xf32>
    %260 = vector.extract_strided_slice %253 {offsets = [0, 128], sizes = [2, 128], strides = [1, 1]} : vector<2x512xf32> to vector<2x128xf32>
    %261 = arith.negf %260 : vector<2x128xf32>
    %262 = math.exp %261 : vector<2x128xf32>
    %cst_58 = arith.constant 1.000000e+00 : f32
    %263 = vector.broadcast %cst_58 : f32 to vector<2x128xf32>
    %264 = arith.addf %263, %262 : vector<2x128xf32>
    %265 = arith.divf %263, %264 : vector<2x128xf32>
    %266 = vector.extract_strided_slice %253 {offsets = [0, 256], sizes = [2, 128], strides = [1, 1]} : vector<2x512xf32> to vector<2x128xf32>
    %267 = vector.extract_strided_slice %253 {offsets = [0, 384], sizes = [2, 128], strides = [1, 1]} : vector<2x512xf32> to vector<2x128xf32>
    %268 = arith.mulf %259, %267 : vector<2x128xf32>
    %269 = arith.addf %266, %268 : vector<2x128xf32>
    %270 = math.tanh %269 : vector<2x128xf32>
    %271 = arith.subf %222, %270 : vector<2x128xf32>
    %272 = arith.mulf %265, %271 : vector<2x128xf32>
    %273 = arith.addf %270, %272 : vector<2x128xf32>
    %c0_59 = arith.constant 0 : index
    %c5 = arith.constant 5 : index
    %c0_60 = arith.constant 0 : index
    %274 = vector.load %arg15[%c0_59, %c5, %c0_60] : memref<2x8x384xf32, #tpu.memory_space<vmem>>, vector<2x1x384xf32>
    %275 = vector.shape_cast %274 : vector<2x1x384xf32> to vector<2x384xf32>
    %cst_61 = arith.constant dense<0.000000e+00> : vector<2x384xf32>
    %276 = tpu.matmul %250, %9, %cst_61 {dimension_numbers = #tpu.dot_dimension_numbers<[1], [0], [0], [1], [0, 0, 1, 1], [], []>} : vector<2x128xf32>, vector<128x384xf32>, vector<2x384xf32> -> vector<2x384xf32>
    %277 = vector.extract_strided_slice %275 {offsets = [0, 0], sizes = [2, 128], strides = [1, 1]} : vector<2x384xf32> to vector<2x128xf32>
    %278 = vector.extract_strided_slice %276 {offsets = [0, 0], sizes = [2, 128], strides = [1, 1]} : vector<2x384xf32> to vector<2x128xf32>
    %279 = arith.addf %277, %278 : vector<2x128xf32>
    %280 = arith.negf %279 : vector<2x128xf32>
    %281 = math.exp %280 : vector<2x128xf32>
    %cst_62 = arith.constant 1.000000e+00 : f32
    %282 = vector.broadcast %cst_62 : f32 to vector<2x128xf32>
    %283 = arith.addf %282, %281 : vector<2x128xf32>
    %284 = arith.divf %282, %283 : vector<2x128xf32>
    %285 = vector.extract_strided_slice %275 {offsets = [0, 128], sizes = [2, 128], strides = [1, 1]} : vector<2x384xf32> to vector<2x128xf32>
    %286 = vector.extract_strided_slice %276 {offsets = [0, 128], sizes = [2, 128], strides = [1, 1]} : vector<2x384xf32> to vector<2x128xf32>
    %287 = arith.addf %285, %286 : vector<2x128xf32>
    %288 = arith.negf %287 : vector<2x128xf32>
    %289 = math.exp %288 : vector<2x128xf32>
    %cst_63 = arith.constant 1.000000e+00 : f32
    %290 = vector.broadcast %cst_63 : f32 to vector<2x128xf32>
    %291 = arith.addf %290, %289 : vector<2x128xf32>
    %292 = arith.divf %290, %291 : vector<2x128xf32>
    %293 = vector.extract_strided_slice %275 {offsets = [0, 256], sizes = [2, 128], strides = [1, 1]} : vector<2x384xf32> to vector<2x128xf32>
    %294 = vector.extract_strided_slice %276 {offsets = [0, 256], sizes = [2, 128], strides = [1, 1]} : vector<2x384xf32> to vector<2x128xf32>
    %295 = arith.addf %294, %13 : vector<2x128xf32>
    %296 = arith.mulf %284, %295 : vector<2x128xf32>
    %297 = arith.addf %293, %296 : vector<2x128xf32>
    %298 = math.tanh %297 : vector<2x128xf32>
    %299 = arith.subf %250, %298 : vector<2x128xf32>
    %300 = arith.mulf %292, %299 : vector<2x128xf32>
    %301 = arith.addf %298, %300 : vector<2x128xf32>
    %302 = tpu.concatenate %301, %273 in 1 : vector<2x128xf32>, vector<2x128xf32> -> vector<2x256xf32>
    %cst_64 = arith.constant dense<0.000000e+00> : vector<2x512xf32>
    %303 = tpu.matmul %302, %10, %cst_64 {dimension_numbers = #tpu.dot_dimension_numbers<[1], [0], [0], [1], [0, 0, 1, 1], [], []>} : vector<2x256xf32>, vector<256x512xf32>, vector<2x512xf32> -> vector<2x512xf32>
    %304 = arith.addf %303, %16 : vector<2x512xf32>
    %305 = vector.extract_strided_slice %304 {offsets = [0, 0], sizes = [2, 128], strides = [1, 1]} : vector<2x512xf32> to vector<2x128xf32>
    %306 = arith.negf %305 : vector<2x128xf32>
    %307 = math.exp %306 : vector<2x128xf32>
    %cst_65 = arith.constant 1.000000e+00 : f32
    %308 = vector.broadcast %cst_65 : f32 to vector<2x128xf32>
    %309 = arith.addf %308, %307 : vector<2x128xf32>
    %310 = arith.divf %308, %309 : vector<2x128xf32>
    %311 = vector.extract_strided_slice %304 {offsets = [0, 128], sizes = [2, 128], strides = [1, 1]} : vector<2x512xf32> to vector<2x128xf32>
    %312 = arith.negf %311 : vector<2x128xf32>
    %313 = math.exp %312 : vector<2x128xf32>
    %cst_66 = arith.constant 1.000000e+00 : f32
    %314 = vector.broadcast %cst_66 : f32 to vector<2x128xf32>
    %315 = arith.addf %314, %313 : vector<2x128xf32>
    %316 = arith.divf %314, %315 : vector<2x128xf32>
    %317 = vector.extract_strided_slice %304 {offsets = [0, 256], sizes = [2, 128], strides = [1, 1]} : vector<2x512xf32> to vector<2x128xf32>
    %318 = vector.extract_strided_slice %304 {offsets = [0, 384], sizes = [2, 128], strides = [1, 1]} : vector<2x512xf32> to vector<2x128xf32>
    %319 = arith.mulf %310, %318 : vector<2x128xf32>
    %320 = arith.addf %317, %319 : vector<2x128xf32>
    %321 = math.tanh %320 : vector<2x128xf32>
    %322 = arith.subf %273, %321 : vector<2x128xf32>
    %323 = arith.mulf %316, %322 : vector<2x128xf32>
    %324 = arith.addf %321, %323 : vector<2x128xf32>
    %c0_67 = arith.constant 0 : index
    %c6 = arith.constant 6 : index
    %c0_68 = arith.constant 0 : index
    %325 = vector.load %arg15[%c0_67, %c6, %c0_68] : memref<2x8x384xf32, #tpu.memory_space<vmem>>, vector<2x1x384xf32>
    %326 = vector.shape_cast %325 : vector<2x1x384xf32> to vector<2x384xf32>
    %cst_69 = arith.constant dense<0.000000e+00> : vector<2x384xf32>
    %327 = tpu.matmul %301, %9, %cst_69 {dimension_numbers = #tpu.dot_dimension_numbers<[1], [0], [0], [1], [0, 0, 1, 1], [], []>} : vector<2x128xf32>, vector<128x384xf32>, vector<2x384xf32> -> vector<2x384xf32>
    %328 = vector.extract_strided_slice %326 {offsets = [0, 0], sizes = [2, 128], strides = [1, 1]} : vector<2x384xf32> to vector<2x128xf32>
    %329 = vector.extract_strided_slice %327 {offsets = [0, 0], sizes = [2, 128], strides = [1, 1]} : vector<2x384xf32> to vector<2x128xf32>
    %330 = arith.addf %328, %329 : vector<2x128xf32>
    %331 = arith.negf %330 : vector<2x128xf32>
    %332 = math.exp %331 : vector<2x128xf32>
    %cst_70 = arith.constant 1.000000e+00 : f32
    %333 = vector.broadcast %cst_70 : f32 to vector<2x128xf32>
    %334 = arith.addf %333, %332 : vector<2x128xf32>
    %335 = arith.divf %333, %334 : vector<2x128xf32>
    %336 = vector.extract_strided_slice %326 {offsets = [0, 128], sizes = [2, 128], strides = [1, 1]} : vector<2x384xf32> to vector<2x128xf32>
    %337 = vector.extract_strided_slice %327 {offsets = [0, 128], sizes = [2, 128], strides = [1, 1]} : vector<2x384xf32> to vector<2x128xf32>
    %338 = arith.addf %336, %337 : vector<2x128xf32>
    %339 = arith.negf %338 : vector<2x128xf32>
    %340 = math.exp %339 : vector<2x128xf32>
    %cst_71 = arith.constant 1.000000e+00 : f32
    %341 = vector.broadcast %cst_71 : f32 to vector<2x128xf32>
    %342 = arith.addf %341, %340 : vector<2x128xf32>
    %343 = arith.divf %341, %342 : vector<2x128xf32>
    %344 = vector.extract_strided_slice %326 {offsets = [0, 256], sizes = [2, 128], strides = [1, 1]} : vector<2x384xf32> to vector<2x128xf32>
    %345 = vector.extract_strided_slice %327 {offsets = [0, 256], sizes = [2, 128], strides = [1, 1]} : vector<2x384xf32> to vector<2x128xf32>
    %346 = arith.addf %345, %13 : vector<2x128xf32>
    %347 = arith.mulf %335, %346 : vector<2x128xf32>
    %348 = arith.addf %344, %347 : vector<2x128xf32>
    %349 = math.tanh %348 : vector<2x128xf32>
    %350 = arith.subf %301, %349 : vector<2x128xf32>
    %351 = arith.mulf %343, %350 : vector<2x128xf32>
    %352 = arith.addf %349, %351 : vector<2x128xf32>
    %353 = tpu.concatenate %352, %324 in 1 : vector<2x128xf32>, vector<2x128xf32> -> vector<2x256xf32>
    %cst_72 = arith.constant dense<0.000000e+00> : vector<2x512xf32>
    %354 = tpu.matmul %353, %10, %cst_72 {dimension_numbers = #tpu.dot_dimension_numbers<[1], [0], [0], [1], [0, 0, 1, 1], [], []>} : vector<2x256xf32>, vector<256x512xf32>, vector<2x512xf32> -> vector<2x512xf32>
    %355 = arith.addf %354, %16 : vector<2x512xf32>
    %356 = vector.extract_strided_slice %355 {offsets = [0, 0], sizes = [2, 128], strides = [1, 1]} : vector<2x512xf32> to vector<2x128xf32>
    %357 = arith.negf %356 : vector<2x128xf32>
    %358 = math.exp %357 : vector<2x128xf32>
    %cst_73 = arith.constant 1.000000e+00 : f32
    %359 = vector.broadcast %cst_73 : f32 to vector<2x128xf32>
    %360 = arith.addf %359, %358 : vector<2x128xf32>
    %361 = arith.divf %359, %360 : vector<2x128xf32>
    %362 = vector.extract_strided_slice %355 {offsets = [0, 128], sizes = [2, 128], strides = [1, 1]} : vector<2x512xf32> to vector<2x128xf32>
    %363 = arith.negf %362 : vector<2x128xf32>
    %364 = math.exp %363 : vector<2x128xf32>
    %cst_74 = arith.constant 1.000000e+00 : f32
    %365 = vector.broadcast %cst_74 : f32 to vector<2x128xf32>
    %366 = arith.addf %365, %364 : vector<2x128xf32>
    %367 = arith.divf %365, %366 : vector<2x128xf32>
    %368 = vector.extract_strided_slice %355 {offsets = [0, 256], sizes = [2, 128], strides = [1, 1]} : vector<2x512xf32> to vector<2x128xf32>
    %369 = vector.extract_strided_slice %355 {offsets = [0, 384], sizes = [2, 128], strides = [1, 1]} : vector<2x512xf32> to vector<2x128xf32>
    %370 = arith.mulf %361, %369 : vector<2x128xf32>
    %371 = arith.addf %368, %370 : vector<2x128xf32>
    %372 = math.tanh %371 : vector<2x128xf32>
    %373 = arith.subf %324, %372 : vector<2x128xf32>
    %374 = arith.mulf %367, %373 : vector<2x128xf32>
    %375 = arith.addf %372, %374 : vector<2x128xf32>
    %c0_75 = arith.constant 0 : index
    %c7 = arith.constant 7 : index
    %c0_76 = arith.constant 0 : index
    %376 = vector.load %arg15[%c0_75, %c7, %c0_76] : memref<2x8x384xf32, #tpu.memory_space<vmem>>, vector<2x1x384xf32>
    %377 = vector.shape_cast %376 : vector<2x1x384xf32> to vector<2x384xf32>
    %cst_77 = arith.constant dense<0.000000e+00> : vector<2x384xf32>
    %378 = tpu.matmul %352, %9, %cst_77 {dimension_numbers = #tpu.dot_dimension_numbers<[1], [0], [0], [1], [0, 0, 1, 1], [], []>} : vector<2x128xf32>, vector<128x384xf32>, vector<2x384xf32> -> vector<2x384xf32>
    %379 = vector.extract_strided_slice %377 {offsets = [0, 0], sizes = [2, 128], strides = [1, 1]} : vector<2x384xf32> to vector<2x128xf32>
    %380 = vector.extract_strided_slice %378 {offsets = [0, 0], sizes = [2, 128], strides = [1, 1]} : vector<2x384xf32> to vector<2x128xf32>
    %381 = arith.addf %379, %380 : vector<2x128xf32>
    %382 = arith.negf %381 : vector<2x128xf32>
    %383 = math.exp %382 : vector<2x128xf32>
    %cst_78 = arith.constant 1.000000e+00 : f32
    %384 = vector.broadcast %cst_78 : f32 to vector<2x128xf32>
    %385 = arith.addf %384, %383 : vector<2x128xf32>
    %386 = arith.divf %384, %385 : vector<2x128xf32>
    %387 = vector.extract_strided_slice %377 {offsets = [0, 128], sizes = [2, 128], strides = [1, 1]} : vector<2x384xf32> to vector<2x128xf32>
    %388 = vector.extract_strided_slice %378 {offsets = [0, 128], sizes = [2, 128], strides = [1, 1]} : vector<2x384xf32> to vector<2x128xf32>
    %389 = arith.addf %387, %388 : vector<2x128xf32>
    %390 = arith.negf %389 : vector<2x128xf32>
    %391 = math.exp %390 : vector<2x128xf32>
    %cst_79 = arith.constant 1.000000e+00 : f32
    %392 = vector.broadcast %cst_79 : f32 to vector<2x128xf32>
    %393 = arith.addf %392, %391 : vector<2x128xf32>
    %394 = arith.divf %392, %393 : vector<2x128xf32>
    %395 = vector.extract_strided_slice %377 {offsets = [0, 256], sizes = [2, 128], strides = [1, 1]} : vector<2x384xf32> to vector<2x128xf32>
    %396 = vector.extract_strided_slice %378 {offsets = [0, 256], sizes = [2, 128], strides = [1, 1]} : vector<2x384xf32> to vector<2x128xf32>
    %397 = arith.addf %396, %13 : vector<2x128xf32>
    %398 = arith.mulf %386, %397 : vector<2x128xf32>
    %399 = arith.addf %395, %398 : vector<2x128xf32>
    %400 = math.tanh %399 : vector<2x128xf32>
    %401 = arith.subf %352, %400 : vector<2x128xf32>
    %402 = arith.mulf %394, %401 : vector<2x128xf32>
    %403 = arith.addf %400, %402 : vector<2x128xf32>
    %404 = tpu.concatenate %403, %375 in 1 : vector<2x128xf32>, vector<2x128xf32> -> vector<2x256xf32>
    %cst_80 = arith.constant dense<0.000000e+00> : vector<2x512xf32>
    %405 = tpu.matmul %404, %10, %cst_80 {dimension_numbers = #tpu.dot_dimension_numbers<[1], [0], [0], [1], [0, 0, 1, 1], [], []>} : vector<2x256xf32>, vector<256x512xf32>, vector<2x512xf32> -> vector<2x512xf32>
    %406 = arith.addf %405, %16 : vector<2x512xf32>
    %407 = vector.extract_strided_slice %406 {offsets = [0, 0], sizes = [2, 128], strides = [1, 1]} : vector<2x512xf32> to vector<2x128xf32>
    %408 = arith.negf %407 : vector<2x128xf32>
    %409 = math.exp %408 : vector<2x128xf32>
    %cst_81 = arith.constant 1.000000e+00 : f32
    %410 = vector.broadcast %cst_81 : f32 to vector<2x128xf32>
    %411 = arith.addf %410, %409 : vector<2x128xf32>
    %412 = arith.divf %410, %411 : vector<2x128xf32>
    %413 = vector.extract_strided_slice %406 {offsets = [0, 128], sizes = [2, 128], strides = [1, 1]} : vector<2x512xf32> to vector<2x128xf32>
    %414 = arith.negf %413 : vector<2x128xf32>
    %415 = math.exp %414 : vector<2x128xf32>
    %cst_82 = arith.constant 1.000000e+00 : f32
    %416 = vector.broadcast %cst_82 : f32 to vector<2x128xf32>
    %417 = arith.addf %416, %415 : vector<2x128xf32>
    %418 = arith.divf %416, %417 : vector<2x128xf32>
    %419 = vector.extract_strided_slice %406 {offsets = [0, 256], sizes = [2, 128], strides = [1, 1]} : vector<2x512xf32> to vector<2x128xf32>
    %420 = vector.extract_strided_slice %406 {offsets = [0, 384], sizes = [2, 128], strides = [1, 1]} : vector<2x512xf32> to vector<2x128xf32>
    %421 = arith.mulf %412, %420 : vector<2x128xf32>
    %422 = arith.addf %419, %421 : vector<2x128xf32>
    %423 = math.tanh %422 : vector<2x128xf32>
    %424 = arith.subf %375, %423 : vector<2x128xf32>
    %425 = arith.mulf %418, %424 : vector<2x128xf32>
    %426 = arith.addf %423, %425 : vector<2x128xf32>
    %427 = vector.extract_strided_slice %426 {offsets = [0, 0], sizes = [2, 32], strides = [1, 1]} : vector<2x128xf32> to vector<2x32xf32>
    %cst_83 = arith.constant dense<0.000000e+00> : vector<2xf32>
    %428 = vector.multi_reduction <add>, %427, %cst_83 [1] : vector<2x32xf32> to vector<2xf32>
    %429 = vector.shape_cast %428 : vector<2xf32> to vector<2x1xf32>
    %cst_84 = arith.constant 3.200000e+01 : f32
    %430 = vector.broadcast %cst_84 : f32 to vector<2x1xf32>
    %431 = arith.divf %429, %430 : vector<2x1xf32>
    %432 = vector.broadcast %431 : vector<2x1xf32> to vector<2x32xf32>
    %433 = arith.subf %427, %432 : vector<2x32xf32>
    %434 = arith.mulf %433, %433 : vector<2x32xf32>
    %cst_85 = arith.constant dense<0.000000e+00> : vector<2xf32>
    %435 = vector.multi_reduction <add>, %434, %cst_85 [1] : vector<2x32xf32> to vector<2xf32>
    %436 = vector.shape_cast %435 : vector<2xf32> to vector<2x1xf32>
    %cst_86 = arith.constant 3.200000e+01 : f32
    %437 = vector.broadcast %cst_86 : f32 to vector<2x1xf32>
    %438 = arith.divf %436, %437 : vector<2x1xf32>
    %439 = vector.broadcast %431 : vector<2x1xf32> to vector<2x32xf32>
    %440 = arith.subf %427, %439 : vector<2x32xf32>
    %cst_87 = arith.constant 9.99999974E-6 : f32
    %441 = vector.broadcast %cst_87 : f32 to vector<2x1xf32>
    %442 = arith.addf %438, %441 : vector<2x1xf32>
    %443 = math.rsqrt %442 : vector<2x1xf32>
    %444 = vector.broadcast %443 : vector<2x1xf32> to vector<2x32xf32>
    %445 = arith.mulf %440, %444 : vector<2x32xf32>
    %c0_88 = arith.constant 0 : index
    %c0_89 = arith.constant 0 : index
    %446 = vector.load %arg8[%c0_88, %c0_89] : memref<1x32xf32, #tpu.memory_space<vmem>>, vector<1x32xf32>
    %447 = vector.broadcast %446 : vector<1x32xf32> to vector<2x32xf32>
    %448 = arith.mulf %445, %447 : vector<2x32xf32>
    %c0_90 = arith.constant 0 : index
    %c0_91 = arith.constant 0 : index
    %449 = vector.load %arg9[%c0_90, %c0_91] : memref<1x32xf32, #tpu.memory_space<vmem>>, vector<1x32xf32>
    %450 = vector.broadcast %449 : vector<1x32xf32> to vector<2x32xf32>
    %451 = arith.addf %448, %450 : vector<2x32xf32>
    %c0_92 = arith.constant 0 : index
    %c0_93 = arith.constant 0 : index
    %452 = vector.load %arg10[%c0_92, %c0_93] : memref<32x16xf32, #tpu.memory_space<vmem>>, vector<32x16xf32>
    %cst_94 = arith.constant dense<0.000000e+00> : vector<2x16xf32>
    %453 = tpu.matmul %451, %452, %cst_94 {dimension_numbers = #tpu.dot_dimension_numbers<[1], [0], [0], [1], [0, 0, 1, 1], [], []>} : vector<2x32xf32>, vector<32x16xf32>, vector<2x16xf32> -> vector<2x16xf32>
    %c0_95 = arith.constant 0 : index
    %c0_96 = arith.constant 0 : index
    %454 = vector.load %arg11[%c0_95, %c0_96] : memref<1x16xf32, #tpu.memory_space<vmem>>, vector<1x16xf32>
    %455 = vector.broadcast %454 : vector<1x16xf32> to vector<2x16xf32>
    %456 = arith.addf %453, %455 : vector<2x16xf32>
    %cst_97 = arith.constant 0.000000e+00 : f32
    %457 = vector.broadcast %cst_97 : f32 to vector<2x16xf32>
    %458 = arith.maximumf %456, %457 : vector<2x16xf32>
    %c0_98 = arith.constant 0 : index
    %c0_99 = arith.constant 0 : index
    %459 = vector.load %arg12[%c0_98, %c0_99] : memref<16x128xf32, #tpu.memory_space<vmem>>, vector<16x128xf32>
    %cst_100 = arith.constant dense<0.000000e+00> : vector<2x128xf32>
    %460 = tpu.matmul %458, %459, %cst_100 {dimension_numbers = #tpu.dot_dimension_numbers<[1], [0], [0], [1], [0, 0, 1, 1], [], []>} : vector<2x16xf32>, vector<16x128xf32>, vector<2x128xf32> -> vector<2x128xf32>
    %c0_101 = arith.constant 0 : index
    %c0_102 = arith.constant 0 : index
    %461 = vector.load %arg13[%c0_101, %c0_102] : memref<1x128xf32, #tpu.memory_space<vmem>>, vector<1x128xf32>
    %462 = vector.broadcast %461 : vector<1x128xf32> to vector<2x128xf32>
    %463 = arith.addf %460, %462 : vector<2x128xf32>
    %c0_103 = arith.constant 0 : index
    %c0_104 = arith.constant 0 : index
    %464 = vector.load %arg14[%c0_103, %c0_104] : memref<2x128xf32, #tpu.memory_space<vmem>>, vector<2x128xf32>
    tpu.vector_store %arg14[%c0_103, %c0_104], %463 {strides = array<i32>} : memref<2x128xf32, #tpu.memory_space<vmem>>, vector<2x128xf32>,
    return
  }
  func.func @transform_0(%arg0: i32) -> (i32, i32) {
    %c0_i32 = arith.constant 0 : i32
    %c0_i32_0 = arith.constant 0 : i32
    return %arg0, %c0_i32 : i32, i32
  }
  func.func @transform_1(%arg0: i32) -> (i32, i32) {
    %c0_i32 = arith.constant 0 : i32
    %c0_i32_0 = arith.constant 0 : i32
    %c0_i32_1 = arith.constant 0 : i32
    return %c0_i32, %c0_i32_0 : i32, i32
  }
  func.func @transform_2(%arg0: i32) -> (i32, i32) {
    %c0_i32 = arith.constant 0 : i32
    %c0_i32_0 = arith.constant 0 : i32
    %c0_i32_1 = arith.constant 0 : i32
    return %c0_i32, %c0_i32_0 : i32, i32
  }
  func.func @transform_3(%arg0: i32) -> (i32, i32) {
    %c0_i32 = arith.constant 0 : i32
    %c0_i32_0 = arith.constant 0 : i32
    %c0_i32_1 = arith.constant 0 : i32
    return %c0_i32, %c0_i32_0 : i32, i32
  }
  func.func @transform_4(%arg0: i32) -> (i32, i32) {
    %c0_i32 = arith.constant 0 : i32
    %c0_i32_0 = arith.constant 0 : i32
    %c0_i32_1 = arith.constant 0 : i32
    return %c0_i32, %c0_i32_0 : i32, i32
  }
  func.func @transform_5(%arg0: i32) -> (i32, i32) {
    %c0_i32 = arith.constant 0 : i32
    %c0_i32_0 = arith.constant 0 : i32
    %c0_i32_1 = arith.constant 0 : i32
    return %c0_i32, %c0_i32_0 : i32, i32
  }
  func.func @transform_6(%arg0: i32) -> (i32, i32) {
    %c0_i32 = arith.constant 0 : i32
    %c0_i32_0 = arith.constant 0 : i32
    %c0_i32_1 = arith.constant 0 : i32
    return %c0_i32, %c0_i32_0 : i32, i32
  }
  func.func @transform_7(%arg0: i32) -> (i32, i32) {
    %c0_i32 = arith.constant 0 : i32
    %c0_i32_0 = arith.constant 0 : i32
    %c0_i32_1 = arith.constant 0 : i32
    return %c0_i32, %c0_i32_0 : i32, i32
  }
  func.func @transform_8(%arg0: i32) -> (i32, i32) {
    %c0_i32 = arith.constant 0 : i32
    %c0_i32_0 = arith.constant 0 : i32
    %c0_i32_1 = arith.constant 0 : i32
    return %c0_i32, %c0_i32_0 : i32, i32
  }
  func.func @transform_9(%arg0: i32) -> (i32, i32) {
    %c0_i32 = arith.constant 0 : i32
    %c0_i32_0 = arith.constant 0 : i32
    %c0_i32_1 = arith.constant 0 : i32
    return %c0_i32, %c0_i32_0 : i32, i32
  }
  func.func @transform_10(%arg0: i32) -> (i32, i32) {
    %c0_i32 = arith.constant 0 : i32
    %c0_i32_0 = arith.constant 0 : i32
    %c0_i32_1 = arith.constant 0 : i32
    return %c0_i32, %c0_i32_0 : i32, i32
  }
  func.func @transform_11(%arg0: i32) -> (i32, i32) {
    %c0_i32 = arith.constant 0 : i32
    %c0_i32_0 = arith.constant 0 : i32
    %c0_i32_1 = arith.constant 0 : i32
    return %c0_i32, %c0_i32_0 : i32, i32
  }
  func.func @transform_12(%arg0: i32) -> (i32, i32) {
    %c0_i32 = arith.constant 0 : i32
    %c0_i32_0 = arith.constant 0 : i32
    %c0_i32_1 = arith.constant 0 : i32
    return %c0_i32, %c0_i32_0 : i32, i32
  }
  func.func @transform_13(%arg0: i32) -> (i32, i32) {
    %c0_i32 = arith.constant 0 : i32
    %c0_i32_0 = arith.constant 0 : i32
    return %arg0, %c0_i32 : i32, i32
  }
}

</mosaic_0001>

<bundles_post_ra>
// kernel: tpu_custom_call.1
= control target key start
LH: loop header
LB: loop body
LE: loop exit
PB: predicated region body
PF: predicated region fallthrough
CT: control target
= control target key end

     0   :  { %18 = vsyncpa [#allocation4], 0  ;;  %s8180_s0 = inlined_call_operand.vmem [shape: f32[16,4], index: 0, kind: input, shape index: {}]   ;;  %s8181_s1 = inlined_call_operand.vmem [shape: f32[4,384], index: 1, kind: input, shape index: {}]   ;;  %s8182_s2 = inlined_call_operand.hbm [shape: f32[128,384], index: 2, kind: input, shape index: {}]   ;;  %s8183_s3 = inlined_call_operand.vmem [shape: f32[1,384], index: 3, kind: input, shape index: {}]   ;;  %s8184_s4 = inlined_call_operand.vmem [shape: f32[1,128], index: 4, kind: input, shape index: {}]   ;;  %s8185_s5 = inlined_call_operand.hbm [shape: f32[256,512], index: 5, kind: input, shape index: {}]   ;;  %s8186_s6 = inlined_call_operand.vmem [shape: f32[1,512], index: 6, kind: input, shape index: {}]   ;;  %s8187_s7 = inlined_call_operand.vmem [shape: f32[1,32], index: 7, kind: input, shape index: {}]   ;;  %s8188_s8 = inlined_call_operand.vmem [shape: f32[1,32], index: 8, kind: input, shape index: {}]   ;;  %s8189_s9 = inlined_call_operand.vmem [shape: f32[32,16], index: 9, kind: input, shape index: {}]   ;;  %s8190_s10 = inlined_call_operand.vmem [shape: f32[1,16], index: 10, kind: input, shape index: {}]   ;;  %s8191_s11 = inlined_call_operand.vmem [shape: f32[16,128], index: 11, kind: input, shape index: {}]   ;;  %s8192_s12 = inlined_call_operand.vmem [shape: f32[1,128], index: 12, kind: input, shape index: {}]   ;;  %s8193_s13 = inlined_call_operand.hbm [shape: f32[2,128], index: 13, kind: output, shape index: {}]  }
   0x1   :  { %19 = vsyncpa [#allocation7], 0 }
   0x2   :  { %20 = vsyncpa [#allocation5], 0  ;;  %s29_s27 = sshll.u32 %s8182_s2, 4  ;;  %s4591_s28 = smov [#allocation3]   ;;  %s30_s27 = int_to_ptr.hbm [resolvable:$true] %s29_s27 }
   0x3   :  { %s31_s29 = sshll.u32 %s4591_s28, 4  ;;  %s46_s15 = sshll.u32 %s8185_s5, 4  ;;  %s32_s29 = int_to_ptr.vmem [resolvable:$true] %s31_s29  ;;  %s47_s15 = int_to_ptr.hbm [resolvable:$true] %s46_s15 }
   0x4   :  { %s4592_s16 = smov 384   ;;  %s4593_s17 = smov 24  }
   0x5   :  { %37 = dma.hbm_to_vmem [thread:$0]  %s30_s27, 6144, %s32_s29, [#allocation4], %s4592_s16, %s4592_s16, %s4593_s17  }
   0x6   :  { %s4594_s18 = smov [#allocation6]   ;;  %s4595_s20 = smov 512  }
   0x7   :  { %s48_s19 = sshll.u32 %s4594_s18, 4  ;;  %s4596_s21 = smov 32   ;;  %s49_s19 = int_to_ptr.vmem [resolvable:$true] %s48_s19 }
   0x8   :  { %54 = dma.hbm_to_vmem [thread:$0]  %s47_s15, 16384, %s49_s19, [#allocation7], %s4595_s20, %s4595_s20, %s4596_s21  }
   0x9   :  { %4585 = dma.done.wait [#allocation4], 6144  }
   0xa   :  { %4586 = vsyncadd [#allocation4], 4294961152 }
   0xb   :  { %4587 = dma.done.wait [#allocation7], 16384  }
   0xc   :  { %4588 = vsyncadd [#allocation7], 4294950912  ;;  %v237_v0 = vld [vmem:[#allocation3 + $0x168] sm:$0xff]  ;;  %v234_v1 = vld [vmem:[#allocation3 + $0x150] sm:$0xff]  ;;  %vm96_vm0 = vcmask 1043456   ;;  %vm89_vm1 = vcmask 31744  }
   0xd   :  { %385 = vmatpush.msra.mxu3 %v237_v0  ;;  %v79_v2 = vld [vmem:[%s8181_s1] sm:$0xff]  ;;  %v80_v4 = vld [vmem:[%s8181_s1 + $0x8] sm:$0xf]  ;;  %v225_v6 = vld [vmem:[#allocation3 + $0x108] sm:$0xff]  ;;  %v8194_v45 = vmov 0.0   ;;  %s4599_s30 = smov [#allocation8]  }
   0xe   :  { %v231_v3 = vld [vmem:[#allocation3 + $0x138] sm:$0xff]  ;;  %83 = vst [vmem:[#allocation1] ss:$2 sm:$0xff] %v79_v2  ;;  %v228_v5 = vld [vmem:[#allocation3 + $0x120] sm:$0xff]  ;;  %v4682_v7 = vld [vmem:[#allocation3 + $0x170] sm:$0xff] }
   0xf   :  { %386 = vmatpush.msra.mxu3 %v234_v1  ;;  %85 = vst [vmem:[#allocation1 + $0x10] ss:$2 sm:$0xff] %v80_v4  ;;  %v222_v8 = vld [vmem:[#allocation3 + $0xf0] sm:$0xff]  ;;  %v4685_v11 = vld [vmem:[#allocation3 + $0x158] sm:$0xff]  ;;  %v4692_v15 = vld [vmem:[#allocation3 + $0x140] sm:$0xff] }
  0x10   :  { %v219_v12 = vld [vmem:[#allocation3 + $0xd8] sm:$0xff]  ;;  %v216_v16 = vld [vmem:[#allocation3 + $0xc0] sm:$0xff]  ;;  %v4698_v18 = vld [vmem:[#allocation3 + $0x128] sm:$0xff] }
  0x11   :  { %387 = vmatpush.msra.mxu3 %v231_v3  ;;  %v77_v14 = vld [vmem:[%s8180_s0] sm:$0xff]  ;;  %v213_v19 = vld [vmem:[#allocation3 + $0xa8] sm:$0xff]  ;;  %v236_v20 = vld [vmem:[#allocation3 + $0x160] sm:$0xff] }
  0x12   :  { %v239_v17 = vld [vmem:[#allocation3 + $0x178] sm:$0xff]  ;;  %v4702_v21 = vld [vmem:[#allocation3 + $0x110] sm:$0xff]  ;;  %v233_v23 = vld [vmem:[#allocation3 + $0x148] sm:$0xff] }
  0x13   :  { %388 = vmatpush.msra.mxu3 %v228_v5  ;;  %v210_v22 = vld [vmem:[#allocation3 + $0x90] sm:$0xff]  ;;  %v4705_v24 = vld [vmem:[#allocation3 + $0xf8] sm:$0xff]  ;;  %v4708_v26 = vld [vmem:[#allocation3 + $0xe0] sm:$0xff] }
  0x14   :  { %v207_v25 = vld [vmem:[#allocation3 + $0x78] sm:$0xff]  ;;  %v78_v27 = vld [vmem:[%s8180_s0 + $0x8] sm:$0xff]  ;;  %v230_v29 = vld [vmem:[#allocation3 + $0x130] sm:$0xff] }
  0x15   :  { %v86_v9 = vld.sshfl [vmem:[#allocation1] sm:$0xff pattern:$0x75316420]  ;;  %389 = vmatpush.msra.mxu3 %v225_v6  ;;  %v87_v10 = vld.sshfl [vmem:[#allocation1 + $0x8] sm:$0xff pattern:$0x75316420] }
  0x16   :  { %3634 = vmatpush.msk.msra.mxu0 %vm96_vm0, %v86_v9  ;;  %3637 = vmatpush.msk.msra.mxu1 %vm96_vm0, %v87_v10  ;;  %v88_v13 = vld.sshfl [vmem:[#allocation1 + $0x10] sm:$0xff pattern:$0x75316420]  ;;  %v204_v28 = vld [vmem:[#allocation3 + $0x60] sm:$0xff]  ;;  %v4716_v30 = vld [vmem:[#allocation3 + $0xc8] sm:$0xff] }
  0x17   :  { %390 = vmatpush.msra.mxu3 %v222_v8  ;;  %3640 = vmatpush.msk.msra.mxu2 %vm96_vm0, %v88_v13  ;;  %v201_v31 = vld [vmem:[#allocation3 + $0x48] sm:$0xff]  ;;  %v4720_v32 = vld [vmem:[#allocation3 + $0x118] sm:$0xff]  ;;  %v4722_v33 = vld [vmem:[#allocation3 + $0xb0] sm:$0xff] }
  0x18   :  { %405 = vmatpush.msrb.mxu0 %v4682_v7  ;;  %3641 = vmatmul.msk.f32.vlgmr.msra.gmra.mxu2 %vm89_vm1, %v77_v14  ;;  %v198_v34 = vld [vmem:[#allocation3 + $0x30] sm:$0xff]  ;;  %v4725_v35 = vld [vmem:[#allocation3 + $0x100] sm:$0xff]  ;;  %v4727_v36 = vld [vmem:[#allocation3 + $0x98] sm:$0xff] }
  0x19   :  { %3635 = vmatmul.msk.f32.vlgmr.msra.gmra.mxu0 %vm89_vm1, %v77_v14  ;;  %391 = vmatpush.msra.mxu3 %v219_v12  ;;  %v195_v37 = vld [vmem:[#allocation3 + $0x18] sm:$0xff]  ;;  %v4731_v38 = vld [vmem:[#allocation3 + $0xe8] sm:$0xff]  ;;  %v4733_v39 = vld [vmem:[#allocation3 + $0x80] sm:$0xff] }
  0x1a   :  { %406 = vmatpush.msrb.mxu0 %v4685_v11  ;;  %3638 = vmatmul.msk.f32.vlgmr.msra.gmra.mxu1 %vm89_vm1, %v77_v14  ;;  %8650 = vst [vmem:[#allocation12_spill] sm:$0xff] %v4731_v38  ;;  %v192_v40 = vld [vmem:[#allocation3] sm:$0xff]  ;;  %v4737_v41 = vld [vmem:[#allocation3 + $0xd0] sm:$0xff]  ;;  %v4739_v42 = vld [vmem:[#allocation3 + $0x68] sm:$0xff] }
  0x1b   :  { %392 = vmatpush.msra.mxu3 %v216_v16  ;;  %425 = vmatpush.msrb.mxu1 %v239_v17  ;;  %8651 = vst [vmem:[#allocation13_spill] sm:$0xff] %v4737_v41  ;;  %v364_v43 = vld [vmem:[#allocation6 + $0x3e0] sm:$0xff]  ;;  %v4743_v44 = vld [vmem:[#allocation3 + $0xb8] sm:$0xff]  ;;  %v4746_v46 = vld [vmem:[#allocation3 + $0x50] sm:$0xff] }
  0x1c   :  { %407 = vmatpush.msrb.mxu0 %v4692_v15  ;;  %8652 = vst [vmem:[#allocation14_spill] sm:$0xff] %v4743_v44  ;;  %v360_v47 = vld [vmem:[#allocation6 + $0x3c0] sm:$0xff]  ;;  %v4752_v49 = vld [vmem:[#allocation3 + $0x38] sm:$0xff]  ;;  %v4756_v51 = vld [vmem:[#allocation3 + $0x88] sm:$0xff] }
  0x1d   :  { %393 = vmatpush.msra.mxu3 %v213_v19  ;;  %426 = vmatpush.msrb.mxu1 %v236_v20  ;;  %v4750_v48 = vld [vmem:[#allocation3 + $0xa0] sm:$0xff]  ;;  %8654 = vst [vmem:[#allocation16_spill] sm:$0xff] %v4756_v51  ;;  %v4762_v54 = vld [vmem:[#allocation3 + $0x70] sm:$0xff]  ;;  %v4764_v55 = vld [vmem:[#allocation3 + $0x8] sm:$0xff] }
  0x1e   :  { %408 = vmatpush.msrb.mxu0 %v4698_v18  ;;  %8653 = vst [vmem:[#allocation15_spill] sm:$0xff] %v4750_v48  ;;  %v356_v50 = vld [vmem:[#allocation6 + $0x3a0] sm:$0xff]  ;;  %v4768_v57 = vld [vmem:[#allocation3 + $0x58] sm:$0xff]  ;;  %v4776_v60 = vld [vmem:[#allocation3 + $0x28] sm:$0xff] }
  0x1f   :  { %394 = vmatpush.msra.mxu3 %v210_v22  ;;  %427 = vmatpush.msrb.mxu1 %v233_v23  ;;  %v4758_v52 = vld [vmem:[#allocation3 + $0x20] sm:$0xff]  ;;  %8655 = vst [vmem:[#allocation17_spill] sm:$0xff] %v4762_v54  ;;  %v4779_v61 = vld [vmem:[#allocation3 + $0x10] sm:$0xff]  ;;  %v4790_v5 = vld [vmem:[#allocation6 + $0x1e8] sm:$0xff] }
  0x20   :  { %409 = vmatpush.msrb.mxu0 %v4702_v21  ;;  %3642 = vmatmul.msk.f32.gmra.mxu2 %vm89_vm1, %v78_v27  ;;  %v352_v53 = vld [vmem:[#allocation6 + $0x380] sm:$0xff]  ;;  %8656 = vst [vmem:[#allocation18_spill] sm:$0xff] %v4768_v57  ;;  %v4797_v9 = vld [vmem:[#allocation6 + $0x1c8] sm:$0xff]  ;;  %v4807_v12 = vld [vmem:[%s8183_s3] sm:$0x7] }
  0x21   :  { %3636 = vmatmul.msk.f32.gmra.mxu0 %vm89_vm1, %v78_v27  ;;  %395 = vmatpush.msra.mxu3 %v207_v25  ;;  %v348_v56 = vld [vmem:[#allocation6 + $0x360] sm:$0xff]  ;;  %8658 = vst [vmem:[#allocation20_spill] sm:$0xff] %v4776_v60  ;;  %v4812_v14 = vld [vmem:[#allocation6 + $0x1a8] sm:$0xff]  ;;  %v174_v20 = vperm.slane %v4807_v12, 0  ;;  %v175_v23 = vperm.slane %v4807_v12, 1 }
  0x22   :  { %410 = vmatpush.msrb.mxu0 %v4705_v24  ;;  %3639 = vmatmul.msk.f32.gmra.mxu1 %vm89_vm1, %v78_v27  ;;  %v344_v58 = vld [vmem:[#allocation6 + $0x340] sm:$0xff]  ;;  %8659 = vst [vmem:[#allocation21_spill] sm:$0xff] %v4779_v61  ;;  %v4821_v19 = vld [vmem:[#allocation6 + $0x188] sm:$0xff] }
  0x23   :  { %396 = vmatpush.msra.mxu3 %v204_v28  ;;  %428 = vmatpush.msrb.mxu1 %v230_v29  ;;  %v4772_v59 = vld [vmem:[#allocation3 + $0x40] sm:$0xff]  ;;  %v4832_v27 = vld [vmem:[#allocation6 + $0x168] sm:$0xff]  ;;  %v4834_v28 = vld [vmem:[#allocation6 + $0x3f0] sm:$0xff] }
  0x24   :  { %411 = vmatpush.msrb.mxu0 %v4708_v26  ;;  %8657 = vst [vmem:[#allocation19_spill] sm:$0xff] %v4772_v59  ;;  %v4784_v62 = vld [vmem:[#allocation6 + $0x320] sm:$0xff] }
  0x25   :  { %397 = vmatpush.msra.mxu3 %v201_v31  ;;  %429 = vmatpush.msrb.mxu1 %v4720_v32  ;;  %8660 = vst [vmem:[#allocation22_spill] sm:$0xff] %v4784_v62  ;;  %v336_v63 = vld [vmem:[#allocation6 + $0x300] sm:$0xff] }
  0x26   :  { %412 = vmatpush.msrb.mxu0 %v4716_v30  ;;  %v332_v0 = vld [vmem:[#allocation6 + $0x2e0] sm:$0xff]  ;;  %8665 = vst [vmem:[#allocation27_spill] sm:$0xff] %v4834_v28 }
  0x27   :  { %398 = vmatpush.msra.mxu3 %v198_v34  ;;  %430 = vmatpush.msrb.mxu1 %v4725_v35  ;;  %v328_v1 = vld [vmem:[#allocation6 + $0x2c0] sm:$0xff] }
  0x28   :  { %413 = vmatpush.msrb.mxu0 %v4722_v33  ;;  %v324_v2 = vld [vmem:[#allocation6 + $0x2a0] sm:$0xff] }
  0x29   :  { %399 = vmatpush.msra.mxu3 %v195_v37  ;;  %431 = vmatpush.msrb.mxu1 %v4731_v38  ;;  %v320_v3 = vld [vmem:[#allocation6 + $0x280] sm:$0xff]  ;;  %v4841_v37 = vld [vmem:[#allocation6 + $0x148] sm:$0xff] }
  0x2a   :  { %414 = vmatpush.msrb.mxu0 %v4727_v36  ;;  %v4787_v4 = vld [vmem:[#allocation6 + $0x1e0] sm:$0xff] }
  0x2b   :  { %400 = vmatpush.msra.mxu3 %v192_v40  ;;  %432 = vmatpush.msrb.mxu1 %v4737_v41  ;;  %v4792_v6 = vld [vmem:[#allocation6 + $0x1c0] sm:$0xff]  ;;  %v4843_v40 = vld [vmem:[#allocation6 + $0x3e8] sm:$0xff] }
  0x2c   :  { %415 = vmatpush.msrb.mxu0 %v4733_v39  ;;  %401 = vmatmul.f32.vlgmr.msra.gmra.mxu3 %v8194_v45  ;;  %v4795_v8 = vld [vmem:[#allocation6 + $0x260] sm:$0xff]  ;;  %8666 = vst [vmem:[#allocation28_spill] sm:$0xff] %v4843_v40 }
  0x2d   :  { %584 = vmatpush.msrb.mxu3 %v364_v43  ;;  %433 = vmatpush.msrb.mxu1 %v4743_v44  ;;  %8661 = vst [vmem:[#allocation23_spill] sm:$0xff] %v4795_v8  ;;  %v4801_v10 = vld [vmem:[#allocation6 + $0x240] sm:$0xff]  ;;  %v5000_v44 = vld [vmem:[#allocation6 + $0x1b8] sm:$0xff] }
  0x2e   :  { %416 = vmatpush.msrb.mxu0 %v4739_v42  ;;  %564 = vmatpush.msrb.mxu2 %v4787_v4  ;;  %8662 = vst [vmem:[#allocation24_spill] sm:$0xff] %v4801_v10  ;;  %v4810_v13 = vld [vmem:[#allocation6 + $0x1a0] sm:$0xff] }
  0x2f   :  { %585 = vmatpush.msrb.mxu3 %v360_v47  ;;  %434 = vmatpush.msrb.mxu1 %v4750_v48  ;;  %v4816_v16 = vld [vmem:[#allocation6 + $0x220] sm:$0xff]  ;;  %v4847_v47 = vld [vmem:[#allocation6 + $0x3d0] sm:$0xff]  ;;  %8702 = vst [vmem:[#allocation64_spill] sm:$0xff] %v5000_v44 }
  0x30   :  { %417 = vmatpush.msrb.mxu0 %v4746_v46  ;;  %565 = vmatpush.msrb.mxu2 %v4792_v6  ;;  %8663 = vst [vmem:[#allocation25_spill] sm:$0xff] %v4816_v16  ;;  %v4819_v17 = vld [vmem:[#allocation6 + $0x180] sm:$0xff] }
  0x31   :  { %586 = vmatpush.msrb.mxu3 %v356_v50  ;;  %435 = vmatpush.msrb.mxu1 %v4756_v51  ;;  %v4826_v22 = vld [vmem:[#allocation6 + $0x200] sm:$0xff]  ;;  %8667 = vst [vmem:[#allocation29_spill] sm:$0xff] %v4847_v47 }
  0x32   :  { %418 = vmatpush.msrb.mxu0 %v4752_v49  ;;  %566 = vmatpush.msrb.mxu2 %v4810_v13  ;;  %8664 = vst [vmem:[#allocation26_spill] sm:$0xff] %v4826_v22  ;;  %v4830_v25 = vld [vmem:[#allocation6 + $0x160] sm:$0xff] }
  0x33   :  { %587 = vmatpush.msrb.mxu3 %v352_v53  ;;  %436 = vmatpush.msrb.mxu1 %v4762_v54  ;;  %v4839_v34 = vld [vmem:[#allocation6 + $0x140] sm:$0xff] }
  0x34   :  { %419 = vmatpush.msrb.mxu0 %v4758_v52  ;;  %567 = vmatpush.msrb.mxu2 %v4819_v17  ;;  %v4851_v53 = vld [vmem:[#allocation6 + $0x120] sm:$0xff] }
  0x35   :  { %588 = vmatpush.msrb.mxu3 %v348_v56  ;;  %437 = vmatpush.msrb.mxu1 %v4768_v57  ;;  %v4853_v56 = vld [vmem:[#allocation6 + $0x128] sm:$0xff]  ;;  %v4984_v57 = vld [vmem:[#allocation6 + $0x1d8] sm:$0xff] }
  0x36   :  { %420 = vmatpush.msrb.mxu0 %v4764_v55  ;;  %568 = vmatpush.msrb.mxu2 %v4830_v25  ;;  %8698 = vst [vmem:[#allocation60_spill] sm:$0xff] %v4984_v57 }
  0x37   :  { %421 = vmatmul.f32.vlgmr.msrb.gmra.mxu0 %v8194_v45  ;;  %589 = vmatpush.msrb.mxu3 %v344_v58  ;;  %v4855_v58 = vld [vmem:[#allocation6 + $0x3c8] sm:$0xff] }
  0x38   :  { %438 = vmatpush.msrb.mxu1 %v4772_v59  ;;  %604 = vmatpush.msra.mxu0 %v4790_v5  ;;  %8668 = vst [vmem:[#allocation30_spill] sm:$0xff] %v4855_v58  ;;  %v4982_v59 = vld [vmem:[#allocation6 + $0x1d0] sm:$0xff] }
  0x39   :  { %590 = vmatpush.msrb.mxu3 %v4784_v62  ;;  %569 = vmatpush.msrb.mxu2 %v4839_v34  ;;  %v4908_v62 = vld [vmem:[#allocation6 + $0x330] sm:$0xff]  ;;  %8697 = vst [vmem:[#allocation59_spill] sm:$0xff] %v4982_v59 }
  0x3a   :  { %439 = vmatpush.msrb.mxu1 %v4776_v60  ;;  %605 = vmatpush.msra.mxu0 %v4797_v9  ;;  %8677 = vst [vmem:[#allocation39_spill] sm:$0xff] %v4908_v62  ;;  %v4972_v60 = vld [vmem:[#allocation6 + $0x1f8] sm:$0xff] }
  0x3b   :  { %591 = vmatpush.msrb.mxu3 %v336_v63  ;;  %570 = vmatpush.msrb.mxu2 %v4851_v53  ;;  %v4859_v63 = vld [vmem:[#allocation6 + $0x3b0] sm:$0xff]  ;;  %8694 = vst [vmem:[#allocation56_spill] sm:$0xff] %v4972_v60 }
  0x3c   :  { %440 = vmatpush.msrb.mxu1 %v4779_v61  ;;  %606 = vmatpush.msra.mxu0 %v4812_v14  ;;  %8669 = vst [vmem:[#allocation31_spill] sm:$0xff] %v4859_v63  ;;  %v4970_v61 = vld [vmem:[#allocation6 + $0x1f0] sm:$0xff] }
  0x3d   :  { %441 = vmatmul.f32.vlgmr.msrb.gmra.mxu1 %v8194_v45  ;;  %592 = vmatpush.msrb.mxu3 %v332_v0  ;;  %v176_v0 = vperm.slane %v4807_v12, 2  ;;  %v4876_v12 = vld [vmem:[#allocation6 + $0xe0] sm:$0xff]  ;;  %8693 = vst [vmem:[#allocation55_spill] sm:$0xff] %v4970_v61 }
  0x3e   :  { %607 = vmatpush.msra.mxu0 %v4821_v19  ;;  %624 = vmatpush.msra.mxu1 %v4843_v40  ;;  %v4968_v40 = vld [vmem:[#allocation6 + $0x290] sm:$0xff] }
  0x3f   :  { %593 = vmatpush.msrb.mxu3 %v328_v1  ;;  %v4864_v1 = vld [vmem:[#allocation6 + $0x100] sm:$0xff]  ;;  %8692 = vst [vmem:[#allocation54_spill] sm:$0xff] %v4968_v40 }
  0x40   :  { %608 = vmatpush.msra.mxu0 %v4832_v27  ;;  %625 = vmatpush.msra.mxu1 %v4855_v58  ;;  %v4944_v58 = vld [vmem:[#allocation6 + $0x2d0] sm:$0xff] }
  0x41   :  { %594 = vmatpush.msrb.mxu3 %v324_v2  ;;  %v4866_v2 = vld [vmem:[#allocation6 + $0x108] sm:$0xff]  ;;  %571 = vmatpush.msrb.mxu2 %v4864_v1  ;;  %8684 = vst [vmem:[#allocation46_spill] sm:$0xff] %v4944_v58 }
  0x42   :  { %609 = vmatpush.msra.mxu0 %v4841_v37 }
  0x43   :  { %595 = vmatpush.msrb.mxu3 %v320_v3  ;;  %v4868_v3 = vld [vmem:[#allocation6 + $0x3a8] sm:$0xff]  ;;  %572 = vmatpush.msrb.mxu2 %v4876_v12 }
  0x44   :  { %610 = vmatpush.msra.mxu0 %v4853_v56  ;;  %8670 = vst [vmem:[#allocation32_spill] sm:$0xff] %v4868_v3  ;;  %626 = vmatpush.msra.mxu1 %v4868_v3  ;;  %v4940_v3 = vld [vmem:[#allocation6 + $0x2e8] sm:$0xff] }
  0x45   :  { %596 = vmatpush.msrb.mxu3 %v4795_v8  ;;  %v4896_v8 = vld [vmem:[#allocation6 + $0x350] sm:$0xff]  ;;  %8683 = vst [vmem:[#allocation45_spill] sm:$0xff] %v4940_v3 }
  0x46   :  { %611 = vmatpush.msra.mxu0 %v4866_v2  ;;  %8675 = vst [vmem:[#allocation37_spill] sm:$0xff] %v4896_v8 }
  0x47   :  { %597 = vmatpush.msrb.mxu3 %v4801_v10 }
  0x49   :  { %598 = vmatpush.msrb.mxu3 %v4816_v16  ;;  %v4892_v16 = vld [vmem:[#allocation6 + $0x368] sm:$0xff] }
  0x4a   :  { %8674 = vst [vmem:[#allocation36_spill] sm:$0xff] %v4892_v16 }
  0x4b   :  { %599 = vmatpush.msrb.mxu3 %v4826_v22  ;;  %v4890_v22 = vld [vmem:[#allocation6 + $0xc8] sm:$0xff] }
  0x4d   :  { %664 = vmatpush.msra.mxu3 %v4834_v28 }
  0x4f   :  { %665 = vmatpush.msra.mxu3 %v4847_v47 }
  0x51   :  { %666 = vmatpush.msra.mxu3 %v4859_v63  ;;  %v4884_v63 = vld [vmem:[#allocation6 + $0x370] sm:$0xff] }
  0x52   :  { %8673 = vst [vmem:[#allocation35_spill] sm:$0xff] %v4884_v63 }
  0x96   :  { %v120_v29 = vpop.f32.mrf.mxu0 }
  0x97   :  { %v180_v31 = vadd.f32 %v174_v20, %v120_v29  ;;  %v143_v43 = vpop.f32.mrf.mxu1  ;;  %v4872_v29 = vld [vmem:[#allocation6 + $0x390] sm:$0xff] }
  0x98   :  { %v181_v50 = vadd.f32 %v175_v23, %v143_v43  ;;  %8671 = vst [vmem:[#allocation33_spill] sm:$0xff] %v4872_v29  ;;  %667 = vmatpush.msra.mxu3 %v4872_v29  ;;  %v4880_v43 = vld [vmem:[#allocation6 + $0x388] sm:$0xff]  ;;  %v4888_v29 = vld [vmem:[#allocation6 + $0xc0] sm:$0xff] }
  0x99   :  { %186 = vst [vmem:[#allocation2] sm:$0xff] %v180_v31  ;;  %v4878_v31 = vld [vmem:[#allocation6 + $0xe8] sm:$0xff]  ;;  %627 = vmatpush.msra.mxu1 %v4880_v43  ;;  %573 = vmatpush.msrb.mxu2 %v4888_v29 }
  0x9a   :  { %187 = vst [vmem:[#allocation2 + $0x8] sm:$0xff] %v181_v50  ;;  %612 = vmatpush.msra.mxu0 %v4878_v31  ;;  %668 = vmatpush.msra.mxu3 %v4884_v63  ;;  %v4904_v63 = vld [vmem:[#allocation6 + $0x348] sm:$0xff] }
  0x9b   :  { %8672 = vst [vmem:[#allocation34_spill] sm:$0xff] %v4880_v43  ;;  %v166_v50 = vpop.f32.mrf.mxu2  ;;  %628 = vmatpush.msra.mxu1 %v4892_v16  ;;  %v4932_v16 = vld [vmem:[#allocation6 + $0x2f0] sm:$0xff] }
  0x9c   :  { %v182_v47 = vadd.f32 %v176_v0, %v166_v50  ;;  %613 = vmatpush.msra.mxu0 %v4890_v22  ;;  %669 = vmatpush.msra.mxu3 %v4896_v8  ;;  %8676 = vst [vmem:[#allocation38_spill] sm:$0xff] %v4904_v63  ;;  %v4926_v8 = vld [vmem:[#allocation6 + $0x68] sm:$0xff] }
  0x9d   :  { %629 = vmatpush.msra.mxu1 %v4904_v63  ;;  %8681 = vst [vmem:[#allocation43_spill] sm:$0xff] %v4932_v16 }
  0x9e   :  { %v123_v45 = vpop.f32.mrf.mxu0  ;;  %188 = vst [vmem:[#allocation2 + $0x10] sm:$0xff] %v182_v47  ;;  %670 = vmatpush.msra.mxu3 %v4908_v62  ;;  %v4916_v47 = vld [vmem:[#allocation6 + $0x328] sm:$0xff] }
  0x9f   :  { %v183_v28 = vadd.f32 %v174_v20, %v123_v45  ;;  %v146_v10 = vpop.f32.mrf.mxu1  ;;  %v4900_v45 = vld [vmem:[#allocation6 + $0xa0] sm:$0xff]  ;;  %v4902_v20 = vld [vmem:[#allocation6 + $0xa8] sm:$0xff]  ;;  %8678 = vst [vmem:[#allocation40_spill] sm:$0xff] %v4916_v47  ;;  %630 = vmatpush.msra.mxu1 %v4916_v47 }
  0xa0   :  { %v184_v50 = vadd.f32 %v175_v23, %v146_v10  ;;  %574 = vmatpush.msrb.mxu2 %v4900_v45  ;;  %614 = vmatpush.msra.mxu0 %v4902_v20  ;;  %v4912_v10 = vld [vmem:[#allocation6 + $0x80] sm:$0xff]  ;;  %v4914_v23 = vld [vmem:[#allocation6 + $0x88] sm:$0xff] }
  0xa1   :  { %189 = vst [vmem:[#allocation2 + $0x18] sm:$0xff] %v183_v28  ;;  %v4920_v28 = vld [vmem:[#allocation6 + $0x310] sm:$0xff]  ;;  %v4928_v62 = vld [vmem:[#allocation6 + $0x308] sm:$0xff]  ;;  %v4936_v47 = vld [vmem:[#allocation6 + $0x40] sm:$0xff] }
  0xa2   :  { %190 = vst [vmem:[#allocation2 + $0x20] sm:$0xff] %v184_v50  ;;  %575 = vmatpush.msrb.mxu2 %v4912_v10  ;;  %615 = vmatpush.msra.mxu0 %v4914_v23  ;;  %v4924_v50 = vld [vmem:[#allocation6 + $0x60] sm:$0xff] }
  0xa3   :  { %8679 = vst [vmem:[#allocation41_spill] sm:$0xff] %v4920_v28  ;;  %671 = vmatpush.msra.mxu3 %v4920_v28  ;;  %v169_v63 = vpop.f32.mrf.mxu2  ;;  %631 = vmatpush.msra.mxu1 %v4928_v62  ;;  %v4938_v28 = vld [vmem:[#allocation6 + $0x48] sm:$0xff] }
  0xa4   :  { %8680 = vst [vmem:[#allocation42_spill] sm:$0xff] %v4928_v62  ;;  %576 = vmatpush.msrb.mxu2 %v4924_v50  ;;  %616 = vmatpush.msra.mxu0 %v4926_v8  ;;  %v185_v43 = vadd.f32 %v176_v0, %v169_v63  ;;  %v4948_v63 = vld [vmem:[#allocation6 + $0x20] sm:$0xff]  ;;  %v4950_v0 = vld [vmem:[#allocation6 + $0x28] sm:$0xff]  ;;  %v4956_v62 = vld [vmem:[#allocation6 + $0x2b0] sm:$0xff] }
  0xa5   :  { %672 = vmatpush.msra.mxu3 %v4932_v16  ;;  %8682 = vst [vmem:[#allocation44_spill] sm:$0xff] %v4936_v47  ;;  %632 = vmatpush.msra.mxu1 %v4940_v3  ;;  %v4952_v16 = vld [vmem:[#allocation6 + $0x2c8] sm:$0xff]  ;;  %v4986_v54 = vld [vmem:[#allocation2] ss:$8 sm:$0x7] }
  0xa6   :  { %577 = vmatpush.msrb.mxu2 %v4936_v47  ;;  %617 = vmatpush.msra.mxu0 %v4938_v28  ;;  %191 = vst [vmem:[#allocation2 + $0x28] sm:$0xff] %v185_v43  ;;  %v4960_v43 = vld [vmem:[#allocation6] sm:$0xff]  ;;  %v4962_v3 = vld [vmem:[#allocation6 + $0x8] sm:$0xff]  ;;  %v5040_v47 = vld [vmem:[#allocation6 + $0x3f8] sm:$0xff] }
  0xa7   :  { %673 = vmatpush.msra.mxu3 %v4944_v58  ;;  %8685 = vst [vmem:[#allocation47_spill] sm:$0xff] %v4948_v63  ;;  %633 = vmatpush.msra.mxu1 %v4952_v16  ;;  %v4964_v58 = vld [vmem:[#allocation6 + $0x2a8] sm:$0xff] }
  0xa8   :  { %8686 = vst [vmem:[#allocation48_spill] sm:$0xff] %v4950_v0  ;;  %578 = vmatpush.msrb.mxu2 %v4948_v63  ;;  %618 = vmatpush.msra.mxu0 %v4950_v0  ;;  %v5026_v63 = vld [vmem:[#allocation6 + $0x170] sm:$0xff] }
  0xa9   :  { %8687 = vst [vmem:[#allocation49_spill] sm:$0xff] %v4952_v16  ;;  %674 = vmatpush.msra.mxu3 %v4956_v62  ;;  %634 = vmatpush.msra.mxu1 %v4964_v58  ;;  %v4978_v16 = vld [vmem:[#allocation6 + $0x270] sm:$0xff] }
  0xaa   :  { %8688 = vst [vmem:[#allocation50_spill] sm:$0xff] %v4956_v62  ;;  %579 = vmatpush.msrb.mxu2 %v4960_v43  ;;  %619 = vmatpush.msra.mxu0 %v4962_v3  ;;  %v4976_v62 = vld [vmem:[#allocation6 + $0x288] sm:$0xff] }
  0xab   :  { %8689 = vst [vmem:[#allocation51_spill] sm:$0xff] %v4960_v43  ;;  %675 = vmatpush.msra.mxu3 %v4968_v40  ;;  %635 = vmatpush.msra.mxu1 %v4976_v62  ;;  %v4992_v40 = vld [vmem:[#allocation6 + $0x250] sm:$0xff] }
  0xac   :  { %8690 = vst [vmem:[#allocation52_spill] sm:$0xff] %v4962_v3  ;;  %644 = vmatpush.msra.mxu2 %v4970_v61  ;;  %684 = vmatpush.msrb.mxu0 %v4972_v60  ;;  %v4998_v60 = vld [vmem:[#allocation6 + $0x1b0] sm:$0xff] }
  0xad   :  { %8691 = vst [vmem:[#allocation53_spill] sm:$0xff] %v4964_v58  ;;  %676 = vmatpush.msra.mxu3 %v4978_v16  ;;  %v4990_v58 = vld [vmem:[#allocation6 + $0x268] sm:$0xff]  ;;  %v5007_v43 = vld [vmem:[#allocation6 + $0x230] sm:$0xff] }
  0xae   :  { %8695 = vst [vmem:[#allocation57_spill] sm:$0xff] %v4976_v62  ;;  %v4994_v51 = vld [vmem:[#allocation2 + $0x18] ss:$8 sm:$0x7]  ;;  %645 = vmatpush.msra.mxu2 %v4982_v59  ;;  %685 = vmatpush.msrb.mxu0 %v4984_v57 }
  0xaf   :  { %8696 = vst [vmem:[#allocation58_spill] sm:$0xff] %v4978_v16  ;;  %v402_v48 = vpop.f32.mrf.mxu3  ;;  %636 = vmatpush.msra.mxu1 %v4990_v58  ;;  %677 = vmatpush.msra.mxu3 %v4992_v40  ;;  %v5005_v16 = vld [vmem:[#allocation6 + $0x248] sm:$0xff]  ;;  %v5011_v57 = vld [vmem:[#allocation6 + $0x190] sm:$0xff]  ;;  %v5013_v59 = vld [vmem:[#allocation6 + $0x198] sm:$0xff] }
  0xb0   :  { %8699 = vst [vmem:[#allocation61_spill] sm:$0xff] %v4990_v58  ;;  %v446_v61 = vrot.slane %v402_v48, 1  ;;  %v448_v62 = vadd.f32 %v402_v48, %v4986_v54  ;;  %646 = vmatpush.msra.mxu2 %v4998_v60  ;;  %686 = vmatpush.msrb.mxu0 %v5000_v44  ;;  %v490_v48 = vrot.slane %v4986_v54, 1  ;;  %v491_v58 = vrot.slane %v4994_v51, 1 }
  0xb1   :  { %8700 = vst [vmem:[#allocation62_spill] sm:$0xff] %v4992_v40  ;;  %637 = vmatpush.msra.mxu1 %v5005_v16  ;;  %678 = vmatpush.msra.mxu3 %v5007_v43  ;;  %v5020_v40 = vld [vmem:[#allocation6 + $0x228] sm:$0xff] }
  0xb2   :  { %8701 = vst [vmem:[#allocation63_spill] sm:$0xff] %v4998_v60  ;;  %v449_v41 = vadd.f32 %v446_v61, %v4994_v51  ;;  %v3643_v3 = vmul.f32 -1.442695, %v448_v62  ;;  %v5022_v60 = vld [vmem:[#allocation6 + $0x210] sm:$0xff]  ;;  %647 = vmatpush.msra.mxu2 %v5011_v57  ;;  %687 = vmatpush.msrb.mxu0 %v5013_v59  ;;  %v5028_v61 = vld [vmem:[#allocation6 + $0x178] sm:$0xff] }
  0xb3   :  { %8703 = vst [vmem:[#allocation65_spill] sm:$0xff] %v5005_v16  ;;  %638 = vmatpush.msra.mxu1 %v5020_v40  ;;  %679 = vmatpush.msra.mxu3 %v5022_v60  ;;  %v8712_v16 = vmov 0.0  }
  0xb4   :  { %8704 = vst [vmem:[#allocation66_spill] sm:$0xff] %v5007_v43  ;;  %v422_v44 = vpop.f32.mrf.mxu0  ;;  %3707 = vpow2.f32 %v3643_v3  ;;  %v3644_v62 = vmul.f32 -1.442695, %v449_v41  ;;  %v5032_v43 = vld [vmem:[#allocation6 + $0x208] sm:$0xff]  ;;  %600 = vmatmul.f32.vlgmr.msrb.gmra.mxu3 %v8712_v16  ;;  %648 = vmatpush.msra.mxu2 %v5026_v63 }
  0xb5   :  { %8705 = vst [vmem:[#allocation67_spill] sm:$0xff] %v5011_v57  ;;  %v495_v38 = vrot.slane %v422_v44, 1  ;;  %v497_v0 = vadd.f32 %v490_v48, %v422_v44  ;;  %v5036_v57 = vld [vmem:[#allocation6 + $0x150] sm:$0xff]  ;;  %688 = vmatpush.msrb.mxu0 %v5028_v61  ;;  %797 = vmatpush.msrb.mxu3 %v4682_v7  ;;  %v5048_v48 = vld [vmem:[#allocation6 + $0x138] sm:$0xff] }
  0xb6   :  { %8706 = vst [vmem:[#allocation68_spill] sm:$0xff] %v5013_v59  ;;  %v5038_v59 = vld [vmem:[#allocation6 + $0x158] sm:$0xff]  ;;  %3709 = vpow2.f32 %v3644_v62  ;;  %639 = vmatpush.msra.mxu1 %v5032_v43  ;;  %649 = vmatpush.msra.mxu2 %v5036_v57  ;;  %v5046_v44 = vld [vmem:[#allocation6 + $0x130] sm:$0xff] }
  0xb7   :  { %8707 = vst [vmem:[#allocation69_spill] sm:$0xff] %v5020_v40  ;;  %v498_v41 = vadd.f32 %v495_v38, %v491_v58  ;;  %v3645_v3 = vmul.f32 -1.442695, %v497_v0  ;;  %689 = vmatpush.msrb.mxu0 %v5038_v59  ;;  %798 = vmatpush.msrb.mxu3 %v4685_v11  ;;  %v5056_v7 = vld [vmem:[#allocation6 + $0x110] sm:$0xff]  ;;  %v5058_v38 = vld [vmem:[#allocation6 + $0x118] sm:$0xff] }
  0xb8   :  { %8708 = vst [vmem:[#allocation70_spill] sm:$0xff] %v5022_v60  ;;  %v5050_v60 = vld [vmem:[#allocation6 + $0x3d8] sm:$0xff]  ;;  %704 = vmatpush.msrb.mxu1 %v5040_v47  ;;  %650 = vmatpush.msra.mxu2 %v5046_v44  ;;  %v5068_v11 = vld [vmem:[#allocation6 + $0xf0] sm:$0xff] }
  0xb9   :  { %8709 = vst [vmem:[#allocation71_spill] sm:$0xff] %v5026_v63  ;;  %3711 = vpow2.f32 %v3645_v3  ;;  %v3646_v40 = vmul.f32 -1.442695, %v498_v41  ;;  %v5060_v58 = vld [vmem:[#allocation6 + $0x3b8] sm:$0xff]  ;;  %690 = vmatpush.msrb.mxu0 %v5048_v48  ;;  %799 = vmatpush.msrb.mxu3 %v4692_v15  ;;  %v5081_v15 = vld [vmem:[#allocation6 + $0xd0] sm:$0xff] }
  0xba   :  { %8710 = vst [vmem:[#allocation72_spill] sm:$0xff] %v5028_v61  ;;  %v3708_v0 = vpop.eup %3707  ;;  %705 = vmatpush.msrb.mxu1 %v5050_v60  ;;  %651 = vmatpush.msra.mxu2 %v5056_v7  ;;  %v5070_v41 = vld [vmem:[#allocation6 + $0xf8] sm:$0xff] }
  0xbb   :  { %8711 = vst [vmem:[#allocation73_spill] sm:$0xff] %v5032_v43  ;;  %3713 = vpow2.f32 %v3646_v40  ;;  %v5064_v62 = vadd.f32 1.0, %v3708_v0  ;;  %v5072_v3 = vld [vmem:[#allocation6 + $0x398] sm:$0xff]  ;;  %691 = vmatpush.msrb.mxu0 %v5058_v38  ;;  %800 = vmatpush.msrb.mxu3 %v4698_v18  ;;  %v5094_v18 = vld [vmem:[#allocation6 + $0xb0] sm:$0xff] }
  0xbc   :  { %8713 = vst [vmem:[#allocation74_spill] sm:$0xff] %v5036_v57  ;;  %706 = vmatpush.msrb.mxu1 %v5060_v58  ;;  %652 = vmatpush.msra.mxu2 %v5068_v11  ;;  %v5083_v0 = vld [vmem:[#allocation6 + $0xd8] sm:$0xff] }
  0xbd   :  { %8714 = vst [vmem:[#allocation75_spill] sm:$0xff] %v5038_v59  ;;  %3715 = vrcp.f32 %v5064_v62  ;;  %692 = vmatpush.msrb.mxu0 %v5070_v41  ;;  %801 = vmatpush.msrb.mxu3 %v4702_v21  ;;  %v5107_v21 = vld [vmem:[#allocation6 + $0x90] sm:$0xff]  ;;  %v5165_v57 = vld [vmem:[#allocation6 + $0x2d8] sm:$0xff]  ;;  %vm463_vm3 = vweird.f32 %v5064_v62 }
  0xbe   :  { %8715 = vst [vmem:[#allocation76_spill] sm:$0xff] %v5040_v47  ;;  %v3710_v47 = vpop.eup %3709  ;;  %707 = vmatpush.msrb.mxu1 %v5072_v3  ;;  %653 = vmatpush.msra.mxu2 %v5081_v15  ;;  %v5175_v61 = vld [vmem:[#allocation6 + $0x18] sm:$0xff] }
  0xbf   :  { %8716 = vst [vmem:[#allocation77_spill] sm:$0xff] %v5046_v44  ;;  %v5076_v40 = vadd.f32 1.0, %v3710_v47  ;;  %v3712_v43 = vpop.eup %3711  ;;  %693 = vmatpush.msrb.mxu0 %v5083_v0  ;;  %802 = vmatpush.msrb.mxu3 %v4705_v24  ;;  %v5120_v24 = vld [vmem:[#allocation6 + $0x70] sm:$0xff]  ;;  %v5157_v44 = vld [vmem:[#allocation6 + $0x38] sm:$0xff] }
  0xc0   :  { %8717 = vst [vmem:[#allocation78_spill] sm:$0xff] %v5048_v48  ;;  %v5090_v47 = vadd.f32 1.0, %v3712_v43  ;;  %654 = vmatpush.msra.mxu2 %v5094_v18  ;;  %v5109_v43 = vld [vmem:[#allocation6 + $0x98] sm:$0xff]  ;;  %640 = vmatmul.f32.vlgmr.msra.gmra.mxu1 %v8712_v16 }
  0xc1   :  { %8718 = vst [vmem:[#allocation79_spill] sm:$0xff] %v5050_v60  ;;  %v5085_v60 = vld [vmem:[#allocation6 + $0x378] sm:$0xff]  ;;  %3717 = vrcp.f32 %v5076_v40  ;;  %803 = vmatpush.msrb.mxu3 %v4708_v26  ;;  %v484_v63 = vand.u32 2147483648, %v5076_v40  ;;  %vm478_vm7 = vweird.f32 %v5076_v40 }
  0xc2   :  { %8719 = vst [vmem:[#allocation80_spill] sm:$0xff] %v5056_v7  ;;  %708 = vmatpush.msrb.mxu1 %v5085_v60  ;;  %3719 = vrcp.f32 %v5090_v47  ;;  %655 = vmatpush.msra.mxu2 %v5107_v21  ;;  %v5135_v26 = vld [vmem:[%s8184_s4] ss:$0 sm:$0xff]  ;;  %vm512_vm11 = vweird.f32 %v5090_v47 }
  0xc3   :  { %8720 = vst [vmem:[#allocation81_spill] sm:$0xff] %v5058_v38  ;;  %v3714_v38 = vpop.eup %3713  ;;  %804 = vmatpush.msrb.mxu3 %v4716_v30  ;;  %v5148_v48 = vld [vmem:[#allocation6 + $0x2f8] sm:$0xff] }
  0xc4   :  { %8721 = vst [vmem:[#allocation82_spill] sm:$0xff] %v5060_v58  ;;  %v5096_v58 = vld [vmem:[#allocation6 + $0xb8] sm:$0xff]  ;;  %656 = vmatpush.msra.mxu2 %v5120_v24  ;;  %680 = vmatmul.f32.vlgmr.msra.gmra.mxu3 %v8712_v16 }
  0xc5   :  { %8722 = vst [vmem:[#allocation83_spill] sm:$0xff] %v5068_v11  ;;  %v5098_v11 = vld [vmem:[#allocation6 + $0x358] sm:$0xff]  ;;  %694 = vmatpush.msrb.mxu0 %v5096_v58  ;;  %805 = vmatpush.msrb.mxu3 %v4722_v33 }
  0xc6   :  { %8723 = vst [vmem:[#allocation84_spill] sm:$0xff] %v5070_v41  ;;  %709 = vmatpush.msrb.mxu1 %v5098_v11  ;;  %v442_v41 = vpop.f32.mrf.mxu1 }
  0xc7   :  { %8724 = vst [vmem:[#allocation85_spill] sm:$0xff] %v5072_v3  ;;  %v5102_v3 = vadd.f32 1.0, %v3714_v38  ;;  %v5122_v38 = vld [vmem:[#allocation6 + $0x78] sm:$0xff]  ;;  %695 = vmatpush.msrb.mxu0 %v5109_v43  ;;  %806 = vmatpush.msrb.mxu3 %v4727_v36 }
  0xc8   :  { %8725 = vst [vmem:[#allocation86_spill] sm:$0xff] %v5081_v15  ;;  %v5111_v15 = vld [vmem:[#allocation6 + $0x338] sm:$0xff] }
  0xc9   :  { %8726 = vst [vmem:[#allocation87_spill] sm:$0xff] %v5083_v0  ;;  %v5115_v0 = vpop.eup %3715  ;;  %3721 = vrcp.f32 %v5102_v3  ;;  %710 = vmatpush.msrb.mxu1 %v5111_v15  ;;  %696 = vmatpush.msrb.mxu0 %v5122_v38  ;;  %vm527_vm14 = vweird.f32 %v5102_v3 }
  0xca   :  { %8727 = vst [vmem:[#allocation88_spill] sm:$0xff] %v5085_v60  ;;  %v5124_v60 = vld [vmem:[#allocation6 + $0x318] sm:$0xff]  ;;  %vm464_vm2 = vweird.f32 %v5115_v0  ;;  %807 = vmatpush.msrb.mxu3 %v4733_v39 }
  0xcb   :  { %8728 = vst [vmem:[#allocation89_spill] sm:$0xff] %v5094_v18  ;;  %v459_v18 = vmul.f32 %v5115_v0, %v5064_v62  ;;  %711 = vmatpush.msrb.mxu1 %v5124_v60  ;;  %vm465_vm4 = vmor %vm463_vm3, %vm464_vm2  ;;  %v5201_v39 = vld [vmem:[#allocation6 + $0x278] sm:$0xff] }
  0xcc   :  { %8729 = vst [vmem:[#allocation90_spill] sm:$0xff] %v5096_v58  ;;  %v5141_v58 = vld [vmem:[#allocation6 + $0x58] sm:$0xff]  ;;  %808 = vmatpush.msrb.mxu3 %v4739_v42 }
  0xcd   :  { %8730 = vst [vmem:[#allocation91_spill] sm:$0xff] %v5098_v11  ;;  %v5130_v11 = vpop.eup %3717  ;;  %v460_v7 = vsub.f32 1.0, %v459_v18  ;;  %v5155_v18 = vld [vmem:[#allocation6 + $0x30] sm:$0xff]  ;;  %697 = vmatpush.msrb.mxu0 %v5141_v58  ;;  %712 = vmatpush.msrb.mxu1 %v5148_v48 }
  0xce   :  { %8731 = vst [vmem:[#allocation92_spill] sm:$0xff] %v5107_v21  ;;  %v5139_v21 = vld [vmem:[#allocation6 + $0x50] sm:$0xff]  ;;  %v5150_v30 = vpop.eup %3719  ;;  %vm479_vm5 = vweird.f32 %v5130_v11  ;;  %809 = vmatpush.msrb.mxu3 %v4746_v46 }
  0xcf   :  { %8732 = vst [vmem:[#allocation93_spill] sm:$0xff] %v5109_v43  ;;  %v469_v43 = vand.u32 2147483648, %v5064_v62  ;;  %657 = vmatpush.msra.mxu2 %v5139_v21  ;;  %v508_v59 = vmul.f32 %v5150_v30, %v5090_v47  ;;  %v5167_v33 = vpop.eup %3721  ;;  %698 = vmatpush.msrb.mxu0 %v5157_v44  ;;  %vm480_vm8 = vmor %vm478_vm7, %vm479_vm5  ;;  %vm513_vm10 = vweird.f32 %v5150_v30 }
  0xd0   :  { %8733 = vst [vmem:[#allocation94_spill] sm:$0xff] %v5111_v15  ;;  %v474_v15 = vmul.f32 %v5130_v11, %v5076_v40  ;;  %713 = vmatpush.msrb.mxu1 %v5165_v57  ;;  %810 = vmatpush.msrb.mxu3 %v4752_v49  ;;  %v516_v49 = vand.u32 2147483647, %v5090_v47  ;;  %vm5230_vm12 = vmor %vm512_vm11, %vm513_vm10  ;;  %vm528_vm13 = vweird.f32 %v5167_v33 }
  0xd1   :  { %8734 = vst [vmem:[#allocation95_spill] sm:$0xff] %v5120_v24  ;;  %v467_v24 = vand.u32 2147483647, %v5064_v62  ;;  %658 = vmatpush.msra.mxu2 %v5155_v18  ;;  %v5183_v62 = vld [vmem:[#allocation6 + $0x2b8] sm:$0xff]  ;;  %v509_v36 = vsub.f32 1.0, %v508_v59  ;;  %699 = vmatpush.msrb.mxu0 %v5175_v61  ;;  %vm529_vm15 = vmor %vm527_vm14, %vm528_vm13 }
  0xd2   :  { %8735 = vst [vmem:[#allocation96_spill] sm:$0xff] %v5122_v38  ;;  %v461_v38 = vmul.f32 %v5115_v0, %v460_v7  ;;  %v5173_v7 = vld [vmem:[#allocation6 + $0x10] sm:$0xff]  ;;  %714 = vmatpush.msrb.mxu1 %v5183_v62  ;;  %811 = vmatpush.msrb.mxu3 %v4758_v52  ;;  %v533_v52 = vand.u32 2147483648, %v5102_v3  ;;  %vm517_vm0 = vcmp.eq.f32.partialorder %v516_v49, 8.507059e+37  ;;  %v8763_v49 = vld [vmem:[#allocation68_spill] sm:$0xff] }
  0xd3   :  { %8736 = vst [vmem:[#allocation97_spill] sm:$0xff] %v5124_v60  ;;  %v475_v60 = vsub.f32 1.0, %v474_v15  ;;  %v523_v15 = vmul.f32 %v5167_v33, %v5102_v3  ;;  %659 = vmatpush.msra.mxu2 %v5173_v7  ;;  %vm468_vm6 = vcmp.eq.f32.partialorder %v467_v24, 8.507059e+37 }
  0xd4   :  { %8737 = vst [vmem:[#allocation98_spill] sm:$0xff] %v5135_v26  ;;  %812 = vmatpush.msrb.mxu3 %v4764_v55 }
  0xd5   :  { %8738 = vst [vmem:[#allocation99_spill] sm:$0xff] %v5139_v21  ;;  %v537_v21 = vadd.f32 %v5135_v26, %v442_v41  ;;  %v476_v41 = vmul.f32 %v5130_v11, %v475_v60  ;;  %v482_v26 = vand.u32 2147483647, %v5076_v40  ;;  %v5211_v40 = vld [vmem:[#allocation6 + $0x258] sm:$0xff] }
  0xd6   :  { %8739 = vst [vmem:[#allocation100_spill] sm:$0xff] %v5141_v58  ;;  %v470_v58 = vor.u32 1.1754944e-38, %v469_v43  ;;  %v5192_v43 = vld [vmem:[#allocation6 + $0x298] sm:$0xff]  ;;  %996 = vmatpush.msra.mxu3 %v4790_v5 }
  0xd7   :  { %8740 = vst [vmem:[#allocation101_spill] sm:$0xff] %v5148_v48  ;;  %v462_v48 = vadd.f32 %v5115_v0, %v461_v38  ;;  %v477_v60 = vadd.f32 %v5130_v11, %v476_v41  ;;  %715 = vmatpush.msrb.mxu1 %v5192_v43  ;;  %vm483_vm9 = vcmp.eq.f32.partialorder %v482_v26, 8.507059e+37  ;;  %v5216_v41 = vld [vmem:[#allocation6 + $0x238] sm:$0xff]  ;;  %v518_v26 = vand.u32 2147483648, %v5090_v47 }
  0xd8   :  { %8741 = vst [vmem:[#allocation102_spill] sm:$0xff] %v5165_v57  ;;  %v539_v57 = vrot.slane %v537_v21, 1  ;;  %997 = vmatpush.msra.mxu3 %v4797_v9 }
  0xd9   :  { %8742 = vst [vmem:[#allocation103_spill] sm:$0xff] %v5173_v7  ;;  %v466_v38 = vsel %vm465_vm4, %v5115_v0, %v462_v48  ;;  %v543_v7 = vrot.slane %v4986_v54, 2  ;;  %v524_v48 = vsub.f32 1.0, %v523_v15  ;;  %v485_v0 = vor.u32 1.1754944e-38, %v484_v63  ;;  %716 = vmatpush.msrb.mxu1 %v5201_v39 }
  0xda   :  { %v471_v59 = vsel %vm468_vm6, %v470_v58, %v466_v38  ;;  %v510_v58 = vmul.f32 %v5150_v30, %v509_v36  ;;  %v481_v42 = vsel %vm480_vm8, %v5130_v11, %v477_v60  ;;  %v544_v63 = vrot.slane %v4994_v51, 2  ;;  %v5225_v51 = vld [vmem:[#allocation6 + $0x218] sm:$0xff]  ;;  %998 = vmatpush.msra.mxu3 %v4812_v14  ;;  %v5272_v14 = vld [vmem:[#allocation3 + $0x168] sm:$0xff] }
  0xdb   :  { %v541_v24 = vmul.f32 %v537_v21, %v471_v59  ;;  %v486_v54 = vsel %vm483_vm9, %v485_v0, %v481_v42  ;;  %v525_v36 = vmul.f32 %v5167_v33, %v524_v48  ;;  %717 = vmatpush.msrb.mxu1 %v5211_v40  ;;  %v519_v38 = vor.u32 1.1754944e-38, %v518_v26  ;;  %v8756_v42 = vld [vmem:[#allocation15_spill] sm:$0xff]  ;;  %v8762_v26 = vld [vmem:[#allocation17_spill] sm:$0xff] }
  0xdc   :  { %v542_v21 = vmul.f32 %v539_v57, %v486_v54  ;;  %v511_v46 = vadd.f32 %v5150_v30, %v510_v58  ;;  %v531_v59 = vand.u32 2147483647, %v5102_v3  ;;  %999 = vmatpush.msra.mxu3 %v4821_v19  ;;  %v5280_v19 = vld [vmem:[#allocation3 + $0x150] sm:$0xff]  ;;  %v8755_v58 = vld [vmem:[#allocation59_spill] sm:$0xff]  ;;  %v8757_v54 = vld [vmem:[#allocation60_spill] sm:$0xff] }
  0xdd   :  { %v547_v15 = vadd.f32 %v543_v7, %v541_v24  ;;  %718 = vmatpush.msrb.mxu1 %v5216_v41  ;;  %v526_v7 = vadd.f32 %v5167_v33, %v525_v36  ;;  %v8760_v36 = vld [vmem:[#allocation64_spill] sm:$0xff] }
  0xde   :  { %v548_v11 = vadd.f32 %v544_v63, %v542_v21  ;;  %v515_v47 = vsel %vm5230_vm12, %v5150_v30, %v511_v46  ;;  %v534_v30 = vor.u32 1.1754944e-38, %v533_v52  ;;  %vm532_vm1 = vcmp.eq.f32.partialorder %v531_v59, 8.507059e+37  ;;  %1000 = vmatpush.msra.mxu3 %v4832_v27  ;;  %v5291_v27 = vld [vmem:[#allocation3 + $0x148] sm:$0xff]  ;;  %v8758_v63 = vld [vmem:[#allocation63_spill] sm:$0xff]  ;;  %v8765_v52 = vld [vmem:[#allocation18_spill] sm:$0xff] }
  0xdf   :  { %3723 = vtanh.f32 %v547_v15  ;;  %719 = vmatpush.msrb.mxu1 %v5225_v51  ;;  %v520_v60 = vsel %vm517_vm0, %v519_v38, %v515_v47  ;;  %v530_v48 = vsel %vm529_vm15, %v5167_v33, %v526_v7  ;;  %v5331_v33 = vld [vmem:[#allocation3 + $0x90] sm:$0xff]  ;;  %v5337_v15 = vld [vmem:[#allocation3 + $0x78] sm:$0xff]  ;;  %v8759_v21 = vld [vmem:[#allocation16_spill] sm:$0xff] }
  0xe0   :  { %3725 = vtanh.f32 %v548_v11  ;;  %720 = vmatmul.f32.vlgmr.msrb.gmra.mxu1 %v8712_v16  ;;  %1001 = vmatpush.msra.mxu3 %v4841_v37  ;;  %v5299_v37 = vld [vmem:[#allocation3 + $0x130] sm:$0xff]  ;;  %v5343_v46 = vld [vmem:[#allocation3 + $0x60] sm:$0xff]  ;;  %v5349_v57 = vld [vmem:[#allocation3 + $0x48] sm:$0xff] }
  0xe1   :  { %956 = vmatpush.msra.mxu1 %v4787_v4  ;;  %v535_v4 = vsel %vm532_vm1, %v534_v30, %v530_v48  ;;  %v8761_v11 = vld [vmem:[#allocation67_spill] sm:$0xff]  ;;  %v8766_v47 = vld [vmem:[#allocation72_spill] sm:$0xff]  ;;  %v8767_v38 = vld [vmem:[#allocation74_spill] sm:$0xff] }
  0xe2   :  { %1002 = vmatpush.msra.mxu3 %v4853_v56  ;;  %v5302_v56 = vld [vmem:[#allocation3 + $0x108] sm:$0xff]  ;;  %v8764_v7 = vld [vmem:[#allocation71_spill] sm:$0xff]  ;;  %v8772_v30 = vld [vmem:[#allocation78_spill] sm:$0xff] }
  0xe3   :  { %957 = vmatpush.msra.mxu1 %v4792_v6  ;;  %v8768_v59 = vld [vmem:[#allocation19_spill] sm:$0xff]  ;;  %v8770_v48 = vld [vmem:[#allocation77_spill] sm:$0xff] }
  0xe4   :  { %1003 = vmatpush.msra.mxu3 %v4866_v2  ;;  %v5313_v2 = vld [vmem:[#allocation3 + $0xd8] sm:$0xff] }
  0xe5   :  { %v3724_v55 = vpop.eup %3723  ;;  %958 = vmatpush.msra.mxu1 %v4810_v13 }
  0xe6   :  { %v551_v5 = vsub.f32 0.0, %v3724_v55  ;;  %v3726_v16 = vpop.eup %3725  ;;  %1004 = vmatpush.msra.mxu3 %v4878_v31  ;;  %v5319_v31 = vld [vmem:[#allocation3 + $0xc0] sm:$0xff] }
  0xe7   :  { %v552_v24 = vsub.f32 0.0, %v3726_v16  ;;  %959 = vmatpush.msra.mxu1 %v4819_v17  ;;  %v5275_v17 = vld [vmem:[#allocation3 + $0x178] sm:$0xff] }
  0xe8   :  { %v553_v0 = vmul.f32 %v551_v5, %v520_v60  ;;  %1005 = vmatpush.msra.mxu3 %v4890_v22  ;;  %v5283_v22 = vld [vmem:[#allocation3 + $0x160] sm:$0xff]  ;;  %v5361_v60 = vld [vmem:[#allocation3 + $0x18] sm:$0xff] }
  0xe9   :  { %v554_v3 = vmul.f32 %v552_v24, %v535_v4  ;;  %960 = vmatpush.msra.mxu1 %v4830_v25  ;;  %v5288_v25 = vld [vmem:[#allocation3 + $0x138] sm:$0xff]  ;;  %v8773_v24 = vld [vmem:[#allocation80_spill] sm:$0xff]  ;;  %v8774_v4 = vld [vmem:[#allocation21_spill] sm:$0xff] }
  0xea   :  { %v5252_v9 = vadd.f32 %v3724_v55, %v553_v0  ;;  %1006 = vmatpush.msra.mxu3 %v4902_v20  ;;  %v8750_v20 = vld [vmem:[#allocation13_spill] sm:$0xff]  ;;  %v8769_v5 = vld [vmem:[#allocation75_spill] sm:$0xff] }
  0xeb   :  { %v5257_v6 = vadd.f32 %v3726_v16, %v554_v3  ;;  %961 = vmatpush.msra.mxu1 %v4839_v34  ;;  %v5296_v34 = vld [vmem:[#allocation3 + $0x120] sm:$0xff]  ;;  %v5355_v55 = vld [vmem:[#allocation3 + $0x30] sm:$0xff] }
  0xec   :  { %559 = vst [vmem:[#allocation1] ss:$9 sm:$0xff] %v5252_v9  ;;  %1007 = vmatpush.msra.mxu3 %v4914_v23  ;;  %v8752_v23 = vld [vmem:[#allocation55_spill] sm:$0xff]  ;;  %v8771_v16 = vld [vmem:[#allocation20_spill] sm:$0xff] }
  0xed   :  { %561 = vst [vmem:[#allocation1 + $0x1] ss:$9 sm:$0xff] %v5257_v6  ;;  %962 = vmatpush.msra.mxu1 %v4851_v53  ;;  %v5367_v0 = vld [vmem:[#allocation3] sm:$0xff] }
  0xee   :  { %1008 = vmatpush.msra.mxu3 %v4926_v8  ;;  %v5307_v8 = vld [vmem:[#allocation3 + $0xf0] sm:$0xff]  ;;  %v5372_v3 = vld [vmem:[#allocation6 + $0x3e0] sm:$0xff] }
  0xef   :  { %963 = vmatpush.msra.mxu1 %v4864_v1  ;;  %v8745_v1 = vld [vmem:[#allocation44_spill] sm:$0xff] }
  0xf0   :  { %1009 = vmatpush.msra.mxu3 %v4938_v28  ;;  %v8753_v28 = vld [vmem:[#allocation14_spill] sm:$0xff] }
  0xf1   :  { %964 = vmatpush.msra.mxu1 %v4876_v12  ;;  %v8747_v12 = vld [vmem:[#allocation12_spill] sm:$0xff] }
  0xf3   :  { %965 = vmatpush.msra.mxu1 %v4888_v29  ;;  %v8746_v29 = vld [vmem:[#allocation48_spill] sm:$0xff] }
  0xf4   :  { %v562_v13 = vld [vmem:[#allocation1] sm:$0xff]  ;;  %1010 = vmatpush.msra.mxu3 %v8746_v29  ;;  %v5377_v29 = vld [vmem:[#allocation6 + $0x3c0] sm:$0xff] }
  0xf5   :  { %772 = vst [vmem:[#allocation1] ss:$9 sm:$0xff] %v5252_v9  ;;  %580 = vmatmul.f32.vlgmr.msrb.gmra.mxu2 %v562_v13  ;;  %620 = vmatmul.f32.vlgmr.msra.gmra.mxu0 %v562_v13 }
  0xf6   :  { %774 = vst [vmem:[#allocation1 + $0x1] ss:$9 sm:$0xff] %v5257_v6  ;;  %777 = vmatpush.msrb.mxu2 %v5272_v14  ;;  %817 = vmatpush.msra.mxu0 %v5275_v17 }
  0xf7   :  { %966 = vmatpush.msra.mxu1 %v4900_v45  ;;  %v8749_v45 = vld [vmem:[#allocation52_spill] sm:$0xff] }
  0xf8   :  { %778 = vmatpush.msrb.mxu2 %v5280_v19  ;;  %818 = vmatpush.msra.mxu0 %v5283_v22 }
  0xf9   :  { %967 = vmatpush.msra.mxu1 %v4912_v10  ;;  %1011 = vmatpush.msra.mxu3 %v8749_v45  ;;  %v5325_v10 = vld [vmem:[#allocation3 + $0xa8] sm:$0xff] }
  0xfa   :  { %779 = vmatpush.msrb.mxu2 %v5288_v25  ;;  %819 = vmatpush.msra.mxu0 %v5291_v27  ;;  %v8779_v45 = vld [vmem:[#allocation84_spill] sm:$0xff] }
  0xfb   :  { %968 = vmatpush.msra.mxu1 %v4924_v50  ;;  %v8754_v50 = vld [vmem:[#allocation56_spill] sm:$0xff] }
  0xfc   :  { %780 = vmatpush.msrb.mxu2 %v5296_v34  ;;  %820 = vmatpush.msra.mxu0 %v5299_v37 }
  0xfd   :  { %v775_v53 = vld [vmem:[#allocation1] sm:$0xff]  ;;  %660 = vmatmul.f32.vlgmr.msra.gmra.mxu2 %v562_v13  ;;  %700 = vmatmul.f32.vlgmr.msrb.gmra.mxu0 %v562_v13 }
  0xfe   :  { %781 = vmatpush.msrb.mxu2 %v5302_v56  ;;  %813 = vmatmul.f32.vlgmr.msrb.gmra.mxu3 %v775_v53  ;;  %v8775_v13 = vld [vmem:[#allocation28_spill] sm:$0xff] }
  0xff   :  { %821 = vmatpush.msra.mxu0 %v4720_v32  ;;  %969 = vmatpush.msra.mxu1 %v8745_v1  ;;  %v8748_v32 = vld [vmem:[#allocation47_spill] sm:$0xff]  ;;  %v8776_v1 = vld [vmem:[#allocation81_spill] sm:$0xff] }
 0x100   :  { %782 = vmatpush.msrb.mxu2 %v5307_v8  ;;  %1076 = vmatpush.msrb.mxu3 %v8754_v50  ;;  %v8783_v50 = vld [vmem:[#allocation89_spill] sm:$0xff] }
 0x101   :  { %822 = vmatpush.msra.mxu0 %v4725_v35  ;;  %970 = vmatpush.msra.mxu1 %v8748_v32  ;;  %v8751_v35 = vld [vmem:[#allocation51_spill] sm:$0xff]  ;;  %v8778_v32 = vld [vmem:[#allocation30_spill] sm:$0xff] }
 0x102   :  { %783 = vmatpush.msrb.mxu2 %v5313_v2  ;;  %1077 = vmatpush.msrb.mxu3 %v8757_v54  ;;  %v5395_v54 = vld [vmem:[#allocation6 + $0x360] sm:$0xff] }
 0x103   :  { %823 = vmatpush.msra.mxu0 %v8747_v12  ;;  %971 = vmatpush.msra.mxu1 %v8751_v35  ;;  %v8777_v12 = vld [vmem:[#allocation83_spill] sm:$0xff]  ;;  %v8781_v35 = vld [vmem:[#allocation32_spill] sm:$0xff] }
 0x104   :  { %784 = vmatpush.msrb.mxu2 %v5319_v31  ;;  %1078 = vmatpush.msrb.mxu3 %v8760_v36  ;;  %v8788_v36 = vld [vmem:[#allocation93_spill] sm:$0xff] }
 0x105   :  { %824 = vmatpush.msra.mxu0 %v8750_v20  ;;  %1036 = vmatpush.msrb.mxu1 %v8752_v23  ;;  %v5383_v20 = vld [vmem:[#allocation6 + $0x3a0] sm:$0xff] }
 0x106   :  { %785 = vmatpush.msrb.mxu2 %v5325_v10  ;;  %1079 = vmatpush.msrb.mxu3 %v8763_v49  ;;  %v8782_v23 = vld [vmem:[#allocation87_spill] sm:$0xff]  ;;  %v8790_v49 = vld [vmem:[#allocation38_spill] sm:$0xff] }
 0x107   :  { %825 = vmatpush.msra.mxu0 %v8753_v28  ;;  %1037 = vmatpush.msrb.mxu1 %v8755_v58  ;;  %v5389_v28 = vld [vmem:[#allocation6 + $0x380] sm:$0xff]  ;;  %v8784_v58 = vld [vmem:[#allocation34_spill] sm:$0xff] }
 0x108   :  { %786 = vmatpush.msrb.mxu2 %v5331_v33  ;;  %1080 = vmatpush.msrb.mxu3 %v8766_v47  ;;  %v8793_v47 = vld [vmem:[#allocation99_spill] sm:$0xff] }
 0x109   :  { %826 = vmatpush.msra.mxu0 %v8756_v42  ;;  %1038 = vmatpush.msrb.mxu1 %v8758_v63  ;;  %v8785_v42 = vld [vmem:[#allocation90_spill] sm:$0xff]  ;;  %v8786_v63 = vld [vmem:[#allocation92_spill] sm:$0xff] }
 0x10a   :  { %787 = vmatpush.msrb.mxu2 %v5337_v15  ;;  %1081 = vmatpush.msrb.mxu3 %v8769_v5  ;;  %v5411_v5 = vld [vmem:[#allocation6 + $0x300] sm:$0xff] }
 0x10b   :  { %827 = vmatpush.msra.mxu0 %v8759_v21  ;;  %1039 = vmatpush.msrb.mxu1 %v8761_v11  ;;  %v8787_v21 = vld [vmem:[#allocation36_spill] sm:$0xff] }
 0x10c   :  { %788 = vmatpush.msrb.mxu2 %v5343_v46  ;;  %1082 = vmatpush.msrb.mxu3 %v8772_v30  ;;  %v5401_v11 = vld [vmem:[#allocation6 + $0x340] sm:$0xff] }
 0x10d   :  { %828 = vmatpush.msra.mxu0 %v8762_v26  ;;  %1040 = vmatpush.msrb.mxu1 %v8764_v7  ;;  %v8789_v26 = vld [vmem:[#allocation95_spill] sm:$0xff]  ;;  %v8791_v7 = vld [vmem:[#allocation96_spill] sm:$0xff] }
 0x10e   :  { %789 = vmatpush.msrb.mxu2 %v5349_v57  ;;  %1083 = vmatpush.msrb.mxu3 %v8776_v1  ;;  %v8797_v30 = vld [vmem:[#allocation103_spill] sm:$0xff] }
 0x10f   :  { %829 = vmatpush.msra.mxu0 %v8765_v52  ;;  %1041 = vmatpush.msrb.mxu1 %v8767_v38  ;;  %v8792_v52 = vld [vmem:[#allocation22_spill] sm:$0xff]  ;;  %v8794_v38 = vld [vmem:[#allocation40_spill] sm:$0xff] }
 0x110   :  { %790 = vmatpush.msrb.mxu2 %v5355_v55  ;;  %1084 = vmatpush.msrb.mxu3 %v8779_v45  ;;  %v5431_v1 = vld [vmem:[#allocation6 + $0x280] sm:$0xff] }
 0x111   :  { %830 = vmatpush.msra.mxu0 %v8768_v59  ;;  %1042 = vmatpush.msrb.mxu1 %v8770_v48  ;;  %v8795_v59 = vld [vmem:[#allocation100_spill] sm:$0xff]  ;;  %v8796_v48 = vld [vmem:[#allocation42_spill] sm:$0xff]  ;;  %8802 = vst [vmem:[#allocation48_spill] sm:$0xff] %v5431_v1 }
 0x112   :  { %791 = vmatpush.msrb.mxu2 %v5361_v60  ;;  %1085 = vmatpush.msrb.mxu3 %v8782_v23  ;;  %v8806_v45 = vld [vmem:[#allocation24_spill] sm:$0xff]  ;;  %v8809_v23 = vld [vmem:[#allocation69_spill] sm:$0xff] }
 0x113   :  { %831 = vmatpush.msra.mxu0 %v8771_v16  ;;  %1043 = vmatpush.msrb.mxu1 %v8773_v24  ;;  %v5417_v16 = vld [vmem:[#allocation6 + $0x2e0] sm:$0xff]  ;;  %v8798_v24 = vld [vmem:[#allocation45_spill] sm:$0xff] }
 0x114   :  { %792 = vmatpush.msrb.mxu2 %v5367_v0  ;;  %1086 = vmatpush.msrb.mxu3 %v8785_v42  ;;  %v8812_v42 = vld [vmem:[#allocation27_spill] sm:$0xff] }
 0x115   :  { %832 = vmatpush.msra.mxu0 %v8774_v4  ;;  %793 = vmatmul.f32.vlgmr.msrb.gmra.mxu2 %v775_v53  ;;  %v5423_v4 = vld [vmem:[#allocation6 + $0x2c0] sm:$0xff] }
 0x116   :  { %833 = vmatmul.f32.vlgmr.msra.gmra.mxu0 %v775_v53  ;;  %976 = vmatpush.msra.mxu2 %v5372_v3  ;;  %v8780_v53 = vld [vmem:[#allocation86_spill] sm:$0xff] }
 0x117   :  { %1016 = vmatpush.msrb.mxu0 %v8775_v13  ;;  %1044 = vmatpush.msrb.mxu1 %v8777_v12  ;;  %v8799_v13 = vld [vmem:[#allocation49_spill] sm:$0xff] }
 0x118   :  { %977 = vmatpush.msra.mxu2 %v5377_v29  ;;  %1087 = vmatpush.msrb.mxu3 %v8788_v36  ;;  %v8803_v12 = vld [vmem:[#allocation57_spill] sm:$0xff]  ;;  %v8815_v36 = vld [vmem:[#allocation79_spill] sm:$0xff] }
 0x119   :  { %1017 = vmatpush.msrb.mxu0 %v8778_v32  ;;  %1045 = vmatpush.msrb.mxu1 %v8780_v53  ;;  %v8804_v32 = vld [vmem:[#allocation23_spill] sm:$0xff]  ;;  %v8807_v53 = vld [vmem:[#allocation65_spill] sm:$0xff] }
 0x11a   :  { %978 = vmatpush.msra.mxu2 %v5383_v20  ;;  %1088 = vmatpush.msrb.mxu3 %v8791_v7  ;;  %v8818_v7 = vld [vmem:[#allocation33_spill] sm:$0xff] }
 0x11b   :  { %1018 = vmatpush.msrb.mxu0 %v8781_v35  ;;  %1046 = vmatpush.msrb.mxu1 %v8783_v50  ;;  %v8808_v35 = vld [vmem:[#allocation25_spill] sm:$0xff]  ;;  %v8810_v50 = vld [vmem:[#allocation26_spill] sm:$0xff] }
 0x11c   :  { %979 = vmatpush.msra.mxu2 %v5389_v28  ;;  %1089 = vmatpush.msrb.mxu3 %v8795_v59  ;;  %v8822_v59 = vld [vmem:[#allocation37_spill] sm:$0xff] }
 0x11d   :  { %1019 = vmatpush.msrb.mxu0 %v8784_v58  ;;  %1047 = vmatpush.msrb.mxu1 %v8786_v63  ;;  %v8811_v58 = vld [vmem:[#allocation73_spill] sm:$0xff]  ;;  %v8813_v63 = vld [vmem:[#allocation76_spill] sm:$0xff] }
 0x11e   :  { %980 = vmatpush.msra.mxu2 %v5395_v54  ;;  %1090 = vmatpush.msrb.mxu3 %v5157_v44  ;;  %v8801_v44 = vld [vmem:[#allocation53_spill] sm:$0xff] }
 0x11f   :  { %1020 = vmatpush.msrb.mxu0 %v8787_v21  ;;  %1048 = vmatpush.msrb.mxu1 %v8789_v26  ;;  %v8814_v21 = vld [vmem:[#allocation29_spill] sm:$0xff]  ;;  %v8816_v26 = vld [vmem:[#allocation31_spill] sm:$0xff] }
 0x120   :  { %981 = vmatpush.msra.mxu2 %v5401_v11  ;;  %1091 = vmatpush.msrb.mxu3 %v5175_v61  ;;  %v8805_v61 = vld [vmem:[#allocation61_spill] sm:$0xff] }
 0x121   :  { %1021 = vmatpush.msrb.mxu0 %v8790_v49  ;;  %1049 = vmatpush.msrb.mxu1 %v8793_v47  ;;  %v8817_v49 = vld [vmem:[#allocation82_spill] sm:$0xff]  ;;  %v8820_v47 = vld [vmem:[#allocation35_spill] sm:$0xff] }
 0x122   :  { %982 = vmatpush.msra.mxu2 %v8792_v52  ;;  %v8819_v52 = vld [vmem:[#allocation85_spill] sm:$0xff] }
 0x123   :  { %1022 = vmatpush.msrb.mxu0 %v8794_v38  ;;  %1050 = vmatpush.msrb.mxu1 %v5155_v18  ;;  %v5427_v18 = vld [vmem:[#allocation6 + $0x2a0] sm:$0xff] }
 0x124   :  { %983 = vmatpush.msra.mxu2 %v5411_v5  ;;  %8800 = vst [vmem:[#allocation44_spill] sm:$0xff] %v5427_v18  ;;  %v8821_v38 = vld [vmem:[#allocation88_spill] sm:$0xff] }
 0x125   :  { %1023 = vmatpush.msrb.mxu0 %v8796_v48  ;;  %1051 = vmatpush.msrb.mxu1 %v8797_v30  ;;  %v8823_v48 = vld [vmem:[#allocation91_spill] sm:$0xff] }
 0x126   :  { %984 = vmatpush.msra.mxu2 %v5417_v16  ;;  %v8824_v30 = vld [vmem:[#allocation39_spill] sm:$0xff] }
 0x127   :  { %1024 = vmatpush.msrb.mxu0 %v8798_v24  ;;  %v8825_v24 = vld [vmem:[#allocation94_spill] sm:$0xff] }
 0x128   :  { %985 = vmatpush.msra.mxu2 %v5423_v4 }
 0x129   :  { %1025 = vmatpush.msrb.mxu0 %v8799_v13  ;;  %v8826_v13 = vld [vmem:[#allocation41_spill] sm:$0xff] }
 0x12a   :  { %986 = vmatpush.msra.mxu2 %v5427_v18 }
 0x12b   :  { %1026 = vmatpush.msrb.mxu0 %v8801_v44  ;;  %v8827_v44 = vld [vmem:[#allocation97_spill] sm:$0xff] }
 0x12c   :  { %987 = vmatpush.msra.mxu2 %v5431_v1 }
 0x12d   :  { %1027 = vmatpush.msrb.mxu0 %v8803_v12  ;;  %v8828_v12 = vld [vmem:[#allocation43_spill] sm:$0xff] }
 0x12e   :  { %988 = vmatpush.msra.mxu2 %v8804_v32  ;;  %v8829_v32 = vld [vmem:[#allocation101_spill] sm:$0xff] }
 0x12f   :  { %1028 = vmatpush.msrb.mxu0 %v8805_v61  ;;  %v8830_v61 = vld [vmem:[#allocation46_spill] sm:$0xff] }
 0x130   :  { %989 = vmatpush.msra.mxu2 %v8806_v45  ;;  %v8831_v45 = vld [vmem:[#allocation102_spill] sm:$0xff] }
 0x131   :  { %1029 = vmatpush.msrb.mxu0 %v8807_v53  ;;  %v8832_v53 = vld [vmem:[#allocation50_spill] sm:$0xff] }
 0x132   :  { %990 = vmatpush.msra.mxu2 %v8808_v35  ;;  %v8833_v35 = vld [vmem:[#allocation54_spill] sm:$0xff] }
 0x133   :  { %1030 = vmatpush.msrb.mxu0 %v8809_v23  ;;  %v8834_v23 = vld [vmem:[#allocation58_spill] sm:$0xff] }
 0x134   :  { %991 = vmatpush.msra.mxu2 %v8810_v50  ;;  %v8835_v50 = vld [vmem:[#allocation62_spill] sm:$0xff] }
 0x135   :  { %1031 = vmatpush.msrb.mxu0 %v8811_v58  ;;  %v8836_v58 = vld [vmem:[#allocation66_spill] sm:$0xff] }
 0x136   :  { %1056 = vmatpush.msrb.mxu2 %v8812_v42  ;;  %v8837_v42 = vld [vmem:[#allocation70_spill] sm:$0xff] }
 0x137   :  { %1096 = vmatpush.msra.mxu0 %v8813_v63 }
 0x138   :  { %1057 = vmatpush.msrb.mxu2 %v8814_v21 }
 0x139   :  { %1097 = vmatpush.msra.mxu0 %v8815_v36 }
 0x13a   :  { %1058 = vmatpush.msrb.mxu2 %v8816_v26 }
 0x13b   :  { %1098 = vmatpush.msra.mxu0 %v8817_v49 }
 0x13c   :  { %1059 = vmatpush.msrb.mxu2 %v8818_v7 }
 0x13d   :  { %1099 = vmatpush.msra.mxu0 %v8819_v52 }
 0x13e   :  { %1060 = vmatpush.msrb.mxu2 %v8820_v47 }
 0x13f   :  { %1100 = vmatpush.msra.mxu0 %v8821_v38 }
 0x140   :  { %1061 = vmatpush.msrb.mxu2 %v8822_v59 }
 0x141   :  { %1101 = vmatpush.msra.mxu0 %v8823_v48 }
 0x142   :  { %1062 = vmatpush.msrb.mxu2 %v8824_v30 }
 0x143   :  { %1102 = vmatpush.msra.mxu0 %v8825_v24 }
 0x144   :  { %1063 = vmatpush.msrb.mxu2 %v8826_v13 }
 0x145   :  { %1103 = vmatpush.msra.mxu0 %v8827_v44 }
 0x146   :  { %1064 = vmatpush.msrb.mxu2 %v8828_v12  ;;  %v5489_v12 = vld [vmem:[#allocation2 + $0x1] ss:$8 sm:$0x7] }
 0x147   :  { %1104 = vmatpush.msra.mxu0 %v8829_v32 }
 0x148   :  { %1065 = vmatpush.msrb.mxu2 %v8830_v61 }
 0x149   :  { %1105 = vmatpush.msra.mxu0 %v8831_v45 }
 0x14a   :  { %1066 = vmatpush.msrb.mxu2 %v8832_v53  ;;  %v5493_v53 = vld [vmem:[#allocation2 + $0x19] ss:$8 sm:$0x7] }
 0x14b   :  { %1106 = vmatpush.msra.mxu0 %v5183_v62  ;;  %v372_v62 = vld [vmem:[%s8186_s6] sm:$0xf]  ;;  %s3621_s6 = sshll.u32 %s4599_s30, 4  ;;  %s3622_s6 = int_to_ptr.vmem [resolvable:$true] %s3621_s6 }
 0x14c   :  { %1067 = vmatpush.msrb.mxu2 %v8833_v35  ;;  %v5487_v44 = vperm.slane %v372_v62, 3 }
 0x14d   :  { %1107 = vmatpush.msra.mxu0 %v5192_v43  ;;  %v5478_v43 = vperm.slane %v372_v62, 1 }
 0x14e   :  { %1068 = vmatpush.msrb.mxu2 %v8834_v23  ;;  %8840 = vst [vmem:[#allocation52_spill] sm:$0xff] %v5487_v44 }
 0x14f   :  { %1108 = vmatpush.msra.mxu0 %v5201_v39  ;;  %8838 = vst [vmem:[#allocation12_spill] sm:$0xff] %v5478_v43  ;;  %v641_v39 = vpop.f32.mrf.mxu1 }
 0x150   :  { %1069 = vmatpush.msrb.mxu2 %v8835_v50 }
 0x151   :  { %1109 = vmatpush.msra.mxu0 %v5211_v40  ;;  %v5481_v40 = vperm.slane %v372_v62, 0 }
 0x152   :  { %1070 = vmatpush.msrb.mxu2 %v8836_v58  ;;  %v5495_v58 = vperm.slane %v372_v62, 2 }
 0x153   :  { %1110 = vmatpush.msra.mxu0 %v5216_v41  ;;  %8839 = vst [vmem:[#allocation47_spill] sm:$0xff] %v5481_v40  ;;  %v601_v41 = vpop.f32.mrf.mxu3 }
 0x154   :  { %1071 = vmatpush.msrb.mxu2 %v8837_v42  ;;  %v882_v42 = vrot.slane %v5489_v12, 1 }
 0x155   :  { %1111 = vmatpush.msra.mxu0 %v5225_v51 }
 0x15b   :  { %v681_v38 = vpop.f32.mrf.mxu3 }
 0x172   :  { %v621_v63 = vpop.f32.mrf.mxu0 }
 0x173   :  { %v622_v21 = vadd.f32 %v621_v63, %v5478_v43 }
 0x175   :  { %v642_v36 = vadd.f32 %v641_v39, %v622_v21 }
 0x177   :  { %v3648_v26 = vmul.f32 -1.442695, %v642_v36  ;;  %v883_v36 = vrot.slane %v5493_v53, 1 }
 0x178   :  { %v581_v49 = vpop.f32.mrf.mxu2 }
 0x179   :  { %v582_v7 = vadd.f32 %v581_v49, %v5481_v40  ;;  %3727 = vpow2.f32 %v3648_v26 }
 0x17a   :  { %v701_v61 = vpop.f32.mrf.mxu0 }
 0x17b   :  { %v602_v52 = vadd.f32 %v601_v41, %v582_v7  ;;  %v702_v39 = vadd.f32 %v701_v61, %v5487_v44  ;;  %v721_v7 = vpop.f32.mrf.mxu1 }
 0x17d   :  { %v3647_v51 = vmul.f32 -1.442695, %v602_v52 }
 0x17f   :  { %3729 = vpow2.f32 %v3647_v51  ;;  %v3728_v47 = vpop.eup %3727 }
 0x180   :  { %v5484_v48 = vadd.f32 1.0, %v3728_v47  ;;  %v661_v35 = vpop.f32.mrf.mxu2 }
 0x181   :  { %v814_v24 = vpop.f32.mrf.mxu3  ;;  %v662_v62 = vadd.f32 %v661_v35, %v5495_v58 }
 0x182   :  { %v887_v23 = vrot.slane %v814_v24, 1  ;;  %v889_v41 = vadd.f32 %v882_v42, %v814_v24  ;;  %vm752_vm7 = vweird.f32 %v5484_v48 }
 0x183   :  { %v682_v18 = vadd.f32 %v681_v38, %v662_v62  ;;  %v758_v38 = vand.u32 2147483648, %v5484_v48 }
 0x184   :  { %v890_v52 = vadd.f32 %v887_v23, %v883_v36  ;;  %v3651_v61 = vmul.f32 -1.442695, %v889_v41 }
 0x185   :  { %v3730_v59 = vpop.eup %3729 }
 0x186   :  { %v727_v30 = vadd.f32 1.0, %v3730_v59  ;;  %v3652_v40 = vmul.f32 -1.442695, %v890_v52 }
 0x188   :  { %3731 = vrcp.f32 %v727_v30  ;;  %v739_v21 = vand.u32 2147483648, %v727_v30  ;;  %v737_v49 = vand.u32 2147483647, %v727_v30  ;;  %vm733_vm3 = vweird.f32 %v727_v30 }
 0x189   :  { %3733 = vrcp.f32 %v5484_v48 }
 0x18a   :  { %v740_v59 = vor.u32 1.1754944e-38, %v739_v21  ;;  %vm738_vm5 = vcmp.eq.f32.partialorder %v737_v49, 8.507059e+37  ;;  %3735 = vpow2.f32 %v3651_v61  ;;  %v759_v21 = vor.u32 1.1754944e-38, %v758_v38  ;;  %v5534_v61 = vld [vmem:[#allocation3 + $0x158] sm:$0xff] }
 0x18b   :  { %3737 = vpow2.f32 %v3652_v40 }
 0x18e   :  { %v3732_v13 = vpop.eup %3731 }
 0x18f   :  { %v5491_v32 = vpop.eup %3733  ;;  %v729_v45 = vmul.f32 %v3732_v13, %v727_v30  ;;  %vm734_vm2 = vweird.f32 %v3732_v13 }
 0x190   :  { %v748_v63 = vmul.f32 %v5491_v32, %v5484_v48  ;;  %vm735_vm4 = vmor %vm733_vm3, %vm734_vm2  ;;  %vm753_vm6 = vweird.f32 %v5491_v32 }
 0x191   :  { %v730_v50 = vsub.f32 1.0, %v729_v45  ;;  %v722_v45 = vadd.f32 %v721_v7, %v702_v39  ;;  %vm754_vm8 = vmor %vm752_vm7, %vm753_vm6 }
 0x192   :  { %v749_v47 = vsub.f32 1.0, %v748_v63 }
 0x193   :  { %v731_v26 = vmul.f32 %v3732_v13, %v730_v50 }
 0x194   :  { %v750_v24 = vmul.f32 %v5491_v32, %v749_v47  ;;  %v5528_v47 = vld [vmem:[#allocation3 + $0x170] sm:$0xff] }
 0x195   :  { %v732_v51 = vadd.f32 %v3732_v13, %v731_v26 }
 0x197   :  { %v736_v43 = vsel %vm735_vm4, %v3732_v13, %v732_v51  ;;  %v751_v13 = vadd.f32 %v5491_v32, %v750_v24 }
 0x198   :  { %v741_v44 = vsel %vm738_vm5, %v740_v59, %v736_v43  ;;  %v794_v1 = vpop.f32.mrf.mxu2  ;;  %v5531_v59 = vld [vmem:[#allocation6 + $0x1e0] sm:$0xff] }
 0x199   :  { %v762_v50 = vmul.f32 %v741_v44, %v722_v45  ;;  %v838_v42 = vrot.slane %v794_v1, 1  ;;  %v840_v23 = vadd.f32 %v794_v1, %v5489_v12  ;;  %v756_v44 = vand.u32 2147483647, %v5484_v48 }
 0x19a   :  { %v755_v40 = vsel %vm754_vm8, %v5491_v32, %v751_v13  ;;  %v834_v13 = vpop.f32.mrf.mxu0 }
 0x19b   :  { %v763_v30 = vadd.f32 %v762_v50, %v682_v18  ;;  %v841_v35 = vadd.f32 %v838_v42, %v5493_v53  ;;  %v3649_v63 = vmul.f32 -1.442695, %v840_v23  ;;  %v3736_v18 = vpop.eup %3735  ;;  %vm757_vm9 = vcmp.eq.f32.partialorder %v756_v44, 8.507059e+37  ;;  %v5537_v50 = vld [vmem:[#allocation6 + $0x1c0] sm:$0xff] }
 0x19c   :  { %v3738_v1 = vpop.eup %3737  ;;  %v5512_v49 = vadd.f32 1.0, %v3736_v18  ;;  %v760_v7 = vsel %vm757_vm9, %v759_v21, %v755_v40  ;;  %v5558_v40 = vld [vmem:[#allocation6 + $0x180] sm:$0xff] }
 0x19d   :  { %3739 = vtanh.f32 %v763_v30  ;;  %v3650_v43 = vmul.f32 -1.442695, %v841_v35  ;;  %v5516_v51 = vadd.f32 1.0, %v3738_v1  ;;  %v5543_v30 = vld [vmem:[#allocation3 + $0x140] sm:$0xff]  ;;  %v5555_v1 = vld [vmem:[#allocation3 + $0x128] sm:$0xff]  ;;  %8844 = vst [vmem:[#allocation14_spill] sm:$0xff] %v5558_v40 }
 0x19e   :  { %3741 = vpow2.f32 %v3649_v63  ;;  %8841 = vst [vmem:[#allocation13_spill] sm:$0xff] %v5543_v30  ;;  %v5546_v35 = vld [vmem:[#allocation6 + $0x1a0] sm:$0xff]  ;;  %vm904_vm3 = vweird.f32 %v5512_v49 }
 0x19f   :  { %3743 = vpow2.f32 %v3650_v43  ;;  %8842 = vst [vmem:[#allocation51_spill] sm:$0xff] %v5546_v35  ;;  %vm919_vm6 = vweird.f32 %v5516_v51 }
 0x1a0   :  { %8843 = vst [vmem:[#allocation55_spill] sm:$0xff] %v5555_v1 }
 0x1a3   :  { %v3740_v39 = vpop.eup %3739 }
 0x1a4   :  { %v3742_v36 = vpop.eup %3741  ;;  %v765_v26 = vsub.f32 0.0, %v3740_v39 }
 0x1a5   :  { %v5514_v41 = vadd.f32 1.0, %v3742_v36  ;;  %v3744_v52 = vpop.eup %3743 }
 0x1a6   :  { %v766_v48 = vmul.f32 %v765_v26, %v760_v7  ;;  %v5518_v62 = vadd.f32 1.0, %v3744_v52  ;;  %v8845_v7 = vld [vmem:[#allocation98_spill] sm:$0xff] }
 0x1a7   :  { %3745 = vrcp.f32 %v5514_v41  ;;  %v861_v18 = vand.u32 2147483648, %v5514_v41  ;;  %v859_v21 = vand.u32 2147483647, %v5514_v41  ;;  %v929_v52 = vadd.f32 %v8845_v7, %v834_v13  ;;  %v5580_v7 = vld [vmem:[#allocation6 + $0x140] sm:$0xff] }
 0x1a8   :  { %3747 = vrcp.f32 %v5512_v49  ;;  %v5522_v32 = vadd.f32 %v3740_v39, %v766_v48  ;;  %vm855_vm11 = vweird.f32 %v5514_v41  ;;  %v876_v48 = vand.u32 2147483648, %v5518_v62 }
 0x1a9   :  { %3749 = vrcp.f32 %v5518_v62  ;;  %v862_v13 = vor.u32 1.1754944e-38, %v861_v18  ;;  %vm860_vm14 = vcmp.eq.f32.partialorder %v859_v21, 8.507059e+37  ;;  %vm870_vm15 = vweird.f32 %v5518_v62 }
 0x1aa   :  { %3751 = vrcp.f32 %v5516_v51  ;;  %992 = vmatmul.f32.vlgmr.msra.gmra.mxu2 %v5522_v32  ;;  %1032 = vmatmul.f32.vlgmr.msrb.gmra.mxu0 %v5522_v32  ;;  %v877_v18 = vor.u32 1.1754944e-38, %v876_v48  ;;  %v5596_v48 = vld [vmem:[#allocation6 + $0x100] sm:$0xff] }
 0x1ab   :  { %1189 = vmatpush.msra.mxu2 %v5528_v47  ;;  %1348 = vmatpush.msrb.mxu0 %v5531_v59 }
 0x1ad   :  { %v3746_v45 = vpop.eup %3745  ;;  %1190 = vmatpush.msra.mxu2 %v5534_v61  ;;  %1349 = vmatpush.msrb.mxu0 %v5537_v50 }
 0x1ae   :  { %v5540_v24 = vpop.eup %3747  ;;  %v851_v42 = vmul.f32 %v3746_v45, %v5514_v41  ;;  %vm856_vm10 = vweird.f32 %v3746_v45  ;;  %v5577_v41 = vld [vmem:[#allocation3 + $0xf8] sm:$0xff] }
 0x1af   :  { %v3750_v23 = vpop.eup %3749  ;;  %1191 = vmatpush.msra.mxu2 %v5543_v30  ;;  %1350 = vmatpush.msrb.mxu0 %v5546_v35  ;;  %v900_v44 = vmul.f32 %v5540_v24, %v5512_v49  ;;  %vm857_vm13 = vmor %vm855_vm11, %vm856_vm10  ;;  %8848 = vst [vmem:[#allocation15_spill] sm:$0xff] %v5577_v41  ;;  %v5586_v30 = vld [vmem:[#allocation3 + $0xe0] sm:$0xff]  ;;  %vm905_vm2 = vweird.f32 %v5540_v24 }
 0x1b0   :  { %v5549_v63 = vpop.eup %3751  ;;  %v852_v43 = vsub.f32 1.0, %v851_v42  ;;  %v866_v38 = vmul.f32 %v3750_v23, %v5518_v62  ;;  %v5569_v42 = vld [vmem:[#allocation3 + $0x110] sm:$0xff]  ;;  %vm871_vm12 = vweird.f32 %v3750_v23  ;;  %vm5628_vm5 = vmor %vm904_vm3, %vm905_vm2 }
 0x1b1   :  { %1192 = vmatpush.msra.mxu2 %v5555_v1  ;;  %1351 = vmatpush.msrb.mxu0 %v5558_v40  ;;  %v915_v26 = vmul.f32 %v5549_v63, %v5516_v51  ;;  %8846 = vst [vmem:[#allocation56_spill] sm:$0xff] %v5569_v42  ;;  %v874_v1 = vand.u32 2147483647, %v5518_v62  ;;  %v901_v35 = vsub.f32 1.0, %v900_v44  ;;  %vm872_vm0 = vmor %vm870_vm15, %vm871_vm12  ;;  %vm920_vm4 = vweird.f32 %v5549_v63 }
 0x1b2   :  { %v853_v39 = vmul.f32 %v3746_v45, %v852_v43  ;;  %v867_v36 = vsub.f32 1.0, %v866_v38  ;;  %1072 = vmatmul.f32.vlgmr.msrb.gmra.mxu2 %v5522_v32  ;;  %1112 = vmatmul.f32.vlgmr.msra.gmra.mxu0 %v5522_v32  ;;  %v5572_v43 = vld [vmem:[#allocation6 + $0x160] sm:$0xff]  ;;  %vm5646_vm7 = vmor %vm919_vm6, %vm920_vm4 }
 0x1b3   :  { %1193 = vmatpush.msra.mxu2 %v5569_v42  ;;  %8847 = vst [vmem:[#allocation59_spill] sm:$0xff] %v5572_v43  ;;  %1352 = vmatpush.msrb.mxu0 %v5572_v43  ;;  %vm875_vm1 = vcmp.eq.f32.partialorder %v874_v1, 8.507059e+37  ;;  %v902_v62 = vmul.f32 %v5540_v24, %v901_v35  ;;  %v5604_v35 = vld [vmem:[#allocation6 + $0xe0] sm:$0xff] }
 0x1b4   :  { %v854_v38 = vadd.f32 %v3746_v45, %v853_v39  ;;  %v868_v40 = vmul.f32 %v3750_v23, %v867_v36  ;;  %v916_v39 = vsub.f32 1.0, %v915_v26  ;;  %v935_v36 = vrot.slane %v5489_v12, 2  ;;  %v5593_v12 = vld [vmem:[#allocation3 + $0xc8] sm:$0xff] }
 0x1b5   :  { %1194 = vmatpush.msra.mxu2 %v5577_v41  ;;  %1353 = vmatpush.msrb.mxu0 %v5580_v7  ;;  %v5589_v41 = vld [vmem:[#allocation6 + $0x120] sm:$0xff] }
 0x1b6   :  { %v858_v42 = vsel %vm857_vm13, %v3746_v45, %v854_v38  ;;  %v869_v43 = vadd.f32 %v3750_v23, %v868_v40  ;;  %8849 = vst [vmem:[#allocation60_spill] sm:$0xff] %v5589_v41  ;;  %v931_v45 = vrot.slane %v929_v52, 1 }
 0x1b7   :  { %v863_v44 = vsel %vm860_vm14, %v862_v13, %v858_v42  ;;  %1195 = vmatpush.msra.mxu2 %v5586_v30  ;;  %1354 = vmatpush.msrb.mxu0 %v5589_v41  ;;  %v936_v42 = vrot.slane %v5493_v53, 2  ;;  %v917_v41 = vmul.f32 %v5549_v63, %v916_v39  ;;  %v5612_v53 = vld [vmem:[#allocation6 + $0xc0] sm:$0xff]  ;;  %v910_v39 = vand.u32 2147483648, %v5512_v49 }
 0x1b8   :  { %v873_v21 = vsel %vm872_vm0, %v3750_v23, %v869_v43  ;;  %v933_v40 = vmul.f32 %v929_v52, %v863_v44  ;;  %v5601_v23 = vld [vmem:[#allocation3 + $0xb0] sm:$0xff]  ;;  %v903_v52 = vadd.f32 %v5540_v24, %v902_v62  ;;  %v5609_v43 = vld [vmem:[#allocation3 + $0x98] sm:$0xff]  ;;  %v5638_v62 = vld [vmem:[#allocation3 + $0x68] sm:$0xff] }
 0x1b9   :  { %v878_v26 = vsel %vm875_vm1, %v877_v18, %v873_v21  ;;  %1196 = vmatpush.msra.mxu2 %v5593_v12  ;;  %1355 = vmatpush.msrb.mxu0 %v5596_v48  ;;  %v918_v44 = vadd.f32 %v5549_v63, %v917_v41  ;;  %v5620_v18 = vld [vmem:[#allocation3 + $0x80] sm:$0xff]  ;;  %8853 = vst [vmem:[#allocation16_spill] sm:$0xff] %v5638_v62 }
 0x1ba   :  { %v934_v38 = vmul.f32 %v931_v45, %v878_v26  ;;  %v939_v13 = vadd.f32 %v935_v36, %v933_v40  ;;  %v908_v36 = vand.u32 2147483647, %v5512_v49  ;;  %v5623_v45 = vld [vmem:[#allocation6 + $0xa0] sm:$0xff]  ;;  %v925_v49 = vand.u32 2147483648, %v5516_v51 }
 0x1bb   :  { %1197 = vmatpush.msra.mxu2 %v5601_v23  ;;  %1356 = vmatpush.msrb.mxu0 %v5604_v35  ;;  %8850 = vst [vmem:[#allocation63_spill] sm:$0xff] %v5623_v45  ;;  %v907_v41 = vsel %vm5628_vm5, %v5540_v24, %v903_v52  ;;  %v923_v40 = vand.u32 2147483647, %v5516_v51  ;;  %v5641_v26 = vld [vmem:[#allocation6 + $0x80] sm:$0xff]  ;;  %v922_v51 = vsel %vm5646_vm7, %v5549_v63, %v918_v44 }
 0x1bc   :  { %v940_v1 = vadd.f32 %v936_v42, %v934_v38  ;;  %3753 = vtanh.f32 %v939_v13  ;;  %8854 = vst [vmem:[#allocation64_spill] sm:$0xff] %v5641_v26  ;;  %v911_v38 = vor.u32 1.1754944e-38, %v910_v39  ;;  %vm909_vm8 = vcmp.eq.f32.partialorder %v908_v36, 8.507059e+37  ;;  %v5657_v52 = vld [vmem:[#allocation6 + $0x60] sm:$0xff] }
 0x1bd   :  { %1198 = vmatpush.msra.mxu2 %v5609_v43  ;;  %1357 = vmatpush.msrb.mxu0 %v5612_v53  ;;  %8857 = vst [vmem:[#allocation67_spill] sm:$0xff] %v5657_v52  ;;  %vm924_vm9 = vcmp.eq.f32.partialorder %v923_v40, 8.507059e+37  ;;  %v5681_v40 = vld [vmem:[#allocation6] sm:$0xff] }
 0x1be   :  { %3755 = vtanh.f32 %v940_v1  ;;  %v5654_v1 = vld [vmem:[#allocation3 + $0x50] sm:$0xff]  ;;  %v912_v21 = vsel %vm909_vm8, %v911_v38, %v907_v41  ;;  %v5678_v41 = vld [vmem:[#allocation3 + $0x8] sm:$0xff] }
 0x1bf   :  { %1199 = vmatpush.msra.mxu2 %v5620_v18  ;;  %1358 = vmatpush.msrb.mxu0 %v5623_v45  ;;  %v5661_v45 = vld [vmem:[#allocation3 + $0x38] sm:$0xff]  ;;  %v5694_v38 = vld [vmem:[#allocation6 + $0x1d0] sm:$0xff] }
 0x1c1   :  { %1200 = vmatpush.msra.mxu2 %v5638_v62  ;;  %1359 = vmatpush.msrb.mxu0 %v5641_v26  ;;  %v926_v26 = vor.u32 1.1754944e-38, %v925_v49  ;;  %v5672_v49 = vld [vmem:[#allocation6 + $0x20] sm:$0xff] }
 0x1c2   :  { %v3754_v42 = vpop.eup %3753 }
 0x1c3   :  { %v943_v24 = vsub.f32 %v5252_v9, %v3754_v42  ;;  %1201 = vmatpush.msra.mxu2 %v5654_v1  ;;  %1360 = vmatpush.msrb.mxu0 %v5657_v52  ;;  %v5664_v9 = vld [vmem:[#allocation6 + $0x40] sm:$0xff]  ;;  %v927_v63 = vsel %vm924_vm9, %v926_v26, %v922_v51  ;;  %v5687_v26 = vld [vmem:[#allocation6 + $0x1f0] sm:$0xff]  ;;  %v5697_v51 = vld [vmem:[#allocation6 + $0x1a8] sm:$0xff] }
 0x1c4   :  { %v3756_v39 = vpop.eup %3755  ;;  %v5669_v52 = vld [vmem:[#allocation3 + $0x20] sm:$0xff] }
 0x1c5   :  { %v944_v36 = vsub.f32 %v5257_v6, %v3756_v39  ;;  %v945_v62 = vmul.f32 %v943_v24, %v912_v21  ;;  %1202 = vmatpush.msra.mxu2 %v5661_v45  ;;  %1361 = vmatpush.msrb.mxu0 %v5664_v9  ;;  %v5700_v24 = vld [vmem:[#allocation6 + $0x1b0] sm:$0xff] }
 0x1c6   :  { %v5706_v21 = vld [vmem:[#allocation6 + $0x190] sm:$0xff] }
 0x1c7   :  { %v946_v44 = vmul.f32 %v944_v36, %v927_v63  ;;  %v5667_v13 = vadd.f32 %v3754_v42, %v945_v62  ;;  %1203 = vmatpush.msra.mxu2 %v5669_v52  ;;  %1362 = vmatpush.msrb.mxu0 %v5672_v49  ;;  %v5684_v62 = vld [vmem:[#allocation6 + $0x1e8] sm:$0xff]  ;;  %8859 = vst [vmem:[#allocation68_spill] sm:$0xff] %v5706_v21 }
 0x1c8   :  { %v5691_v42 = vld [vmem:[#allocation6 + $0x1c8] sm:$0xff] }
 0x1c9   :  { %v5675_v6 = vadd.f32 %v3756_v39, %v946_v44  ;;  %951 = vst [vmem:[#allocation1] ss:$9 sm:$0xff] %v5667_v13  ;;  %1204 = vmatpush.msra.mxu2 %v5678_v41  ;;  %1363 = vmatpush.msrb.mxu0 %v5681_v40  ;;  %v5703_v39 = vld [vmem:[#allocation6 + $0x188] sm:$0xff]  ;;  %v5712_v44 = vld [vmem:[#allocation6 + $0x170] sm:$0xff] }
 0x1ca   :  { %8858 = vst [vmem:[#allocation17_spill] sm:$0xff] %v5703_v39  ;;  %v5709_v63 = vld [vmem:[#allocation6 + $0x168] sm:$0xff] }
 0x1cb   :  { %1388 = vmatpush.msrb.mxu2 %v5684_v62  ;;  %1428 = vmatpush.msra.mxu0 %v5687_v26  ;;  %953 = vst [vmem:[#allocation1 + $0x1] ss:$9 sm:$0xff] %v5675_v6 }
 0x1cc   :  { %8860 = vst [vmem:[#allocation71_spill] sm:$0xff] %v5709_v63 }
 0x1cd   :  { %1389 = vmatpush.msrb.mxu2 %v5691_v42  ;;  %1429 = vmatpush.msra.mxu0 %v5694_v38  ;;  %8861 = vst [vmem:[#allocation18_spill] sm:$0xff] %v5712_v44 }
 0x1cf   :  { %1390 = vmatpush.msrb.mxu2 %v5697_v51  ;;  %1430 = vmatpush.msra.mxu0 %v5700_v24 }
 0x1d1   :  { %1391 = vmatpush.msrb.mxu2 %v5703_v39  ;;  %1431 = vmatpush.msra.mxu0 %v5706_v21  ;;  %v5719_v21 = vld [vmem:[#allocation6 + $0x148] sm:$0xff]  ;;  %v5722_v39 = vld [vmem:[#allocation6 + $0x150] sm:$0xff] }
 0x1d2   :  { %v954_v36 = vld [vmem:[#allocation1] sm:$0xff] }
 0x1d3   :  { %1392 = vmatpush.msrb.mxu2 %v5709_v63  ;;  %1432 = vmatpush.msra.mxu0 %v5712_v44  ;;  %1164 = vst [vmem:[#allocation1] ss:$9 sm:$0xff] %v5667_v13  ;;  %v5727_v44 = vld [vmem:[#allocation6 + $0x128] sm:$0xff]  ;;  %v5730_v63 = vld [vmem:[#allocation6 + $0x130] sm:$0xff] }
 0x1d4   :  { %972 = vmatmul.f32.vlgmr.msra.gmra.mxu1 %v954_v36  ;;  %1012 = vmatmul.f32.vlgmr.msra.gmra.mxu3 %v954_v36  ;;  %1166 = vst [vmem:[#allocation1 + $0x1] ss:$9 sm:$0xff] %v5675_v6 }
 0x1d5   :  { %1169 = vmatpush.msra.mxu1 %v5272_v14  ;;  %1209 = vmatpush.msra.mxu3 %v5275_v17  ;;  %8862 = vst [vmem:[#allocation72_spill] sm:$0xff] %v5727_v44  ;;  %v5735_v14 = vld [vmem:[#allocation6 + $0x108] sm:$0xff]  ;;  %v5738_v17 = vld [vmem:[#allocation6 + $0x110] sm:$0xff] }
 0x1d6   :  { %1393 = vmatpush.msrb.mxu2 %v5719_v21  ;;  %1433 = vmatpush.msra.mxu0 %v5722_v39  ;;  %8863 = vst [vmem:[#allocation74_spill] sm:$0xff] %v5730_v63 }
 0x1d7   :  { %1170 = vmatpush.msra.mxu1 %v5280_v19  ;;  %1210 = vmatpush.msra.mxu3 %v5283_v22  ;;  %8864 = vst [vmem:[#allocation19_spill] sm:$0xff] %v5735_v14  ;;  %v5747_v22 = vld [vmem:[#allocation3 + $0x118] sm:$0xff] }
 0x1d8   :  { %1394 = vmatpush.msrb.mxu2 %v5727_v44  ;;  %1434 = vmatpush.msra.mxu0 %v5730_v63  ;;  %8865 = vst [vmem:[#allocation75_spill] sm:$0xff] %v5738_v17 }
 0x1d9   :  { %1171 = vmatpush.msra.mxu1 %v5288_v25  ;;  %1211 = vmatpush.msra.mxu3 %v5291_v27  ;;  %8866 = vst [vmem:[#allocation77_spill] sm:$0xff] %v5747_v22  ;;  %v5750_v25 = vld [vmem:[#allocation6 + $0xe8] sm:$0xff]  ;;  %v5754_v27 = vld [vmem:[#allocation6 + $0xf0] sm:$0xff] }
 0x1da   :  { %1395 = vmatpush.msrb.mxu2 %v5735_v14  ;;  %1435 = vmatpush.msra.mxu0 %v5738_v17  ;;  %8867 = vst [vmem:[#allocation20_spill] sm:$0xff] %v5750_v25 }
 0x1db   :  { %1172 = vmatpush.msra.mxu1 %v5296_v34  ;;  %1212 = vmatpush.msra.mxu3 %v5299_v37  ;;  %v5743_v19 = vld [vmem:[#allocation1] sm:$0xff]  ;;  %8868 = vst [vmem:[#allocation78_spill] sm:$0xff] %v5754_v27  ;;  %v5757_v34 = vld [vmem:[#allocation3 + $0x100] sm:$0xff] }
 0x1dc   :  { %1052 = vmatmul.f32.vlgmr.msrb.gmra.mxu1 %v954_v36  ;;  %1092 = vmatmul.f32.vlgmr.msrb.gmra.mxu3 %v954_v36  ;;  %8869 = vst [vmem:[#allocation80_spill] sm:$0xff] %v5757_v34  ;;  %v5760_v37 = vld [vmem:[#allocation6 + $0xc8] sm:$0xff] }
 0x1dd   :  { %1173 = vmatpush.msra.mxu1 %v5302_v56  ;;  %1205 = vmatmul.f32.vlgmr.msra.gmra.mxu2 %v5743_v19  ;;  %8870 = vst [vmem:[#allocation21_spill] sm:$0xff] %v5760_v37  ;;  %v5764_v56 = vld [vmem:[#allocation6 + $0xd0] sm:$0xff]  ;;  %v5767_v36 = vld [vmem:[#allocation3 + $0xe8] sm:$0xff] }
 0x1de   :  { %1213 = vmatpush.msra.mxu3 %v5747_v22  ;;  %1396 = vmatpush.msrb.mxu2 %v5750_v25  ;;  %8871 = vst [vmem:[#allocation28_spill] sm:$0xff] %v5764_v56 }
 0x1df   :  { %1174 = vmatpush.msra.mxu1 %v5307_v8  ;;  %1436 = vmatpush.msra.mxu0 %v5754_v27  ;;  %8872 = vst [vmem:[#allocation81_spill] sm:$0xff] %v5767_v36  ;;  %v5770_v8 = vld [vmem:[#allocation6 + $0xa8] sm:$0xff] }
 0x1e0   :  { %1214 = vmatpush.msra.mxu3 %v5757_v34  ;;  %1397 = vmatpush.msrb.mxu2 %v5760_v37  ;;  %8873 = vst [vmem:[#allocation83_spill] sm:$0xff] %v5770_v8  ;;  %v5774_v34 = vld [vmem:[#allocation6 + $0xb0] sm:$0xff] }
 0x1e1   :  { %1175 = vmatpush.msra.mxu1 %v5313_v2  ;;  %1437 = vmatpush.msra.mxu0 %v5764_v56  ;;  %8874 = vst [vmem:[#allocation30_spill] sm:$0xff] %v5774_v34  ;;  %v5777_v37 = vld [vmem:[#allocation3 + $0xd0] sm:$0xff]  ;;  %v5780_v2 = vld [vmem:[#allocation6 + $0x88] sm:$0xff] }
 0x1e2   :  { %1215 = vmatpush.msra.mxu3 %v5767_v36  ;;  %1398 = vmatpush.msrb.mxu2 %v5770_v8  ;;  %8875 = vst [vmem:[#allocation84_spill] sm:$0xff] %v5777_v37  ;;  %v5784_v36 = vld [vmem:[#allocation6 + $0x90] sm:$0xff]  ;;  %v5787_v8 = vld [vmem:[#allocation3 + $0xb8] sm:$0xff] }
 0x1e3   :  { %1176 = vmatpush.msra.mxu1 %v5319_v31  ;;  %1438 = vmatpush.msra.mxu0 %v5774_v34  ;;  %8876 = vst [vmem:[#allocation86_spill] sm:$0xff] %v5780_v2  ;;  %v5790_v31 = vld [vmem:[#allocation6 + $0x68] sm:$0xff] }
 0x1e4   :  { %1216 = vmatpush.msra.mxu3 %v5777_v37  ;;  %1399 = vmatpush.msrb.mxu2 %v5780_v2  ;;  %8877 = vst [vmem:[#allocation32_spill] sm:$0xff] %v5784_v36  ;;  %v5794_v37 = vld [vmem:[#allocation6 + $0x70] sm:$0xff]  ;;  %v5797_v2 = vld [vmem:[#allocation3 + $0xa0] sm:$0xff] }
 0x1e5   :  { %1177 = vmatpush.msra.mxu1 %v5325_v10  ;;  %1439 = vmatpush.msra.mxu0 %v5784_v36  ;;  %8878 = vst [vmem:[#allocation87_spill] sm:$0xff] %v5787_v8  ;;  %v5800_v10 = vld [vmem:[#allocation6 + $0x48] sm:$0xff] }
 0x1e6   :  { %1217 = vmatpush.msra.mxu3 %v5787_v8  ;;  %8879 = vst [vmem:[#allocation89_spill] sm:$0xff] %v5790_v31  ;;  %1400 = vmatpush.msrb.mxu2 %v5790_v31  ;;  %v5804_v8 = vld [vmem:[#allocation6 + $0x50] sm:$0xff]  ;;  %v5807_v31 = vld [vmem:[#allocation3 + $0x88] sm:$0xff] }
 0x1e7   :  { %1178 = vmatpush.msra.mxu1 %v5331_v33  ;;  %8880 = vst [vmem:[#allocation34_spill] sm:$0xff] %v5794_v37  ;;  %1440 = vmatpush.msra.mxu0 %v5794_v37  ;;  %v5810_v33 = vld [vmem:[#allocation6 + $0x28] sm:$0xff] }
 0x1e8   :  { %8881 = vst [vmem:[#allocation90_spill] sm:$0xff] %v5797_v2  ;;  %1218 = vmatpush.msra.mxu3 %v5797_v2  ;;  %1401 = vmatpush.msrb.mxu2 %v5800_v10  ;;  %v5814_v2 = vld [vmem:[#allocation6 + $0x30] sm:$0xff] }
 0x1e9   :  { %8882 = vst [vmem:[#allocation92_spill] sm:$0xff] %v5800_v10  ;;  %1179 = vmatpush.msra.mxu1 %v5337_v15  ;;  %1441 = vmatpush.msra.mxu0 %v5804_v8  ;;  %v5817_v10 = vld [vmem:[#allocation3 + $0x70] sm:$0xff]  ;;  %v5820_v15 = vld [vmem:[#allocation6 + $0x8] sm:$0xff] }
 0x1ea   :  { %8883 = vst [vmem:[#allocation36_spill] sm:$0xff] %v5804_v8  ;;  %1219 = vmatpush.msra.mxu3 %v5807_v31  ;;  %1402 = vmatpush.msrb.mxu2 %v5810_v33 }
 0x1eb   :  { %8884 = vst [vmem:[#allocation93_spill] sm:$0xff] %v5807_v31  ;;  %1180 = vmatpush.msra.mxu1 %v5343_v46  ;;  %1442 = vmatpush.msra.mxu0 %v5814_v2  ;;  %v5824_v31 = vld [vmem:[#allocation6 + $0x1f8] sm:$0xff]  ;;  %v5830_v46 = vld [vmem:[#allocation6 + $0x10] sm:$0xff] }
 0x1ec   :  { %8885 = vst [vmem:[#allocation95_spill] sm:$0xff] %v5810_v33  ;;  %1220 = vmatpush.msra.mxu3 %v5817_v10  ;;  %1403 = vmatpush.msrb.mxu2 %v5820_v15  ;;  %v5827_v33 = vld [vmem:[#allocation3 + $0x58] sm:$0xff] }
 0x1ed   :  { %8886 = vst [vmem:[#allocation38_spill] sm:$0xff] %v5814_v2  ;;  %1181 = vmatpush.msra.mxu1 %v5349_v57  ;;  %1443 = vmatpush.msra.mxu0 %v5830_v46  ;;  %v5841_v57 = vld [vmem:[#allocation6 + $0x1b8] sm:$0xff] }
 0x1ee   :  { %8887 = vst [vmem:[#allocation96_spill] sm:$0xff] %v5817_v10  ;;  %1468 = vmatpush.msra.mxu2 %v5824_v31  ;;  %1221 = vmatpush.msra.mxu3 %v5827_v33  ;;  %v5834_v10 = vld [vmem:[#allocation6 + $0x1d8] sm:$0xff] }
 0x1ef   :  { %8888 = vst [vmem:[#allocation22_spill] sm:$0xff] %v5820_v15  ;;  %1182 = vmatpush.msra.mxu1 %v5355_v55  ;;  %v5837_v15 = vld [vmem:[#allocation3 + $0x40] sm:$0xff]  ;;  %v5848_v55 = vld [vmem:[#allocation6 + $0x198] sm:$0xff] }
 0x1f0   :  { %8889 = vst [vmem:[#allocation99_spill] sm:$0xff] %v5824_v31  ;;  %1469 = vmatpush.msra.mxu2 %v5834_v10  ;;  %1222 = vmatpush.msra.mxu3 %v5837_v15 }
 0x1f1   :  { %8890 = vst [vmem:[#allocation40_spill] sm:$0xff] %v5827_v33  ;;  %1183 = vmatpush.msra.mxu1 %v5361_v60  ;;  %v5844_v33 = vld [vmem:[#allocation3 + $0x28] sm:$0xff] }
 0x1f2   :  { %8891 = vst [vmem:[#allocation100_spill] sm:$0xff] %v5830_v46  ;;  %1470 = vmatpush.msra.mxu2 %v5841_v57  ;;  %1223 = vmatpush.msra.mxu3 %v5844_v33  ;;  %v5857_v60 = vld [vmem:[#allocation6 + $0x3e8] sm:$0xff] }
 0x1f3   :  { %8892 = vst [vmem:[#allocation42_spill] sm:$0xff] %v5834_v10  ;;  %1184 = vmatpush.msra.mxu1 %v5367_v0  ;;  %v5851_v10 = vld [vmem:[#allocation3 + $0x10] sm:$0xff]  ;;  %v5864_v0 = vld [vmem:[#allocation6 + $0x3c8] sm:$0xff] }
 0x1f4   :  { %8893 = vst [vmem:[#allocation103_spill] sm:$0xff] %v5837_v15  ;;  %1471 = vmatpush.msra.mxu2 %v5848_v55  ;;  %1224 = vmatpush.msra.mxu3 %v5851_v10 }
 0x1f5   :  { %8894 = vst [vmem:[#allocation45_spill] sm:$0xff] %v5841_v57  ;;  %1185 = vmatmul.f32.vlgmr.msra.gmra.mxu1 %v5743_v19  ;;  %1225 = vmatmul.f32.vlgmr.msra.gmra.mxu3 %v5743_v19  ;;  %v5874_v19 = vld [vmem:[#allocation6 + $0x138] sm:$0xff] }
 0x1f6   :  { %8895 = vst [vmem:[#allocation49_spill] sm:$0xff] %v5844_v33  ;;  %1368 = vmatpush.msrb.mxu1 %v5372_v3  ;;  %1408 = vmatpush.msrb.mxu3 %v5857_v60  ;;  %v5860_v33 = vld [vmem:[#allocation6 + $0x178] sm:$0xff]  ;;  %v5871_v3 = vld [vmem:[#allocation6 + $0x3a8] sm:$0xff] }
 0x1f7   :  { %8896 = vst [vmem:[#allocation53_spill] sm:$0xff] %v5848_v55  ;;  %1472 = vmatpush.msra.mxu2 %v5860_v33 }
 0x1f8   :  { %8897 = vst [vmem:[#allocation57_spill] sm:$0xff] %v5851_v10  ;;  %1369 = vmatpush.msrb.mxu1 %v5377_v29  ;;  %1409 = vmatpush.msrb.mxu3 %v5864_v0  ;;  %v5867_v10 = vld [vmem:[#allocation6 + $0x158] sm:$0xff]  ;;  %v5878_v29 = vld [vmem:[#allocation6 + $0x388] sm:$0xff] }
 0x1f9   :  { %8898 = vst [vmem:[#allocation23_spill] sm:$0xff] %v5857_v60  ;;  %1473 = vmatpush.msra.mxu2 %v5867_v10 }
 0x1fa   :  { %8899 = vst [vmem:[#allocation61_spill] sm:$0xff] %v5860_v33  ;;  %1370 = vmatpush.msrb.mxu1 %v5383_v20  ;;  %1410 = vmatpush.msrb.mxu3 %v5871_v3  ;;  %v5885_v20 = vld [vmem:[#allocation6 + $0x368] sm:$0xff] }
 0x1fb   :  { %8900 = vst [vmem:[#allocation24_spill] sm:$0xff] %v5864_v0  ;;  %1474 = vmatpush.msra.mxu2 %v5874_v19  ;;  %v5881_v0 = vld [vmem:[#allocation6 + $0x118] sm:$0xff] }
 0x1fc   :  { %8901 = vst [vmem:[#allocation65_spill] sm:$0xff] %v5867_v10  ;;  %1371 = vmatpush.msrb.mxu1 %v5389_v28  ;;  %1411 = vmatpush.msrb.mxu3 %v5878_v29  ;;  %v5892_v28 = vld [vmem:[#allocation6 + $0x348] sm:$0xff] }
 0x1fd   :  { %8902 = vst [vmem:[#allocation25_spill] sm:$0xff] %v5871_v3  ;;  %1475 = vmatpush.msra.mxu2 %v5881_v0  ;;  %v5888_v3 = vld [vmem:[#allocation6 + $0xf8] sm:$0xff] }
 0x1fe   :  { %8903 = vst [vmem:[#allocation69_spill] sm:$0xff] %v5874_v19  ;;  %1372 = vmatpush.msrb.mxu1 %v5395_v54  ;;  %1412 = vmatpush.msrb.mxu3 %v5885_v20  ;;  %v5901_v54 = vld [vmem:[#allocation6 + $0x328] sm:$0xff] }
 0x1ff   :  { %8904 = vst [vmem:[#allocation26_spill] sm:$0xff] %v5878_v29  ;;  %1476 = vmatpush.msra.mxu2 %v5888_v3  ;;  %v5895_v29 = vld [vmem:[#allocation6 + $0xd8] sm:$0xff] }
 0x200   :  { %8905 = vst [vmem:[#allocation73_spill] sm:$0xff] %v5881_v0  ;;  %1373 = vmatpush.msrb.mxu1 %v5401_v11  ;;  %1413 = vmatpush.msrb.mxu3 %v5892_v28  ;;  %v5898_v0 = vld [vmem:[#allocation6 + $0x320] sm:$0xff]  ;;  %v5908_v11 = vld [vmem:[#allocation6 + $0x308] sm:$0xff] }
 0x201   :  { %8906 = vst [vmem:[#allocation27_spill] sm:$0xff] %v5885_v20  ;;  %1477 = vmatpush.msra.mxu2 %v5895_v29  ;;  %v5904_v20 = vld [vmem:[#allocation6 + $0xb8] sm:$0xff] }
 0x202   :  { %8907 = vst [vmem:[#allocation76_spill] sm:$0xff] %v5888_v3  ;;  %1374 = vmatpush.msrb.mxu1 %v5898_v0  ;;  %1414 = vmatpush.msrb.mxu3 %v5901_v54 }
 0x203   :  { %8908 = vst [vmem:[#allocation29_spill] sm:$0xff] %v5892_v28  ;;  %1478 = vmatpush.msra.mxu2 %v5904_v20  ;;  %v5911_v28 = vld [vmem:[#allocation6 + $0x98] sm:$0xff] }
 0x204   :  { %8909 = vst [vmem:[#allocation79_spill] sm:$0xff] %v5895_v29  ;;  %1375 = vmatpush.msrb.mxu1 %v5411_v5  ;;  %1415 = vmatpush.msrb.mxu3 %v5908_v11  ;;  %v5922_v5 = vld [vmem:[#allocation6 + $0x2c8] sm:$0xff] }
 0x205   :  { %8910 = vst [vmem:[#allocation31_spill] sm:$0xff] %v5898_v0  ;;  %1479 = vmatpush.msra.mxu2 %v5911_v28  ;;  %v5915_v0 = vld [vmem:[#allocation6 + $0x2e8] sm:$0xff] }
 0x206   :  { %8911 = vst [vmem:[#allocation82_spill] sm:$0xff] %v5901_v54  ;;  %1376 = vmatpush.msrb.mxu1 %v5417_v16  ;;  %1416 = vmatpush.msrb.mxu3 %v5915_v0  ;;  %v5918_v54 = vld [vmem:[#allocation6 + $0x78] sm:$0xff]  ;;  %v5929_v16 = vld [vmem:[#allocation6 + $0x2a8] sm:$0xff] }
 0x207   :  { %8912 = vst [vmem:[#allocation33_spill] sm:$0xff] %v5904_v20  ;;  %1480 = vmatpush.msra.mxu2 %v5918_v54 }
 0x208   :  { %8913 = vst [vmem:[#allocation85_spill] sm:$0xff] %v5908_v11  ;;  %1377 = vmatpush.msrb.mxu1 %v5423_v4  ;;  %1417 = vmatpush.msrb.mxu3 %v5922_v5  ;;  %v5925_v11 = vld [vmem:[#allocation6 + $0x58] sm:$0xff]  ;;  %v5936_v4 = vld [vmem:[#allocation6 + $0x288] sm:$0xff] }
 0x209   :  { %8914 = vst [vmem:[#allocation35_spill] sm:$0xff] %v5911_v28  ;;  %1481 = vmatpush.msra.mxu2 %v5925_v11  ;;  %v8919_v28 = vld [vmem:[#allocation44_spill] sm:$0xff] }
 0x20a   :  { %8915 = vst [vmem:[#allocation88_spill] sm:$0xff] %v5915_v0  ;;  %1378 = vmatpush.msrb.mxu1 %v8919_v28  ;;  %1418 = vmatpush.msrb.mxu3 %v5929_v16  ;;  %v5932_v0 = vld [vmem:[#allocation6 + $0x38] sm:$0xff]  ;;  %v5945_v28 = vld [vmem:[#allocation6 + $0x268] sm:$0xff] }
 0x20b   :  { %8916 = vst [vmem:[#allocation37_spill] sm:$0xff] %v5918_v54  ;;  %1482 = vmatpush.msra.mxu2 %v5932_v0  ;;  %v8922_v54 = vld [vmem:[#allocation48_spill] sm:$0xff] }
 0x20c   :  { %8917 = vst [vmem:[#allocation91_spill] sm:$0xff] %v5922_v5  ;;  %1379 = vmatpush.msrb.mxu1 %v8922_v54  ;;  %1419 = vmatpush.msrb.mxu3 %v5936_v4  ;;  %v5939_v5 = vld [vmem:[#allocation6 + $0x18] sm:$0xff]  ;;  %v5951_v54 = vld [vmem:[#allocation6 + $0x248] sm:$0xff] }
 0x20d   :  { %8918 = vst [vmem:[#allocation39_spill] sm:$0xff] %v5925_v11  ;;  %1483 = vmatpush.msra.mxu2 %v5939_v5  ;;  %v5942_v11 = vld [vmem:[#allocation6 + $0x260] sm:$0xff] }
 0x20e   :  { %8920 = vst [vmem:[#allocation94_spill] sm:$0xff] %v5929_v16  ;;  %1380 = vmatpush.msrb.mxu1 %v5942_v11  ;;  %1420 = vmatpush.msrb.mxu3 %v5945_v28  ;;  %v5948_v16 = vld [vmem:[#allocation6 + $0x240] sm:$0xff] }
 0x20f   :  { %8921 = vst [vmem:[#allocation41_spill] sm:$0xff] %v5932_v0  ;;  %v8965_v0 = vld [vmem:[#allocation47_spill] sm:$0xff] }
 0x210   :  { %8923 = vst [vmem:[#allocation97_spill] sm:$0xff] %v5936_v4  ;;  %1381 = vmatpush.msrb.mxu1 %v5948_v16  ;;  %1421 = vmatpush.msrb.mxu3 %v5951_v54  ;;  %v5954_v4 = vld [vmem:[#allocation6 + $0x220] sm:$0xff] }
 0x211   :  { %8924 = vst [vmem:[#allocation43_spill] sm:$0xff] %v5939_v5  ;;  %v5957_v5 = vld [vmem:[#allocation6 + $0x228] sm:$0xff] }
 0x212   :  { %8925 = vst [vmem:[#allocation101_spill] sm:$0xff] %v5942_v11  ;;  %1382 = vmatpush.msrb.mxu1 %v5954_v4  ;;  %1422 = vmatpush.msrb.mxu3 %v5957_v5  ;;  %v5960_v11 = vld [vmem:[#allocation6 + $0x200] sm:$0xff] }
 0x213   :  { %8926 = vst [vmem:[#allocation46_spill] sm:$0xff] %v5945_v28  ;;  %v5963_v28 = vld [vmem:[#allocation6 + $0x208] sm:$0xff] }
 0x214   :  { %8927 = vst [vmem:[#allocation102_spill] sm:$0xff] %v5948_v16  ;;  %1383 = vmatpush.msrb.mxu1 %v5960_v11  ;;  %1423 = vmatpush.msrb.mxu3 %v5963_v28  ;;  %v5966_v16 = vld [vmem:[#allocation6 + $0x3f0] sm:$0xff] }
 0x215   :  { %8928 = vst [vmem:[#allocation50_spill] sm:$0xff] %v5951_v54  ;;  %v5969_v54 = vld [vmem:[#allocation6 + $0x3f8] sm:$0xff] }
 0x216   :  { %8929 = vst [vmem:[#allocation54_spill] sm:$0xff] %v5954_v4  ;;  %1448 = vmatpush.msra.mxu1 %v5966_v16  ;;  %1488 = vmatpush.msra.mxu3 %v5969_v54  ;;  %v5972_v4 = vld [vmem:[#allocation6 + $0x3d0] sm:$0xff] }
 0x217   :  { %8930 = vst [vmem:[#allocation58_spill] sm:$0xff] %v5957_v5  ;;  %v5975_v5 = vld [vmem:[#allocation6 + $0x3d8] sm:$0xff] }
 0x218   :  { %8931 = vst [vmem:[#allocation62_spill] sm:$0xff] %v5960_v11  ;;  %1449 = vmatpush.msra.mxu1 %v5972_v4  ;;  %1489 = vmatpush.msra.mxu3 %v5975_v5  ;;  %v5978_v11 = vld [vmem:[#allocation6 + $0x3b0] sm:$0xff] }
 0x219   :  { %8932 = vst [vmem:[#allocation66_spill] sm:$0xff] %v5963_v28  ;;  %v5981_v28 = vld [vmem:[#allocation6 + $0x3b8] sm:$0xff] }
 0x21a   :  { %8933 = vst [vmem:[#allocation70_spill] sm:$0xff] %v5966_v16  ;;  %1450 = vmatpush.msra.mxu1 %v5978_v11  ;;  %1490 = vmatpush.msra.mxu3 %v5981_v28  ;;  %v5984_v16 = vld [vmem:[#allocation6 + $0x390] sm:$0xff] }
 0x21b   :  { %8934 = vst [vmem:[#allocation98_spill] sm:$0xff] %v5969_v54  ;;  %v5987_v54 = vld [vmem:[#allocation6 + $0x398] sm:$0xff] }
 0x21c   :  { %8935 = vst [vmem:[#allocation44_spill] sm:$0xff] %v5972_v4  ;;  %1451 = vmatpush.msra.mxu1 %v5984_v16  ;;  %1491 = vmatpush.msra.mxu3 %v5987_v54  ;;  %v5990_v4 = vld [vmem:[#allocation6 + $0x370] sm:$0xff] }
 0x21d   :  { %8936 = vst [vmem:[#allocation48_spill] sm:$0xff] %v5975_v5  ;;  %v5993_v5 = vld [vmem:[#allocation6 + $0x378] sm:$0xff] }
 0x21e   :  { %8937 = vst [vmem:[#allocation104_spill] sm:$0xff] %v5978_v11  ;;  %1452 = vmatpush.msra.mxu1 %v5990_v4  ;;  %1492 = vmatpush.msra.mxu3 %v5993_v5  ;;  %v5996_v11 = vld [vmem:[#allocation6 + $0x350] sm:$0xff] }
 0x21f   :  { %8938 = vst [vmem:[#allocation105_spill] sm:$0xff] %v5981_v28  ;;  %v5999_v28 = vld [vmem:[#allocation6 + $0x358] sm:$0xff] }
 0x220   :  { %8939 = vst [vmem:[#allocation106_spill] sm:$0xff] %v5984_v16  ;;  %1453 = vmatpush.msra.mxu1 %v5996_v11  ;;  %1493 = vmatpush.msra.mxu3 %v5999_v28  ;;  %v6002_v16 = vld [vmem:[#allocation6 + $0x330] sm:$0xff] }
 0x221   :  { %8940 = vst [vmem:[#allocation107_spill] sm:$0xff] %v5987_v54  ;;  %v6005_v54 = vld [vmem:[#allocation6 + $0x338] sm:$0xff] }
 0x222   :  { %8941 = vst [vmem:[#allocation108_spill] sm:$0xff] %v5990_v4  ;;  %1454 = vmatpush.msra.mxu1 %v6002_v16  ;;  %1494 = vmatpush.msra.mxu3 %v6005_v54  ;;  %v6008_v4 = vld [vmem:[#allocation6 + $0x310] sm:$0xff] }
 0x223   :  { %8942 = vst [vmem:[#allocation109_spill] sm:$0xff] %v5993_v5  ;;  %v6011_v5 = vld [vmem:[#allocation6 + $0x318] sm:$0xff] }
 0x224   :  { %8943 = vst [vmem:[#allocation110_spill] sm:$0xff] %v5996_v11  ;;  %1455 = vmatpush.msra.mxu1 %v6008_v4  ;;  %1495 = vmatpush.msra.mxu3 %v6011_v5  ;;  %v6014_v11 = vld [vmem:[#allocation6 + $0x2f0] sm:$0xff] }
 0x225   :  { %8944 = vst [vmem:[#allocation111_spill] sm:$0xff] %v5999_v28  ;;  %v6017_v28 = vld [vmem:[#allocation6 + $0x2f8] sm:$0xff] }
 0x226   :  { %8945 = vst [vmem:[#allocation112_spill] sm:$0xff] %v6002_v16  ;;  %1456 = vmatpush.msra.mxu1 %v6014_v11  ;;  %1496 = vmatpush.msra.mxu3 %v6017_v28  ;;  %v6020_v16 = vld [vmem:[#allocation6 + $0x2d0] sm:$0xff] }
 0x227   :  { %8946 = vst [vmem:[#allocation113_spill] sm:$0xff] %v6005_v54  ;;  %v6023_v54 = vld [vmem:[#allocation6 + $0x2d8] sm:$0xff]  ;;  %v1033_v33 = vpop.f32.mrf.mxu0 }
 0x228   :  { %8947 = vst [vmem:[#allocation114_spill] sm:$0xff] %v6008_v4  ;;  %1457 = vmatpush.msra.mxu1 %v6020_v16  ;;  %1497 = vmatpush.msra.mxu3 %v6023_v54  ;;  %v6026_v4 = vld [vmem:[#allocation6 + $0x2b0] sm:$0xff] }
 0x229   :  { %8948 = vst [vmem:[#allocation115_spill] sm:$0xff] %v6011_v5  ;;  %v6029_v5 = vld [vmem:[#allocation6 + $0x2b8] sm:$0xff] }
 0x22a   :  { %8949 = vst [vmem:[#allocation116_spill] sm:$0xff] %v6014_v11  ;;  %1458 = vmatpush.msra.mxu1 %v6026_v4  ;;  %1498 = vmatpush.msra.mxu3 %v6029_v5  ;;  %v6032_v11 = vld [vmem:[#allocation6 + $0x290] sm:$0xff] }
 0x22b   :  { %8950 = vst [vmem:[#allocation117_spill] sm:$0xff] %v6017_v28  ;;  %v6035_v28 = vld [vmem:[#allocation6 + $0x298] sm:$0xff] }
 0x22c   :  { %8951 = vst [vmem:[#allocation118_spill] sm:$0xff] %v6020_v16  ;;  %1459 = vmatpush.msra.mxu1 %v6032_v11  ;;  %1499 = vmatpush.msra.mxu3 %v6035_v28  ;;  %v6038_v16 = vld [vmem:[#allocation6 + $0x270] sm:$0xff] }
 0x22d   :  { %8952 = vst [vmem:[#allocation119_spill] sm:$0xff] %v6023_v54  ;;  %v6041_v54 = vld [vmem:[#allocation6 + $0x278] sm:$0xff] }
 0x22e   :  { %8953 = vst [vmem:[#allocation120_spill] sm:$0xff] %v6026_v4  ;;  %1460 = vmatpush.msra.mxu1 %v6038_v16  ;;  %1500 = vmatpush.msra.mxu3 %v6041_v54  ;;  %v6044_v4 = vld [vmem:[#allocation6 + $0x250] sm:$0xff] }
 0x22f   :  { %8954 = vst [vmem:[#allocation121_spill] sm:$0xff] %v6029_v5  ;;  %v6047_v5 = vld [vmem:[#allocation6 + $0x258] sm:$0xff]  ;;  %v1113_v36 = vpop.f32.mrf.mxu0 }
 0x230   :  { %8955 = vst [vmem:[#allocation122_spill] sm:$0xff] %v6032_v11  ;;  %1461 = vmatpush.msra.mxu1 %v6044_v4  ;;  %1501 = vmatpush.msra.mxu3 %v6047_v5  ;;  %v6050_v11 = vld [vmem:[#allocation6 + $0x230] sm:$0xff] }
 0x231   :  { %8956 = vst [vmem:[#allocation123_spill] sm:$0xff] %v6035_v28  ;;  %v6053_v28 = vld [vmem:[#allocation6 + $0x238] sm:$0xff] }
 0x232   :  { %8957 = vst [vmem:[#allocation124_spill] sm:$0xff] %v6038_v16  ;;  %1462 = vmatpush.msra.mxu1 %v6050_v11  ;;  %1502 = vmatpush.msra.mxu3 %v6053_v28  ;;  %v6056_v16 = vld [vmem:[#allocation6 + $0x210] sm:$0xff] }
 0x233   :  { %8958 = vst [vmem:[#allocation125_spill] sm:$0xff] %v6041_v54  ;;  %v6059_v54 = vld [vmem:[#allocation6 + $0x218] sm:$0xff] }
 0x234   :  { %8959 = vst [vmem:[#allocation126_spill] sm:$0xff] %v6044_v4  ;;  %1463 = vmatpush.msra.mxu1 %v6056_v16  ;;  %1503 = vmatpush.msra.mxu3 %v6059_v54 }
 0x235   :  { %8960 = vst [vmem:[#allocation127_spill] sm:$0xff] %v6047_v5  ;;  %v993_v5 = vpop.f32.mrf.mxu2 }
 0x236   :  { %8961 = vst [vmem:[#allocation128_spill] sm:$0xff] %v6050_v11  ;;  %v8966_v11 = vld [vmem:[#allocation12_spill] sm:$0xff] }
 0x237   :  { %8962 = vst [vmem:[#allocation129_spill] sm:$0xff] %v6053_v28 }
 0x238   :  { %8963 = vst [vmem:[#allocation130_spill] sm:$0xff] %v6056_v16 }
 0x239   :  { %8964 = vst [vmem:[#allocation131_spill] sm:$0xff] %v6059_v54 }
 0x23d   :  { %v1073_v57 = vpop.f32.mrf.mxu2 }
 0x251   :  { %v973_v4 = vpop.f32.mrf.mxu1 }
 0x252   :  { %v974_v20 = vadd.f32 %v973_v4, %v8965_v0 }
 0x254   :  { %v994_v29 = vadd.f32 %v993_v5, %v974_v20 }
 0x256   :  { %v3653_v3 = vmul.f32 -1.442695, %v994_v29  ;;  %v6067_v29 = vld [vmem:[#allocation2 + $0x2] ss:$8 sm:$0x7] }
 0x257   :  { %v1013_v19 = vpop.f32.mrf.mxu3 }
 0x258   :  { %3757 = vpow2.f32 %v3653_v3  ;;  %v1014_v10 = vadd.f32 %v1013_v19, %v8966_v11  ;;  %v6069_v19 = vld [vmem:[#allocation2 + $0x1a] ss:$8 sm:$0x7] }
 0x25a   :  { %v1034_v28 = vadd.f32 %v1033_v33, %v1014_v10  ;;  %v1053_v10 = vpop.f32.mrf.mxu1 }
 0x25b   :  { %v1054_v56 = vadd.f32 %v1053_v10, %v5495_v58 }
 0x25c   :  { %v3654_v60 = vmul.f32 -1.442695, %v1034_v28 }
 0x25e   :  { %v3758_v55 = vpop.eup %3757  ;;  %3759 = vpow2.f32 %v3654_v60  ;;  %v1274_v60 = vrot.slane %v6067_v29, 1 }
 0x25f   :  { %v1119_v16 = vadd.f32 1.0, %v3758_v55  ;;  %v1093_v3 = vpop.f32.mrf.mxu3  ;;  %v8967_v55 = vld [vmem:[#allocation52_spill] sm:$0xff] }
 0x260   :  { %v1206_v46 = vpop.f32.mrf.mxu2  ;;  %v1094_v28 = vadd.f32 %v1093_v3, %v8967_v55 }
 0x261   :  { %3761 = vrcp.f32 %v1119_v16  ;;  %v1279_v33 = vrot.slane %v1206_v46, 1  ;;  %v1131_v11 = vand.u32 2147483648, %v1119_v16  ;;  %v1129_v31 = vand.u32 2147483647, %v1119_v16 }
 0x262   :  { %v1281_v2 = vadd.f32 %v1274_v60, %v1206_v46  ;;  %vm1125_vm11 = vweird.f32 %v1119_v16  ;;  %v1074_v46 = vadd.f32 %v1073_v57, %v1054_v56 }
 0x263   :  { %v1132_v25 = vor.u32 1.1754944e-38, %v1131_v11  ;;  %vm1130_vm13 = vcmp.eq.f32.partialorder %v1129_v31, 8.507059e+37 }
 0x264   :  { %v3760_v15 = vpop.eup %3759  ;;  %v3657_v22 = vmul.f32 -1.442695, %v1281_v2 }
 0x265   :  { %v6064_v54 = vadd.f32 1.0, %v3760_v15  ;;  %v1275_v15 = vrot.slane %v6069_v19, 1 }
 0x267   :  { %v3762_v4 = vpop.eup %3761  ;;  %3763 = vrcp.f32 %v6064_v54  ;;  %v1282_v37 = vadd.f32 %v1279_v33, %v1275_v15  ;;  %vm1144_vm15 = vweird.f32 %v6064_v54 }
 0x268   :  { %v1121_v20 = vmul.f32 %v3762_v4, %v1119_v16  ;;  %vm1126_vm10 = vweird.f32 %v3762_v4  ;;  %3765 = vpow2.f32 %v3657_v22 }
 0x269   :  { %vm1127_vm12 = vmor %vm1125_vm11, %vm1126_vm10  ;;  %v3658_v17 = vmul.f32 -1.442695, %v1282_v37  ;;  %v1148_v37 = vand.u32 2147483647, %v6064_v54 }
 0x26a   :  { %v1122_v5 = vsub.f32 1.0, %v1121_v20  ;;  %v1114_v20 = vadd.f32 %v1113_v36, %v1094_v28 }
 0x26b   :  { %3767 = vpow2.f32 %v3658_v17  ;;  %vm1149_vm1 = vcmp.eq.f32.partialorder %v1148_v37, 8.507059e+37  ;;  %v6113_v37 = vld [vmem:[%s8184_s4] ss:$0 sm:$0xff] }
 0x26c   :  { %v1123_v0 = vmul.f32 %v3762_v4, %v1122_v5 }
 0x26d   :  { %v3764_v8 = vpop.eup %3763 }
 0x26e   :  { %v1140_v34 = vmul.f32 %v3764_v8, %v6064_v54  ;;  %v1124_v27 = vadd.f32 %v3762_v4, %v1123_v0  ;;  %vm1145_vm14 = vweird.f32 %v3764_v8  ;;  %v3766_v56 = vpop.eup %3765 }
 0x26f   :  { %vm1146_vm0 = vmor %vm1144_vm15, %vm1145_vm14 }
 0x270   :  { %v1141_v3 = vsub.f32 1.0, %v1140_v34  ;;  %v1128_v55 = vsel %vm1127_vm12, %v3762_v4, %v1124_v27 }
 0x271   :  { %v1133_v5 = vsel %vm1130_vm13, %v1132_v25, %v1128_v55  ;;  %v1150_v25 = vand.u32 2147483648, %v6064_v54 }
 0x272   :  { %v1186_v14 = vpop.f32.mrf.mxu1  ;;  %v1154_v60 = vmul.f32 %v1133_v5, %v1114_v20  ;;  %v1142_v33 = vmul.f32 %v3764_v8, %v1141_v3  ;;  %v8968_v3 = vld [vmem:[#allocation13_spill] sm:$0xff]  ;;  %v8969_v5 = vld [vmem:[#allocation51_spill] sm:$0xff] }
 0x273   :  { %v1230_v15 = vrot.slane %v1186_v14, 1  ;;  %v1232_v63 = vadd.f32 %v1186_v14, %v6067_v29  ;;  %v3768_v14 = vpop.eup %3767  ;;  %v1151_v2 = vor.u32 1.1754944e-38, %v1150_v25 }
 0x274   :  { %v1155_v44 = vadd.f32 %v1154_v60, %v1074_v46  ;;  %v1143_v34 = vadd.f32 %v3764_v8, %v1142_v33  ;;  %v6084_v4 = vadd.f32 1.0, %v3768_v14  ;;  %v8972_v14 = vld [vmem:[#allocation56_spill] sm:$0xff] }
 0x275   :  { %v1233_v36 = vadd.f32 %v1230_v15, %v6069_v19  ;;  %v3655_v0 = vmul.f32 -1.442695, %v1232_v63 }
 0x276   :  { %3769 = vtanh.f32 %v1155_v44  ;;  %v1147_v22 = vsel %vm1146_vm0, %v3764_v8, %v1143_v34  ;;  %v6082_v44 = vadd.f32 1.0, %v3766_v56  ;;  %vm1311_vm14 = vweird.f32 %v6084_v4 }
 0x277   :  { %3771 = vpow2.f32 %v3655_v0  ;;  %v3656_v27 = vmul.f32 -1.442695, %v1233_v36  ;;  %v1152_v11 = vsel %vm1149_vm1, %v1151_v2, %v1147_v22  ;;  %v8973_v22 = vld [vmem:[#allocation59_spill] sm:$0xff] }
 0x278   :  { %v1226_v60 = vpop.f32.mrf.mxu3  ;;  %vm1296_vm11 = vweird.f32 %v6082_v44 }
 0x279   :  { %3773 = vpow2.f32 %v3656_v27  ;;  %v1321_v56 = vadd.f32 %v6113_v37, %v1226_v60  ;;  %v1327_v60 = vrot.slane %v6067_v29, 2 }
 0x27c   :  { %v3770_v17 = vpop.eup %3769 }
 0x27d   :  { %v3772_v31 = vpop.eup %3771  ;;  %v1157_v63 = vsub.f32 %v5522_v32, %v3770_v17 }
 0x27e   :  { %v1240_v57 = vadd.f32 1.0, %v3772_v31 }
 0x27f   :  { %v3774_v16 = vpop.eup %3773  ;;  %v1158_v10 = vmul.f32 %v1157_v63, %v1152_v11  ;;  %v8974_v11 = vld [vmem:[#allocation15_spill] sm:$0xff] }
 0x280   :  { %v1241_v55 = vadd.f32 1.0, %v3774_v16  ;;  %3775 = vrcp.f32 %v1240_v57  ;;  %v1253_v15 = vand.u32 2147483648, %v1240_v57  ;;  %v1251_v0 = vand.u32 2147483647, %v1240_v57 }
 0x281   :  { %3777 = vrcp.f32 %v6082_v44  ;;  %v6087_v54 = vadd.f32 %v3770_v17, %v1158_v10  ;;  %vm1247_vm3 = vweird.f32 %v1240_v57 }
 0x282   :  { %3779 = vrcp.f32 %v1241_v55  ;;  %v1268_v25 = vand.u32 2147483648, %v1241_v55  ;;  %v1266_v31 = vand.u32 2147483647, %v1241_v55  ;;  %vm1252_vm6 = vcmp.eq.f32.partialorder %v1251_v0, 8.507059e+37  ;;  %v8980_v0 = vld [vmem:[#allocation64_spill] sm:$0xff] }
 0x283   :  { %3781 = vrcp.f32 %v6084_v4  ;;  %1384 = vmatmul.f32.vlgmr.msrb.gmra.mxu1 %v6087_v54  ;;  %1424 = vmatmul.f32.vlgmr.msrb.gmra.mxu3 %v6087_v54  ;;  %vm1262_vm7 = vweird.f32 %v1241_v55 }
 0x284   :  { %1581 = vmatpush.msrb.mxu1 %v5528_v47  ;;  %1740 = vmatpush.msrb.mxu3 %v5531_v59  ;;  %vm1267_vm9 = vcmp.eq.f32.partialorder %v1266_v31, 8.507059e+37 }
 0x286   :  { %v3776_v32 = vpop.eup %3775  ;;  %1582 = vmatpush.msrb.mxu1 %v5534_v61  ;;  %1741 = vmatpush.msrb.mxu3 %v5537_v50  ;;  %v8970_v61 = vld [vmem:[#allocation55_spill] sm:$0xff]  ;;  %v8971_v50 = vld [vmem:[#allocation14_spill] sm:$0xff] }
 0x287   :  { %v6096_v8 = vpop.eup %3777  ;;  %v1243_v28 = vmul.f32 %v3776_v32, %v1240_v57  ;;  %vm1248_vm2 = vweird.f32 %v3776_v32  ;;  %v1254_v57 = vor.u32 1.1754944e-38, %v1253_v15 }
 0x288   :  { %v3780_v20 = vpop.eup %3779  ;;  %1583 = vmatpush.msrb.mxu1 %v8968_v3  ;;  %1742 = vmatpush.msrb.mxu3 %v8969_v5  ;;  %v1292_v59 = vmul.f32 %v6096_v8, %v6082_v44  ;;  %vm1249_vm5 = vmor %vm1247_vm3, %vm1248_vm2  ;;  %v1269_v5 = vor.u32 1.1754944e-38, %v1268_v25  ;;  %vm1297_vm10 = vweird.f32 %v6096_v8 }
 0x289   :  { %v6100_v46 = vpop.eup %3781  ;;  %v1244_v33 = vsub.f32 1.0, %v1243_v28  ;;  %v1258_v47 = vmul.f32 %v3780_v20, %v1241_v55  ;;  %vm1263_vm4 = vweird.f32 %v3780_v20  ;;  %vm6142_vm13 = vmor %vm1296_vm11, %vm1297_vm10 }
 0x28a   :  { %1584 = vmatpush.msrb.mxu1 %v8970_v61  ;;  %1743 = vmatpush.msrb.mxu3 %v8971_v50  ;;  %v1307_v34 = vmul.f32 %v6100_v46, %v6084_v4  ;;  %v1293_v63 = vsub.f32 1.0, %v1292_v59  ;;  %vm1264_vm8 = vmor %vm1262_vm7, %vm1263_vm4  ;;  %v1323_v59 = vrot.slane %v1321_v56, 1  ;;  %v1328_v61 = vrot.slane %v6069_v19, 2  ;;  %v6248_v19 = vld [vmem:[#allocation3 + $0x78] sm:$0xff] }
 0x28b   :  { %v1245_v36 = vmul.f32 %v3776_v32, %v1244_v33  ;;  %v1259_v27 = vsub.f32 1.0, %v1258_v47  ;;  %1464 = vmatmul.f32.vlgmr.msra.gmra.mxu1 %v6087_v54  ;;  %1504 = vmatmul.f32.vlgmr.msra.gmra.mxu3 %v6087_v54  ;;  %v8975_v33 = vld [vmem:[#allocation60_spill] sm:$0xff]  ;;  %vm1312_vm12 = vweird.f32 %v6100_v46 }
 0x28c   :  { %1585 = vmatpush.msrb.mxu1 %v8972_v14  ;;  %1744 = vmatpush.msrb.mxu3 %v8973_v22  ;;  %v1308_v28 = vsub.f32 1.0, %v1307_v34  ;;  %vm1313_vm15 = vmor %vm1311_vm14, %vm1312_vm12 }
 0x28d   :  { %v1246_v17 = vadd.f32 %v3776_v32, %v1245_v36  ;;  %v1260_v2 = vmul.f32 %v3780_v20, %v1259_v27  ;;  %v8979_v36 = vld [vmem:[#allocation16_spill] sm:$0xff] }
 0x28e   :  { %1586 = vmatpush.msrb.mxu1 %v8974_v11  ;;  %1745 = vmatpush.msrb.mxu3 %v5580_v7  ;;  %v1294_v7 = vmul.f32 %v6096_v8, %v1293_v63  ;;  %v1309_v29 = vmul.f32 %v6100_v46, %v1308_v28  ;;  %v6210_v63 = vld [vmem:[#allocation3 + $0x130] sm:$0xff]  ;;  %v6213_v11 = vld [vmem:[#allocation3 + $0x108] sm:$0xff] }
 0x28f   :  { %v1250_v16 = vsel %vm1249_vm5, %v3776_v32, %v1246_v17  ;;  %v1261_v10 = vadd.f32 %v3780_v20, %v1260_v2  ;;  %v6218_v28 = vld [vmem:[#allocation3 + $0xf0] sm:$0xff] }
 0x290   :  { %v1255_v3 = vsel %vm1252_vm6, %v1254_v57, %v1250_v16  ;;  %1587 = vmatpush.msrb.mxu1 %v5586_v30  ;;  %1746 = vmatpush.msrb.mxu3 %v8975_v33  ;;  %v8990_v16 = vld [vmem:[#allocation77_spill] sm:$0xff]  ;;  %v6224_v33 = vld [vmem:[#allocation3 + $0xd8] sm:$0xff] }
 0x291   :  { %v1265_v47 = vsel %vm1264_vm8, %v3780_v20, %v1261_v10  ;;  %v1325_v15 = vmul.f32 %v1321_v56, %v1255_v3  ;;  %v1295_v20 = vadd.f32 %v6096_v8, %v1294_v7  ;;  %v8981_v56 = vld [vmem:[#allocation67_spill] sm:$0xff]  ;;  %v8991_v10 = vld [vmem:[#allocation20_spill] sm:$0xff]  ;;  %v8992_v3 = vld [vmem:[#allocation78_spill] sm:$0xff] }
 0x292   :  { %v1270_v32 = vsel %vm1267_vm9, %v1269_v5, %v1265_v47  ;;  %1588 = vmatpush.msrb.mxu1 %v5593_v12  ;;  %1747 = vmatpush.msrb.mxu3 %v5596_v48  ;;  %v1302_v12 = vand.u32 2147483648, %v6082_v44  ;;  %v1300_v48 = vand.u32 2147483647, %v6082_v44  ;;  %v8993_v5 = vld [vmem:[#allocation80_spill] sm:$0xff] }
 0x293   :  { %v1326_v55 = vmul.f32 %v1323_v59, %v1270_v32  ;;  %v1331_v50 = vadd.f32 %v1327_v60, %v1325_v15  ;;  %v1299_v44 = vsel %vm6142_vm13, %v6096_v8, %v1295_v20  ;;  %v8994_v60 = vld [vmem:[#allocation21_spill] sm:$0xff]  ;;  %v8995_v47 = vld [vmem:[#allocation28_spill] sm:$0xff]  ;;  %v8997_v15 = vld [vmem:[#allocation83_spill] sm:$0xff] }
 0x294   :  { %1589 = vmatpush.msrb.mxu1 %v5601_v23  ;;  %1748 = vmatpush.msrb.mxu3 %v5604_v35  ;;  %v1310_v23 = vadd.f32 %v6100_v46, %v1309_v29  ;;  %v8976_v35 = vld [vmem:[#allocation63_spill] sm:$0xff]  ;;  %v1303_v27 = vor.u32 1.1754944e-38, %v1302_v12  ;;  %vm1301_vm0 = vcmp.eq.f32.partialorder %v1300_v48, 8.507059e+37  ;;  %v8996_v59 = vld [vmem:[#allocation81_spill] sm:$0xff]  ;;  %v8998_v32 = vld [vmem:[#allocation30_spill] sm:$0xff] }
 0x295   :  { %v1332_v30 = vadd.f32 %v1328_v61, %v1326_v55  ;;  %3783 = vtanh.f32 %v1331_v50  ;;  %v6230_v7 = vld [vmem:[#allocation3 + $0xc0] sm:$0xff]  ;;  %v9000_v61 = vld [vmem:[#allocation86_spill] sm:$0xff]  ;;  %v6236_v50 = vld [vmem:[#allocation3 + $0xa8] sm:$0xff] }
 0x296   :  { %1590 = vmatpush.msrb.mxu1 %v5609_v43  ;;  %1749 = vmatpush.msrb.mxu3 %v5612_v53  ;;  %v1317_v43 = vand.u32 2147483648, %v6084_v4  ;;  %v1315_v53 = vand.u32 2147483647, %v6084_v4  ;;  %v1314_v34 = vsel %vm1313_vm15, %v6100_v46, %v1310_v23  ;;  %v1304_v22 = vsel %vm1301_vm0, %v1303_v27, %v1299_v44  ;;  %v8999_v55 = vld [vmem:[#allocation84_spill] sm:$0xff]  ;;  %v9003_v20 = vld [vmem:[#allocation89_spill] sm:$0xff]  ;;  %v9004_v48 = vld [vmem:[#allocation34_spill] sm:$0xff] }
 0x297   :  { %3785 = vtanh.f32 %v1332_v30  ;;  %v9001_v29 = vld [vmem:[#allocation32_spill] sm:$0xff]  ;;  %v9002_v30 = vld [vmem:[#allocation87_spill] sm:$0xff]  ;;  %v6242_v12 = vld [vmem:[#allocation3 + $0x90] sm:$0xff] }
 0x298   :  { %1591 = vmatpush.msrb.mxu1 %v5620_v18  ;;  %1750 = vmatpush.msrb.mxu3 %v8976_v35  ;;  %v1318_v14 = vor.u32 1.1754944e-38, %v1317_v43  ;;  %vm1316_vm1 = vcmp.eq.f32.partialorder %v1315_v53, 8.507059e+37  ;;  %v9005_v23 = vld [vmem:[#allocation90_spill] sm:$0xff]  ;;  %v9006_v35 = vld [vmem:[#allocation92_spill] sm:$0xff]  ;;  %v9008_v53 = vld [vmem:[#allocation93_spill] sm:$0xff] }
 0x299   :  { %v9007_v43 = vld [vmem:[#allocation36_spill] sm:$0xff]  ;;  %v9009_v44 = vld [vmem:[#allocation95_spill] sm:$0xff]  ;;  %v9012_v27 = vld [vmem:[#allocation22_spill] sm:$0xff] }
 0x29a   :  { %1592 = vmatpush.msrb.mxu1 %v8979_v36  ;;  %1751 = vmatpush.msrb.mxu3 %v8980_v0  ;;  %v1319_v2 = vsel %vm1316_vm1, %v1318_v14, %v1314_v34  ;;  %v6254_v36 = vld [vmem:[#allocation3 + $0x60] sm:$0xff]  ;;  %v9010_v0 = vld [vmem:[#allocation38_spill] sm:$0xff]  ;;  %v6260_v34 = vld [vmem:[#allocation3 + $0x48] sm:$0xff] }
 0x29b   :  { %v3784_v18 = vpop.eup %3783  ;;  %v6266_v14 = vld [vmem:[#allocation3 + $0x30] sm:$0xff] }
 0x29c   :  { %v1335_v25 = vsub.f32 %v5667_v13, %v3784_v18  ;;  %1593 = vmatpush.msrb.mxu1 %v5654_v1  ;;  %1752 = vmatpush.msrb.mxu3 %v8981_v56  ;;  %v8984_v13 = vld [vmem:[#allocation71_spill] sm:$0xff]  ;;  %v9014_v56 = vld [vmem:[#allocation40_spill] sm:$0xff] }
 0x29d   :  { %v3786_v4 = vpop.eup %3785 }
 0x29e   :  { %v1336_v8 = vsub.f32 %v5675_v6, %v3786_v4  ;;  %v1337_v17 = vmul.f32 %v1335_v25, %v1304_v22  ;;  %1594 = vmatpush.msrb.mxu1 %v5661_v45  ;;  %1753 = vmatpush.msrb.mxu3 %v5664_v9  ;;  %v8982_v45 = vld [vmem:[#allocation17_spill] sm:$0xff]  ;;  %v9013_v25 = vld [vmem:[#allocation99_spill] sm:$0xff]  ;;  %v9016_v22 = vld [vmem:[#allocation42_spill] sm:$0xff] }
 0x29f   :  { %v6183_v6 = vld [vmem:[#allocation3 + $0x168] sm:$0xff] }
 0x2a0   :  { %v1338_v31 = vmul.f32 %v1336_v8, %v1319_v2  ;;  %v6161_v46 = vadd.f32 %v3784_v18, %v1337_v17  ;;  %1595 = vmatpush.msrb.mxu1 %v5669_v52  ;;  %1754 = vmatpush.msrb.mxu3 %v5672_v49  ;;  %v8983_v52 = vld [vmem:[#allocation68_spill] sm:$0xff]  ;;  %v8985_v49 = vld [vmem:[#allocation18_spill] sm:$0xff]  ;;  %v9017_v8 = vld [vmem:[#allocation103_spill] sm:$0xff] }
 0x2a1   :  { %v9011_v18 = vld [vmem:[#allocation96_spill] sm:$0xff]  ;;  %v6271_v17 = vld [vmem:[#allocation3 + $0x18] sm:$0xff]  ;;  %v9018_v2 = vld [vmem:[#allocation45_spill] sm:$0xff] }
 0x2a2   :  { %v6165_v1 = vadd.f32 %v3786_v4, %v1338_v31  ;;  %1343 = vst [vmem:[#allocation1] ss:$9 sm:$0xff] %v6161_v46  ;;  %1596 = vmatpush.msrb.mxu1 %v5678_v41  ;;  %1755 = vmatpush.msrb.mxu3 %v5681_v40  ;;  %v6186_v41 = vld [vmem:[#allocation3 + $0x178] sm:$0xff]  ;;  %v6191_v40 = vld [vmem:[#allocation3 + $0x150] sm:$0xff]  ;;  %v9015_v4 = vld [vmem:[#allocation100_spill] sm:$0xff] }
 0x2a3   :  { %v9019_v31 = vld [vmem:[#allocation49_spill] sm:$0xff] }
 0x2a4   :  { %1780 = vmatpush.msra.mxu1 %v5684_v62  ;;  %1820 = vmatpush.msra.mxu3 %v5687_v26  ;;  %1345 = vst [vmem:[#allocation1 + $0x1] ss:$9 sm:$0xff] %v6165_v1  ;;  %v6194_v62 = vld [vmem:[#allocation3 + $0x160] sm:$0xff] }
 0x2a5   :  { %v8986_v26 = vld [vmem:[#allocation72_spill] sm:$0xff] }
 0x2a6   :  { %1781 = vmatpush.msra.mxu1 %v5691_v42  ;;  %1821 = vmatpush.msra.mxu3 %v5694_v38  ;;  %v8987_v42 = vld [vmem:[#allocation74_spill] sm:$0xff] }
 0x2a7   :  { %v6199_v38 = vld [vmem:[#allocation3 + $0x138] sm:$0xff] }
 0x2a8   :  { %1782 = vmatpush.msra.mxu1 %v5697_v51  ;;  %1822 = vmatpush.msra.mxu3 %v5700_v24  ;;  %v6202_v51 = vld [vmem:[#allocation3 + $0x148] sm:$0xff]  ;;  %v8988_v24 = vld [vmem:[#allocation19_spill] sm:$0xff] }
 0x2aa   :  { %1783 = vmatpush.msra.mxu1 %v8982_v45  ;;  %1823 = vmatpush.msra.mxu3 %v8983_v52  ;;  %v6276_v45 = vld [vmem:[#allocation3] sm:$0xff]  ;;  %v9020_v52 = vld [vmem:[#allocation53_spill] sm:$0xff] }
 0x2ab   :  { %v1346_v9 = vld [vmem:[#allocation1] sm:$0xff] }
 0x2ac   :  { %1784 = vmatpush.msra.mxu1 %v8984_v13  ;;  %1824 = vmatpush.msra.mxu3 %v8985_v49  ;;  %1556 = vst [vmem:[#allocation1] ss:$9 sm:$0xff] %v6161_v46  ;;  %v6281_v13 = vld [vmem:[#allocation6 + $0x3e0] sm:$0xff] }
 0x2ad   :  { %1364 = vmatmul.f32.vlgmr.msrb.gmra.mxu0 %v1346_v9  ;;  %1404 = vmatmul.f32.vlgmr.msrb.gmra.mxu2 %v1346_v9  ;;  %1558 = vst [vmem:[#allocation1 + $0x1] ss:$9 sm:$0xff] %v6165_v1  ;;  %v9022_v49 = vld [vmem:[#allocation23_spill] sm:$0xff] }
 0x2ae   :  { %1561 = vmatpush.msrb.mxu0 %v6183_v6  ;;  %1601 = vmatpush.msrb.mxu2 %v6186_v41 }
 0x2af   :  { %1785 = vmatpush.msra.mxu1 %v5719_v21  ;;  %1825 = vmatpush.msra.mxu3 %v5722_v39  ;;  %v8989_v39 = vld [vmem:[#allocation75_spill] sm:$0xff] }
 0x2b0   :  { %1562 = vmatpush.msrb.mxu0 %v6191_v40  ;;  %1602 = vmatpush.msrb.mxu2 %v6194_v62  ;;  %v6207_v21 = vld [vmem:[#allocation3 + $0x120] sm:$0xff] }
 0x2b1   :  { %1786 = vmatpush.msra.mxu1 %v8986_v26  ;;  %1826 = vmatpush.msra.mxu3 %v8987_v42  ;;  %v9023_v26 = vld [vmem:[#allocation61_spill] sm:$0xff]  ;;  %v6286_v42 = vld [vmem:[#allocation6 + $0x3c0] sm:$0xff] }
 0x2b2   :  { %1563 = vmatpush.msrb.mxu0 %v6199_v38  ;;  %1603 = vmatpush.msrb.mxu2 %v6202_v51 }
 0x2b3   :  { %1787 = vmatpush.msra.mxu1 %v8988_v24  ;;  %1827 = vmatpush.msra.mxu3 %v8989_v39  ;;  %v9024_v24 = vld [vmem:[#allocation24_spill] sm:$0xff]  ;;  %v9025_v39 = vld [vmem:[#allocation65_spill] sm:$0xff] }
 0x2b4   :  { %1564 = vmatpush.msrb.mxu0 %v6207_v21  ;;  %1604 = vmatpush.msrb.mxu2 %v6210_v63  ;;  %v1559_v57 = vld [vmem:[#allocation1] sm:$0xff] }
 0x2b5   :  { %1444 = vmatmul.f32.vlgmr.msra.gmra.mxu0 %v1346_v9  ;;  %1484 = vmatmul.f32.vlgmr.msra.gmra.mxu2 %v1346_v9  ;;  %v9021_v9 = vld [vmem:[#allocation57_spill] sm:$0xff] }
 0x2b6   :  { %1565 = vmatpush.msrb.mxu0 %v6213_v11  ;;  %1597 = vmatmul.f32.vlgmr.msrb.gmra.mxu1 %v1559_v57 }
 0x2b7   :  { %1605 = vmatpush.msrb.mxu2 %v8990_v16  ;;  %1788 = vmatpush.msra.mxu1 %v8991_v10  ;;  %v6291_v16 = vld [vmem:[#allocation6 + $0x3a0] sm:$0xff]  ;;  %v9027_v10 = vld [vmem:[#allocation69_spill] sm:$0xff] }
 0x2b8   :  { %1566 = vmatpush.msrb.mxu0 %v6218_v28  ;;  %1828 = vmatpush.msra.mxu3 %v8992_v3  ;;  %v6296_v3 = vld [vmem:[#allocation6 + $0x380] sm:$0xff] }
 0x2b9   :  { %1606 = vmatpush.msrb.mxu2 %v8993_v5  ;;  %1789 = vmatpush.msra.mxu1 %v8994_v60  ;;  %v9028_v5 = vld [vmem:[#allocation26_spill] sm:$0xff]  ;;  %v9029_v60 = vld [vmem:[#allocation73_spill] sm:$0xff] }
 0x2ba   :  { %1567 = vmatpush.msrb.mxu0 %v6224_v33  ;;  %1829 = vmatpush.msra.mxu3 %v8995_v47  ;;  %v6301_v47 = vld [vmem:[#allocation6 + $0x360] sm:$0xff] }
 0x2bb   :  { %1607 = vmatpush.msrb.mxu2 %v8996_v59  ;;  %1790 = vmatpush.msra.mxu1 %v8997_v15  ;;  %v9030_v59 = vld [vmem:[#allocation27_spill] sm:$0xff]  ;;  %v9031_v15 = vld [vmem:[#allocation76_spill] sm:$0xff] }
 0x2bc   :  { %1568 = vmatpush.msrb.mxu0 %v6230_v7  ;;  %1830 = vmatpush.msra.mxu3 %v8998_v32  ;;  %v6306_v32 = vld [vmem:[#allocation6 + $0x340] sm:$0xff] }
 0x2bd   :  { %1608 = vmatpush.msrb.mxu2 %v8999_v55  ;;  %1791 = vmatpush.msra.mxu1 %v9000_v61  ;;  %v9032_v55 = vld [vmem:[#allocation29_spill] sm:$0xff]  ;;  %v9033_v61 = vld [vmem:[#allocation79_spill] sm:$0xff] }
 0x2be   :  { %1569 = vmatpush.msrb.mxu0 %v6236_v50  ;;  %1831 = vmatpush.msra.mxu3 %v9001_v29  ;;  %v9034_v29 = vld [vmem:[#allocation31_spill] sm:$0xff] }
 0x2bf   :  { %1609 = vmatpush.msrb.mxu2 %v9002_v30  ;;  %1792 = vmatpush.msra.mxu1 %v9003_v20  ;;  %v9035_v30 = vld [vmem:[#allocation82_spill] sm:$0xff]  ;;  %v9036_v20 = vld [vmem:[#allocation33_spill] sm:$0xff] }
 0x2c0   :  { %1570 = vmatpush.msrb.mxu0 %v6242_v12  ;;  %1832 = vmatpush.msra.mxu3 %v9004_v48  ;;  %v6314_v48 = vld [vmem:[#allocation6 + $0x300] sm:$0xff] }
 0x2c1   :  { %1610 = vmatpush.msrb.mxu2 %v9005_v23  ;;  %1793 = vmatpush.msra.mxu1 %v9006_v35  ;;  %v9037_v23 = vld [vmem:[#allocation85_spill] sm:$0xff]  ;;  %v9038_v35 = vld [vmem:[#allocation35_spill] sm:$0xff] }
 0x2c2   :  { %1571 = vmatpush.msrb.mxu0 %v6248_v19  ;;  %1833 = vmatpush.msra.mxu3 %v9007_v43  ;;  %v6319_v43 = vld [vmem:[#allocation6 + $0x2e0] sm:$0xff] }
 0x2c3   :  { %1611 = vmatpush.msrb.mxu2 %v9008_v53  ;;  %1794 = vmatpush.msra.mxu1 %v9009_v44  ;;  %v9039_v53 = vld [vmem:[#allocation88_spill] sm:$0xff]  ;;  %v9040_v44 = vld [vmem:[#allocation37_spill] sm:$0xff] }
 0x2c4   :  { %1572 = vmatpush.msrb.mxu0 %v6254_v36  ;;  %1834 = vmatpush.msra.mxu3 %v9010_v0  ;;  %v6324_v0 = vld [vmem:[#allocation6 + $0x2c0] sm:$0xff] }
 0x2c5   :  { %1612 = vmatpush.msrb.mxu2 %v9011_v18  ;;  %1795 = vmatpush.msra.mxu1 %v9012_v27  ;;  %v9041_v18 = vld [vmem:[#allocation91_spill] sm:$0xff] }
 0x2c6   :  { %1573 = vmatpush.msrb.mxu0 %v6260_v34  ;;  %1835 = vmatpush.msra.mxu3 %v9015_v4  ;;  %v9042_v27 = vld [vmem:[#allocation39_spill] sm:$0xff]  ;;  %v9045_v4 = vld [vmem:[#allocation41_spill] sm:$0xff] }
 0x2c7   :  { %1860 = vmatpush.msrb.mxu1 %v9013_v25  ;;  %1613 = vmatpush.msrb.mxu2 %v9014_v56  ;;  %v6329_v25 = vld [vmem:[#allocation6 + $0x2a0] sm:$0xff]  ;;  %v9044_v56 = vld [vmem:[#allocation94_spill] sm:$0xff] }
 0x2c8   :  { %1574 = vmatpush.msrb.mxu0 %v6266_v14  ;;  %9043 = vst [vmem:[#allocation13_spill] sm:$0xff] %v6329_v25 }
 0x2c9   :  { %1861 = vmatpush.msrb.mxu1 %v9016_v22  ;;  %1614 = vmatpush.msrb.mxu2 %v9017_v8  ;;  %v6334_v22 = vld [vmem:[#allocation6 + $0x280] sm:$0xff]  ;;  %v9047_v8 = vld [vmem:[#allocation97_spill] sm:$0xff] }
 0x2ca   :  { %1575 = vmatpush.msrb.mxu0 %v6271_v17  ;;  %9046 = vst [vmem:[#allocation51_spill] sm:$0xff] %v6334_v22 }
 0x2cb   :  { %1862 = vmatpush.msrb.mxu1 %v9018_v2  ;;  %1615 = vmatpush.msrb.mxu2 %v9019_v31  ;;  %v9048_v2 = vld [vmem:[#allocation43_spill] sm:$0xff]  ;;  %v9049_v31 = vld [vmem:[#allocation101_spill] sm:$0xff] }
 0x2cc   :  { %1576 = vmatpush.msrb.mxu0 %v6276_v45 }
 0x2cd   :  { %1863 = vmatpush.msrb.mxu1 %v9020_v52  ;;  %1616 = vmatpush.msrb.mxu2 %v9021_v9  ;;  %v9050_v52 = vld [vmem:[#allocation46_spill] sm:$0xff] }
 0x2ce   :  { %1577 = vmatmul.f32.vlgmr.msrb.gmra.mxu0 %v1559_v57  ;;  %1617 = vmatmul.f32.vlgmr.msrb.gmra.mxu2 %v1559_v57  ;;  %v9026_v57 = vld [vmem:[#allocation25_spill] sm:$0xff]  ;;  %v9051_v9 = vld [vmem:[#allocation102_spill] sm:$0xff] }
 0x2cf   :  { %1760 = vmatpush.msra.mxu0 %v6281_v13  ;;  %1800 = vmatpush.msra.mxu2 %v9022_v49  ;;  %v9052_v49 = vld [vmem:[#allocation50_spill] sm:$0xff] }
 0x2d0   :  { %1864 = vmatpush.msrb.mxu1 %v9023_v26  ;;  %v9053_v26 = vld [vmem:[#allocation54_spill] sm:$0xff] }
 0x2d1   :  { %1761 = vmatpush.msra.mxu0 %v6286_v42  ;;  %1801 = vmatpush.msra.mxu2 %v9024_v24  ;;  %v9054_v24 = vld [vmem:[#allocation58_spill] sm:$0xff] }
 0x2d2   :  { %1865 = vmatpush.msrb.mxu1 %v9025_v39  ;;  %v9055_v39 = vld [vmem:[#allocation62_spill] sm:$0xff] }
 0x2d3   :  { %1762 = vmatpush.msra.mxu0 %v6291_v16  ;;  %1802 = vmatpush.msra.mxu2 %v9026_v57  ;;  %v9056_v57 = vld [vmem:[#allocation66_spill] sm:$0xff] }
 0x2d4   :  { %1866 = vmatpush.msrb.mxu1 %v9027_v10  ;;  %v9057_v10 = vld [vmem:[#allocation70_spill] sm:$0xff] }
 0x2d5   :  { %1763 = vmatpush.msra.mxu0 %v6296_v3  ;;  %1803 = vmatpush.msra.mxu2 %v9028_v5  ;;  %v9058_v5 = vld [vmem:[#allocation98_spill] sm:$0xff] }
 0x2d6   :  { %1867 = vmatpush.msrb.mxu1 %v9029_v60  ;;  %v9059_v60 = vld [vmem:[#allocation44_spill] sm:$0xff] }
 0x2d7   :  { %1764 = vmatpush.msra.mxu0 %v6301_v47  ;;  %1804 = vmatpush.msra.mxu2 %v9030_v59  ;;  %v9060_v59 = vld [vmem:[#allocation48_spill] sm:$0xff] }
 0x2d8   :  { %1868 = vmatpush.msrb.mxu1 %v9031_v15  ;;  %v9061_v15 = vld [vmem:[#allocation104_spill] sm:$0xff] }
 0x2d9   :  { %1765 = vmatpush.msra.mxu0 %v6306_v32  ;;  %1805 = vmatpush.msra.mxu2 %v9032_v55  ;;  %v9062_v55 = vld [vmem:[#allocation105_spill] sm:$0xff] }
 0x2da   :  { %1869 = vmatpush.msrb.mxu1 %v9033_v61  ;;  %v9063_v61 = vld [vmem:[#allocation106_spill] sm:$0xff] }
 0x2db   :  { %1766 = vmatpush.msra.mxu0 %v9034_v29  ;;  %1806 = vmatpush.msra.mxu2 %v9035_v30  ;;  %v9064_v29 = vld [vmem:[#allocation107_spill] sm:$0xff]  ;;  %v9065_v30 = vld [vmem:[#allocation108_spill] sm:$0xff] }
 0x2dc   :  { %1870 = vmatpush.msrb.mxu1 %v9036_v20  ;;  %v9066_v20 = vld [vmem:[#allocation109_spill] sm:$0xff] }
 0x2dd   :  { %1767 = vmatpush.msra.mxu0 %v6314_v48  ;;  %1807 = vmatpush.msra.mxu2 %v9037_v23  ;;  %v9067_v23 = vld [vmem:[#allocation110_spill] sm:$0xff] }
 0x2de   :  { %1871 = vmatpush.msrb.mxu1 %v9038_v35  ;;  %v9068_v35 = vld [vmem:[#allocation111_spill] sm:$0xff] }
 0x2df   :  { %1768 = vmatpush.msra.mxu0 %v6319_v43  ;;  %1808 = vmatpush.msra.mxu2 %v9039_v53  ;;  %v9069_v53 = vld [vmem:[#allocation112_spill] sm:$0xff] }
 0x2e0   :  { %1872 = vmatpush.msrb.mxu1 %v9040_v44  ;;  %v9070_v44 = vld [vmem:[#allocation113_spill] sm:$0xff] }
 0x2e1   :  { %1769 = vmatpush.msra.mxu0 %v6324_v0  ;;  %1809 = vmatpush.msra.mxu2 %v9041_v18  ;;  %v9071_v18 = vld [vmem:[#allocation114_spill] sm:$0xff] }
 0x2e2   :  { %1873 = vmatpush.msrb.mxu1 %v9042_v27  ;;  %v9072_v27 = vld [vmem:[#allocation115_spill] sm:$0xff] }
 0x2e3   :  { %1770 = vmatpush.msra.mxu0 %v6329_v25  ;;  %1810 = vmatpush.msra.mxu2 %v9044_v56  ;;  %v9073_v56 = vld [vmem:[#allocation116_spill] sm:$0xff] }
 0x2e4   :  { %1874 = vmatpush.msrb.mxu1 %v9045_v4  ;;  %v9074_v4 = vld [vmem:[#allocation117_spill] sm:$0xff] }
 0x2e5   :  { %1771 = vmatpush.msra.mxu0 %v6334_v22  ;;  %1811 = vmatpush.msra.mxu2 %v9047_v8  ;;  %v9075_v8 = vld [vmem:[#allocation118_spill] sm:$0xff] }
 0x2e6   :  { %1875 = vmatpush.msrb.mxu1 %v9048_v2  ;;  %v9076_v2 = vld [vmem:[#allocation119_spill] sm:$0xff] }
 0x2e7   :  { %1772 = vmatpush.msra.mxu0 %v9049_v31  ;;  %1812 = vmatpush.msra.mxu2 %v9050_v52  ;;  %v9077_v31 = vld [vmem:[#allocation120_spill] sm:$0xff]  ;;  %v9078_v52 = vld [vmem:[#allocation121_spill] sm:$0xff] }
 0x2e9   :  { %1773 = vmatpush.msra.mxu0 %v9051_v9  ;;  %1813 = vmatpush.msra.mxu2 %v9052_v49  ;;  %v9079_v9 = vld [vmem:[#allocation122_spill] sm:$0xff]  ;;  %v9080_v49 = vld [vmem:[#allocation123_spill] sm:$0xff] }
 0x2eb   :  { %1774 = vmatpush.msra.mxu0 %v9053_v26  ;;  %1814 = vmatpush.msra.mxu2 %v9054_v24  ;;  %v9081_v26 = vld [vmem:[#allocation124_spill] sm:$0xff]  ;;  %v9082_v24 = vld [vmem:[#allocation125_spill] sm:$0xff] }
 0x2ed   :  { %1775 = vmatpush.msra.mxu0 %v9055_v39  ;;  %1815 = vmatpush.msra.mxu2 %v9056_v57  ;;  %v9083_v39 = vld [vmem:[#allocation126_spill] sm:$0xff]  ;;  %v9084_v57 = vld [vmem:[#allocation127_spill] sm:$0xff] }
 0x2ef   :  { %1840 = vmatpush.msrb.mxu0 %v9057_v10  ;;  %1880 = vmatpush.msrb.mxu2 %v9058_v5  ;;  %v9085_v10 = vld [vmem:[#allocation128_spill] sm:$0xff]  ;;  %v9086_v5 = vld [vmem:[#allocation129_spill] sm:$0xff] }
 0x2f1   :  { %1841 = vmatpush.msrb.mxu0 %v9059_v60  ;;  %1881 = vmatpush.msrb.mxu2 %v9060_v59  ;;  %v9087_v60 = vld [vmem:[#allocation130_spill] sm:$0xff]  ;;  %v9088_v59 = vld [vmem:[#allocation131_spill] sm:$0xff] }
 0x2f3   :  { %1842 = vmatpush.msrb.mxu0 %v9061_v15  ;;  %1882 = vmatpush.msrb.mxu2 %v9062_v55  ;;  %v9089_v55 = vld [vmem:[#allocation47_spill] sm:$0xff] }
 0x2f5   :  { %1843 = vmatpush.msrb.mxu0 %v9063_v61  ;;  %1883 = vmatpush.msrb.mxu2 %v9064_v29 }
 0x2f7   :  { %1844 = vmatpush.msrb.mxu0 %v9065_v30  ;;  %1884 = vmatpush.msrb.mxu2 %v9066_v20 }
 0x2f9   :  { %1845 = vmatpush.msrb.mxu0 %v9067_v23  ;;  %1885 = vmatpush.msrb.mxu2 %v9068_v35  ;;  %v9090_v35 = vld [vmem:[#allocation12_spill] sm:$0xff] }
 0x2fb   :  { %1846 = vmatpush.msrb.mxu0 %v9069_v53  ;;  %1886 = vmatpush.msrb.mxu2 %v9070_v44 }
 0x2fd   :  { %1847 = vmatpush.msrb.mxu0 %v9071_v18  ;;  %1887 = vmatpush.msrb.mxu2 %v9072_v27 }
 0x2ff   :  { %1848 = vmatpush.msrb.mxu0 %v9073_v56  ;;  %1888 = vmatpush.msrb.mxu2 %v9074_v4 }
 0x300   :  { %v1385_v29 = vpop.f32.mrf.mxu1 }
 0x301   :  { %1849 = vmatpush.msrb.mxu0 %v9075_v8  ;;  %1889 = vmatpush.msrb.mxu2 %v9076_v2 }
 0x303   :  { %1850 = vmatpush.msrb.mxu0 %v9077_v31  ;;  %1890 = vmatpush.msrb.mxu2 %v9078_v52 }
 0x305   :  { %1851 = vmatpush.msrb.mxu0 %v9079_v9  ;;  %1891 = vmatpush.msrb.mxu2 %v9080_v49  ;;  %v6384_v49 = vld [vmem:[#allocation2 + $0x3] ss:$8 sm:$0x7] }
 0x306   :  { %v1425_v44 = vpop.f32.mrf.mxu3 }
 0x307   :  { %1852 = vmatpush.msrb.mxu0 %v9081_v26  ;;  %1892 = vmatpush.msrb.mxu2 %v9082_v24  ;;  %v6386_v26 = vld [vmem:[#allocation2 + $0x1b] ss:$8 sm:$0x7] }
 0x308   :  { %v1465_v4 = vpop.f32.mrf.mxu1 }
 0x309   :  { %1853 = vmatpush.msrb.mxu0 %v9083_v39  ;;  %1893 = vmatpush.msrb.mxu2 %v9084_v57 }
 0x30b   :  { %1854 = vmatpush.msrb.mxu0 %v9085_v10  ;;  %1894 = vmatpush.msrb.mxu2 %v9086_v5  ;;  %v1666_v10 = vrot.slane %v6384_v49, 1 }
 0x30d   :  { %1855 = vmatpush.msrb.mxu0 %v9087_v60  ;;  %1895 = vmatpush.msrb.mxu2 %v9088_v59  ;;  %v1667_v60 = vrot.slane %v6386_v26, 1 }
 0x32a   :  { %v1365_v15 = vpop.f32.mrf.mxu0 }
 0x32b   :  { %v1366_v61 = vadd.f32 %v1365_v15, %v9089_v55  ;;  %v1505_v55 = vpop.f32.mrf.mxu3 }
 0x32d   :  { %v1386_v30 = vadd.f32 %v1385_v29, %v1366_v61 }
 0x32f   :  { %v3659_v20 = vmul.f32 -1.442695, %v1386_v30  ;;  %v9091_v30 = vld [vmem:[#allocation52_spill] sm:$0xff] }
 0x330   :  { %v1405_v23 = vpop.f32.mrf.mxu2 }
 0x331   :  { %3787 = vpow2.f32 %v3659_v20  ;;  %v1406_v53 = vadd.f32 %v1405_v23, %v9090_v35 }
 0x332   :  { %v1445_v24 = vpop.f32.mrf.mxu0 }
 0x333   :  { %v1426_v18 = vadd.f32 %v1425_v44, %v1406_v53  ;;  %v1598_v52 = vpop.f32.mrf.mxu1 }
 0x334   :  { %v1671_v39 = vrot.slane %v1598_v52, 1  ;;  %v1673_v59 = vadd.f32 %v1666_v10, %v1598_v52 }
 0x335   :  { %v3660_v27 = vmul.f32 -1.442695, %v1426_v18 }
 0x336   :  { %v1674_v29 = vadd.f32 %v1671_v39, %v1667_v60 }
 0x337   :  { %v3788_v56 = vpop.eup %3787  ;;  %3789 = vpow2.f32 %v3660_v27  ;;  %v1446_v27 = vadd.f32 %v1445_v24, %v5495_v58 }
 0x338   :  { %v1511_v8 = vadd.f32 1.0, %v3788_v56  ;;  %v1485_v5 = vpop.f32.mrf.mxu2  ;;  %v3663_v56 = vmul.f32 -1.442695, %v1673_v59  ;;  %v3664_v10 = vmul.f32 -1.442695, %v1674_v29 }
 0x339   :  { %v1486_v20 = vadd.f32 %v1485_v5, %v9091_v30  ;;  %v1466_v22 = vadd.f32 %v1465_v4, %v1446_v27 }
 0x33a   :  { %3791 = vrcp.f32 %v1511_v8  ;;  %v1523_v23 = vand.u32 2147483648, %v1511_v8  ;;  %v1521_v18 = vand.u32 2147483647, %v1511_v8  ;;  %vm1517_vm3 = vweird.f32 %v1511_v8 }
 0x33b   :  { %v1506_v39 = vadd.f32 %v1505_v55, %v1486_v20 }
 0x33c   :  { %v1524_v52 = vor.u32 1.1754944e-38, %v1523_v23  ;;  %vm1522_vm5 = vcmp.eq.f32.partialorder %v1521_v18, 8.507059e+37 }
 0x33d   :  { %v3790_v2 = vpop.eup %3789 }
 0x33e   :  { %v6381_v31 = vadd.f32 1.0, %v3790_v2 }
 0x340   :  { %v3792_v9 = vpop.eup %3791  ;;  %3793 = vrcp.f32 %v6381_v31  ;;  %v1542_v29 = vand.u32 2147483648, %v6381_v31  ;;  %vm1536_vm7 = vweird.f32 %v6381_v31  ;;  %v1540_v4 = vand.u32 2147483647, %v6381_v31 }
 0x341   :  { %v1513_v57 = vmul.f32 %v3792_v9, %v1511_v8  ;;  %vm1518_vm2 = vweird.f32 %v3792_v9  ;;  %3795 = vpow2.f32 %v3663_v56 }
 0x342   :  { %vm1519_vm4 = vmor %vm1517_vm3, %vm1518_vm2  ;;  %3797 = vpow2.f32 %v3664_v10  ;;  %vm1541_vm9 = vcmp.eq.f32.partialorder %v1540_v4, 8.507059e+37  ;;  %v6415_v10 = vld [vmem:[#allocation3 + $0x170] sm:$0xff]  ;;  %v6436_v4 = vld [vmem:[#allocation3 + $0x140] sm:$0xff] }
 0x343   :  { %v1514_v15 = vsub.f32 1.0, %v1513_v57  ;;  %9092 = vst [vmem:[#allocation55_spill] sm:$0xff] %v6436_v4 }
 0x345   :  { %v1515_v44 = vmul.f32 %v3792_v9, %v1514_v15 }
 0x346   :  { %v3794_v61 = vpop.eup %3793 }
 0x347   :  { %v1532_v53 = vmul.f32 %v3794_v61, %v6381_v31  ;;  %v1516_v2 = vadd.f32 %v3792_v9, %v1515_v44  ;;  %vm1537_vm6 = vweird.f32 %v3794_v61 }
 0x348   :  { %vm1538_vm8 = vmor %vm1536_vm7, %vm1537_vm6 }
 0x349   :  { %v1533_v35 = vsub.f32 1.0, %v1532_v53  ;;  %v1520_v60 = vsel %vm1519_vm4, %v3792_v9, %v1516_v2  ;;  %v3796_v9 = vpop.eup %3795 }
 0x34a   :  { %v1525_v5 = vsel %vm1522_vm5, %v1524_v52, %v1520_v60  ;;  %v3798_v20 = vpop.eup %3797 }
 0x34b   :  { %v1578_v57 = vpop.f32.mrf.mxu0  ;;  %v1546_v25 = vmul.f32 %v1525_v5, %v1506_v39  ;;  %v1534_v24 = vmul.f32 %v3794_v61, %v1533_v35  ;;  %v6402_v56 = vadd.f32 1.0, %v3798_v20  ;;  %v6418_v39 = vld [vmem:[#allocation6 + $0x1e0] sm:$0xff] }
 0x34c   :  { %v1622_v30 = vrot.slane %v1578_v57, 1  ;;  %v1624_v15 = vadd.f32 %v1578_v57, %v6384_v49  ;;  %v6439_v20 = vld [vmem:[#allocation6 + $0x1a0] sm:$0xff] }
 0x34d   :  { %v1547_v53 = vadd.f32 %v1546_v25, %v1466_v22  ;;  %v1535_v55 = vadd.f32 %v3794_v61, %v1534_v24  ;;  %v1543_v22 = vor.u32 1.1754944e-38, %v1542_v29  ;;  %v6424_v24 = vld [vmem:[#allocation3 + $0x158] sm:$0xff]  ;;  %9093 = vst [vmem:[#allocation14_spill] sm:$0xff] %v6439_v20  ;;  %vm1703_vm6 = vweird.f32 %v6402_v56 }
 0x34e   :  { %v1625_v59 = vadd.f32 %v1622_v30, %v6386_v26  ;;  %v3661_v8 = vmul.f32 -1.442695, %v1624_v15  ;;  %v6398_v30 = vadd.f32 1.0, %v3796_v9 }
 0x34f   :  { %v1539_v44 = vsel %vm1538_vm8, %v3794_v61, %v1535_v55 }
 0x350   :  { %3799 = vpow2.f32 %v3661_v8  ;;  %v3662_v23 = vmul.f32 -1.442695, %v1625_v59  ;;  %v1544_v31 = vsel %vm1541_vm9, %v1543_v22, %v1539_v44  ;;  %v6427_v59 = vld [vmem:[#allocation6 + $0x1c0] sm:$0xff]  ;;  %vm1688_vm3 = vweird.f32 %v6398_v30 }
 0x351   :  { %3801 = vtanh.f32 %v1547_v53  ;;  %v1618_v53 = vpop.f32.mrf.mxu2 }
 0x352   :  { %3803 = vpow2.f32 %v3662_v23 }
 0x356   :  { %v3800_v35 = vpop.eup %3799 }
 0x357   :  { %v3802_v25 = vpop.eup %3801  ;;  %v6400_v18 = vadd.f32 1.0, %v3800_v35 }
 0x358   :  { %v3804_v27 = vpop.eup %3803  ;;  %v1549_v2 = vsub.f32 %v6087_v54, %v3802_v25 }
 0x359   :  { %v6405_v52 = vadd.f32 1.0, %v3804_v27  ;;  %3805 = vrcp.f32 %v6400_v18  ;;  %v1645_v29 = vand.u32 2147483648, %v6400_v18  ;;  %v1643_v44 = vand.u32 2147483647, %v6400_v18 }
 0x35a   :  { %3807 = vrcp.f32 %v6398_v30  ;;  %v1550_v57 = vmul.f32 %v1549_v2, %v1544_v31  ;;  %vm1639_vm11 = vweird.f32 %v6400_v18  ;;  %v1713_v2 = vadd.f32 %v6113_v37, %v1618_v53  ;;  %v6448_v31 = vld [vmem:[#allocation3 + $0x128] sm:$0xff]  ;;  %v6458_v53 = vld [vmem:[#allocation3 + $0x110] sm:$0xff] }
 0x35b   :  { %3809 = vrcp.f32 %v6405_v52  ;;  %v1660_v27 = vand.u32 2147483648, %v6405_v52  ;;  %9094 = vst [vmem:[#allocation56_spill] sm:$0xff] %v6448_v31  ;;  %v1646_v37 = vor.u32 1.1754944e-38, %v1645_v29  ;;  %vm1644_vm14 = vcmp.eq.f32.partialorder %v1643_v44, 8.507059e+37 }
 0x35c   :  { %3811 = vrcp.f32 %v6402_v56  ;;  %v6411_v61 = vadd.f32 %v3802_v25, %v1550_v57  ;;  %v6451_v57 = vld [vmem:[#allocation6 + $0x180] sm:$0xff]  ;;  %9096 = vst [vmem:[#allocation15_spill] sm:$0xff] %v6458_v53  ;;  %vm1654_vm15 = vweird.f32 %v6405_v52  ;;  %v1719_v29 = vrot.slane %v6384_v49, 2 }
 0x35d   :  { %9095 = vst [vmem:[#allocation59_spill] sm:$0xff] %v6451_v57  ;;  %v1715_v44 = vrot.slane %v1713_v2, 1  ;;  %v6477_v49 = vld [vmem:[#allocation6 + $0x120] sm:$0xff] }
 0x35e   :  { %1776 = vmatmul.f32.vlgmr.msra.gmra.mxu0 %v6411_v61  ;;  %1816 = vmatmul.f32.vlgmr.msra.gmra.mxu2 %v6411_v61 }
 0x35f   :  { %v3806_v54 = vpop.eup %3805  ;;  %1973 = vmatpush.msra.mxu0 %v6415_v10  ;;  %2132 = vmatpush.msra.mxu2 %v6418_v39 }
 0x360   :  { %v6421_v60 = vpop.eup %3807  ;;  %v1635_v5 = vmul.f32 %v3806_v54, %v6400_v18  ;;  %vm1640_vm10 = vweird.f32 %v3806_v54 }
 0x361   :  { %v3810_v15 = vpop.eup %3809  ;;  %1974 = vmatpush.msra.mxu0 %v6424_v24  ;;  %2133 = vmatpush.msra.mxu2 %v6427_v59  ;;  %v1684_v9 = vmul.f32 %v6421_v60, %v6398_v30  ;;  %vm1641_vm13 = vmor %vm1639_vm11, %vm1640_vm10  ;;  %vm1689_vm2 = vweird.f32 %v6421_v60 }
 0x362   :  { %v6430_v8 = vpop.eup %3811  ;;  %v1636_v23 = vsub.f32 1.0, %v1635_v5  ;;  %v1650_v55 = vmul.f32 %v3810_v15, %v6405_v52  ;;  %vm1655_vm12 = vweird.f32 %v3810_v15  ;;  %vm6509_vm5 = vmor %vm1688_vm3, %vm1689_vm2 }
 0x363   :  { %1975 = vmatpush.msra.mxu0 %v6436_v4  ;;  %2134 = vmatpush.msra.mxu2 %v6439_v20  ;;  %v1699_v22 = vmul.f32 %v6430_v8, %v6402_v56  ;;  %v1685_v18 = vsub.f32 1.0, %v1684_v9  ;;  %vm1656_vm0 = vmor %vm1654_vm15, %vm1655_vm12  ;;  %v1661_v9 = vor.u32 1.1754944e-38, %v1660_v27  ;;  %v6467_v4 = vld [vmem:[#allocation3 + $0xf8] sm:$0xff]  ;;  %vm1704_vm4 = vweird.f32 %v6430_v8 }
 0x364   :  { %v1637_v35 = vmul.f32 %v3806_v54, %v1636_v23  ;;  %v1651_v25 = vsub.f32 1.0, %v1650_v55  ;;  %v1658_v55 = vand.u32 2147483647, %v6405_v52  ;;  %vm6527_vm7 = vmor %vm1703_vm6, %vm1704_vm4 }
 0x365   :  { %1976 = vmatpush.msra.mxu0 %v6448_v31  ;;  %2135 = vmatpush.msra.mxu2 %v6451_v57  ;;  %v6461_v31 = vld [vmem:[#allocation6 + $0x160] sm:$0xff]  ;;  %v1700_v57 = vsub.f32 1.0, %v1699_v22  ;;  %v1686_v52 = vmul.f32 %v6421_v60, %v1685_v18 }
 0x366   :  { %v1638_v5 = vadd.f32 %v3806_v54, %v1637_v35  ;;  %v1652_v23 = vmul.f32 %v3810_v15, %v1651_v25  ;;  %1856 = vmatmul.f32.vlgmr.msrb.gmra.mxu0 %v6411_v61  ;;  %1896 = vmatmul.f32.vlgmr.msrb.gmra.mxu2 %v6411_v61  ;;  %vm1659_vm1 = vcmp.eq.f32.partialorder %v1658_v55, 8.507059e+37  ;;  %v6482_v55 = vld [vmem:[#allocation3 + $0xc8] sm:$0xff] }
 0x367   :  { %1977 = vmatpush.msra.mxu0 %v6458_v53  ;;  %2136 = vmatpush.msra.mxu2 %v6461_v31  ;;  %v6470_v53 = vld [vmem:[#allocation6 + $0x140] sm:$0xff]  ;;  %v1687_v18 = vadd.f32 %v6421_v60, %v1686_v52  ;;  %v1707_v52 = vand.u32 2147483647, %v6402_v56 }
 0x368   :  { %v1642_v35 = vsel %vm1641_vm13, %v3806_v54, %v1638_v5  ;;  %v1653_v25 = vadd.f32 %v3810_v15, %v1652_v23  ;;  %v6474_v23 = vld [vmem:[#allocation3 + $0xe0] sm:$0xff] }
 0x369   :  { %v1647_v20 = vsel %vm1644_vm14, %v1646_v37, %v1642_v35  ;;  %1978 = vmatpush.msra.mxu0 %v6467_v4  ;;  %2137 = vmatpush.msra.mxu2 %v6470_v53  ;;  %v1720_v37 = vrot.slane %v6386_v26, 2  ;;  %v6493_v26 = vld [vmem:[#allocation6 + $0xe0] sm:$0xff]  ;;  %vm1708_vm9 = vcmp.eq.f32.partialorder %v1707_v52, 8.507059e+37 }
 0x36a   :  { %v1657_v54 = vsel %vm1656_vm0, %v3810_v15, %v1653_v25  ;;  %v1717_v5 = vmul.f32 %v1713_v2, %v1647_v20  ;;  %v1701_v15 = vmul.f32 %v6430_v8, %v1700_v57  ;;  %v6485_v20 = vld [vmem:[#allocation6 + $0x100] sm:$0xff]  ;;  %v6490_v25 = vld [vmem:[#allocation3 + $0xb0] sm:$0xff]  ;;  %v1694_v57 = vand.u32 2147483648, %v6398_v30 }
 0x36b   :  { %v1662_v22 = vsel %vm1659_vm1, %v1661_v9, %v1657_v54  ;;  %1979 = vmatpush.msra.mxu0 %v6474_v23  ;;  %2138 = vmatpush.msra.mxu2 %v6477_v49  ;;  %v1692_v9 = vand.u32 2147483647, %v6398_v30  ;;  %v6501_v54 = vld [vmem:[#allocation3 + $0x98] sm:$0xff]  ;;  %v1709_v30 = vand.u32 2147483648, %v6402_v56  ;;  %v6559_v52 = vld [vmem:[#allocation3 + $0x20] sm:$0xff] }
 0x36c   :  { %v1718_v27 = vmul.f32 %v1715_v44, %v1662_v22  ;;  %v1723_v35 = vadd.f32 %v1719_v29, %v1717_v5  ;;  %v1702_v29 = vadd.f32 %v6430_v8, %v1701_v15  ;;  %9097 = vst [vmem:[#allocation60_spill] sm:$0xff] %v6501_v54  ;;  %v6504_v44 = vld [vmem:[#allocation6 + $0xc0] sm:$0xff]  ;;  %v1691_v22 = vsel %vm6509_vm5, %v6421_v60, %v1687_v18  ;;  %v6535_v18 = vld [vmem:[#allocation3 + $0x68] sm:$0xff] }
 0x36d   :  { %1980 = vmatpush.msra.mxu0 %v6482_v55  ;;  %2139 = vmatpush.msra.mxu2 %v6485_v20  ;;  %9098 = vst [vmem:[#allocation63_spill] sm:$0xff] %v6504_v44  ;;  %v1695_v15 = vor.u32 1.1754944e-38, %v1694_v57  ;;  %vm1693_vm8 = vcmp.eq.f32.partialorder %v1692_v9, 8.507059e+37  ;;  %v6538_v5 = vld [vmem:[#allocation6 + $0x80] sm:$0xff] }
 0x36e   :  { %v1724_v2 = vadd.f32 %v1720_v37, %v1718_v27  ;;  %3813 = vtanh.f32 %v1723_v35  ;;  %v6519_v27 = vld [vmem:[#allocation3 + $0x80] sm:$0xff]  ;;  %v1706_v56 = vsel %vm6527_vm7, %v6430_v8, %v1702_v29  ;;  %9105 = vst [vmem:[#allocation67_spill] sm:$0xff] %v6538_v5 }
 0x36f   :  { %1981 = vmatpush.msra.mxu0 %v6490_v25  ;;  %2140 = vmatpush.msra.mxu2 %v6493_v26  ;;  %9101 = vst [vmem:[#allocation16_spill] sm:$0xff] %v6519_v27  ;;  %v6522_v37 = vld [vmem:[#allocation6 + $0xa0] sm:$0xff] }
 0x370   :  { %3815 = vtanh.f32 %v1724_v2  ;;  %9102 = vst [vmem:[#allocation64_spill] sm:$0xff] %v6522_v37 }
 0x371   :  { %1982 = vmatpush.msra.mxu0 %v6501_v54  ;;  %2141 = vmatpush.msra.mxu2 %v6504_v44  ;;  %v6542_v54 = vld [vmem:[#allocation3 + $0x50] sm:$0xff] }
 0x373   :  { %1983 = vmatpush.msra.mxu0 %v6519_v27  ;;  %2142 = vmatpush.msra.mxu2 %v6522_v37  ;;  %v1710_v37 = vor.u32 1.1754944e-38, %v1709_v30  ;;  %v1696_v27 = vsel %vm1693_vm8, %v1695_v15, %v1691_v22  ;;  %v6553_v30 = vld [vmem:[#allocation6 + $0x40] sm:$0xff]  ;;  %v6578_v15 = vld [vmem:[#allocation6 + $0x1c8] sm:$0xff] }
 0x374   :  { %v3814_v35 = vpop.eup %3813  ;;  %v6562_v22 = vld [vmem:[#allocation6 + $0x20] sm:$0xff] }
 0x375   :  { %v1727_v60 = vsub.f32 %v6161_v46, %v3814_v35  ;;  %1984 = vmatpush.msra.mxu0 %v6535_v18  ;;  %2143 = vmatpush.msra.mxu2 %v6538_v5  ;;  %v6545_v46 = vld [vmem:[#allocation6 + $0x60] sm:$0xff]  ;;  %v1711_v8 = vsel %vm1708_vm9, %v1710_v37, %v1706_v56  ;;  %v6550_v5 = vld [vmem:[#allocation3 + $0x38] sm:$0xff]  ;;  %v6572_v37 = vld [vmem:[#allocation6 + $0x1e8] sm:$0xff] }
 0x376   :  { %v3816_v57 = vpop.eup %3815  ;;  %v6581_v56 = vld [vmem:[#allocation6 + $0x1d0] sm:$0xff] }
 0x377   :  { %v1728_v9 = vsub.f32 %v6165_v1, %v3816_v57  ;;  %v1729_v44 = vmul.f32 %v1727_v60, %v1696_v27  ;;  %1985 = vmatpush.msra.mxu0 %v6542_v54  ;;  %2144 = vmatpush.msra.mxu2 %v6545_v46  ;;  %v6569_v27 = vld [vmem:[#allocation6] sm:$0xff]  ;;  %v6584_v60 = vld [vmem:[#allocation6 + $0x1a8] sm:$0xff] }
 0x378   :  { %9106 = vst [vmem:[#allocation17_spill] sm:$0xff] %v6584_v60 }
 0x379   :  { %v1730_v29 = vmul.f32 %v1728_v9, %v1711_v8  ;;  %v6548_v2 = vadd.f32 %v3814_v35, %v1729_v44  ;;  %1986 = vmatpush.msra.mxu0 %v6550_v5  ;;  %2145 = vmatpush.msra.mxu2 %v6553_v30  ;;  %v6566_v44 = vld [vmem:[#allocation3 + $0x8] sm:$0xff]  ;;  %v6575_v35 = vld [vmem:[#allocation6 + $0x1f0] sm:$0xff] }
 0x37a   :  { %v6590_v8 = vld [vmem:[#allocation6 + $0x188] sm:$0xff] }
 0x37b   :  { %v6556_v1 = vadd.f32 %v3816_v57, %v1730_v29  ;;  %1735 = vst [vmem:[#allocation1] ss:$9 sm:$0xff] %v6548_v2  ;;  %1987 = vmatpush.msra.mxu0 %v6559_v52  ;;  %2146 = vmatpush.msra.mxu2 %v6562_v22  ;;  %v6587_v57 = vld [vmem:[#allocation6 + $0x1b0] sm:$0xff] }
 0x37c   :  { %9107 = vst [vmem:[#allocation68_spill] sm:$0xff] %v6587_v57  ;;  %v6593_v29 = vld [vmem:[#allocation6 + $0x190] sm:$0xff] }
 0x37d   :  { %1737 = vst [vmem:[#allocation1 + $0x1] ss:$9 sm:$0xff] %v6556_v1  ;;  %1988 = vmatpush.msra.mxu0 %v6566_v44  ;;  %2147 = vmatpush.msra.mxu2 %v6569_v27 }
 0x37e   :  { %9108 = vst [vmem:[#allocation71_spill] sm:$0xff] %v6590_v8 }
 0x37f   :  { %2172 = vmatpush.msrb.mxu0 %v6572_v37  ;;  %2212 = vmatpush.msrb.mxu2 %v6575_v35  ;;  %9109 = vst [vmem:[#allocation18_spill] sm:$0xff] %v6593_v29 }
 0x381   :  { %2173 = vmatpush.msrb.mxu0 %v6578_v15  ;;  %2213 = vmatpush.msrb.mxu2 %v6581_v56 }
 0x383   :  { %2174 = vmatpush.msrb.mxu0 %v6584_v60  ;;  %2214 = vmatpush.msrb.mxu2 %v6587_v57  ;;  %v6600_v57 = vld [vmem:[#allocation6 + $0x168] sm:$0xff]  ;;  %v6603_v60 = vld [vmem:[#allocation6 + $0x170] sm:$0xff] }
 0x384   :  { %v1738_v9 = vld [vmem:[#allocation1] sm:$0xff] }
 0x385   :  { %2175 = vmatpush.msrb.mxu0 %v6590_v8  ;;  %2215 = vmatpush.msrb.mxu2 %v6593_v29  ;;  %1948 = vst [vmem:[#allocation1] ss:$9 sm:$0xff] %v6548_v2  ;;  %v6608_v29 = vld [vmem:[#allocation6 + $0x148] sm:$0xff]  ;;  %v6611_v8 = vld [vmem:[#allocation6 + $0x150] sm:$0xff] }
 0x386   :  { %1756 = vmatmul.f32.vlgmr.msrb.gmra.mxu3 %v1738_v9  ;;  %1796 = vmatmul.f32.vlgmr.msra.gmra.mxu1 %v1738_v9  ;;  %1950 = vst [vmem:[#allocation1 + $0x1] ss:$9 sm:$0xff] %v6556_v1 }
 0x387   :  { %1953 = vmatpush.msrb.mxu3 %v6183_v6  ;;  %1993 = vmatpush.msra.mxu1 %v6186_v41  ;;  %v6616_v6 = vld [vmem:[#allocation6 + $0x128] sm:$0xff]  ;;  %v6619_v41 = vld [vmem:[#allocation6 + $0x130] sm:$0xff] }
 0x388   :  { %2176 = vmatpush.msrb.mxu0 %v6600_v57  ;;  %2216 = vmatpush.msrb.mxu2 %v6603_v60  ;;  %9110 = vst [vmem:[#allocation72_spill] sm:$0xff] %v6619_v41 }
 0x389   :  { %1954 = vmatpush.msrb.mxu3 %v6191_v40  ;;  %1994 = vmatpush.msra.mxu1 %v6194_v62  ;;  %v6628_v62 = vld [vmem:[#allocation3 + $0x118] sm:$0xff] }
 0x38a   :  { %2177 = vmatpush.msrb.mxu0 %v6608_v29  ;;  %2217 = vmatpush.msrb.mxu2 %v6611_v8  ;;  %9111 = vst [vmem:[#allocation74_spill] sm:$0xff] %v6628_v62 }
 0x38b   :  { %1955 = vmatpush.msrb.mxu3 %v6199_v38  ;;  %1995 = vmatpush.msra.mxu1 %v6202_v51  ;;  %v6631_v38 = vld [vmem:[#allocation6 + $0x108] sm:$0xff]  ;;  %v6635_v51 = vld [vmem:[#allocation6 + $0x110] sm:$0xff] }
 0x38c   :  { %2178 = vmatpush.msrb.mxu0 %v6616_v6  ;;  %2218 = vmatpush.msrb.mxu2 %v6619_v41  ;;  %9112 = vst [vmem:[#allocation19_spill] sm:$0xff] %v6631_v38 }
 0x38d   :  { %1956 = vmatpush.msrb.mxu3 %v6207_v21  ;;  %1996 = vmatpush.msra.mxu1 %v6210_v63  ;;  %v6624_v40 = vld [vmem:[#allocation1] sm:$0xff]  ;;  %9113 = vst [vmem:[#allocation75_spill] sm:$0xff] %v6635_v51  ;;  %v6638_v21 = vld [vmem:[#allocation3 + $0x100] sm:$0xff] }
 0x38e   :  { %1836 = vmatmul.f32.vlgmr.msra.gmra.mxu3 %v1738_v9  ;;  %1876 = vmatmul.f32.vlgmr.msrb.gmra.mxu1 %v1738_v9  ;;  %9114 = vst [vmem:[#allocation77_spill] sm:$0xff] %v6638_v21  ;;  %v6641_v63 = vld [vmem:[#allocation6 + $0xe8] sm:$0xff] }
 0x38f   :  { %1957 = vmatpush.msrb.mxu3 %v6213_v11  ;;  %1989 = vmatmul.f32.vlgmr.msra.gmra.mxu0 %v6624_v40  ;;  %9115 = vst [vmem:[#allocation20_spill] sm:$0xff] %v6641_v63  ;;  %v6645_v11 = vld [vmem:[#allocation6 + $0xf0] sm:$0xff]  ;;  %v6648_v9 = vld [vmem:[#allocation3 + $0xe8] sm:$0xff] }
 0x390   :  { %1997 = vmatpush.msra.mxu1 %v6628_v62  ;;  %2179 = vmatpush.msrb.mxu0 %v6631_v38  ;;  %9116 = vst [vmem:[#allocation78_spill] sm:$0xff] %v6645_v11 }
 0x391   :  { %1958 = vmatpush.msrb.mxu3 %v6218_v28  ;;  %2219 = vmatpush.msrb.mxu2 %v6635_v51  ;;  %9117 = vst [vmem:[#allocation80_spill] sm:$0xff] %v6648_v9  ;;  %v6651_v28 = vld [vmem:[#allocation6 + $0xc8] sm:$0xff] }
 0x392   :  { %1998 = vmatpush.msra.mxu1 %v6638_v21  ;;  %2180 = vmatpush.msrb.mxu0 %v6641_v63  ;;  %9118 = vst [vmem:[#allocation21_spill] sm:$0xff] %v6651_v28  ;;  %v6655_v21 = vld [vmem:[#allocation6 + $0xd0] sm:$0xff] }
 0x393   :  { %1959 = vmatpush.msrb.mxu3 %v6224_v33  ;;  %2220 = vmatpush.msrb.mxu2 %v6645_v11  ;;  %9119 = vst [vmem:[#allocation28_spill] sm:$0xff] %v6655_v21  ;;  %v6658_v63 = vld [vmem:[#allocation3 + $0xd0] sm:$0xff]  ;;  %v6661_v33 = vld [vmem:[#allocation6 + $0xa8] sm:$0xff] }
 0x394   :  { %1999 = vmatpush.msra.mxu1 %v6648_v9  ;;  %2181 = vmatpush.msrb.mxu0 %v6651_v28  ;;  %9120 = vst [vmem:[#allocation81_spill] sm:$0xff] %v6658_v63  ;;  %v6665_v9 = vld [vmem:[#allocation6 + $0xb0] sm:$0xff]  ;;  %v6668_v28 = vld [vmem:[#allocation3 + $0xb8] sm:$0xff] }
 0x395   :  { %1960 = vmatpush.msrb.mxu3 %v6230_v7  ;;  %2221 = vmatpush.msrb.mxu2 %v6655_v21  ;;  %9121 = vst [vmem:[#allocation83_spill] sm:$0xff] %v6661_v33  ;;  %v6671_v7 = vld [vmem:[#allocation6 + $0x88] sm:$0xff] }
 0x396   :  { %2000 = vmatpush.msra.mxu1 %v6658_v63  ;;  %2182 = vmatpush.msrb.mxu0 %v6661_v33  ;;  %9122 = vst [vmem:[#allocation30_spill] sm:$0xff] %v6665_v9  ;;  %v6675_v63 = vld [vmem:[#allocation6 + $0x90] sm:$0xff]  ;;  %v6678_v33 = vld [vmem:[#allocation3 + $0xa0] sm:$0xff] }
 0x397   :  { %1961 = vmatpush.msrb.mxu3 %v6236_v50  ;;  %2222 = vmatpush.msrb.mxu2 %v6665_v9  ;;  %9123 = vst [vmem:[#allocation84_spill] sm:$0xff] %v6668_v28  ;;  %v6681_v50 = vld [vmem:[#allocation6 + $0x68] sm:$0xff] }
 0x398   :  { %2001 = vmatpush.msra.mxu1 %v6668_v28  ;;  %9124 = vst [vmem:[#allocation86_spill] sm:$0xff] %v6671_v7  ;;  %2183 = vmatpush.msrb.mxu0 %v6671_v7  ;;  %v6685_v28 = vld [vmem:[#allocation6 + $0x70] sm:$0xff]  ;;  %v6688_v7 = vld [vmem:[#allocation3 + $0x88] sm:$0xff] }
 0x399   :  { %1962 = vmatpush.msrb.mxu3 %v6242_v12  ;;  %9125 = vst [vmem:[#allocation32_spill] sm:$0xff] %v6675_v63  ;;  %2223 = vmatpush.msrb.mxu2 %v6675_v63  ;;  %v6691_v12 = vld [vmem:[#allocation6 + $0x48] sm:$0xff] }
 0x39a   :  { %9126 = vst [vmem:[#allocation87_spill] sm:$0xff] %v6678_v33  ;;  %2002 = vmatpush.msra.mxu1 %v6678_v33  ;;  %2184 = vmatpush.msrb.mxu0 %v6681_v50  ;;  %v6695_v33 = vld [vmem:[#allocation6 + $0x50] sm:$0xff] }
 0x39b   :  { %9127 = vst [vmem:[#allocation89_spill] sm:$0xff] %v6681_v50  ;;  %1963 = vmatpush.msrb.mxu3 %v6248_v19  ;;  %2224 = vmatpush.msrb.mxu2 %v6685_v28  ;;  %v6698_v50 = vld [vmem:[#allocation3 + $0x70] sm:$0xff]  ;;  %v6701_v19 = vld [vmem:[#allocation6 + $0x28] sm:$0xff] }
 0x39c   :  { %9128 = vst [vmem:[#allocation34_spill] sm:$0xff] %v6685_v28  ;;  %2003 = vmatpush.msra.mxu1 %v6688_v7  ;;  %2185 = vmatpush.msrb.mxu0 %v6691_v12 }
 0x39d   :  { %9129 = vst [vmem:[#allocation90_spill] sm:$0xff] %v6688_v7  ;;  %1964 = vmatpush.msrb.mxu3 %v6254_v36  ;;  %2225 = vmatpush.msrb.mxu2 %v6695_v33  ;;  %v6705_v7 = vld [vmem:[#allocation6 + $0x30] sm:$0xff]  ;;  %v6711_v36 = vld [vmem:[#allocation6 + $0x8] sm:$0xff] }
 0x39e   :  { %9130 = vst [vmem:[#allocation92_spill] sm:$0xff] %v6691_v12  ;;  %2004 = vmatpush.msra.mxu1 %v6698_v50  ;;  %2186 = vmatpush.msrb.mxu0 %v6701_v19  ;;  %v6708_v12 = vld [vmem:[#allocation3 + $0x58] sm:$0xff] }
 0x39f   :  { %9131 = vst [vmem:[#allocation36_spill] sm:$0xff] %v6695_v33  ;;  %1965 = vmatpush.msrb.mxu3 %v6260_v34  ;;  %2226 = vmatpush.msrb.mxu2 %v6705_v7  ;;  %v6721_v34 = vld [vmem:[#allocation6 + $0x10] sm:$0xff]  ;;  %v9214_v33 = vld [vmem:[#allocation52_spill] sm:$0xff] }
 0x3a0   :  { %9132 = vst [vmem:[#allocation93_spill] sm:$0xff] %v6698_v50  ;;  %2005 = vmatpush.msra.mxu1 %v6708_v12  ;;  %2187 = vmatpush.msrb.mxu0 %v6711_v36  ;;  %v6715_v50 = vld [vmem:[#allocation6 + $0x1f8] sm:$0xff] }
 0x3a1   :  { %9133 = vst [vmem:[#allocation95_spill] sm:$0xff] %v6701_v19  ;;  %1966 = vmatpush.msrb.mxu3 %v6266_v14  ;;  %v6718_v19 = vld [vmem:[#allocation3 + $0x40] sm:$0xff]  ;;  %2227 = vmatpush.msrb.mxu2 %v6721_v34  ;;  %v6732_v14 = vld [vmem:[#allocation6 + $0x1b8] sm:$0xff] }
 0x3a2   :  { %9134 = vst [vmem:[#allocation38_spill] sm:$0xff] %v6705_v7  ;;  %2252 = vmatpush.msra.mxu0 %v6715_v50  ;;  %2006 = vmatpush.msra.mxu1 %v6718_v19 }
 0x3a3   :  { %9135 = vst [vmem:[#allocation96_spill] sm:$0xff] %v6708_v12  ;;  %1967 = vmatpush.msrb.mxu3 %v6271_v17  ;;  %v6725_v12 = vld [vmem:[#allocation6 + $0x1d8] sm:$0xff]  ;;  %v6741_v17 = vld [vmem:[#allocation6 + $0x3e8] sm:$0xff] }
 0x3a4   :  { %9136 = vst [vmem:[#allocation22_spill] sm:$0xff] %v6711_v36  ;;  %2253 = vmatpush.msra.mxu0 %v6725_v12  ;;  %v6728_v36 = vld [vmem:[#allocation3 + $0x28] sm:$0xff] }
 0x3a5   :  { %9137 = vst [vmem:[#allocation99_spill] sm:$0xff] %v6715_v50  ;;  %2007 = vmatpush.msra.mxu1 %v6728_v36  ;;  %1968 = vmatpush.msrb.mxu3 %v6276_v45  ;;  %v6748_v45 = vld [vmem:[#allocation6 + $0x3c8] sm:$0xff] }
 0x3a6   :  { %9138 = vst [vmem:[#allocation40_spill] sm:$0xff] %v6718_v19  ;;  %2254 = vmatpush.msra.mxu0 %v6732_v14  ;;  %v6735_v19 = vld [vmem:[#allocation3 + $0x10] sm:$0xff]  ;;  %1969 = vmatmul.f32.vlgmr.msrb.gmra.mxu3 %v6624_v40 }
 0x3a7   :  { %9139 = vst [vmem:[#allocation100_spill] sm:$0xff] %v6721_v34  ;;  %2008 = vmatpush.msra.mxu1 %v6735_v19  ;;  %2152 = vmatpush.msra.mxu3 %v6281_v13  ;;  %v6755_v13 = vld [vmem:[#allocation6 + $0x3a8] sm:$0xff] }
 0x3a8   :  { %9140 = vst [vmem:[#allocation42_spill] sm:$0xff] %v6725_v12  ;;  %2009 = vmatmul.f32.vlgmr.msra.gmra.mxu1 %v6624_v40  ;;  %v6758_v40 = vld [vmem:[#allocation6 + $0x158] sm:$0xff] }
 0x3a9   :  { %9141 = vst [vmem:[#allocation103_spill] sm:$0xff] %v6728_v36  ;;  %2192 = vmatpush.msrb.mxu1 %v6741_v17  ;;  %v6744_v36 = vld [vmem:[#allocation6 + $0x198] sm:$0xff]  ;;  %2153 = vmatpush.msra.mxu3 %v6286_v42  ;;  %v6762_v42 = vld [vmem:[#allocation6 + $0x388] sm:$0xff] }
 0x3aa   :  { %9142 = vst [vmem:[#allocation45_spill] sm:$0xff] %v6732_v14  ;;  %2255 = vmatpush.msra.mxu0 %v6744_v36 }
 0x3ab   :  { %9143 = vst [vmem:[#allocation49_spill] sm:$0xff] %v6735_v19  ;;  %2193 = vmatpush.msrb.mxu1 %v6748_v45  ;;  %v6751_v19 = vld [vmem:[#allocation6 + $0x178] sm:$0xff]  ;;  %2154 = vmatpush.msra.mxu3 %v6291_v16  ;;  %v6769_v16 = vld [vmem:[#allocation6 + $0x368] sm:$0xff] }
 0x3ac   :  { %9144 = vst [vmem:[#allocation53_spill] sm:$0xff] %v6741_v17  ;;  %2256 = vmatpush.msra.mxu0 %v6751_v19 }
 0x3ad   :  { %9145 = vst [vmem:[#allocation57_spill] sm:$0xff] %v6744_v36  ;;  %2194 = vmatpush.msrb.mxu1 %v6755_v13  ;;  %2155 = vmatpush.msra.mxu3 %v6296_v3  ;;  %v6776_v3 = vld [vmem:[#allocation6 + $0x348] sm:$0xff] }
 0x3ae   :  { %9146 = vst [vmem:[#allocation23_spill] sm:$0xff] %v6748_v45  ;;  %2257 = vmatpush.msra.mxu0 %v6758_v40  ;;  %v6765_v45 = vld [vmem:[#allocation6 + $0x138] sm:$0xff] }
 0x3af   :  { %9147 = vst [vmem:[#allocation61_spill] sm:$0xff] %v6751_v19  ;;  %2195 = vmatpush.msrb.mxu1 %v6762_v42  ;;  %2156 = vmatpush.msra.mxu3 %v6301_v47  ;;  %v6785_v47 = vld [vmem:[#allocation6 + $0x328] sm:$0xff]  ;;  %v9213_v19 = vld [vmem:[#allocation47_spill] sm:$0xff] }
 0x3b0   :  { %9148 = vst [vmem:[#allocation24_spill] sm:$0xff] %v6755_v13  ;;  %2258 = vmatpush.msra.mxu0 %v6765_v45  ;;  %v6772_v13 = vld [vmem:[#allocation6 + $0x118] sm:$0xff] }
 0x3b1   :  { %9149 = vst [vmem:[#allocation65_spill] sm:$0xff] %v6758_v40  ;;  %2196 = vmatpush.msrb.mxu1 %v6769_v16  ;;  %2157 = vmatpush.msra.mxu3 %v6306_v32  ;;  %v6792_v32 = vld [vmem:[#allocation6 + $0x308] sm:$0xff] }
 0x3b2   :  { %9150 = vst [vmem:[#allocation25_spill] sm:$0xff] %v6762_v42  ;;  %2259 = vmatpush.msra.mxu0 %v6772_v13  ;;  %v6779_v42 = vld [vmem:[#allocation6 + $0xf8] sm:$0xff] }
 0x3b3   :  { %9151 = vst [vmem:[#allocation69_spill] sm:$0xff] %v6765_v45  ;;  %2197 = vmatpush.msrb.mxu1 %v6776_v3  ;;  %v6782_v45 = vld [vmem:[#allocation6 + $0x320] sm:$0xff] }
 0x3b4   :  { %9152 = vst [vmem:[#allocation26_spill] sm:$0xff] %v6769_v16  ;;  %2260 = vmatpush.msra.mxu0 %v6779_v42  ;;  %2158 = vmatpush.msra.mxu3 %v6782_v45  ;;  %v6788_v16 = vld [vmem:[#allocation6 + $0xd8] sm:$0xff] }
 0x3b5   :  { %9153 = vst [vmem:[#allocation73_spill] sm:$0xff] %v6772_v13  ;;  %2198 = vmatpush.msrb.mxu1 %v6785_v47 }
 0x3b6   :  { %9154 = vst [vmem:[#allocation27_spill] sm:$0xff] %v6776_v3  ;;  %2261 = vmatpush.msra.mxu0 %v6788_v16  ;;  %2159 = vmatpush.msra.mxu3 %v6314_v48  ;;  %v6795_v3 = vld [vmem:[#allocation6 + $0xb8] sm:$0xff]  ;;  %v6806_v48 = vld [vmem:[#allocation6 + $0x2c8] sm:$0xff] }
 0x3b7   :  { %9155 = vst [vmem:[#allocation76_spill] sm:$0xff] %v6779_v42  ;;  %2199 = vmatpush.msrb.mxu1 %v6792_v32 }
 0x3b8   :  { %9156 = vst [vmem:[#allocation29_spill] sm:$0xff] %v6782_v45  ;;  %2262 = vmatpush.msra.mxu0 %v6795_v3  ;;  %2160 = vmatpush.msra.mxu3 %v6319_v43  ;;  %v6799_v45 = vld [vmem:[#allocation6 + $0x2e8] sm:$0xff] }
 0x3b9   :  { %9157 = vst [vmem:[#allocation79_spill] sm:$0xff] %v6785_v47  ;;  %2200 = vmatpush.msrb.mxu1 %v6799_v45  ;;  %v6802_v47 = vld [vmem:[#allocation6 + $0x98] sm:$0xff]  ;;  %v6813_v43 = vld [vmem:[#allocation6 + $0x2a8] sm:$0xff] }
 0x3ba   :  { %9158 = vst [vmem:[#allocation31_spill] sm:$0xff] %v6788_v16  ;;  %2263 = vmatpush.msra.mxu0 %v6802_v47  ;;  %2161 = vmatpush.msra.mxu3 %v6324_v0  ;;  %v6820_v0 = vld [vmem:[#allocation6 + $0x288] sm:$0xff] }
 0x3bb   :  { %9159 = vst [vmem:[#allocation82_spill] sm:$0xff] %v6792_v32  ;;  %2201 = vmatpush.msrb.mxu1 %v6806_v48  ;;  %v6809_v32 = vld [vmem:[#allocation6 + $0x78] sm:$0xff] }
 0x3bc   :  { %9160 = vst [vmem:[#allocation33_spill] sm:$0xff] %v6795_v3  ;;  %2264 = vmatpush.msra.mxu0 %v6809_v32  ;;  %v9165_v3 = vld [vmem:[#allocation13_spill] sm:$0xff] }
 0x3bd   :  { %9161 = vst [vmem:[#allocation85_spill] sm:$0xff] %v6799_v45  ;;  %2162 = vmatpush.msra.mxu3 %v9165_v3  ;;  %2202 = vmatpush.msrb.mxu1 %v6813_v43  ;;  %v6816_v45 = vld [vmem:[#allocation6 + $0x58] sm:$0xff]  ;;  %v6829_v3 = vld [vmem:[#allocation6 + $0x268] sm:$0xff] }
 0x3be   :  { %9162 = vst [vmem:[#allocation35_spill] sm:$0xff] %v6802_v47  ;;  %2265 = vmatpush.msra.mxu0 %v6816_v45  ;;  %v9168_v47 = vld [vmem:[#allocation51_spill] sm:$0xff] }
 0x3bf   :  { %9163 = vst [vmem:[#allocation88_spill] sm:$0xff] %v6806_v48  ;;  %2163 = vmatpush.msra.mxu3 %v9168_v47  ;;  %2203 = vmatpush.msrb.mxu1 %v6820_v0  ;;  %v6823_v48 = vld [vmem:[#allocation6 + $0x38] sm:$0xff]  ;;  %v6835_v47 = vld [vmem:[#allocation6 + $0x240] sm:$0xff] }
 0x3c0   :  { %9164 = vst [vmem:[#allocation37_spill] sm:$0xff] %v6809_v32  ;;  %2266 = vmatpush.msra.mxu0 %v6823_v48  ;;  %v6826_v32 = vld [vmem:[#allocation6 + $0x260] sm:$0xff] }
 0x3c1   :  { %9166 = vst [vmem:[#allocation91_spill] sm:$0xff] %v6813_v43  ;;  %2164 = vmatpush.msra.mxu3 %v6826_v32  ;;  %2204 = vmatpush.msrb.mxu1 %v6829_v3  ;;  %v6832_v43 = vld [vmem:[#allocation6 + $0x18] sm:$0xff] }
 0x3c2   :  { %9167 = vst [vmem:[#allocation39_spill] sm:$0xff] %v6816_v45  ;;  %2267 = vmatpush.msra.mxu0 %v6832_v43  ;;  %v9212_v45 = vld [vmem:[#allocation12_spill] sm:$0xff] }
 0x3c3   :  { %9169 = vst [vmem:[#allocation94_spill] sm:$0xff] %v6820_v0  ;;  %2165 = vmatpush.msra.mxu3 %v6835_v47  ;;  %v6838_v0 = vld [vmem:[#allocation6 + $0x248] sm:$0xff] }
 0x3c4   :  { %9170 = vst [vmem:[#allocation41_spill] sm:$0xff] %v6823_v48  ;;  %2205 = vmatpush.msrb.mxu1 %v6838_v0  ;;  %v6841_v48 = vld [vmem:[#allocation6 + $0x220] sm:$0xff] }
 0x3c5   :  { %9171 = vst [vmem:[#allocation97_spill] sm:$0xff] %v6826_v32  ;;  %2166 = vmatpush.msra.mxu3 %v6841_v48  ;;  %v6844_v32 = vld [vmem:[#allocation6 + $0x228] sm:$0xff] }
 0x3c6   :  { %9172 = vst [vmem:[#allocation43_spill] sm:$0xff] %v6829_v3  ;;  %2206 = vmatpush.msrb.mxu1 %v6844_v32  ;;  %v6847_v3 = vld [vmem:[#allocation6 + $0x200] sm:$0xff] }
 0x3c7   :  { %9173 = vst [vmem:[#allocation101_spill] sm:$0xff] %v6832_v43  ;;  %2167 = vmatpush.msra.mxu3 %v6847_v3  ;;  %v6850_v43 = vld [vmem:[#allocation6 + $0x208] sm:$0xff] }
 0x3c8   :  { %9174 = vst [vmem:[#allocation46_spill] sm:$0xff] %v6835_v47  ;;  %2207 = vmatpush.msrb.mxu1 %v6850_v43  ;;  %v6853_v47 = vld [vmem:[#allocation6 + $0x3f0] sm:$0xff] }
 0x3c9   :  { %9175 = vst [vmem:[#allocation102_spill] sm:$0xff] %v6838_v0  ;;  %2232 = vmatpush.msrb.mxu3 %v6853_v47  ;;  %v6856_v0 = vld [vmem:[#allocation6 + $0x3f8] sm:$0xff] }
 0x3ca   :  { %9176 = vst [vmem:[#allocation50_spill] sm:$0xff] %v6841_v48  ;;  %2272 = vmatpush.msra.mxu1 %v6856_v0  ;;  %v6859_v48 = vld [vmem:[#allocation6 + $0x3d0] sm:$0xff] }
 0x3cb   :  { %9177 = vst [vmem:[#allocation54_spill] sm:$0xff] %v6844_v32  ;;  %2233 = vmatpush.msrb.mxu3 %v6859_v48  ;;  %v6862_v32 = vld [vmem:[#allocation6 + $0x3d8] sm:$0xff] }
 0x3cc   :  { %9178 = vst [vmem:[#allocation58_spill] sm:$0xff] %v6847_v3  ;;  %2273 = vmatpush.msra.mxu1 %v6862_v32  ;;  %v6865_v3 = vld [vmem:[#allocation6 + $0x3b0] sm:$0xff] }
 0x3cd   :  { %9179 = vst [vmem:[#allocation62_spill] sm:$0xff] %v6850_v43  ;;  %2234 = vmatpush.msrb.mxu3 %v6865_v3  ;;  %v6868_v43 = vld [vmem:[#allocation6 + $0x3b8] sm:$0xff] }
 0x3ce   :  { %9180 = vst [vmem:[#allocation66_spill] sm:$0xff] %v6853_v47  ;;  %2274 = vmatpush.msra.mxu1 %v6868_v43  ;;  %v6871_v47 = vld [vmem:[#allocation6 + $0x390] sm:$0xff] }
 0x3cf   :  { %9181 = vst [vmem:[#allocation70_spill] sm:$0xff] %v6856_v0  ;;  %2235 = vmatpush.msrb.mxu3 %v6871_v47  ;;  %v6874_v0 = vld [vmem:[#allocation6 + $0x398] sm:$0xff] }
 0x3d0   :  { %9182 = vst [vmem:[#allocation98_spill] sm:$0xff] %v6859_v48  ;;  %2275 = vmatpush.msra.mxu1 %v6874_v0  ;;  %v6877_v48 = vld [vmem:[#allocation6 + $0x370] sm:$0xff] }
 0x3d1   :  { %9183 = vst [vmem:[#allocation44_spill] sm:$0xff] %v6862_v32  ;;  %2236 = vmatpush.msrb.mxu3 %v6877_v48  ;;  %v6880_v32 = vld [vmem:[#allocation6 + $0x378] sm:$0xff] }
 0x3d2   :  { %9184 = vst [vmem:[#allocation48_spill] sm:$0xff] %v6865_v3  ;;  %2276 = vmatpush.msra.mxu1 %v6880_v32  ;;  %v6883_v3 = vld [vmem:[#allocation6 + $0x350] sm:$0xff] }
 0x3d3   :  { %9185 = vst [vmem:[#allocation104_spill] sm:$0xff] %v6868_v43  ;;  %2237 = vmatpush.msrb.mxu3 %v6883_v3  ;;  %v6886_v43 = vld [vmem:[#allocation6 + $0x358] sm:$0xff] }
 0x3d4   :  { %9186 = vst [vmem:[#allocation105_spill] sm:$0xff] %v6871_v47  ;;  %2277 = vmatpush.msra.mxu1 %v6886_v43  ;;  %v6889_v47 = vld [vmem:[#allocation6 + $0x330] sm:$0xff] }
 0x3d5   :  { %9187 = vst [vmem:[#allocation106_spill] sm:$0xff] %v6874_v0  ;;  %2238 = vmatpush.msrb.mxu3 %v6889_v47  ;;  %v6892_v0 = vld [vmem:[#allocation6 + $0x338] sm:$0xff] }
 0x3d6   :  { %9188 = vst [vmem:[#allocation107_spill] sm:$0xff] %v6877_v48  ;;  %2278 = vmatpush.msra.mxu1 %v6892_v0  ;;  %v6895_v48 = vld [vmem:[#allocation6 + $0x310] sm:$0xff] }
 0x3d7   :  { %9189 = vst [vmem:[#allocation108_spill] sm:$0xff] %v6880_v32  ;;  %2239 = vmatpush.msrb.mxu3 %v6895_v48  ;;  %v6898_v32 = vld [vmem:[#allocation6 + $0x318] sm:$0xff] }
 0x3d8   :  { %9190 = vst [vmem:[#allocation109_spill] sm:$0xff] %v6883_v3  ;;  %2279 = vmatpush.msra.mxu1 %v6898_v32  ;;  %v6901_v3 = vld [vmem:[#allocation6 + $0x2f0] sm:$0xff] }
 0x3d9   :  { %9191 = vst [vmem:[#allocation110_spill] sm:$0xff] %v6886_v43  ;;  %2240 = vmatpush.msrb.mxu3 %v6901_v3  ;;  %v6904_v43 = vld [vmem:[#allocation6 + $0x2f8] sm:$0xff] }
 0x3da   :  { %9192 = vst [vmem:[#allocation111_spill] sm:$0xff] %v6889_v47  ;;  %2280 = vmatpush.msra.mxu1 %v6904_v43  ;;  %v6907_v47 = vld [vmem:[#allocation6 + $0x2d0] sm:$0xff] }
 0x3db   :  { %9193 = vst [vmem:[#allocation112_spill] sm:$0xff] %v6892_v0  ;;  %2241 = vmatpush.msrb.mxu3 %v6907_v47  ;;  %v6910_v0 = vld [vmem:[#allocation6 + $0x2d8] sm:$0xff]  ;;  %v1777_v13 = vpop.f32.mrf.mxu0 }
 0x3dc   :  { %9194 = vst [vmem:[#allocation113_spill] sm:$0xff] %v6895_v48  ;;  %2281 = vmatpush.msra.mxu1 %v6910_v0  ;;  %v6913_v48 = vld [vmem:[#allocation6 + $0x2b0] sm:$0xff] }
 0x3dd   :  { %9195 = vst [vmem:[#allocation114_spill] sm:$0xff] %v6898_v32  ;;  %2242 = vmatpush.msrb.mxu3 %v6913_v48  ;;  %v6916_v32 = vld [vmem:[#allocation6 + $0x2b8] sm:$0xff] }
 0x3de   :  { %9196 = vst [vmem:[#allocation115_spill] sm:$0xff] %v6901_v3  ;;  %2282 = vmatpush.msra.mxu1 %v6916_v32  ;;  %v6919_v3 = vld [vmem:[#allocation6 + $0x290] sm:$0xff] }
 0x3df   :  { %9197 = vst [vmem:[#allocation116_spill] sm:$0xff] %v6904_v43  ;;  %2243 = vmatpush.msrb.mxu3 %v6919_v3  ;;  %v6922_v43 = vld [vmem:[#allocation6 + $0x298] sm:$0xff] }
 0x3e0   :  { %9198 = vst [vmem:[#allocation117_spill] sm:$0xff] %v6907_v47  ;;  %2283 = vmatpush.msra.mxu1 %v6922_v43  ;;  %v6925_v47 = vld [vmem:[#allocation6 + $0x270] sm:$0xff] }
 0x3e1   :  { %9199 = vst [vmem:[#allocation118_spill] sm:$0xff] %v6910_v0  ;;  %2244 = vmatpush.msrb.mxu3 %v6925_v47  ;;  %v6928_v0 = vld [vmem:[#allocation6 + $0x278] sm:$0xff] }
 0x3e2   :  { %9200 = vst [vmem:[#allocation119_spill] sm:$0xff] %v6913_v48  ;;  %2284 = vmatpush.msra.mxu1 %v6928_v0  ;;  %v6931_v48 = vld [vmem:[#allocation6 + $0x250] sm:$0xff] }
 0x3e3   :  { %9201 = vst [vmem:[#allocation120_spill] sm:$0xff] %v6916_v32  ;;  %2245 = vmatpush.msrb.mxu3 %v6931_v48  ;;  %v6934_v32 = vld [vmem:[#allocation6 + $0x258] sm:$0xff] }
 0x3e4   :  { %9202 = vst [vmem:[#allocation121_spill] sm:$0xff] %v6919_v3  ;;  %2285 = vmatpush.msra.mxu1 %v6934_v32  ;;  %v6937_v3 = vld [vmem:[#allocation6 + $0x230] sm:$0xff] }
 0x3e5   :  { %9203 = vst [vmem:[#allocation122_spill] sm:$0xff] %v6922_v43  ;;  %2246 = vmatpush.msrb.mxu3 %v6937_v3  ;;  %v6940_v43 = vld [vmem:[#allocation6 + $0x238] sm:$0xff] }
 0x3e6   :  { %9204 = vst [vmem:[#allocation123_spill] sm:$0xff] %v6925_v47  ;;  %2286 = vmatpush.msra.mxu1 %v6940_v43  ;;  %v6943_v47 = vld [vmem:[#allocation6 + $0x210] sm:$0xff] }
 0x3e7   :  { %9205 = vst [vmem:[#allocation124_spill] sm:$0xff] %v6928_v0  ;;  %2247 = vmatpush.msrb.mxu3 %v6943_v47  ;;  %v6946_v0 = vld [vmem:[#allocation6 + $0x218] sm:$0xff] }
 0x3e8   :  { %9206 = vst [vmem:[#allocation125_spill] sm:$0xff] %v6931_v48  ;;  %2287 = vmatpush.msra.mxu1 %v6946_v0 }
 0x3e9   :  { %9207 = vst [vmem:[#allocation126_spill] sm:$0xff] %v6934_v32  ;;  %v1817_v32 = vpop.f32.mrf.mxu2 }
 0x3ea   :  { %9208 = vst [vmem:[#allocation127_spill] sm:$0xff] %v6937_v3 }
 0x3eb   :  { %9209 = vst [vmem:[#allocation128_spill] sm:$0xff] %v6940_v43 }
 0x3ec   :  { %9210 = vst [vmem:[#allocation129_spill] sm:$0xff] %v6943_v47  ;;  %v1857_v47 = vpop.f32.mrf.mxu0 }
 0x3ed   :  { %9211 = vst [vmem:[#allocation130_spill] sm:$0xff] %v6946_v0 }
 0x3f1   :  { %v1897_v62 = vpop.f32.mrf.mxu2 }
 0x403   :  { %v1797_v48 = vpop.f32.mrf.mxu1 }
 0x404   :  { %v1798_v16 = vadd.f32 %v1797_v48, %v9212_v45 }
 0x406   :  { %v1818_v42 = vadd.f32 %v1817_v32, %v1798_v16  ;;  %v6954_v16 = vld [vmem:[#allocation2 + $0x4] ss:$8 sm:$0x7] }
 0x408   :  { %v3666_v40 = vmul.f32 -1.442695, %v1818_v42  ;;  %v6956_v42 = vld [vmem:[#allocation2 + $0x1c] ss:$8 sm:$0x7] }
 0x409   :  { %v1757_v3 = vpop.f32.mrf.mxu3 }
 0x40a   :  { %v1758_v36 = vadd.f32 %v1757_v3, %v9213_v19  ;;  %3817 = vpow2.f32 %v3666_v40  ;;  %v2059_v40 = vrot.slane %v6956_v42, 1 }
 0x40c   :  { %v1778_v17 = vadd.f32 %v1777_v13, %v1758_v36  ;;  %v1990_v48 = vpop.f32.mrf.mxu0  ;;  %v2058_v36 = vrot.slane %v6954_v16, 1 }
 0x40d   :  { %v2063_v32 = vrot.slane %v1990_v48, 1 }
 0x40e   :  { %v3665_v43 = vmul.f32 -1.442695, %v1778_v17 }
 0x40f   :  { %v2066_v45 = vadd.f32 %v2063_v32, %v2059_v40 }
 0x410   :  { %3819 = vpow2.f32 %v3665_v43  ;;  %v3818_v14 = vpop.eup %3817  ;;  %v2065_v43 = vadd.f32 %v2058_v36, %v1990_v48 }
 0x411   :  { %v6951_v34 = vadd.f32 1.0, %v3818_v14  ;;  %v1877_v14 = vpop.f32.mrf.mxu1  ;;  %v3670_v51 = vmul.f32 -1.442695, %v2066_v45 }
 0x412   :  { %v1878_v28 = vadd.f32 %v1877_v14, %v9214_v33  ;;  %v3669_v21 = vmul.f32 -1.442695, %v2065_v43 }
 0x413   :  { %vm1928_vm15 = vweird.f32 %v6951_v34 }
 0x414   :  { %v1898_v32 = vadd.f32 %v1897_v62, %v1878_v28 }
 0x416   :  { %v3820_v12 = vpop.eup %3819 }
 0x417   :  { %v1903_v0 = vadd.f32 1.0, %v3820_v12  ;;  %v1837_v12 = vpop.f32.mrf.mxu3 }
 0x418   :  { %v1838_v38 = vadd.f32 %v1837_v12, %v5495_v58 }
 0x419   :  { %3821 = vrcp.f32 %v1903_v0  ;;  %v1915_v7 = vand.u32 2147483648, %v1903_v0  ;;  %v1913_v9 = vand.u32 2147483647, %v1903_v0  ;;  %vm1909_vm11 = vweird.f32 %v1903_v0 }
 0x41a   :  { %3823 = vrcp.f32 %v6951_v34 }
 0x41b   :  { %v1916_v36 = vor.u32 1.1754944e-38, %v1915_v7  ;;  %vm1914_vm13 = vcmp.eq.f32.partialorder %v1913_v9, 8.507059e+37  ;;  %3825 = vpow2.f32 %v3669_v21 }
 0x41c   :  { %3827 = vpow2.f32 %v3670_v51 }
 0x41f   :  { %v3822_v3 = vpop.eup %3821 }
 0x420   :  { %v6959_v17 = vpop.eup %3823  ;;  %v1905_v13 = vmul.f32 %v3822_v3, %v1903_v0  ;;  %vm1910_vm10 = vweird.f32 %v3822_v3 }
 0x421   :  { %v1924_v50 = vmul.f32 %v6959_v17, %v6951_v34  ;;  %vm1911_vm12 = vmor %vm1909_vm11, %vm1910_vm10  ;;  %v3826_v62 = vpop.eup %3825  ;;  %vm1929_vm14 = vweird.f32 %v6959_v17 }
 0x422   :  { %v1906_v19 = vsub.f32 1.0, %v1905_v13  ;;  %vm1930_vm0 = vmor %vm1928_vm15, %vm1929_vm14  ;;  %v6974_v51 = vadd.f32 1.0, %v3826_v62 }
 0x423   :  { %v1925_v48 = vsub.f32 1.0, %v1924_v50 }
 0x424   :  { %v1907_v63 = vmul.f32 %v3822_v3, %v1906_v19  ;;  %v1858_v19 = vadd.f32 %v1857_v47, %v1838_v38  ;;  %v1934_v38 = vand.u32 2147483648, %v6951_v34 }
 0x426   :  { %v1908_v11 = vadd.f32 %v3822_v3, %v1907_v63  ;;  %v1926_v63 = vmul.f32 %v6959_v17, %v1925_v48  ;;  %v1935_v47 = vor.u32 1.1754944e-38, %v1934_v38 }
 0x428   :  { %v1912_v13 = vsel %vm1911_vm12, %v3822_v3, %v1908_v11  ;;  %v1927_v21 = vadd.f32 %v6959_v17, %v1926_v63  ;;  %v3828_v11 = vpop.eup %3827  ;;  %vm2080_vm12 = vweird.f32 %v6974_v51 }
 0x429   :  { %v1917_v40 = vsel %vm1914_vm13, %v1916_v36, %v1912_v13  ;;  %v1970_v41 = vpop.f32.mrf.mxu3  ;;  %v6976_v9 = vadd.f32 1.0, %v3828_v11 }
 0x42a   :  { %v1938_v14 = vmul.f32 %v1917_v40, %v1898_v32  ;;  %v2014_v33 = vrot.slane %v1970_v41, 1  ;;  %v2016_v45 = vadd.f32 %v1970_v41, %v6954_v16  ;;  %v1932_v41 = vand.u32 2147483647, %v6951_v34 }
 0x42b   :  { %v1931_v28 = vsel %vm1930_vm0, %v6959_v17, %v1927_v21  ;;  %vm2095_vm14 = vweird.f32 %v6976_v9 }
 0x42c   :  { %v1939_v0 = vadd.f32 %v1938_v14, %v1858_v19  ;;  %v2017_v43 = vadd.f32 %v2014_v33, %v6956_v42  ;;  %v3667_v50 = vmul.f32 -1.442695, %v2016_v45  ;;  %vm1933_vm1 = vcmp.eq.f32.partialorder %v1932_v41, 8.507059e+37  ;;  %v9218_v41 = vld [vmem:[#allocation59_spill] sm:$0xff] }
 0x42d   :  { %v1936_v32 = vsel %vm1933_vm1, %v1935_v47, %v1931_v28  ;;  %v7005_v28 = vld [vmem:[%s8184_s4] ss:$0 sm:$0xff] }
 0x42e   :  { %3829 = vtanh.f32 %v1939_v0  ;;  %v3668_v7 = vmul.f32 -1.442695, %v2017_v43  ;;  %v2010_v0 = vpop.f32.mrf.mxu1 }
 0x42f   :  { %3831 = vpow2.f32 %v3667_v50  ;;  %v9215_v50 = vld [vmem:[#allocation55_spill] sm:$0xff] }
 0x430   :  { %3833 = vpow2.f32 %v3668_v7  ;;  %v9216_v7 = vld [vmem:[#allocation14_spill] sm:$0xff] }
 0x431   :  { %3835 = vrcp.f32 %v6974_v51 }
 0x432   :  { %3837 = vrcp.f32 %v6976_v9 }
 0x434   :  { %v3830_v33 = vpop.eup %3829 }
 0x435   :  { %v3832_v3 = vpop.eup %3831  ;;  %v1941_v12 = vsub.f32 %v6411_v61, %v3830_v33 }
 0x436   :  { %v3834_v48 = vpop.eup %3833  ;;  %v2024_v36 = vadd.f32 1.0, %v3832_v3 }
 0x437   :  { %v2025_v34 = vadd.f32 1.0, %v3834_v48  ;;  %v1942_v13 = vmul.f32 %v1941_v12, %v1936_v32  ;;  %v6984_v17 = vpop.eup %3835  ;;  %v9219_v48 = vld [vmem:[#allocation15_spill] sm:$0xff] }
 0x438   :  { %3839 = vrcp.f32 %v2024_v36  ;;  %v6988_v61 = vpop.eup %3837  ;;  %v2076_v62 = vmul.f32 %v6984_v17, %v6974_v51  ;;  %vm2031_vm4 = vweird.f32 %v2024_v36  ;;  %vm2081_vm10 = vweird.f32 %v6984_v17 }
 0x439   :  { %3841 = vrcp.f32 %v2025_v34  ;;  %v6982_v40 = vadd.f32 %v3830_v33, %v1942_v13  ;;  %v2052_v38 = vand.u32 2147483648, %v2025_v34  ;;  %v2105_v33 = vadd.f32 %v7005_v28, %v2010_v0  ;;  %vm7036_vm13 = vmor %vm2080_vm12, %vm2081_vm10 }
 0x43a   :  { %v2050_v3 = vand.u32 2147483647, %v2025_v34  ;;  %v2077_v32 = vsub.f32 1.0, %v2076_v62  ;;  %vm2046_vm6 = vweird.f32 %v2025_v34  ;;  %vm2096_vm11 = vweird.f32 %v6988_v61 }
 0x43b   :  { %2168 = vmatmul.f32.vlgmr.msra.gmra.mxu3 %v6982_v40  ;;  %2208 = vmatmul.f32.vlgmr.msrb.gmra.mxu1 %v6982_v40  ;;  %vm7047_vm15 = vmor %vm2095_vm14, %vm2096_vm11 }
 0x43c   :  { %2365 = vmatpush.msra.mxu3 %v6415_v10  ;;  %2524 = vmatpush.msrb.mxu1 %v6418_v39  ;;  %v2091_v10 = vmul.f32 %v6988_v61, %v6976_v9  ;;  %v2037_v39 = vand.u32 2147483648, %v2024_v36  ;;  %vm2051_vm9 = vcmp.eq.f32.partialorder %v2050_v3, 8.507059e+37 }
 0x43e   :  { %v3840_v14 = vpop.eup %3839  ;;  %2366 = vmatpush.msra.mxu3 %v6424_v24  ;;  %2525 = vmatpush.msrb.mxu1 %v6427_v59  ;;  %v2035_v24 = vand.u32 2147483647, %v2024_v36  ;;  %v9217_v59 = vld [vmem:[#allocation56_spill] sm:$0xff]  ;;  %v2038_v13 = vor.u32 1.1754944e-38, %v2037_v39 }
 0x43f   :  { %v3842_v19 = vpop.eup %3841  ;;  %v2027_v63 = vmul.f32 %v3840_v14, %v2024_v36  ;;  %vm2032_vm2 = vweird.f32 %v3840_v14  ;;  %v2107_v36 = vrot.slane %v2105_v33, 1 }
 0x440   :  { %v2042_v45 = vmul.f32 %v3842_v19, %v2025_v34  ;;  %2367 = vmatpush.msra.mxu3 %v9215_v50  ;;  %2526 = vmatpush.msrb.mxu1 %v9216_v7  ;;  %vm2047_vm3 = vweird.f32 %v3842_v19  ;;  %vm2033_vm5 = vmor %vm2031_vm4, %vm2032_vm2  ;;  %vm2036_vm7 = vcmp.eq.f32.partialorder %v2035_v24, 8.507059e+37  ;;  %v2078_v34 = vmul.f32 %v6984_v17, %v2077_v32  ;;  %v9225_v24 = vld [vmem:[#allocation64_spill] sm:$0xff] }
 0x441   :  { %v2028_v43 = vsub.f32 1.0, %v2027_v63  ;;  %vm2048_vm8 = vmor %vm2046_vm6, %vm2047_vm3 }
 0x442   :  { %v2043_v21 = vsub.f32 1.0, %v2042_v45  ;;  %2368 = vmatpush.msra.mxu3 %v9217_v59  ;;  %2527 = vmatpush.msrb.mxu1 %v9218_v41  ;;  %v2092_v45 = vsub.f32 1.0, %v2091_v10 }
 0x443   :  { %v2029_v11 = vmul.f32 %v3840_v14, %v2028_v43  ;;  %2248 = vmatmul.f32.vlgmr.msrb.gmra.mxu3 %v6982_v40  ;;  %2288 = vmatmul.f32.vlgmr.msra.gmra.mxu1 %v6982_v40  ;;  %v2053_v43 = vor.u32 1.1754944e-38, %v2052_v38 }
 0x444   :  { %v2044_v47 = vmul.f32 %v3842_v19, %v2043_v21  ;;  %2369 = vmatpush.msra.mxu3 %v9219_v48  ;;  %2528 = vmatpush.msrb.mxu1 %v6461_v31  ;;  %v2111_v31 = vrot.slane %v6954_v16, 2  ;;  %v2099_v21 = vand.u32 2147483647, %v6976_v9 }
 0x445   :  { %v2030_v12 = vadd.f32 %v3840_v14, %v2029_v11  ;;  %v9224_v11 = vld [vmem:[#allocation16_spill] sm:$0xff] }
 0x446   :  { %v2045_v63 = vadd.f32 %v3842_v19, %v2044_v47  ;;  %2370 = vmatpush.msra.mxu3 %v6467_v4  ;;  %2529 = vmatpush.msrb.mxu1 %v6470_v53  ;;  %v2093_v4 = vmul.f32 %v6988_v61, %v2092_v45  ;;  %vm2100_vm1 = vcmp.eq.f32.partialorder %v2099_v21, 8.507059e+37  ;;  %v9236_v45 = vld [vmem:[#allocation75_spill] sm:$0xff] }
 0x447   :  { %v2034_v0 = vsel %vm2033_vm5, %v3840_v14, %v2030_v12  ;;  %v2112_v14 = vrot.slane %v6956_v42, 2  ;;  %v9253_v42 = vld [vmem:[#allocation92_spill] sm:$0xff] }
 0x448   :  { %v2039_v50 = vsel %vm2036_vm7, %v2038_v13, %v2034_v0  ;;  %v2049_v7 = vsel %vm2048_vm8, %v3842_v19, %v2045_v63  ;;  %2371 = vmatpush.msra.mxu3 %v6474_v23  ;;  %2530 = vmatpush.msrb.mxu1 %v6477_v49  ;;  %v2079_v23 = vadd.f32 %v6984_v17, %v2078_v34  ;;  %v2086_v49 = vand.u32 2147483648, %v6974_v51  ;;  %v9237_v0 = vld [vmem:[#allocation77_spill] sm:$0xff]  ;;  %v7153_v21 = vld [vmem:[#allocation3 + $0x60] sm:$0xff] }
 0x449   :  { %v2054_v62 = vsel %vm2051_vm9, %v2053_v43, %v2049_v7  ;;  %v2109_v39 = vmul.f32 %v2105_v33, %v2039_v50  ;;  %v2094_v16 = vadd.f32 %v6988_v61, %v2093_v4  ;;  %v9238_v43 = vld [vmem:[#allocation20_spill] sm:$0xff]  ;;  %v9239_v50 = vld [vmem:[#allocation78_spill] sm:$0xff]  ;;  %v9243_v34 = vld [vmem:[#allocation81_spill] sm:$0xff] }
 0x44a   :  { %v2110_v10 = vmul.f32 %v2107_v36, %v2054_v62  ;;  %2372 = vmatpush.msra.mxu3 %v6482_v55  ;;  %2531 = vmatpush.msrb.mxu1 %v6485_v20  ;;  %v9220_v55 = vld [vmem:[#allocation60_spill] sm:$0xff]  ;;  %v9221_v20 = vld [vmem:[#allocation63_spill] sm:$0xff]  ;;  %v2083_v38 = vsel %vm7036_vm13, %v6984_v17, %v2079_v23  ;;  %v2087_v41 = vor.u32 1.1754944e-38, %v2086_v49  ;;  %v9245_v4 = vld [vmem:[#allocation30_spill] sm:$0xff] }
 0x44b   :  { %v2115_v53 = vadd.f32 %v2111_v31, %v2109_v39  ;;  %v2098_v33 = vsel %vm7047_vm15, %v6988_v61, %v2094_v16  ;;  %v7123_v36 = vld [vmem:[#allocation3 + $0xd8] sm:$0xff]  ;;  %v9240_v7 = vld [vmem:[#allocation80_spill] sm:$0xff]  ;;  %v9241_v31 = vld [vmem:[#allocation21_spill] sm:$0xff] }
 0x44c   :  { %v2116_v19 = vadd.f32 %v2112_v14, %v2110_v10  ;;  %2373 = vmatpush.msra.mxu3 %v6490_v25  ;;  %2532 = vmatpush.msrb.mxu1 %v6493_v26  ;;  %v2084_v25 = vand.u32 2147483647, %v6974_v51  ;;  %v2101_v26 = vand.u32 2147483648, %v6976_v9  ;;  %v9228_v9 = vld [vmem:[#allocation67_spill] sm:$0xff]  ;;  %v9242_v39 = vld [vmem:[#allocation28_spill] sm:$0xff]  ;;  %v7141_v23 = vld [vmem:[#allocation3 + $0x90] sm:$0xff] }
 0x44d   :  { %3843 = vtanh.f32 %v2115_v53  ;;  %v7129_v62 = vld [vmem:[#allocation3 + $0xc0] sm:$0xff]  ;;  %v7135_v10 = vld [vmem:[#allocation3 + $0xa8] sm:$0xff] }
 0x44e   :  { %3845 = vtanh.f32 %v2116_v19  ;;  %2374 = vmatpush.msra.mxu3 %v9220_v55  ;;  %2533 = vmatpush.msrb.mxu1 %v9221_v20  ;;  %vm2085_vm0 = vcmp.eq.f32.partialorder %v2084_v25, 8.507059e+37  ;;  %v2102_v3 = vor.u32 1.1754944e-38, %v2101_v26  ;;  %v9244_v14 = vld [vmem:[#allocation83_spill] sm:$0xff]  ;;  %v9246_v53 = vld [vmem:[#allocation84_spill] sm:$0xff]  ;;  %v9247_v19 = vld [vmem:[#allocation86_spill] sm:$0xff] }
 0x44f   :  { %v2088_v17 = vsel %vm2085_vm0, %v2087_v41, %v2083_v38  ;;  %v9248_v49 = vld [vmem:[#allocation32_spill] sm:$0xff]  ;;  %v9249_v16 = vld [vmem:[#allocation87_spill] sm:$0xff]  ;;  %v9250_v55 = vld [vmem:[#allocation89_spill] sm:$0xff] }
 0x450   :  { %2375 = vmatpush.msra.mxu3 %v9224_v11  ;;  %2534 = vmatpush.msrb.mxu1 %v9225_v24  ;;  %v2103_v32 = vsel %vm2100_vm1, %v2102_v3, %v2098_v33  ;;  %v7147_v20 = vld [vmem:[#allocation3 + $0x78] sm:$0xff]  ;;  %v9254_v11 = vld [vmem:[#allocation36_spill] sm:$0xff]  ;;  %v9255_v24 = vld [vmem:[#allocation93_spill] sm:$0xff] }
 0x451   :  { %v9251_v25 = vld [vmem:[#allocation34_spill] sm:$0xff]  ;;  %v9256_v38 = vld [vmem:[#allocation95_spill] sm:$0xff]  ;;  %v7159_v51 = vld [vmem:[#allocation3 + $0x48] sm:$0xff] }
 0x452   :  { %2376 = vmatpush.msra.mxu3 %v6535_v18  ;;  %2535 = vmatpush.msrb.mxu1 %v9228_v9  ;;  %v9252_v26 = vld [vmem:[#allocation90_spill] sm:$0xff]  ;;  %v9258_v41 = vld [vmem:[#allocation96_spill] sm:$0xff] }
 0x453   :  { %v3844_v59 = vpop.eup %3843  ;;  %v9259_v33 = vld [vmem:[#allocation22_spill] sm:$0xff]  ;;  %v9261_v3 = vld [vmem:[#allocation40_spill] sm:$0xff] }
 0x454   :  { %v3846_v47 = vpop.eup %3845  ;;  %v2119_v12 = vsub.f32 %v6548_v2, %v3844_v59  ;;  %2377 = vmatpush.msra.mxu3 %v6542_v54  ;;  %2536 = vmatpush.msrb.mxu1 %v6545_v46  ;;  %v9229_v54 = vld [vmem:[#allocation17_spill] sm:$0xff]  ;;  %v9231_v2 = vld [vmem:[#allocation71_spill] sm:$0xff] }
 0x455   :  { %v2120_v48 = vsub.f32 %v6556_v1, %v3846_v47  ;;  %v7082_v1 = vld [vmem:[#allocation3 + $0x168] sm:$0xff]  ;;  %v7165_v9 = vld [vmem:[#allocation3 + $0x30] sm:$0xff] }
 0x456   :  { %v2121_v13 = vmul.f32 %v2119_v12, %v2088_v17  ;;  %2378 = vmatpush.msra.mxu3 %v6550_v5  ;;  %2537 = vmatpush.msrb.mxu1 %v6553_v30  ;;  %v9230_v5 = vld [vmem:[#allocation68_spill] sm:$0xff]  ;;  %v9232_v30 = vld [vmem:[#allocation18_spill] sm:$0xff] }
 0x457   :  { %v2122_v61 = vmul.f32 %v2120_v48, %v2103_v32  ;;  %v9262_v12 = vld [vmem:[#allocation100_spill] sm:$0xff]  ;;  %v7171_v17 = vld [vmem:[#allocation3 + $0x18] sm:$0xff] }
 0x458   :  { %v7062_v18 = vadd.f32 %v3844_v59, %v2121_v13  ;;  %2379 = vmatpush.msra.mxu3 %v6559_v52  ;;  %2538 = vmatpush.msrb.mxu1 %v6562_v22  ;;  %v7085_v52 = vld [vmem:[#allocation3 + $0x178] sm:$0xff]  ;;  %v7090_v22 = vld [vmem:[#allocation3 + $0x150] sm:$0xff]  ;;  %v7176_v13 = vld [vmem:[#allocation3] sm:$0xff] }
 0x459   :  { %v7064_v63 = vadd.f32 %v3846_v47, %v2122_v61  ;;  %v9257_v59 = vld [vmem:[#allocation38_spill] sm:$0xff]  ;;  %v9260_v47 = vld [vmem:[#allocation99_spill] sm:$0xff]  ;;  %v9265_v61 = vld [vmem:[#allocation45_spill] sm:$0xff] }
 0x45a   :  { %2127 = vst [vmem:[#allocation1] ss:$9 sm:$0xff] %v7062_v18  ;;  %2380 = vmatpush.msra.mxu3 %v6566_v44  ;;  %2539 = vmatpush.msrb.mxu1 %v6569_v27  ;;  %v7093_v44 = vld [vmem:[#allocation3 + $0x160] sm:$0xff]  ;;  %v7098_v27 = vld [vmem:[#allocation3 + $0x138] sm:$0xff] }
 0x45b   :  { %2129 = vst [vmem:[#allocation1 + $0x1] ss:$9 sm:$0xff] %v7064_v63  ;;  %v9263_v48 = vld [vmem:[#allocation42_spill] sm:$0xff]  ;;  %v9264_v32 = vld [vmem:[#allocation103_spill] sm:$0xff] }
 0x45c   :  { %2564 = vmatpush.msrb.mxu3 %v6572_v37  ;;  %2604 = vmatpush.msra.mxu1 %v6575_v35  ;;  %v7101_v37 = vld [vmem:[#allocation3 + $0x148] sm:$0xff] }
 0x45d   :  { %v9233_v35 = vld [vmem:[#allocation72_spill] sm:$0xff] }
 0x45e   :  { %2565 = vmatpush.msrb.mxu3 %v6578_v15  ;;  %2605 = vmatpush.msra.mxu1 %v6581_v56  ;;  %v7106_v15 = vld [vmem:[#allocation3 + $0x120] sm:$0xff]  ;;  %v7109_v56 = vld [vmem:[#allocation3 + $0x130] sm:$0xff] }
 0x460   :  { %2566 = vmatpush.msrb.mxu3 %v9229_v54  ;;  %2606 = vmatpush.msra.mxu1 %v9230_v5  ;;  %v9266_v54 = vld [vmem:[#allocation49_spill] sm:$0xff]  ;;  %v7181_v5 = vld [vmem:[#allocation6 + $0x3e0] sm:$0xff] }
 0x462   :  { %v2130_v46 = vld [vmem:[#allocation1] sm:$0xff]  ;;  %2567 = vmatpush.msrb.mxu3 %v9231_v2  ;;  %2607 = vmatpush.msra.mxu1 %v9232_v30  ;;  %v7186_v30 = vld [vmem:[#allocation6 + $0x3c0] sm:$0xff] }
 0x463   :  { %2148 = vmatmul.f32.vlgmr.msra.gmra.mxu2 %v2130_v46  ;;  %2340 = vst [vmem:[#allocation1] ss:$9 sm:$0xff] %v7062_v18  ;;  %2188 = vmatmul.f32.vlgmr.msrb.gmra.mxu0 %v2130_v46  ;;  %v9268_v2 = vld [vmem:[#allocation57_spill] sm:$0xff] }
 0x464   :  { %2342 = vst [vmem:[#allocation1 + $0x1] ss:$9 sm:$0xff] %v7064_v63  ;;  %2345 = vmatpush.msra.mxu2 %v7082_v1  ;;  %2385 = vmatpush.msrb.mxu0 %v7085_v52 }
 0x465   :  { %2568 = vmatpush.msrb.mxu3 %v6600_v57  ;;  %2608 = vmatpush.msra.mxu1 %v6603_v60  ;;  %v7112_v57 = vld [vmem:[#allocation3 + $0x108] sm:$0xff] }
 0x466   :  { %2346 = vmatpush.msra.mxu2 %v7090_v22  ;;  %2386 = vmatpush.msrb.mxu0 %v7093_v44 }
 0x467   :  { %2569 = vmatpush.msrb.mxu3 %v6608_v29  ;;  %2609 = vmatpush.msra.mxu1 %v6611_v8  ;;  %v9234_v8 = vld [vmem:[#allocation74_spill] sm:$0xff]  ;;  %v9235_v29 = vld [vmem:[#allocation19_spill] sm:$0xff] }
 0x468   :  { %2347 = vmatpush.msra.mxu2 %v7098_v27  ;;  %2387 = vmatpush.msrb.mxu0 %v7101_v37 }
 0x469   :  { %2570 = vmatpush.msrb.mxu3 %v6616_v6  ;;  %2610 = vmatpush.msra.mxu1 %v9233_v35  ;;  %v7117_v6 = vld [vmem:[#allocation3 + $0xf0] sm:$0xff]  ;;  %v9269_v35 = vld [vmem:[#allocation23_spill] sm:$0xff] }
 0x46a   :  { %2348 = vmatpush.msra.mxu2 %v7106_v15  ;;  %2388 = vmatpush.msrb.mxu0 %v7109_v56 }
 0x46b   :  { %2228 = vmatmul.f32.vlgmr.msrb.gmra.mxu2 %v2130_v46  ;;  %2268 = vmatmul.f32.vlgmr.msra.gmra.mxu0 %v2130_v46  ;;  %v2343_v60 = vld [vmem:[#allocation1] sm:$0xff] }
 0x46c   :  { %2349 = vmatpush.msra.mxu2 %v7112_v57  ;;  %2381 = vmatmul.f32.vlgmr.msra.gmra.mxu3 %v2343_v60  ;;  %v9267_v46 = vld [vmem:[#allocation53_spill] sm:$0xff] }
 0x46d   :  { %2389 = vmatpush.msrb.mxu0 %v9234_v8  ;;  %2571 = vmatpush.msrb.mxu3 %v9235_v29  ;;  %v9270_v8 = vld [vmem:[#allocation61_spill] sm:$0xff]  ;;  %v7191_v29 = vld [vmem:[#allocation6 + $0x3a0] sm:$0xff] }
 0x46e   :  { %2350 = vmatpush.msra.mxu2 %v7117_v6  ;;  %2611 = vmatpush.msra.mxu1 %v9236_v45  ;;  %v9272_v45 = vld [vmem:[#allocation65_spill] sm:$0xff] }
 0x46f   :  { %2390 = vmatpush.msrb.mxu0 %v9237_v0  ;;  %2572 = vmatpush.msrb.mxu3 %v9238_v43  ;;  %v7196_v0 = vld [vmem:[#allocation6 + $0x380] sm:$0xff]  ;;  %v9273_v43 = vld [vmem:[#allocation25_spill] sm:$0xff] }
 0x470   :  { %2351 = vmatpush.msra.mxu2 %v7123_v36  ;;  %2612 = vmatpush.msra.mxu1 %v9239_v50  ;;  %v9274_v50 = vld [vmem:[#allocation69_spill] sm:$0xff] }
 0x471   :  { %2391 = vmatpush.msrb.mxu0 %v9240_v7  ;;  %2573 = vmatpush.msrb.mxu3 %v9241_v31  ;;  %v7201_v7 = vld [vmem:[#allocation6 + $0x360] sm:$0xff]  ;;  %v9275_v31 = vld [vmem:[#allocation26_spill] sm:$0xff] }
 0x472   :  { %2352 = vmatpush.msra.mxu2 %v7129_v62  ;;  %2613 = vmatpush.msra.mxu1 %v9242_v39  ;;  %v9276_v39 = vld [vmem:[#allocation73_spill] sm:$0xff] }
 0x473   :  { %2392 = vmatpush.msrb.mxu0 %v9243_v34  ;;  %2574 = vmatpush.msrb.mxu3 %v9244_v14  ;;  %v7206_v34 = vld [vmem:[#allocation6 + $0x340] sm:$0xff] }
 0x474   :  { %2353 = vmatpush.msra.mxu2 %v7135_v10  ;;  %2614 = vmatpush.msra.mxu1 %v9245_v4  ;;  %v9277_v14 = vld [vmem:[#allocation27_spill] sm:$0xff]  ;;  %v9278_v4 = vld [vmem:[#allocation76_spill] sm:$0xff] }
 0x475   :  { %2393 = vmatpush.msrb.mxu0 %v9246_v53  ;;  %2575 = vmatpush.msrb.mxu3 %v9247_v19  ;;  %v9279_v53 = vld [vmem:[#allocation29_spill] sm:$0xff]  ;;  %v9280_v19 = vld [vmem:[#allocation79_spill] sm:$0xff] }
 0x476   :  { %2354 = vmatpush.msra.mxu2 %v7141_v23  ;;  %2615 = vmatpush.msra.mxu1 %v9248_v49  ;;  %v9281_v49 = vld [vmem:[#allocation31_spill] sm:$0xff] }
 0x477   :  { %2394 = vmatpush.msrb.mxu0 %v9249_v16  ;;  %2576 = vmatpush.msrb.mxu3 %v9250_v55  ;;  %v7214_v16 = vld [vmem:[#allocation6 + $0x300] sm:$0xff]  ;;  %v9282_v55 = vld [vmem:[#allocation82_spill] sm:$0xff] }
 0x478   :  { %2355 = vmatpush.msra.mxu2 %v7147_v20  ;;  %2616 = vmatpush.msra.mxu1 %v9251_v25  ;;  %v9283_v25 = vld [vmem:[#allocation33_spill] sm:$0xff] }
 0x479   :  { %2395 = vmatpush.msrb.mxu0 %v9252_v26  ;;  %2577 = vmatpush.msrb.mxu3 %v9253_v42  ;;  %v7219_v26 = vld [vmem:[#allocation6 + $0x2e0] sm:$0xff]  ;;  %v9285_v42 = vld [vmem:[#allocation85_spill] sm:$0xff] }
 0x47a   :  { %2356 = vmatpush.msra.mxu2 %v7153_v21  ;;  %2617 = vmatpush.msra.mxu1 %v9254_v11  ;;  %9284 = vst [vmem:[#allocation131_spill] sm:$0xff] %v7219_v26  ;;  %v9286_v11 = vld [vmem:[#allocation35_spill] sm:$0xff] }
 0x47b   :  { %2396 = vmatpush.msrb.mxu0 %v9255_v24  ;;  %2578 = vmatpush.msrb.mxu3 %v9256_v38  ;;  %v7224_v24 = vld [vmem:[#allocation6 + $0x2c0] sm:$0xff] }
 0x47c   :  { %2357 = vmatpush.msra.mxu2 %v7159_v51  ;;  %2618 = vmatpush.msra.mxu1 %v9257_v59  ;;  %9287 = vst [vmem:[#allocation13_spill] sm:$0xff] %v7224_v24  ;;  %v9288_v38 = vld [vmem:[#allocation88_spill] sm:$0xff]  ;;  %v9289_v59 = vld [vmem:[#allocation37_spill] sm:$0xff] }
 0x47d   :  { %2397 = vmatpush.msrb.mxu0 %v9258_v41  ;;  %2579 = vmatpush.msrb.mxu3 %v9259_v33  ;;  %v7229_v41 = vld [vmem:[#allocation6 + $0x2a0] sm:$0xff] }
 0x47e   :  { %2358 = vmatpush.msra.mxu2 %v7165_v9  ;;  %2619 = vmatpush.msra.mxu1 %v9262_v12  ;;  %9290 = vst [vmem:[#allocation51_spill] sm:$0xff] %v7229_v41  ;;  %v9291_v33 = vld [vmem:[#allocation91_spill] sm:$0xff]  ;;  %v9294_v12 = vld [vmem:[#allocation94_spill] sm:$0xff] }
 0x47f   :  { %2644 = vmatpush.msra.mxu3 %v9260_v47  ;;  %2398 = vmatpush.msrb.mxu0 %v9261_v3  ;;  %v9292_v47 = vld [vmem:[#allocation39_spill] sm:$0xff] }
 0x480   :  { %2359 = vmatpush.msra.mxu2 %v7171_v17  ;;  %v7234_v3 = vld [vmem:[#allocation6 + $0x280] sm:$0xff] }
 0x481   :  { %2645 = vmatpush.msra.mxu3 %v9263_v48  ;;  %2399 = vmatpush.msrb.mxu0 %v9264_v32  ;;  %9293 = vst [vmem:[#allocation55_spill] sm:$0xff] %v7234_v3  ;;  %v9295_v48 = vld [vmem:[#allocation41_spill] sm:$0xff] }
 0x482   :  { %2360 = vmatpush.msra.mxu2 %v7176_v13  ;;  %v9296_v32 = vld [vmem:[#allocation97_spill] sm:$0xff] }
 0x483   :  { %2646 = vmatpush.msra.mxu3 %v9265_v61  ;;  %2400 = vmatpush.msrb.mxu0 %v9266_v54  ;;  %v9297_v61 = vld [vmem:[#allocation43_spill] sm:$0xff]  ;;  %v9298_v54 = vld [vmem:[#allocation101_spill] sm:$0xff] }
 0x484   :  { %2361 = vmatmul.f32.vlgmr.msra.gmra.mxu2 %v2343_v60  ;;  %2401 = vmatmul.f32.vlgmr.msrb.gmra.mxu0 %v2343_v60  ;;  %v9271_v60 = vld [vmem:[#allocation24_spill] sm:$0xff] }
 0x485   :  { %2544 = vmatpush.msrb.mxu2 %v7181_v5  ;;  %2584 = vmatpush.msra.mxu0 %v9267_v46  ;;  %v9299_v46 = vld [vmem:[#allocation46_spill] sm:$0xff] }
 0x486   :  { %2647 = vmatpush.msra.mxu3 %v9268_v2  ;;  %v9300_v2 = vld [vmem:[#allocation102_spill] sm:$0xff] }
 0x487   :  { %2545 = vmatpush.msrb.mxu2 %v7186_v30  ;;  %2585 = vmatpush.msra.mxu0 %v9269_v35  ;;  %v9301_v35 = vld [vmem:[#allocation50_spill] sm:$0xff] }
 0x488   :  { %2648 = vmatpush.msra.mxu3 %v9270_v8  ;;  %v9302_v8 = vld [vmem:[#allocation54_spill] sm:$0xff] }
 0x489   :  { %2546 = vmatpush.msrb.mxu2 %v7191_v29  ;;  %2586 = vmatpush.msra.mxu0 %v9271_v60  ;;  %v9303_v60 = vld [vmem:[#allocation58_spill] sm:$0xff] }
 0x48a   :  { %2649 = vmatpush.msra.mxu3 %v9272_v45  ;;  %v9304_v45 = vld [vmem:[#allocation62_spill] sm:$0xff] }
 0x48b   :  { %2547 = vmatpush.msrb.mxu2 %v7196_v0  ;;  %2587 = vmatpush.msra.mxu0 %v9273_v43  ;;  %v9305_v43 = vld [vmem:[#allocation66_spill] sm:$0xff] }
 0x48c   :  { %2650 = vmatpush.msra.mxu3 %v9274_v50  ;;  %v9306_v50 = vld [vmem:[#allocation70_spill] sm:$0xff] }
 0x48d   :  { %2548 = vmatpush.msrb.mxu2 %v7201_v7  ;;  %2588 = vmatpush.msra.mxu0 %v9275_v31  ;;  %v9307_v31 = vld [vmem:[#allocation98_spill] sm:$0xff] }
 0x48e   :  { %2651 = vmatpush.msra.mxu3 %v9276_v39  ;;  %v9308_v39 = vld [vmem:[#allocation44_spill] sm:$0xff] }
 0x48f   :  { %2549 = vmatpush.msrb.mxu2 %v7206_v34  ;;  %2589 = vmatpush.msra.mxu0 %v9277_v14  ;;  %v9309_v14 = vld [vmem:[#allocation48_spill] sm:$0xff] }
 0x490   :  { %2652 = vmatpush.msra.mxu3 %v9278_v4  ;;  %v9310_v4 = vld [vmem:[#allocation104_spill] sm:$0xff] }
 0x491   :  { %2550 = vmatpush.msrb.mxu2 %v9279_v53  ;;  %2590 = vmatpush.msra.mxu0 %v9280_v19  ;;  %v9311_v53 = vld [vmem:[#allocation105_spill] sm:$0xff]  ;;  %v9312_v19 = vld [vmem:[#allocation106_spill] sm:$0xff] }
 0x492   :  { %2653 = vmatpush.msra.mxu3 %v9281_v49  ;;  %v9313_v49 = vld [vmem:[#allocation107_spill] sm:$0xff] }
 0x493   :  { %2551 = vmatpush.msrb.mxu2 %v7214_v16  ;;  %2591 = vmatpush.msra.mxu0 %v9282_v55  ;;  %v9314_v55 = vld [vmem:[#allocation108_spill] sm:$0xff] }
 0x494   :  { %2654 = vmatpush.msra.mxu3 %v9283_v25  ;;  %v9315_v25 = vld [vmem:[#allocation109_spill] sm:$0xff] }
 0x495   :  { %2552 = vmatpush.msrb.mxu2 %v7219_v26  ;;  %2592 = vmatpush.msra.mxu0 %v9285_v42  ;;  %v9316_v42 = vld [vmem:[#allocation110_spill] sm:$0xff] }
 0x496   :  { %2655 = vmatpush.msra.mxu3 %v9286_v11  ;;  %v9317_v11 = vld [vmem:[#allocation111_spill] sm:$0xff] }
 0x497   :  { %2553 = vmatpush.msrb.mxu2 %v7224_v24  ;;  %2593 = vmatpush.msra.mxu0 %v9288_v38  ;;  %v9318_v38 = vld [vmem:[#allocation112_spill] sm:$0xff] }
 0x498   :  { %2656 = vmatpush.msra.mxu3 %v9289_v59  ;;  %v9319_v59 = vld [vmem:[#allocation113_spill] sm:$0xff] }
 0x499   :  { %2554 = vmatpush.msrb.mxu2 %v7229_v41  ;;  %2594 = vmatpush.msra.mxu0 %v9291_v33  ;;  %v9320_v33 = vld [vmem:[#allocation114_spill] sm:$0xff] }
 0x49a   :  { %2657 = vmatpush.msra.mxu3 %v9292_v47  ;;  %v9321_v47 = vld [vmem:[#allocation115_spill] sm:$0xff] }
 0x49b   :  { %2555 = vmatpush.msrb.mxu2 %v7234_v3  ;;  %2595 = vmatpush.msra.mxu0 %v9294_v12  ;;  %v9322_v12 = vld [vmem:[#allocation116_spill] sm:$0xff] }
 0x49c   :  { %2658 = vmatpush.msra.mxu3 %v9295_v48  ;;  %v9323_v48 = vld [vmem:[#allocation117_spill] sm:$0xff] }
 0x49d   :  { %2556 = vmatpush.msrb.mxu2 %v9296_v32  ;;  %2596 = vmatpush.msra.mxu0 %v9297_v61  ;;  %v9324_v32 = vld [vmem:[#allocation118_spill] sm:$0xff]  ;;  %v9325_v61 = vld [vmem:[#allocation119_spill] sm:$0xff] }
 0x49e   :  { %2659 = vmatpush.msra.mxu3 %v9298_v54  ;;  %v9326_v54 = vld [vmem:[#allocation120_spill] sm:$0xff] }
 0x49f   :  { %2557 = vmatpush.msrb.mxu2 %v9299_v46  ;;  %2597 = vmatpush.msra.mxu0 %v9300_v2  ;;  %v9327_v46 = vld [vmem:[#allocation121_spill] sm:$0xff]  ;;  %v9328_v2 = vld [vmem:[#allocation122_spill] sm:$0xff] }
 0x4a1   :  { %2558 = vmatpush.msrb.mxu2 %v9301_v35  ;;  %2598 = vmatpush.msra.mxu0 %v9302_v8  ;;  %v9329_v35 = vld [vmem:[#allocation123_spill] sm:$0xff]  ;;  %v9330_v8 = vld [vmem:[#allocation124_spill] sm:$0xff] }
 0x4a3   :  { %2559 = vmatpush.msrb.mxu2 %v9303_v60  ;;  %2599 = vmatpush.msra.mxu0 %v9304_v45  ;;  %v9331_v60 = vld [vmem:[#allocation125_spill] sm:$0xff]  ;;  %v9332_v45 = vld [vmem:[#allocation126_spill] sm:$0xff] }
 0x4a5   :  { %2624 = vmatpush.msra.mxu2 %v9305_v43  ;;  %2664 = vmatpush.msrb.mxu0 %v9306_v50  ;;  %v9333_v43 = vld [vmem:[#allocation127_spill] sm:$0xff]  ;;  %v9334_v50 = vld [vmem:[#allocation128_spill] sm:$0xff] }
 0x4a7   :  { %2625 = vmatpush.msra.mxu2 %v9307_v31  ;;  %2665 = vmatpush.msrb.mxu0 %v9308_v39  ;;  %v9335_v31 = vld [vmem:[#allocation129_spill] sm:$0xff]  ;;  %v9336_v39 = vld [vmem:[#allocation130_spill] sm:$0xff] }
 0x4a9   :  { %2626 = vmatpush.msra.mxu2 %v9309_v14  ;;  %2666 = vmatpush.msrb.mxu0 %v9310_v4  ;;  %v9337_v4 = vld [vmem:[#allocation12_spill] sm:$0xff] }
 0x4ab   :  { %2627 = vmatpush.msra.mxu2 %v9311_v53  ;;  %2667 = vmatpush.msrb.mxu0 %v9312_v19 }
 0x4ad   :  { %2628 = vmatpush.msra.mxu2 %v9313_v49  ;;  %2668 = vmatpush.msrb.mxu0 %v9314_v55 }
 0x4af   :  { %2629 = vmatpush.msra.mxu2 %v9315_v25  ;;  %2669 = vmatpush.msrb.mxu0 %v9316_v42  ;;  %v9338_v42 = vld [vmem:[#allocation47_spill] sm:$0xff] }
 0x4b1   :  { %2630 = vmatpush.msra.mxu2 %v9317_v11  ;;  %2670 = vmatpush.msrb.mxu0 %v9318_v38 }
 0x4b3   :  { %2631 = vmatpush.msra.mxu2 %v9319_v59  ;;  %2671 = vmatpush.msrb.mxu0 %v9320_v33 }
 0x4b5   :  { %2632 = vmatpush.msra.mxu2 %v9321_v47  ;;  %2672 = vmatpush.msrb.mxu0 %v9322_v12 }
 0x4b7   :  { %2633 = vmatpush.msra.mxu2 %v9323_v48  ;;  %2673 = vmatpush.msrb.mxu0 %v9324_v32 }
 0x4b8   :  { %v2209_v19 = vpop.f32.mrf.mxu1 }
 0x4b9   :  { %2634 = vmatpush.msra.mxu2 %v9325_v61  ;;  %2674 = vmatpush.msrb.mxu0 %v9326_v54 }
 0x4bb   :  { %2635 = vmatpush.msra.mxu2 %v9327_v46  ;;  %2675 = vmatpush.msrb.mxu0 %v9328_v2  ;;  %v7285_v2 = vld [vmem:[#allocation2 + $0x5] ss:$8 sm:$0x7] }
 0x4bd   :  { %2636 = vmatpush.msra.mxu2 %v9329_v35  ;;  %2676 = vmatpush.msrb.mxu0 %v9330_v8 }
 0x4be   :  { %v2169_v38 = vpop.f32.mrf.mxu3 }
 0x4bf   :  { %2637 = vmatpush.msra.mxu2 %v9331_v60  ;;  %2677 = vmatpush.msrb.mxu0 %v9332_v45  ;;  %v7289_v45 = vld [vmem:[#allocation2 + $0x1d] ss:$8 sm:$0x7] }
 0x4c1   :  { %2638 = vmatpush.msra.mxu2 %v9333_v43  ;;  %2678 = vmatpush.msrb.mxu0 %v9334_v50 }
 0x4c3   :  { %2639 = vmatpush.msra.mxu2 %v9335_v31  ;;  %2679 = vmatpush.msrb.mxu0 %v9336_v39  ;;  %v2450_v39 = vrot.slane %v7285_v2, 1 }
 0x4c6   :  { %v2249_v48 = vpop.f32.mrf.mxu3 }
 0x4e0   :  { %v2189_v14 = vpop.f32.mrf.mxu0 }
 0x4e1   :  { %v2190_v53 = vadd.f32 %v2189_v14, %v9337_v4 }
 0x4e3   :  { %v2210_v49 = vadd.f32 %v2209_v19, %v2190_v53  ;;  %v9339_v53 = vld [vmem:[#allocation52_spill] sm:$0xff] }
 0x4e5   :  { %v3672_v55 = vmul.f32 -1.442695, %v2210_v49 }
 0x4e6   :  { %v2149_v25 = vpop.f32.mrf.mxu2 }
 0x4e7   :  { %v2150_v11 = vadd.f32 %v2149_v25, %v9338_v42  ;;  %3847 = vpow2.f32 %v3672_v55  ;;  %v2451_v55 = vrot.slane %v7289_v45, 1 }
 0x4e8   :  { %v2269_v8 = vpop.f32.mrf.mxu0 }
 0x4e9   :  { %v2170_v59 = vadd.f32 %v2169_v38, %v2150_v11  ;;  %v2270_v19 = vadd.f32 %v2269_v8, %v9339_v53 }
 0x4eb   :  { %v3671_v33 = vmul.f32 -1.442695, %v2170_v59 }
 0x4ed   :  { %3849 = vpow2.f32 %v3671_v33  ;;  %v3848_v47 = vpop.eup %3847 }
 0x4ee   :  { %v7282_v32 = vadd.f32 1.0, %v3848_v47  ;;  %v2229_v43 = vpop.f32.mrf.mxu2 }
 0x4ef   :  { %v2382_v54 = vpop.f32.mrf.mxu3  ;;  %v2230_v47 = vadd.f32 %v2229_v43, %v5495_v58 }
 0x4f0   :  { %v2455_v50 = vrot.slane %v2382_v54, 1  ;;  %v2457_v38 = vadd.f32 %v2450_v39, %v2382_v54  ;;  %vm2320_vm7 = vweird.f32 %v7282_v32 }
 0x4f1   :  { %v2250_v26 = vadd.f32 %v2249_v48, %v2230_v47  ;;  %v7326_v47 = vld [vmem:[#allocation6 + $0x1e0] sm:$0xff] }
 0x4f2   :  { %v2458_v59 = vadd.f32 %v2455_v50, %v2451_v55  ;;  %v3675_v8 = vmul.f32 -1.442695, %v2457_v38 }
 0x4f3   :  { %v3850_v12 = vpop.eup %3849 }
 0x4f4   :  { %v2295_v61 = vadd.f32 1.0, %v3850_v12  ;;  %v2289_v12 = vpop.f32.mrf.mxu1  ;;  %v3676_v41 = vmul.f32 -1.442695, %v2458_v59 }
 0x4f5   :  { %v2290_v42 = vadd.f32 %v2289_v12, %v2270_v19 }
 0x4f6   :  { %3851 = vrcp.f32 %v2295_v61  ;;  %v2307_v49 = vand.u32 2147483648, %v2295_v61  ;;  %v2305_v11 = vand.u32 2147483647, %v2295_v61  ;;  %vm2301_vm3 = vweird.f32 %v2295_v61 }
 0x4f7   :  { %3853 = vrcp.f32 %v7282_v32 }
 0x4f8   :  { %v2308_v4 = vor.u32 1.1754944e-38, %v2307_v49  ;;  %vm2306_vm5 = vcmp.eq.f32.partialorder %v2305_v11, 8.507059e+37  ;;  %3855 = vpow2.f32 %v3675_v8  ;;  %v7332_v8 = vld [vmem:[#allocation6 + $0x1c0] sm:$0xff] }
 0x4f9   :  { %3857 = vpow2.f32 %v3676_v41 }
 0x4fc   :  { %v3852_v46 = vpop.eup %3851 }
 0x4fd   :  { %v7287_v35 = vpop.eup %3853  ;;  %v2297_v60 = vmul.f32 %v3852_v46, %v2295_v61  ;;  %vm2302_vm2 = vweird.f32 %v3852_v46 }
 0x4fe   :  { %v2316_v14 = vmul.f32 %v7287_v35, %v7282_v32  ;;  %vm2303_vm4 = vmor %vm2301_vm3, %vm2302_vm2  ;;  %vm2321_vm6 = vweird.f32 %v7287_v35 }
 0x4ff   :  { %v2298_v31 = vsub.f32 1.0, %v2297_v60  ;;  %vm2322_vm8 = vmor %vm2320_vm7, %vm2321_vm6 }
 0x500   :  { %v2317_v60 = vsub.f32 1.0, %v2316_v14 }
 0x501   :  { %v2299_v25 = vmul.f32 %v3852_v46, %v2298_v31 }
 0x502   :  { %v2318_v54 = vmul.f32 %v7287_v35, %v2317_v60  ;;  %v7329_v60 = vld [vmem:[#allocation3 + $0x158] sm:$0xff] }
 0x503   :  { %v2300_v33 = vadd.f32 %v3852_v46, %v2299_v25 }
 0x505   :  { %v2304_v3 = vsel %vm2303_vm4, %v3852_v46, %v2300_v33 }
 0x506   :  { %v2309_v53 = vsel %vm2306_vm5, %v2308_v4, %v2304_v3  ;;  %v2319_v4 = vadd.f32 %v7287_v35, %v2318_v54 }
 0x507   :  { %v2362_v24 = vpop.f32.mrf.mxu2  ;;  %v2330_v31 = vmul.f32 %v2309_v53, %v2290_v42  ;;  %v2326_v42 = vand.u32 2147483648, %v7282_v32 }
 0x508   :  { %v2406_v50 = vrot.slane %v2362_v24, 1  ;;  %v2408_v61 = vadd.f32 %v2362_v24, %v7285_v2  ;;  %v2324_v24 = vand.u32 2147483647, %v7282_v32  ;;  %v2323_v48 = vsel %vm2322_vm8, %v7287_v35, %v2319_v4 }
 0x509   :  { %v2331_v39 = vadd.f32 %v2330_v31, %v2250_v26  ;;  %v3856_v26 = vpop.eup %3855  ;;  %v2327_v53 = vor.u32 1.1754944e-38, %v2326_v42 }
 0x50a   :  { %v2409_v43 = vadd.f32 %v2406_v50, %v7289_v45  ;;  %v3673_v14 = vmul.f32 -1.442695, %v2408_v61  ;;  %v3858_v41 = vpop.eup %3857  ;;  %v7307_v55 = vadd.f32 1.0, %v3856_v26  ;;  %vm2325_vm9 = vcmp.eq.f32.partialorder %v2324_v24, 8.507059e+37  ;;  %v7338_v61 = vld [vmem:[#allocation3 + $0x140] sm:$0xff]  ;;  %v7350_v26 = vld [vmem:[#allocation3 + $0x128] sm:$0xff] }
 0x50b   :  { %3859 = vtanh.f32 %v2331_v39  ;;  %v2328_v11 = vsel %vm2325_vm9, %v2327_v53, %v2323_v48  ;;  %v7311_v59 = vadd.f32 1.0, %v3858_v41  ;;  %v7341_v39 = vld [vmem:[#allocation6 + $0x1a0] sm:$0xff]  ;;  %9340 = vst [vmem:[#allocation14_spill] sm:$0xff] %v7350_v26 }
 0x50c   :  { %3861 = vpow2.f32 %v3673_v14  ;;  %v3674_v3 = vmul.f32 -1.442695, %v2409_v43  ;;  %v2402_v14 = vpop.f32.mrf.mxu0  ;;  %v7353_v41 = vld [vmem:[#allocation6 + $0x180] sm:$0xff]  ;;  %vm2472_vm3 = vweird.f32 %v7307_v55 }
 0x50d   :  { %9341 = vst [vmem:[#allocation56_spill] sm:$0xff] %v7353_v41  ;;  %vm2487_vm6 = vweird.f32 %v7311_v59 }
 0x50e   :  { %3863 = vpow2.f32 %v3674_v3 }
 0x511   :  { %v3860_v46 = vpop.eup %3859 }
 0x512   :  { %v3862_v19 = vpop.eup %3861  ;;  %v2333_v49 = vsub.f32 %v6982_v40, %v3860_v46  ;;  %v7323_v40 = vld [vmem:[#allocation3 + $0x170] sm:$0xff] }
 0x513   :  { %v7309_v25 = vadd.f32 1.0, %v3862_v19 }
 0x514   :  { %v3864_v38 = vpop.eup %3863  ;;  %v2334_v32 = vmul.f32 %v2333_v49, %v2328_v11  ;;  %v2497_v49 = vadd.f32 %v7005_v28, %v2402_v14  ;;  %v7375_v14 = vld [vmem:[#allocation6 + $0x140] sm:$0xff] }
 0x515   :  { %v7313_v33 = vadd.f32 1.0, %v3864_v38  ;;  %3865 = vrcp.f32 %v7309_v25  ;;  %v2429_v24 = vand.u32 2147483648, %v7309_v25  ;;  %vm2423_vm11 = vweird.f32 %v7309_v25  ;;  %v7364_v38 = vld [vmem:[#allocation3 + $0x110] sm:$0xff] }
 0x516   :  { %3867 = vrcp.f32 %v7307_v55  ;;  %v7317_v35 = vadd.f32 %v3860_v46, %v2334_v32  ;;  %v2427_v46 = vand.u32 2147483647, %v7309_v25  ;;  %9342 = vst [vmem:[#allocation59_spill] sm:$0xff] %v7364_v38  ;;  %v7367_v32 = vld [vmem:[#allocation6 + $0x160] sm:$0xff] }
 0x517   :  { %3869 = vrcp.f32 %v7313_v33  ;;  %v2444_v11 = vand.u32 2147483648, %v7313_v33  ;;  %9343 = vst [vmem:[#allocation15_spill] sm:$0xff] %v7367_v32  ;;  %v2430_v28 = vor.u32 1.1754944e-38, %v2429_v24  ;;  %vm2438_vm15 = vweird.f32 %v7313_v33 }
 0x518   :  { %3871 = vrcp.f32 %v7311_v59  ;;  %2560 = vmatmul.f32.vlgmr.msrb.gmra.mxu2 %v7317_v35  ;;  %2600 = vmatmul.f32.vlgmr.msra.gmra.mxu0 %v7317_v35  ;;  %vm2428_vm14 = vcmp.eq.f32.partialorder %v2427_v46, 8.507059e+37 }
 0x519   :  { %2757 = vmatpush.msrb.mxu2 %v7323_v40  ;;  %2916 = vmatpush.msra.mxu0 %v7326_v47  ;;  %v2445_v24 = vor.u32 1.1754944e-38, %v2444_v11  ;;  %v7391_v11 = vld [vmem:[#allocation6 + $0x100] sm:$0xff] }
 0x51b   :  { %v3866_v12 = vpop.eup %3865  ;;  %2758 = vmatpush.msrb.mxu2 %v7329_v60  ;;  %2917 = vmatpush.msra.mxu0 %v7332_v8 }
 0x51c   :  { %v7335_v31 = vpop.eup %3867  ;;  %v2419_v54 = vmul.f32 %v3866_v12, %v7309_v25  ;;  %vm2424_vm10 = vweird.f32 %v3866_v12  ;;  %v7372_v25 = vld [vmem:[#allocation3 + $0xf8] sm:$0xff] }
 0x51d   :  { %v3870_v50 = vpop.eup %3869  ;;  %2759 = vmatpush.msrb.mxu2 %v7338_v61  ;;  %2918 = vmatpush.msra.mxu0 %v7341_v39  ;;  %v2468_v42 = vmul.f32 %v7335_v31, %v7307_v55  ;;  %vm2425_vm13 = vmor %vm2423_vm11, %vm2424_vm10  ;;  %9344 = vst [vmem:[#allocation60_spill] sm:$0xff] %v7372_v25  ;;  %vm2473_vm2 = vweird.f32 %v7335_v31 }
 0x51e   :  { %v7344_v43 = vpop.eup %3871  ;;  %v2420_v3 = vsub.f32 1.0, %v2419_v54  ;;  %v2434_v4 = vmul.f32 %v3870_v50, %v7313_v33  ;;  %vm2439_vm12 = vweird.f32 %v3870_v50  ;;  %vm7423_vm5 = vmor %vm2472_vm3, %vm2473_vm2 }
 0x51f   :  { %2760 = vmatpush.msrb.mxu2 %v7350_v26  ;;  %2919 = vmatpush.msra.mxu0 %v7353_v41  ;;  %v2483_v19 = vmul.f32 %v7344_v43, %v7311_v59  ;;  %v2469_v41 = vsub.f32 1.0, %v2468_v42  ;;  %vm2440_vm0 = vmor %vm2438_vm15, %vm2439_vm12  ;;  %v7381_v26 = vld [vmem:[#allocation3 + $0xe0] sm:$0xff]  ;;  %vm2488_vm4 = vweird.f32 %v7344_v43 }
 0x520   :  { %v2421_v48 = vmul.f32 %v3866_v12, %v2420_v3  ;;  %v2435_v53 = vsub.f32 1.0, %v2434_v4  ;;  %2640 = vmatmul.f32.vlgmr.msra.gmra.mxu2 %v7317_v35  ;;  %2680 = vmatmul.f32.vlgmr.msrb.gmra.mxu0 %v7317_v35  ;;  %v2442_v4 = vand.u32 2147483647, %v7313_v33  ;;  %vm7441_vm7 = vmor %vm2487_vm6, %vm2488_vm4 }
 0x521   :  { %2761 = vmatpush.msrb.mxu2 %v7364_v38  ;;  %2920 = vmatpush.msra.mxu0 %v7367_v32  ;;  %v2470_v33 = vmul.f32 %v7335_v31, %v2469_v41  ;;  %v7399_v41 = vld [vmem:[#allocation6 + $0xe0] sm:$0xff] }
 0x522   :  { %v2422_v54 = vadd.f32 %v3866_v12, %v2421_v48  ;;  %v2436_v3 = vmul.f32 %v3870_v50, %v2435_v53  ;;  %v2484_v48 = vsub.f32 1.0, %v2483_v19  ;;  %v2503_v53 = vrot.slane %v7285_v2, 2  ;;  %v7388_v2 = vld [vmem:[#allocation3 + $0xc8] sm:$0xff] }
 0x523   :  { %2762 = vmatpush.msrb.mxu2 %v7372_v25  ;;  %2921 = vmatpush.msra.mxu0 %v7375_v14  ;;  %v7384_v25 = vld [vmem:[#allocation6 + $0x120] sm:$0xff]  ;;  %vm2443_vm1 = vcmp.eq.f32.partialorder %v2442_v4, 8.507059e+37  ;;  %v7404_v4 = vld [vmem:[#allocation3 + $0x98] sm:$0xff] }
 0x524   :  { %v2426_v38 = vsel %vm2425_vm13, %v3866_v12, %v2422_v54  ;;  %v2437_v32 = vadd.f32 %v3870_v50, %v2436_v3  ;;  %9345 = vst [vmem:[#allocation63_spill] sm:$0xff] %v7384_v25  ;;  %v2499_v12 = vrot.slane %v2497_v49, 1 }
 0x525   :  { %v2431_v42 = vsel %vm2428_vm14, %v2430_v28, %v2426_v38  ;;  %2763 = vmatpush.msrb.mxu2 %v7381_v26  ;;  %2922 = vmatpush.msra.mxu0 %v7384_v25  ;;  %v2504_v38 = vrot.slane %v7289_v45, 2  ;;  %v2485_v25 = vmul.f32 %v7344_v43, %v2484_v48  ;;  %v7407_v45 = vld [vmem:[#allocation6 + $0xc0] sm:$0xff]  ;;  %v2478_v48 = vand.u32 2147483648, %v7307_v55 }
 0x526   :  { %v2441_v46 = vsel %vm2440_vm0, %v3870_v50, %v2437_v32  ;;  %v2501_v54 = vmul.f32 %v2497_v49, %v2431_v42  ;;  %v7396_v50 = vld [vmem:[#allocation3 + $0xb0] sm:$0xff]  ;;  %v2471_v32 = vadd.f32 %v7335_v31, %v2470_v33  ;;  %v7433_v33 = vld [vmem:[#allocation3 + $0x68] sm:$0xff] }
 0x527   :  { %v2446_v19 = vsel %vm2443_vm1, %v2445_v24, %v2441_v46  ;;  %2764 = vmatpush.msrb.mxu2 %v7388_v2  ;;  %2923 = vmatpush.msra.mxu0 %v7391_v11  ;;  %v2486_v42 = vadd.f32 %v7344_v43, %v2485_v25  ;;  %v7415_v24 = vld [vmem:[#allocation3 + $0x80] sm:$0xff]  ;;  %9349 = vst [vmem:[#allocation64_spill] sm:$0xff] %v7433_v33 }
 0x528   :  { %v2502_v3 = vmul.f32 %v2499_v12, %v2446_v19  ;;  %v2507_v28 = vadd.f32 %v2503_v53, %v2501_v54  ;;  %v2476_v53 = vand.u32 2147483647, %v7307_v55  ;;  %v7418_v12 = vld [vmem:[#allocation6 + $0xa0] sm:$0xff]  ;;  %v2493_v55 = vand.u32 2147483648, %v7311_v59 }
 0x529   :  { %2765 = vmatpush.msrb.mxu2 %v7396_v50  ;;  %2924 = vmatpush.msra.mxu0 %v7399_v41  ;;  %9346 = vst [vmem:[#allocation16_spill] sm:$0xff] %v7418_v12  ;;  %v2475_v25 = vsel %vm7423_vm5, %v7335_v31, %v2471_v32  ;;  %v2491_v54 = vand.u32 2147483647, %v7311_v59  ;;  %v7436_v19 = vld [vmem:[#allocation6 + $0x80] sm:$0xff]  ;;  %v2490_v59 = vsel %vm7441_vm7, %v7344_v43, %v2486_v42 }
 0x52a   :  { %v2508_v49 = vadd.f32 %v2504_v38, %v2502_v3  ;;  %3873 = vtanh.f32 %v2507_v28  ;;  %9350 = vst [vmem:[#allocation67_spill] sm:$0xff] %v7436_v19  ;;  %v2479_v3 = vor.u32 1.1754944e-38, %v2478_v48  ;;  %vm2477_vm8 = vcmp.eq.f32.partialorder %v2476_v53, 8.507059e+37  ;;  %v7452_v32 = vld [vmem:[#allocation6 + $0x60] sm:$0xff] }
 0x52b   :  { %2766 = vmatpush.msrb.mxu2 %v7404_v4  ;;  %2925 = vmatpush.msra.mxu0 %v7407_v45  ;;  %9353 = vst [vmem:[#allocation17_spill] sm:$0xff] %v7452_v32  ;;  %vm2492_vm9 = vcmp.eq.f32.partialorder %v2491_v54, 8.507059e+37  ;;  %v7476_v54 = vld [vmem:[#allocation6] sm:$0xff] }
 0x52c   :  { %3875 = vtanh.f32 %v2508_v49  ;;  %v7449_v49 = vld [vmem:[#allocation3 + $0x50] sm:$0xff]  ;;  %v2480_v46 = vsel %vm2477_vm8, %v2479_v3, %v2475_v25  ;;  %v7473_v25 = vld [vmem:[#allocation3 + $0x8] sm:$0xff] }
 0x52d   :  { %2767 = vmatpush.msrb.mxu2 %v7415_v24  ;;  %2926 = vmatpush.msra.mxu0 %v7418_v12  ;;  %v7456_v12 = vld [vmem:[#allocation3 + $0x38] sm:$0xff]  ;;  %v7489_v3 = vld [vmem:[#allocation6 + $0x1d0] sm:$0xff] }
 0x52f   :  { %2768 = vmatpush.msrb.mxu2 %v7433_v33  ;;  %2927 = vmatpush.msra.mxu0 %v7436_v19  ;;  %v2494_v19 = vor.u32 1.1754944e-38, %v2493_v55  ;;  %v7467_v55 = vld [vmem:[#allocation6 + $0x20] sm:$0xff] }
 0x530   :  { %v3874_v38 = vpop.eup %3873 }
 0x531   :  { %v2511_v31 = vsub.f32 %v7062_v18, %v3874_v38  ;;  %2769 = vmatpush.msrb.mxu2 %v7449_v49  ;;  %2928 = vmatpush.msra.mxu0 %v7452_v32  ;;  %v7459_v18 = vld [vmem:[#allocation6 + $0x40] sm:$0xff]  ;;  %v2495_v43 = vsel %vm2492_vm9, %v2494_v19, %v2490_v59  ;;  %v7482_v19 = vld [vmem:[#allocation6 + $0x1f0] sm:$0xff]  ;;  %v7492_v59 = vld [vmem:[#allocation6 + $0x1a8] sm:$0xff] }
 0x532   :  { %v3876_v48 = vpop.eup %3875  ;;  %v7464_v32 = vld [vmem:[#allocation3 + $0x20] sm:$0xff] }
 0x533   :  { %v2512_v53 = vsub.f32 %v7064_v63, %v3876_v48  ;;  %v2513_v33 = vmul.f32 %v2511_v31, %v2480_v46  ;;  %2770 = vmatpush.msrb.mxu2 %v7456_v12  ;;  %2929 = vmatpush.msra.mxu0 %v7459_v18  ;;  %v7495_v31 = vld [vmem:[#allocation6 + $0x1b0] sm:$0xff] }
 0x534   :  { %v7501_v46 = vld [vmem:[#allocation6 + $0x190] sm:$0xff] }
 0x535   :  { %v2514_v42 = vmul.f32 %v2512_v53, %v2495_v43  ;;  %v7462_v28 = vadd.f32 %v3874_v38, %v2513_v33  ;;  %2771 = vmatpush.msrb.mxu2 %v7464_v32  ;;  %2930 = vmatpush.msra.mxu0 %v7467_v55  ;;  %v7479_v33 = vld [vmem:[#allocation6 + $0x1e8] sm:$0xff]  ;;  %9355 = vst [vmem:[#allocation71_spill] sm:$0xff] %v7501_v46 }
 0x536   :  { %v7486_v38 = vld [vmem:[#allocation6 + $0x1c8] sm:$0xff] }
 0x537   :  { %v7470_v63 = vadd.f32 %v3876_v48, %v2514_v42  ;;  %2519 = vst [vmem:[#allocation1] ss:$9 sm:$0xff] %v7462_v28  ;;  %2772 = vmatpush.msrb.mxu2 %v7473_v25  ;;  %2931 = vmatpush.msra.mxu0 %v7476_v54  ;;  %v7498_v48 = vld [vmem:[#allocation6 + $0x188] sm:$0xff]  ;;  %v7507_v42 = vld [vmem:[#allocation6 + $0x170] sm:$0xff] }
 0x538   :  { %9354 = vst [vmem:[#allocation68_spill] sm:$0xff] %v7498_v48  ;;  %v7504_v43 = vld [vmem:[#allocation6 + $0x168] sm:$0xff] }
 0x539   :  { %2956 = vmatpush.msra.mxu2 %v7479_v33  ;;  %2996 = vmatpush.msrb.mxu0 %v7482_v19  ;;  %2521 = vst [vmem:[#allocation1 + $0x1] ss:$9 sm:$0xff] %v7470_v63 }
 0x53a   :  { %9356 = vst [vmem:[#allocation18_spill] sm:$0xff] %v7504_v43 }
 0x53b   :  { %2957 = vmatpush.msra.mxu2 %v7486_v38  ;;  %2997 = vmatpush.msrb.mxu0 %v7489_v3  ;;  %9357 = vst [vmem:[#allocation72_spill] sm:$0xff] %v7507_v42 }
 0x53d   :  { %2958 = vmatpush.msra.mxu2 %v7492_v59  ;;  %2998 = vmatpush.msrb.mxu0 %v7495_v31 }
 0x53f   :  { %2959 = vmatpush.msra.mxu2 %v7498_v48  ;;  %2999 = vmatpush.msrb.mxu0 %v7501_v46  ;;  %v7514_v46 = vld [vmem:[#allocation6 + $0x148] sm:$0xff]  ;;  %v7517_v48 = vld [vmem:[#allocation6 + $0x150] sm:$0xff] }
 0x540   :  { %v2522_v53 = vld [vmem:[#allocation1] sm:$0xff]  ;;  %9358 = vst [vmem:[#allocation74_spill] sm:$0xff] %v7514_v46 }
 0x541   :  { %2960 = vmatpush.msra.mxu2 %v7504_v43  ;;  %3000 = vmatpush.msrb.mxu0 %v7507_v42  ;;  %2732 = vst [vmem:[#allocation1] ss:$9 sm:$0xff] %v7462_v28  ;;  %v7522_v42 = vld [vmem:[#allocation6 + $0x128] sm:$0xff]  ;;  %v7525_v43 = vld [vmem:[#allocation6 + $0x130] sm:$0xff] }
 0x542   :  { %2540 = vmatmul.f32.vlgmr.msrb.gmra.mxu1 %v2522_v53  ;;  %2580 = vmatmul.f32.vlgmr.msrb.gmra.mxu3 %v2522_v53  ;;  %2734 = vst [vmem:[#allocation1 + $0x1] ss:$9 sm:$0xff] %v7470_v63 }
 0x543   :  { %2737 = vmatpush.msrb.mxu1 %v7082_v1  ;;  %2777 = vmatpush.msrb.mxu3 %v7085_v52  ;;  %9359 = vst [vmem:[#allocation19_spill] sm:$0xff] %v7517_v48  ;;  %v7530_v1 = vld [vmem:[#allocation6 + $0x108] sm:$0xff]  ;;  %v7533_v52 = vld [vmem:[#allocation6 + $0x110] sm:$0xff] }
 0x544   :  { %2961 = vmatpush.msra.mxu2 %v7514_v46  ;;  %3001 = vmatpush.msrb.mxu0 %v7517_v48  ;;  %9360 = vst [vmem:[#allocation75_spill] sm:$0xff] %v7522_v42 }
 0x545   :  { %2738 = vmatpush.msrb.mxu1 %v7090_v22  ;;  %2778 = vmatpush.msrb.mxu3 %v7093_v44  ;;  %9361 = vst [vmem:[#allocation77_spill] sm:$0xff] %v7525_v43  ;;  %v7542_v44 = vld [vmem:[#allocation3 + $0x118] sm:$0xff] }
 0x546   :  { %2962 = vmatpush.msra.mxu2 %v7522_v42  ;;  %3002 = vmatpush.msrb.mxu0 %v7525_v43  ;;  %9362 = vst [vmem:[#allocation20_spill] sm:$0xff] %v7530_v1 }
 0x547   :  { %2739 = vmatpush.msrb.mxu1 %v7098_v27  ;;  %2779 = vmatpush.msrb.mxu3 %v7101_v37  ;;  %9363 = vst [vmem:[#allocation78_spill] sm:$0xff] %v7533_v52  ;;  %v7545_v27 = vld [vmem:[#allocation6 + $0xe8] sm:$0xff]  ;;  %v7549_v37 = vld [vmem:[#allocation6 + $0xf0] sm:$0xff] }
 0x548   :  { %2963 = vmatpush.msra.mxu2 %v7530_v1  ;;  %3003 = vmatpush.msrb.mxu0 %v7533_v52  ;;  %9364 = vst [vmem:[#allocation80_spill] sm:$0xff] %v7542_v44 }
 0x549   :  { %2740 = vmatpush.msrb.mxu1 %v7106_v15  ;;  %2780 = vmatpush.msrb.mxu3 %v7109_v56  ;;  %v7538_v22 = vld [vmem:[#allocation1] sm:$0xff]  ;;  %9365 = vst [vmem:[#allocation21_spill] sm:$0xff] %v7545_v27  ;;  %v7552_v15 = vld [vmem:[#allocation3 + $0x100] sm:$0xff] }
 0x54a   :  { %2620 = vmatmul.f32.vlgmr.msra.gmra.mxu1 %v2522_v53  ;;  %2660 = vmatmul.f32.vlgmr.msra.gmra.mxu3 %v2522_v53  ;;  %9366 = vst [vmem:[#allocation28_spill] sm:$0xff] %v7549_v37  ;;  %v7555_v56 = vld [vmem:[#allocation6 + $0xc8] sm:$0xff] }
 0x54b   :  { %2741 = vmatpush.msrb.mxu1 %v7112_v57  ;;  %2773 = vmatmul.f32.vlgmr.msrb.gmra.mxu2 %v7538_v22  ;;  %9367 = vst [vmem:[#allocation81_spill] sm:$0xff] %v7552_v15  ;;  %v7559_v57 = vld [vmem:[#allocation6 + $0xd0] sm:$0xff]  ;;  %v7562_v53 = vld [vmem:[#allocation3 + $0xe8] sm:$0xff] }
 0x54c   :  { %2781 = vmatpush.msrb.mxu3 %v7542_v44  ;;  %2964 = vmatpush.msra.mxu2 %v7545_v27  ;;  %9368 = vst [vmem:[#allocation83_spill] sm:$0xff] %v7555_v56 }
 0x54d   :  { %2742 = vmatpush.msrb.mxu1 %v7117_v6  ;;  %3004 = vmatpush.msrb.mxu0 %v7549_v37  ;;  %9369 = vst [vmem:[#allocation30_spill] sm:$0xff] %v7559_v57  ;;  %v7565_v6 = vld [vmem:[#allocation6 + $0xa8] sm:$0xff] }
 0x54e   :  { %2782 = vmatpush.msrb.mxu3 %v7552_v15  ;;  %2965 = vmatpush.msra.mxu2 %v7555_v56  ;;  %9370 = vst [vmem:[#allocation84_spill] sm:$0xff] %v7562_v53  ;;  %v7569_v15 = vld [vmem:[#allocation6 + $0xb0] sm:$0xff] }
 0x54f   :  { %2743 = vmatpush.msrb.mxu1 %v7123_v36  ;;  %3005 = vmatpush.msrb.mxu0 %v7559_v57  ;;  %9371 = vst [vmem:[#allocation86_spill] sm:$0xff] %v7565_v6  ;;  %v7572_v56 = vld [vmem:[#allocation3 + $0xd0] sm:$0xff]  ;;  %v7575_v36 = vld [vmem:[#allocation6 + $0x88] sm:$0xff] }
 0x550   :  { %2783 = vmatpush.msrb.mxu3 %v7562_v53  ;;  %2966 = vmatpush.msra.mxu2 %v7565_v6  ;;  %9372 = vst [vmem:[#allocation32_spill] sm:$0xff] %v7569_v15  ;;  %v7579_v53 = vld [vmem:[#allocation6 + $0x90] sm:$0xff]  ;;  %v7582_v6 = vld [vmem:[#allocation3 + $0xb8] sm:$0xff] }
 0x551   :  { %2744 = vmatpush.msrb.mxu1 %v7129_v62  ;;  %3006 = vmatpush.msrb.mxu0 %v7569_v15  ;;  %9373 = vst [vmem:[#allocation87_spill] sm:$0xff] %v7572_v56  ;;  %v7585_v62 = vld [vmem:[#allocation6 + $0x68] sm:$0xff] }
 0x552   :  { %2784 = vmatpush.msrb.mxu3 %v7572_v56  ;;  %9374 = vst [vmem:[#allocation89_spill] sm:$0xff] %v7575_v36  ;;  %2967 = vmatpush.msra.mxu2 %v7575_v36  ;;  %v7589_v56 = vld [vmem:[#allocation6 + $0x70] sm:$0xff]  ;;  %v7592_v36 = vld [vmem:[#allocation3 + $0xa0] sm:$0xff] }
 0x553   :  { %2745 = vmatpush.msrb.mxu1 %v7135_v10  ;;  %9375 = vst [vmem:[#allocation34_spill] sm:$0xff] %v7579_v53  ;;  %3007 = vmatpush.msrb.mxu0 %v7579_v53  ;;  %v7595_v10 = vld [vmem:[#allocation6 + $0x48] sm:$0xff] }
 0x554   :  { %9376 = vst [vmem:[#allocation90_spill] sm:$0xff] %v7582_v6  ;;  %2785 = vmatpush.msrb.mxu3 %v7582_v6  ;;  %2968 = vmatpush.msra.mxu2 %v7585_v62  ;;  %v7599_v6 = vld [vmem:[#allocation6 + $0x50] sm:$0xff] }
 0x555   :  { %9377 = vst [vmem:[#allocation92_spill] sm:$0xff] %v7585_v62  ;;  %2746 = vmatpush.msrb.mxu1 %v7141_v23  ;;  %3008 = vmatpush.msrb.mxu0 %v7589_v56  ;;  %v7602_v62 = vld [vmem:[#allocation3 + $0x88] sm:$0xff] }
 0x556   :  { %9378 = vst [vmem:[#allocation36_spill] sm:$0xff] %v7589_v56  ;;  %2786 = vmatpush.msrb.mxu3 %v7592_v36  ;;  %2969 = vmatpush.msra.mxu2 %v7595_v10  ;;  %v7605_v23 = vld [vmem:[#allocation6 + $0x28] sm:$0xff] }
 0x557   :  { %9379 = vst [vmem:[#allocation93_spill] sm:$0xff] %v7592_v36  ;;  %2747 = vmatpush.msrb.mxu1 %v7147_v20  ;;  %3009 = vmatpush.msrb.mxu0 %v7599_v6  ;;  %v7609_v36 = vld [vmem:[#allocation6 + $0x30] sm:$0xff]  ;;  %v7615_v20 = vld [vmem:[#allocation6 + $0x8] sm:$0xff] }
 0x558   :  { %9380 = vst [vmem:[#allocation95_spill] sm:$0xff] %v7595_v10  ;;  %2787 = vmatpush.msrb.mxu3 %v7602_v62  ;;  %2970 = vmatpush.msra.mxu2 %v7605_v23  ;;  %v7612_v10 = vld [vmem:[#allocation3 + $0x70] sm:$0xff] }
 0x559   :  { %9381 = vst [vmem:[#allocation38_spill] sm:$0xff] %v7599_v6  ;;  %2748 = vmatpush.msrb.mxu1 %v7153_v21  ;;  %3010 = vmatpush.msrb.mxu0 %v7609_v36  ;;  %v7625_v21 = vld [vmem:[#allocation6 + $0x10] sm:$0xff] }
 0x55a   :  { %9382 = vst [vmem:[#allocation96_spill] sm:$0xff] %v7602_v62  ;;  %2788 = vmatpush.msrb.mxu3 %v7612_v10  ;;  %2971 = vmatpush.msra.mxu2 %v7615_v20  ;;  %v7619_v62 = vld [vmem:[#allocation6 + $0x1f8] sm:$0xff] }
 0x55b   :  { %9383 = vst [vmem:[#allocation22_spill] sm:$0xff] %v7605_v23  ;;  %2749 = vmatpush.msrb.mxu1 %v7159_v51  ;;  %v7622_v23 = vld [vmem:[#allocation3 + $0x58] sm:$0xff]  ;;  %3011 = vmatpush.msrb.mxu0 %v7625_v21 }
 0x55c   :  { %9384 = vst [vmem:[#allocation99_spill] sm:$0xff] %v7609_v36  ;;  %3036 = vmatpush.msrb.mxu2 %v7619_v62  ;;  %2789 = vmatpush.msrb.mxu3 %v7622_v23  ;;  %v7636_v51 = vld [vmem:[#allocation6 + $0x1b8] sm:$0xff] }
 0x55d   :  { %9385 = vst [vmem:[#allocation40_spill] sm:$0xff] %v7612_v10  ;;  %2750 = vmatpush.msrb.mxu1 %v7165_v9  ;;  %v7629_v10 = vld [vmem:[#allocation6 + $0x1d8] sm:$0xff] }
 0x55e   :  { %9386 = vst [vmem:[#allocation100_spill] sm:$0xff] %v7615_v20  ;;  %3037 = vmatpush.msrb.mxu2 %v7629_v10  ;;  %v7632_v20 = vld [vmem:[#allocation3 + $0x40] sm:$0xff]  ;;  %v7643_v9 = vld [vmem:[#allocation6 + $0x198] sm:$0xff] }
 0x55f   :  { %9387 = vst [vmem:[#allocation42_spill] sm:$0xff] %v7619_v62  ;;  %2790 = vmatpush.msrb.mxu3 %v7632_v20  ;;  %2751 = vmatpush.msrb.mxu1 %v7171_v17  ;;  %v7652_v17 = vld [vmem:[#allocation6 + $0x3e8] sm:$0xff] }
 0x560   :  { %9388 = vst [vmem:[#allocation103_spill] sm:$0xff] %v7622_v23  ;;  %3038 = vmatpush.msrb.mxu2 %v7636_v51  ;;  %v7639_v23 = vld [vmem:[#allocation3 + $0x28] sm:$0xff] }
 0x561   :  { %9389 = vst [vmem:[#allocation45_spill] sm:$0xff] %v7625_v21  ;;  %2791 = vmatpush.msrb.mxu3 %v7639_v23  ;;  %2752 = vmatpush.msrb.mxu1 %v7176_v13  ;;  %v7659_v13 = vld [vmem:[#allocation6 + $0x3c8] sm:$0xff] }
 0x562   :  { %9390 = vst [vmem:[#allocation49_spill] sm:$0xff] %v7629_v10  ;;  %3039 = vmatpush.msrb.mxu2 %v7643_v9  ;;  %v7646_v10 = vld [vmem:[#allocation3 + $0x10] sm:$0xff]  ;;  %2753 = vmatmul.f32.vlgmr.msrb.gmra.mxu1 %v7538_v22 }
 0x563   :  { %9391 = vst [vmem:[#allocation53_spill] sm:$0xff] %v7632_v20  ;;  %2792 = vmatpush.msrb.mxu3 %v7646_v10  ;;  %2936 = vmatpush.msra.mxu1 %v7181_v5  ;;  %v7666_v5 = vld [vmem:[#allocation6 + $0x3a8] sm:$0xff] }
 0x564   :  { %9392 = vst [vmem:[#allocation57_spill] sm:$0xff] %v7636_v51  ;;  %2793 = vmatmul.f32.vlgmr.msrb.gmra.mxu3 %v7538_v22  ;;  %v7669_v22 = vld [vmem:[#allocation6 + $0x138] sm:$0xff] }
 0x565   :  { %9393 = vst [vmem:[#allocation23_spill] sm:$0xff] %v7639_v23  ;;  %2976 = vmatpush.msra.mxu3 %v7652_v17  ;;  %v7655_v23 = vld [vmem:[#allocation6 + $0x178] sm:$0xff]  ;;  %2937 = vmatpush.msra.mxu1 %v7186_v30  ;;  %v7673_v30 = vld [vmem:[#allocation6 + $0x388] sm:$0xff] }
 0x566   :  { %9394 = vst [vmem:[#allocation61_spill] sm:$0xff] %v7643_v9  ;;  %3040 = vmatpush.msrb.mxu2 %v7655_v23 }
 0x567   :  { %9395 = vst [vmem:[#allocation24_spill] sm:$0xff] %v7646_v10  ;;  %2977 = vmatpush.msra.mxu3 %v7659_v13  ;;  %v7662_v10 = vld [vmem:[#allocation6 + $0x158] sm:$0xff]  ;;  %2938 = vmatpush.msra.mxu1 %v7191_v29  ;;  %v7680_v29 = vld [vmem:[#allocation6 + $0x368] sm:$0xff] }
 0x568   :  { %9396 = vst [vmem:[#allocation65_spill] sm:$0xff] %v7652_v17  ;;  %3041 = vmatpush.msrb.mxu2 %v7662_v10 }
 0x569   :  { %9397 = vst [vmem:[#allocation25_spill] sm:$0xff] %v7655_v23  ;;  %2978 = vmatpush.msra.mxu3 %v7666_v5  ;;  %2939 = vmatpush.msra.mxu1 %v7196_v0  ;;  %v7687_v0 = vld [vmem:[#allocation6 + $0x348] sm:$0xff] }
 0x56a   :  { %9398 = vst [vmem:[#allocation69_spill] sm:$0xff] %v7659_v13  ;;  %3042 = vmatpush.msrb.mxu2 %v7669_v22  ;;  %v7676_v13 = vld [vmem:[#allocation6 + $0x118] sm:$0xff] }
 0x56b   :  { %9399 = vst [vmem:[#allocation26_spill] sm:$0xff] %v7662_v10  ;;  %2979 = vmatpush.msra.mxu3 %v7673_v30  ;;  %2940 = vmatpush.msra.mxu1 %v7201_v7  ;;  %v7696_v7 = vld [vmem:[#allocation6 + $0x328] sm:$0xff] }
 0x56c   :  { %9400 = vst [vmem:[#allocation73_spill] sm:$0xff] %v7666_v5  ;;  %3043 = vmatpush.msrb.mxu2 %v7676_v13  ;;  %v7683_v5 = vld [vmem:[#allocation6 + $0xf8] sm:$0xff] }
 0x56d   :  { %9401 = vst [vmem:[#allocation27_spill] sm:$0xff] %v7669_v22  ;;  %2980 = vmatpush.msra.mxu3 %v7680_v29  ;;  %2941 = vmatpush.msra.mxu1 %v7206_v34  ;;  %v7703_v34 = vld [vmem:[#allocation6 + $0x308] sm:$0xff] }
 0x56e   :  { %9402 = vst [vmem:[#allocation76_spill] sm:$0xff] %v7673_v30  ;;  %3044 = vmatpush.msrb.mxu2 %v7683_v5  ;;  %v7690_v30 = vld [vmem:[#allocation6 + $0xd8] sm:$0xff] }
 0x56f   :  { %9403 = vst [vmem:[#allocation29_spill] sm:$0xff] %v7676_v13  ;;  %2981 = vmatpush.msra.mxu3 %v7687_v0  ;;  %v7693_v13 = vld [vmem:[#allocation6 + $0x320] sm:$0xff] }
 0x570   :  { %9404 = vst [vmem:[#allocation79_spill] sm:$0xff] %v7680_v29  ;;  %3045 = vmatpush.msrb.mxu2 %v7690_v30  ;;  %2942 = vmatpush.msra.mxu1 %v7693_v13  ;;  %v7699_v29 = vld [vmem:[#allocation6 + $0xb8] sm:$0xff] }
 0x571   :  { %9405 = vst [vmem:[#allocation31_spill] sm:$0xff] %v7683_v5  ;;  %2982 = vmatpush.msra.mxu3 %v7696_v7 }
 0x572   :  { %9406 = vst [vmem:[#allocation82_spill] sm:$0xff] %v7687_v0  ;;  %3046 = vmatpush.msrb.mxu2 %v7699_v29  ;;  %2943 = vmatpush.msra.mxu1 %v7214_v16  ;;  %v7706_v0 = vld [vmem:[#allocation6 + $0x98] sm:$0xff]  ;;  %v7717_v16 = vld [vmem:[#allocation6 + $0x2c8] sm:$0xff] }
 0x573   :  { %9407 = vst [vmem:[#allocation33_spill] sm:$0xff] %v7690_v30  ;;  %2983 = vmatpush.msra.mxu3 %v7703_v34  ;;  %v9413_v30 = vld [vmem:[#allocation131_spill] sm:$0xff] }
 0x574   :  { %9408 = vst [vmem:[#allocation85_spill] sm:$0xff] %v7693_v13  ;;  %3047 = vmatpush.msrb.mxu2 %v7706_v0  ;;  %2944 = vmatpush.msra.mxu1 %v9413_v30  ;;  %v7710_v13 = vld [vmem:[#allocation6 + $0x2e8] sm:$0xff] }
 0x575   :  { %9409 = vst [vmem:[#allocation35_spill] sm:$0xff] %v7696_v7  ;;  %2984 = vmatpush.msra.mxu3 %v7710_v13  ;;  %v7713_v7 = vld [vmem:[#allocation6 + $0x78] sm:$0xff]  ;;  %v7724_v30 = vld [vmem:[#allocation6 + $0x2a8] sm:$0xff] }
 0x576   :  { %9410 = vst [vmem:[#allocation88_spill] sm:$0xff] %v7699_v29  ;;  %3048 = vmatpush.msrb.mxu2 %v7713_v7  ;;  %v9416_v29 = vld [vmem:[#allocation13_spill] sm:$0xff] }
 0x577   :  { %9411 = vst [vmem:[#allocation37_spill] sm:$0xff] %v7703_v34  ;;  %2945 = vmatpush.msra.mxu1 %v9416_v29  ;;  %2985 = vmatpush.msra.mxu3 %v7717_v16  ;;  %v7720_v34 = vld [vmem:[#allocation6 + $0x58] sm:$0xff]  ;;  %v7731_v29 = vld [vmem:[#allocation6 + $0x288] sm:$0xff] }
 0x578   :  { %9412 = vst [vmem:[#allocation91_spill] sm:$0xff] %v7706_v0  ;;  %3049 = vmatpush.msrb.mxu2 %v7720_v34  ;;  %v9419_v0 = vld [vmem:[#allocation51_spill] sm:$0xff] }
 0x579   :  { %9414 = vst [vmem:[#allocation39_spill] sm:$0xff] %v7710_v13  ;;  %2946 = vmatpush.msra.mxu1 %v9419_v0  ;;  %2986 = vmatpush.msra.mxu3 %v7724_v30  ;;  %v7727_v13 = vld [vmem:[#allocation6 + $0x38] sm:$0xff]  ;;  %v7740_v0 = vld [vmem:[#allocation6 + $0x268] sm:$0xff] }
 0x57a   :  { %9415 = vst [vmem:[#allocation94_spill] sm:$0xff] %v7713_v7  ;;  %3050 = vmatpush.msrb.mxu2 %v7727_v13  ;;  %v9422_v7 = vld [vmem:[#allocation55_spill] sm:$0xff] }
 0x57b   :  { %9417 = vst [vmem:[#allocation41_spill] sm:$0xff] %v7717_v16  ;;  %2947 = vmatpush.msra.mxu1 %v9422_v7  ;;  %2987 = vmatpush.msra.mxu3 %v7731_v29  ;;  %v7734_v16 = vld [vmem:[#allocation6 + $0x18] sm:$0xff]  ;;  %v7746_v7 = vld [vmem:[#allocation6 + $0x248] sm:$0xff] }
 0x57c   :  { %9418 = vst [vmem:[#allocation97_spill] sm:$0xff] %v7720_v34  ;;  %3051 = vmatpush.msrb.mxu2 %v7734_v16  ;;  %v7737_v34 = vld [vmem:[#allocation6 + $0x260] sm:$0xff] }
 0x57d   :  { %9420 = vst [vmem:[#allocation43_spill] sm:$0xff] %v7724_v30  ;;  %2948 = vmatpush.msra.mxu1 %v7737_v34  ;;  %2988 = vmatpush.msra.mxu3 %v7740_v0  ;;  %v7743_v30 = vld [vmem:[#allocation6 + $0x240] sm:$0xff] }
 0x57e   :  { %9421 = vst [vmem:[#allocation101_spill] sm:$0xff] %v7727_v13  ;;  %v9465_v13 = vld [vmem:[#allocation47_spill] sm:$0xff] }
 0x57f   :  { %9423 = vst [vmem:[#allocation46_spill] sm:$0xff] %v7731_v29  ;;  %2949 = vmatpush.msra.mxu1 %v7743_v30  ;;  %2989 = vmatpush.msra.mxu3 %v7746_v7  ;;  %v7749_v29 = vld [vmem:[#allocation6 + $0x220] sm:$0xff] }
 0x580   :  { %9424 = vst [vmem:[#allocation102_spill] sm:$0xff] %v7734_v16  ;;  %v7752_v16 = vld [vmem:[#allocation6 + $0x228] sm:$0xff] }
 0x581   :  { %9425 = vst [vmem:[#allocation50_spill] sm:$0xff] %v7737_v34  ;;  %2950 = vmatpush.msra.mxu1 %v7749_v29  ;;  %2990 = vmatpush.msra.mxu3 %v7752_v16  ;;  %v7755_v34 = vld [vmem:[#allocation6 + $0x200] sm:$0xff] }
 0x582   :  { %9426 = vst [vmem:[#allocation54_spill] sm:$0xff] %v7740_v0  ;;  %v7758_v0 = vld [vmem:[#allocation6 + $0x208] sm:$0xff] }
 0x583   :  { %9427 = vst [vmem:[#allocation58_spill] sm:$0xff] %v7743_v30  ;;  %2951 = vmatpush.msra.mxu1 %v7755_v34  ;;  %2991 = vmatpush.msra.mxu3 %v7758_v0  ;;  %v7761_v30 = vld [vmem:[#allocation6 + $0x3f0] sm:$0xff] }
 0x584   :  { %9428 = vst [vmem:[#allocation62_spill] sm:$0xff] %v7746_v7  ;;  %v7764_v7 = vld [vmem:[#allocation6 + $0x3f8] sm:$0xff] }
 0x585   :  { %9429 = vst [vmem:[#allocation66_spill] sm:$0xff] %v7749_v29  ;;  %3016 = vmatpush.msrb.mxu1 %v7761_v30  ;;  %3056 = vmatpush.msrb.mxu3 %v7764_v7  ;;  %v7767_v29 = vld [vmem:[#allocation6 + $0x3d0] sm:$0xff] }
 0x586   :  { %9430 = vst [vmem:[#allocation70_spill] sm:$0xff] %v7752_v16  ;;  %v7770_v16 = vld [vmem:[#allocation6 + $0x3d8] sm:$0xff] }
 0x587   :  { %9431 = vst [vmem:[#allocation98_spill] sm:$0xff] %v7755_v34  ;;  %3017 = vmatpush.msrb.mxu1 %v7767_v29  ;;  %3057 = vmatpush.msrb.mxu3 %v7770_v16  ;;  %v7773_v34 = vld [vmem:[#allocation6 + $0x3b0] sm:$0xff] }
 0x588   :  { %9432 = vst [vmem:[#allocation44_spill] sm:$0xff] %v7758_v0  ;;  %v7776_v0 = vld [vmem:[#allocation6 + $0x3b8] sm:$0xff] }
 0x589   :  { %9433 = vst [vmem:[#allocation48_spill] sm:$0xff] %v7761_v30  ;;  %3018 = vmatpush.msrb.mxu1 %v7773_v34  ;;  %3058 = vmatpush.msrb.mxu3 %v7776_v0  ;;  %v7779_v30 = vld [vmem:[#allocation6 + $0x390] sm:$0xff] }
 0x58a   :  { %9434 = vst [vmem:[#allocation104_spill] sm:$0xff] %v7764_v7  ;;  %v7782_v7 = vld [vmem:[#allocation6 + $0x398] sm:$0xff] }
 0x58b   :  { %9435 = vst [vmem:[#allocation105_spill] sm:$0xff] %v7767_v29  ;;  %3019 = vmatpush.msrb.mxu1 %v7779_v30  ;;  %3059 = vmatpush.msrb.mxu3 %v7782_v7  ;;  %v7785_v29 = vld [vmem:[#allocation6 + $0x370] sm:$0xff] }
 0x58c   :  { %9436 = vst [vmem:[#allocation106_spill] sm:$0xff] %v7770_v16  ;;  %v7788_v16 = vld [vmem:[#allocation6 + $0x378] sm:$0xff] }
 0x58d   :  { %9437 = vst [vmem:[#allocation107_spill] sm:$0xff] %v7773_v34  ;;  %3020 = vmatpush.msrb.mxu1 %v7785_v29  ;;  %3060 = vmatpush.msrb.mxu3 %v7788_v16  ;;  %v7791_v34 = vld [vmem:[#allocation6 + $0x350] sm:$0xff] }
 0x58e   :  { %9438 = vst [vmem:[#allocation108_spill] sm:$0xff] %v7776_v0  ;;  %v7794_v0 = vld [vmem:[#allocation6 + $0x358] sm:$0xff] }
 0x58f   :  { %9439 = vst [vmem:[#allocation109_spill] sm:$0xff] %v7779_v30  ;;  %3021 = vmatpush.msrb.mxu1 %v7791_v34  ;;  %3061 = vmatpush.msrb.mxu3 %v7794_v0  ;;  %v7797_v30 = vld [vmem:[#allocation6 + $0x330] sm:$0xff] }
 0x590   :  { %9440 = vst [vmem:[#allocation110_spill] sm:$0xff] %v7782_v7  ;;  %v7800_v7 = vld [vmem:[#allocation6 + $0x338] sm:$0xff] }
 0x591   :  { %9441 = vst [vmem:[#allocation111_spill] sm:$0xff] %v7785_v29  ;;  %3022 = vmatpush.msrb.mxu1 %v7797_v30  ;;  %3062 = vmatpush.msrb.mxu3 %v7800_v7  ;;  %v7803_v29 = vld [vmem:[#allocation6 + $0x310] sm:$0xff] }
 0x592   :  { %9442 = vst [vmem:[#allocation112_spill] sm:$0xff] %v7788_v16  ;;  %v7806_v16 = vld [vmem:[#allocation6 + $0x318] sm:$0xff] }
 0x593   :  { %9443 = vst [vmem:[#allocation113_spill] sm:$0xff] %v7791_v34  ;;  %3023 = vmatpush.msrb.mxu1 %v7803_v29  ;;  %3063 = vmatpush.msrb.mxu3 %v7806_v16  ;;  %v7809_v34 = vld [vmem:[#allocation6 + $0x2f0] sm:$0xff] }
 0x594   :  { %9444 = vst [vmem:[#allocation114_spill] sm:$0xff] %v7794_v0  ;;  %v7812_v0 = vld [vmem:[#allocation6 + $0x2f8] sm:$0xff] }
 0x595   :  { %9445 = vst [vmem:[#allocation115_spill] sm:$0xff] %v7797_v30  ;;  %3024 = vmatpush.msrb.mxu1 %v7809_v34  ;;  %3064 = vmatpush.msrb.mxu3 %v7812_v0  ;;  %v7815_v30 = vld [vmem:[#allocation6 + $0x2d0] sm:$0xff]  ;;  %v2601_v9 = vpop.f32.mrf.mxu0 }
 0x596   :  { %9446 = vst [vmem:[#allocation116_spill] sm:$0xff] %v7800_v7  ;;  %v7818_v7 = vld [vmem:[#allocation6 + $0x2d8] sm:$0xff] }
 0x597   :  { %9447 = vst [vmem:[#allocation117_spill] sm:$0xff] %v7803_v29  ;;  %3025 = vmatpush.msrb.mxu1 %v7815_v30  ;;  %3065 = vmatpush.msrb.mxu3 %v7818_v7  ;;  %v7821_v29 = vld [vmem:[#allocation6 + $0x2b0] sm:$0xff] }
 0x598   :  { %9448 = vst [vmem:[#allocation118_spill] sm:$0xff] %v7806_v16  ;;  %v7824_v16 = vld [vmem:[#allocation6 + $0x2b8] sm:$0xff] }
 0x599   :  { %9449 = vst [vmem:[#allocation119_spill] sm:$0xff] %v7809_v34  ;;  %3026 = vmatpush.msrb.mxu1 %v7821_v29  ;;  %3066 = vmatpush.msrb.mxu3 %v7824_v16  ;;  %v7827_v34 = vld [vmem:[#allocation6 + $0x290] sm:$0xff] }
 0x59a   :  { %9450 = vst [vmem:[#allocation120_spill] sm:$0xff] %v7812_v0  ;;  %v7830_v0 = vld [vmem:[#allocation6 + $0x298] sm:$0xff] }
 0x59b   :  { %9451 = vst [vmem:[#allocation121_spill] sm:$0xff] %v7815_v30  ;;  %3027 = vmatpush.msrb.mxu1 %v7827_v34  ;;  %3067 = vmatpush.msrb.mxu3 %v7830_v0  ;;  %v7833_v30 = vld [vmem:[#allocation6 + $0x270] sm:$0xff] }
 0x59c   :  { %9452 = vst [vmem:[#allocation122_spill] sm:$0xff] %v7818_v7  ;;  %v7836_v7 = vld [vmem:[#allocation6 + $0x278] sm:$0xff] }
 0x59d   :  { %9453 = vst [vmem:[#allocation123_spill] sm:$0xff] %v7821_v29  ;;  %3028 = vmatpush.msrb.mxu1 %v7833_v30  ;;  %3068 = vmatpush.msrb.mxu3 %v7836_v7  ;;  %v7839_v29 = vld [vmem:[#allocation6 + $0x250] sm:$0xff]  ;;  %v2681_v57 = vpop.f32.mrf.mxu0 }
 0x59e   :  { %9454 = vst [vmem:[#allocation124_spill] sm:$0xff] %v7824_v16  ;;  %v7842_v16 = vld [vmem:[#allocation6 + $0x258] sm:$0xff] }
 0x59f   :  { %9455 = vst [vmem:[#allocation125_spill] sm:$0xff] %v7827_v34  ;;  %3029 = vmatpush.msrb.mxu1 %v7839_v29  ;;  %3069 = vmatpush.msrb.mxu3 %v7842_v16  ;;  %v7845_v34 = vld [vmem:[#allocation6 + $0x230] sm:$0xff] }
 0x5a0   :  { %9456 = vst [vmem:[#allocation126_spill] sm:$0xff] %v7830_v0  ;;  %v7848_v0 = vld [vmem:[#allocation6 + $0x238] sm:$0xff] }
 0x5a1   :  { %9457 = vst [vmem:[#allocation127_spill] sm:$0xff] %v7833_v30  ;;  %3030 = vmatpush.msrb.mxu1 %v7845_v34  ;;  %3070 = vmatpush.msrb.mxu3 %v7848_v0  ;;  %v7851_v30 = vld [vmem:[#allocation6 + $0x210] sm:$0xff] }
 0x5a2   :  { %9458 = vst [vmem:[#allocation128_spill] sm:$0xff] %v7836_v7  ;;  %v7854_v7 = vld [vmem:[#allocation6 + $0x218] sm:$0xff] }
 0x5a3   :  { %9459 = vst [vmem:[#allocation129_spill] sm:$0xff] %v7839_v29  ;;  %3031 = vmatpush.msrb.mxu1 %v7851_v30  ;;  %3071 = vmatpush.msrb.mxu3 %v7854_v7 }
 0x5a4   :  { %9460 = vst [vmem:[#allocation130_spill] sm:$0xff] %v7842_v16  ;;  %v2561_v16 = vpop.f32.mrf.mxu2 }
 0x5a5   :  { %9461 = vst [vmem:[#allocation131_spill] sm:$0xff] %v7845_v34  ;;  %v9466_v34 = vld [vmem:[#allocation12_spill] sm:$0xff] }
 0x5a6   :  { %9462 = vst [vmem:[#allocation13_spill] sm:$0xff] %v7848_v0 }
 0x5a7   :  { %9463 = vst [vmem:[#allocation51_spill] sm:$0xff] %v7851_v30 }
 0x5a8   :  { %9464 = vst [vmem:[#allocation55_spill] sm:$0xff] %v7854_v7 }
 0x5ac   :  { %v2641_v21 = vpop.f32.mrf.mxu2 }
 0x5bf   :  { %v2541_v29 = vpop.f32.mrf.mxu1 }
 0x5c0   :  { %v2542_v5 = vadd.f32 %v2541_v29, %v9465_v13 }
 0x5c2   :  { %v2562_v22 = vadd.f32 %v2561_v16, %v2542_v5  ;;  %v7862_v5 = vld [vmem:[#allocation2 + $0x6] ss:$8 sm:$0x7] }
 0x5c4   :  { %v3677_v10 = vmul.f32 -1.442695, %v2562_v22 }
 0x5c5   :  { %v2581_v23 = vpop.f32.mrf.mxu3 }
 0x5c6   :  { %3877 = vpow2.f32 %v3677_v10  ;;  %v2582_v17 = vadd.f32 %v2581_v23, %v9466_v34  ;;  %v7864_v23 = vld [vmem:[#allocation2 + $0x1e] ss:$8 sm:$0x7] }
 0x5c8   :  { %v2602_v0 = vadd.f32 %v2601_v9, %v2582_v17  ;;  %v2621_v9 = vpop.f32.mrf.mxu1 }
 0x5c9   :  { %v2622_v27 = vadd.f32 %v2621_v9, %v5495_v58 }
 0x5ca   :  { %v3678_v51 = vmul.f32 -1.442695, %v2602_v0 }
 0x5cc   :  { %v3878_v20 = vpop.eup %3877  ;;  %3879 = vpow2.f32 %v3678_v51  ;;  %v2842_v51 = vrot.slane %v7862_v5, 1 }
 0x5cd   :  { %v2687_v30 = vadd.f32 1.0, %v3878_v20  ;;  %v2661_v10 = vpop.f32.mrf.mxu3  ;;  %v9467_v20 = vld [vmem:[#allocation52_spill] sm:$0xff] }
 0x5ce   :  { %v2774_v36 = vpop.f32.mrf.mxu2  ;;  %v2662_v0 = vadd.f32 %v2661_v10, %v9467_v20 }
 0x5cf   :  { %3881 = vrcp.f32 %v2687_v30  ;;  %v2847_v17 = vrot.slane %v2774_v36, 1  ;;  %v2699_v34 = vand.u32 2147483648, %v2687_v30  ;;  %v2697_v6 = vand.u32 2147483647, %v2687_v30 }
 0x5d0   :  { %v2849_v56 = vadd.f32 %v2842_v51, %v2774_v36  ;;  %vm2693_vm11 = vweird.f32 %v2687_v30  ;;  %v2642_v36 = vadd.f32 %v2641_v21, %v2622_v27 }
 0x5d1   :  { %v2700_v52 = vor.u32 1.1754944e-38, %v2699_v34  ;;  %vm2698_vm13 = vcmp.eq.f32.partialorder %v2697_v6, 8.507059e+37 }
 0x5d2   :  { %v3880_v62 = vpop.eup %3879  ;;  %v3681_v1 = vmul.f32 -1.442695, %v2849_v56 }
 0x5d3   :  { %v7859_v7 = vadd.f32 1.0, %v3880_v62  ;;  %v2843_v62 = vrot.slane %v7864_v23, 1 }
 0x5d5   :  { %v3882_v29 = vpop.eup %3881  ;;  %3883 = vrcp.f32 %v7859_v7  ;;  %v2850_v15 = vadd.f32 %v2847_v17, %v2843_v62  ;;  %vm2712_vm15 = vweird.f32 %v7859_v7  ;;  %v2716_v27 = vand.u32 2147483647, %v7859_v7 }
 0x5d6   :  { %v2689_v22 = vmul.f32 %v3882_v29, %v2687_v30  ;;  %vm2694_vm10 = vweird.f32 %v3882_v29  ;;  %3885 = vpow2.f32 %v3681_v1 }
 0x5d7   :  { %vm2695_vm12 = vmor %vm2693_vm11, %vm2694_vm10  ;;  %v3682_v43 = vmul.f32 -1.442695, %v2850_v15  ;;  %vm2717_vm1 = vcmp.eq.f32.partialorder %v2716_v27, 8.507059e+37 }
 0x5d8   :  { %v2690_v16 = vsub.f32 1.0, %v2689_v22  ;;  %v2682_v22 = vadd.f32 %v2681_v57, %v2662_v0 }
 0x5d9   :  { %3887 = vpow2.f32 %v3682_v43 }
 0x5da   :  { %v2691_v13 = vmul.f32 %v3882_v29, %v2690_v16 }
 0x5db   :  { %v3884_v53 = vpop.eup %3883 }
 0x5dc   :  { %v2708_v37 = vmul.f32 %v3884_v53, %v7859_v7  ;;  %v2692_v44 = vadd.f32 %v3882_v29, %v2691_v13  ;;  %vm2713_vm14 = vweird.f32 %v3884_v53  ;;  %v3886_v15 = vpop.eup %3885 }
 0x5dd   :  { %vm2714_vm0 = vmor %vm2712_vm15, %vm2713_vm14 }
 0x5de   :  { %v2709_v10 = vsub.f32 1.0, %v2708_v37  ;;  %v2696_v20 = vsel %vm2695_vm12, %v3882_v29, %v2692_v44 }
 0x5df   :  { %v2701_v16 = vsel %vm2698_vm13, %v2700_v52, %v2696_v20  ;;  %v2754_v42 = vpop.f32.mrf.mxu1  ;;  %v2718_v52 = vand.u32 2147483648, %v7859_v7 }
 0x5e0   :  { %v2722_v51 = vmul.f32 %v2701_v16, %v2682_v22  ;;  %v2710_v17 = vmul.f32 %v3884_v53, %v2709_v10  ;;  %v2798_v62 = vrot.slane %v2754_v42, 1  ;;  %v2800_v48 = vadd.f32 %v2754_v42, %v7862_v5  ;;  %v3888_v42 = vpop.eup %3887 }
 0x5e1   :  { %v2719_v56 = vor.u32 1.1754944e-38, %v2718_v52  ;;  %v7879_v29 = vadd.f32 1.0, %v3888_v42  ;;  %v9471_v52 = vld [vmem:[#allocation15_spill] sm:$0xff] }
 0x5e2   :  { %v2723_v46 = vadd.f32 %v2722_v51, %v2642_v36  ;;  %v2801_v57 = vadd.f32 %v2798_v62, %v7864_v23  ;;  %v3679_v13 = vmul.f32 -1.442695, %v2800_v48  ;;  %v2711_v37 = vadd.f32 %v3884_v53, %v2710_v17 }
 0x5e3   :  { %vm2879_vm14 = vweird.f32 %v7879_v29 }
 0x5e4   :  { %3889 = vtanh.f32 %v2723_v46  ;;  %v3680_v44 = vmul.f32 -1.442695, %v2801_v57  ;;  %v2715_v1 = vsel %vm2714_vm0, %v3884_v53, %v2711_v37  ;;  %v7877_v46 = vadd.f32 1.0, %v3886_v15  ;;  %v9470_v37 = vld [vmem:[#allocation59_spill] sm:$0xff] }
 0x5e5   :  { %3891 = vpow2.f32 %v3679_v13  ;;  %v2720_v34 = vsel %vm2717_vm1, %v2719_v56, %v2715_v1  ;;  %v7908_v13 = vld [vmem:[%s8184_s4] ss:$0 sm:$0xff]  ;;  %v9472_v56 = vld [vmem:[#allocation60_spill] sm:$0xff] }
 0x5e6   :  { %3893 = vpow2.f32 %v3680_v44  ;;  %vm2864_vm11 = vweird.f32 %v7877_v46 }
 0x5e7   :  { %v2794_v16 = vpop.f32.mrf.mxu3 }
 0x5e8   :  { %v2889_v44 = vadd.f32 %v7908_v13, %v2794_v16 }
 0x5ea   :  { %v3890_v43 = vpop.eup %3889 }
 0x5eb   :  { %v3892_v6 = vpop.eup %3891  ;;  %v2725_v48 = vsub.f32 %v7317_v35, %v3890_v43 }
 0x5ec   :  { %v2808_v21 = vadd.f32 1.0, %v3892_v6  ;;  %v3894_v30 = vpop.eup %3893 }
 0x5ed   :  { %v2726_v9 = vmul.f32 %v2725_v48, %v2720_v34  ;;  %v2809_v20 = vadd.f32 1.0, %v3894_v30 }
 0x5ee   :  { %3895 = vrcp.f32 %v2808_v21  ;;  %v2821_v51 = vand.u32 2147483648, %v2808_v21  ;;  %v2819_v62 = vand.u32 2147483647, %v2808_v21  ;;  %vm2815_vm3 = vweird.f32 %v2808_v21 }
 0x5ef   :  { %3897 = vrcp.f32 %v7877_v46  ;;  %v7882_v7 = vadd.f32 %v3890_v43, %v2726_v9  ;;  %v2834_v42 = vand.u32 2147483647, %v2809_v20  ;;  %vm2830_vm7 = vweird.f32 %v2809_v20 }
 0x5f0   :  { %3899 = vrcp.f32 %v2809_v20  ;;  %v2822_v43 = vor.u32 1.1754944e-38, %v2821_v51  ;;  %vm2820_vm6 = vcmp.eq.f32.partialorder %v2819_v62, 8.507059e+37  ;;  %v2895_v9 = vrot.slane %v7862_v5, 2 }
 0x5f1   :  { %3901 = vrcp.f32 %v7879_v29  ;;  %2952 = vmatmul.f32.vlgmr.msra.gmra.mxu1 %v7882_v7  ;;  %2992 = vmatmul.f32.vlgmr.msra.gmra.mxu3 %v7882_v7  ;;  %vm2835_vm9 = vcmp.eq.f32.partialorder %v2834_v42, 8.507059e+37  ;;  %v9488_v42 = vld [vmem:[#allocation20_spill] sm:$0xff] }
 0x5f2   :  { %3149 = vmatpush.msra.mxu1 %v7323_v40  ;;  %3308 = vmatpush.msra.mxu3 %v7326_v47 }
 0x5f4   :  { %v3896_v35 = vpop.eup %3895  ;;  %3150 = vmatpush.msra.mxu1 %v7329_v60  ;;  %3309 = vmatpush.msra.mxu3 %v7332_v8  ;;  %v9468_v60 = vld [vmem:[#allocation14_spill] sm:$0xff]  ;;  %v9469_v8 = vld [vmem:[#allocation56_spill] sm:$0xff] }
 0x5f5   :  { %v7891_v53 = vpop.eup %3897  ;;  %v2811_v0 = vmul.f32 %v3896_v35, %v2808_v21  ;;  %vm2816_vm2 = vweird.f32 %v3896_v35 }
 0x5f6   :  { %v3900_v22 = vpop.eup %3899  ;;  %3151 = vmatpush.msra.mxu1 %v7338_v61  ;;  %3310 = vmatpush.msra.mxu3 %v7341_v39  ;;  %v2860_v47 = vmul.f32 %v7891_v53, %v7877_v46  ;;  %v2836_v39 = vand.u32 2147483648, %v2809_v20  ;;  %vm2817_vm5 = vmor %vm2815_vm3, %vm2816_vm2  ;;  %vm2865_vm10 = vweird.f32 %v7891_v53 }
 0x5f7   :  { %v7895_v10 = vpop.eup %3901  ;;  %v2812_v36 = vsub.f32 1.0, %v2811_v0  ;;  %v2826_v40 = vmul.f32 %v3900_v22, %v2809_v20  ;;  %vm2831_vm4 = vweird.f32 %v3900_v22  ;;  %v9473_v0 = vld [vmem:[#allocation63_spill] sm:$0xff]  ;;  %vm7937_vm13 = vmor %vm2864_vm11, %vm2865_vm10 }
 0x5f8   :  { %3152 = vmatpush.msra.mxu1 %v9468_v60  ;;  %3311 = vmatpush.msra.mxu3 %v9469_v8  ;;  %v2875_v61 = vmul.f32 %v7895_v10, %v7879_v29  ;;  %v2861_v1 = vsub.f32 1.0, %v2860_v47  ;;  %vm2832_vm8 = vmor %vm2830_vm7, %vm2831_vm4  ;;  %v2837_v30 = vor.u32 1.1754944e-38, %v2836_v39  ;;  %v2896_v47 = vrot.slane %v7864_v23, 2  ;;  %v9477_v60 = vld [vmem:[#allocation64_spill] sm:$0xff]  ;;  %v9478_v8 = vld [vmem:[#allocation67_spill] sm:$0xff] }
 0x5f9   :  { %v2813_v17 = vmul.f32 %v3896_v35, %v2812_v36  ;;  %v2827_v57 = vsub.f32 1.0, %v2826_v40  ;;  %3032 = vmatmul.f32.vlgmr.msrb.gmra.mxu1 %v7882_v7  ;;  %3072 = vmatmul.f32.vlgmr.msrb.gmra.mxu3 %v7882_v7  ;;  %v2891_v36 = vrot.slane %v2889_v44, 1  ;;  %vm2880_vm12 = vweird.f32 %v7895_v10  ;;  %v9505_v23 = vld [vmem:[#allocation93_spill] sm:$0xff] }
 0x5fa   :  { %3153 = vmatpush.msra.mxu1 %v9470_v37  ;;  %3312 = vmatpush.msra.mxu3 %v9471_v52  ;;  %v2876_v21 = vsub.f32 1.0, %v2875_v61  ;;  %vm2881_vm15 = vmor %vm2879_vm14, %vm2880_vm12  ;;  %v9479_v61 = vld [vmem:[#allocation17_spill] sm:$0xff] }
 0x5fb   :  { %v2814_v27 = vadd.f32 %v3896_v35, %v2813_v17  ;;  %v2828_v15 = vmul.f32 %v3900_v22, %v2827_v57 }
 0x5fc   :  { %3154 = vmatpush.msra.mxu1 %v9472_v56  ;;  %3313 = vmatpush.msra.mxu3 %v7375_v14  ;;  %v2862_v14 = vmul.f32 %v7891_v53, %v2861_v1  ;;  %v2877_v5 = vmul.f32 %v7895_v10, %v2876_v21  ;;  %v9489_v1 = vld [vmem:[#allocation78_spill] sm:$0xff]  ;;  %v9490_v21 = vld [vmem:[#allocation80_spill] sm:$0xff] }
 0x5fd   :  { %v2818_v6 = vsel %vm2817_vm5, %v3896_v35, %v2814_v27  ;;  %v2829_v48 = vadd.f32 %v3900_v22, %v2828_v15  ;;  %v4487_v15 = vld [vmem:[#allocation3 + $0x148] sm:$0xff]  ;;  %v4489_v56 = vld [vmem:[#allocation3 + $0x130] sm:$0xff] }
 0x5fe   :  { %v2823_v34 = vsel %vm2820_vm6, %v2822_v43, %v2818_v6  ;;  %3155 = vmatpush.msra.mxu1 %v7381_v26  ;;  %3314 = vmatpush.msra.mxu3 %v9473_v0  ;;  %v4488_v43 = vld [vmem:[#allocation3 + $0x120] sm:$0xff]  ;;  %v9493_v0 = vld [vmem:[#allocation81_spill] sm:$0xff] }
 0x5ff   :  { %v2833_v16 = vsel %vm2832_vm8, %v3900_v22, %v2829_v48  ;;  %v2893_v40 = vmul.f32 %v2889_v44, %v2823_v34  ;;  %v2863_v22 = vadd.f32 %v7891_v53, %v2862_v14  ;;  %v4490_v48 = vld [vmem:[#allocation3 + $0x108] sm:$0xff] }
 0x600   :  { %v2838_v35 = vsel %vm2835_vm9, %v2837_v30, %v2833_v16  ;;  %3156 = vmatpush.msra.mxu1 %v7388_v2  ;;  %3315 = vmatpush.msra.mxu3 %v7391_v11  ;;  %v2870_v2 = vand.u32 2147483648, %v7877_v46  ;;  %v2868_v11 = vand.u32 2147483647, %v7877_v46  ;;  %v9491_v34 = vld [vmem:[#allocation21_spill] sm:$0xff]  ;;  %v9494_v16 = vld [vmem:[#allocation83_spill] sm:$0xff]  ;;  %v9496_v14 = vld [vmem:[#allocation84_spill] sm:$0xff] }
 0x601   :  { %v2894_v20 = vmul.f32 %v2891_v36, %v2838_v35  ;;  %v2899_v51 = vadd.f32 %v2895_v9, %v2893_v40  ;;  %v2867_v46 = vsel %vm7937_vm13, %v7891_v53, %v2863_v22  ;;  %v4491_v30 = vld [vmem:[#allocation3 + $0xf0] sm:$0xff]  ;;  %v9492_v9 = vld [vmem:[#allocation28_spill] sm:$0xff]  ;;  %v4492_v36 = vld [vmem:[#allocation3 + $0xd8] sm:$0xff] }
 0x602   :  { %3157 = vmatpush.msra.mxu1 %v7396_v50  ;;  %3316 = vmatpush.msra.mxu3 %v7399_v41  ;;  %v2878_v50 = vadd.f32 %v7895_v10, %v2877_v5  ;;  %v9474_v41 = vld [vmem:[#allocation16_spill] sm:$0xff]  ;;  %v2871_v17 = vor.u32 1.1754944e-38, %v2870_v2  ;;  %vm2869_vm0 = vcmp.eq.f32.partialorder %v2868_v11, 8.507059e+37  ;;  %v9495_v40 = vld [vmem:[#allocation30_spill] sm:$0xff]  ;;  %v9500_v5 = vld [vmem:[#allocation89_spill] sm:$0xff] }
 0x603   :  { %v2900_v26 = vadd.f32 %v2896_v47, %v2894_v20  ;;  %3903 = vtanh.f32 %v2899_v51  ;;  %v9497_v35 = vld [vmem:[#allocation86_spill] sm:$0xff]  ;;  %v4493_v20 = vld [vmem:[#allocation3 + $0xc0] sm:$0xff] }
 0x604   :  { %3158 = vmatpush.msra.mxu1 %v7404_v4  ;;  %3317 = vmatpush.msra.mxu3 %v7407_v45  ;;  %v2885_v4 = vand.u32 2147483648, %v7879_v29  ;;  %v2883_v45 = vand.u32 2147483647, %v7879_v29  ;;  %v2882_v62 = vsel %vm2881_vm15, %v7895_v10, %v2878_v50  ;;  %v2872_v44 = vsel %vm2869_vm0, %v2871_v17, %v2867_v46  ;;  %v9498_v47 = vld [vmem:[#allocation32_spill] sm:$0xff]  ;;  %v9499_v51 = vld [vmem:[#allocation87_spill] sm:$0xff]  ;;  %v9501_v22 = vld [vmem:[#allocation34_spill] sm:$0xff] }
 0x605   :  { %3905 = vtanh.f32 %v2900_v26  ;;  %v4494_v26 = vld [vmem:[#allocation3 + $0xa8] sm:$0xff]  ;;  %v9502_v2 = vld [vmem:[#allocation90_spill] sm:$0xff]  ;;  %v9510_v17 = vld [vmem:[#allocation99_spill] sm:$0xff] }
 0x606   :  { %3159 = vmatpush.msra.mxu1 %v7415_v24  ;;  %3318 = vmatpush.msra.mxu3 %v9474_v41  ;;  %v2886_v39 = vor.u32 1.1754944e-38, %v2885_v4  ;;  %vm2884_vm1 = vcmp.eq.f32.partialorder %v2883_v45, 8.507059e+37  ;;  %v9503_v11 = vld [vmem:[#allocation92_spill] sm:$0xff]  ;;  %v4495_v50 = vld [vmem:[#allocation3 + $0x90] sm:$0xff]  ;;  %v9506_v4 = vld [vmem:[#allocation95_spill] sm:$0xff] }
 0x607   :  { %v9504_v41 = vld [vmem:[#allocation36_spill] sm:$0xff]  ;;  %v4496_v45 = vld [vmem:[#allocation3 + $0x78] sm:$0xff] }
 0x608   :  { %3160 = vmatpush.msra.mxu1 %v9477_v60  ;;  %3319 = vmatpush.msra.mxu3 %v9478_v8  ;;  %v2887_v52 = vsel %vm2884_vm1, %v2886_v39, %v2882_v62  ;;  %v9507_v46 = vld [vmem:[#allocation38_spill] sm:$0xff]  ;;  %v9508_v60 = vld [vmem:[#allocation96_spill] sm:$0xff]  ;;  %v9514_v39 = vld [vmem:[#allocation103_spill] sm:$0xff] }
 0x609   :  { %v3904_v24 = vpop.eup %3903  ;;  %v9509_v8 = vld [vmem:[#allocation22_spill] sm:$0xff]  ;;  %v9511_v62 = vld [vmem:[#allocation40_spill] sm:$0xff] }
 0x60a   :  { %v2903_v57 = vsub.f32 %v7462_v28, %v3904_v24  ;;  %3161 = vmatpush.msra.mxu1 %v7449_v49  ;;  %3320 = vmatpush.msra.mxu3 %v9479_v61  ;;  %v9482_v28 = vld [vmem:[#allocation18_spill] sm:$0xff]  ;;  %v4498_v61 = vld [vmem:[#allocation3 + $0x48] sm:$0xff] }
 0x60b   :  { %v3906_v29 = vpop.eup %3905 }
 0x60c   :  { %v2904_v53 = vsub.f32 %v7470_v63, %v3906_v29  ;;  %v2905_v37 = vmul.f32 %v2903_v57, %v2872_v44  ;;  %3162 = vmatpush.msra.mxu1 %v7456_v12  ;;  %3321 = vmatpush.msra.mxu3 %v7459_v18  ;;  %v9480_v12 = vld [vmem:[#allocation68_spill] sm:$0xff]  ;;  %v9515_v44 = vld [vmem:[#allocation45_spill] sm:$0xff] }
 0x60d   :  { %v4482_v63 = vld [vmem:[#allocation3 + $0x168] sm:$0xff] }
 0x60e   :  { %v2906_v27 = vmul.f32 %v2904_v53, %v2887_v52  ;;  %v7956_v10 = vadd.f32 %v3904_v24, %v2905_v37  ;;  %3163 = vmatpush.msra.mxu1 %v7464_v32  ;;  %3322 = vmatpush.msra.mxu3 %v7467_v55  ;;  %v9481_v32 = vld [vmem:[#allocation71_spill] sm:$0xff]  ;;  %v9483_v55 = vld [vmem:[#allocation72_spill] sm:$0xff]  ;;  %v4499_v53 = vld [vmem:[#allocation3 + $0x30] sm:$0xff] }
 0x60f   :  { %v4497_v24 = vld [vmem:[#allocation3 + $0x60] sm:$0xff]  ;;  %v9516_v37 = vld [vmem:[#allocation49_spill] sm:$0xff] }
 0x610   :  { %v7960_v49 = vadd.f32 %v3906_v29, %v2906_v27  ;;  %2911 = vst [vmem:[#allocation1] ss:$9 sm:$0xff] %v7956_v10  ;;  %3164 = vmatpush.msra.mxu1 %v7473_v25  ;;  %3323 = vmatpush.msra.mxu3 %v7476_v54  ;;  %v4483_v25 = vld [vmem:[#allocation3 + $0x178] sm:$0xff]  ;;  %v9512_v57 = vld [vmem:[#allocation100_spill] sm:$0xff]  ;;  %v9517_v52 = vld [vmem:[#allocation53_spill] sm:$0xff] }
 0x611   :  { %v9484_v54 = vld [vmem:[#allocation74_spill] sm:$0xff] }
 0x612   :  { %3348 = vmatpush.msrb.mxu1 %v7479_v33  ;;  %3388 = vmatpush.msrb.mxu3 %v7482_v19  ;;  %2913 = vst [vmem:[#allocation1 + $0x1] ss:$9 sm:$0xff] %v7960_v49  ;;  %v9485_v33 = vld [vmem:[#allocation19_spill] sm:$0xff]  ;;  %v4484_v19 = vld [vmem:[#allocation3 + $0x150] sm:$0xff] }
 0x613   :  { %v9513_v29 = vld [vmem:[#allocation42_spill] sm:$0xff] }
 0x614   :  { %3349 = vmatpush.msrb.mxu1 %v7486_v38  ;;  %3389 = vmatpush.msrb.mxu3 %v7489_v3  ;;  %v4485_v38 = vld [vmem:[#allocation3 + $0x160] sm:$0xff]  ;;  %v4500_v27 = vld [vmem:[#allocation3 + $0x18] sm:$0xff] }
 0x615   :  { %v9486_v3 = vld [vmem:[#allocation75_spill] sm:$0xff] }
 0x616   :  { %3350 = vmatpush.msrb.mxu1 %v7492_v59  ;;  %3390 = vmatpush.msrb.mxu3 %v7495_v31  ;;  %v9487_v59 = vld [vmem:[#allocation77_spill] sm:$0xff]  ;;  %v4486_v31 = vld [vmem:[#allocation3 + $0x138] sm:$0xff] }
 0x618   :  { %3351 = vmatpush.msrb.mxu1 %v9480_v12  ;;  %3391 = vmatpush.msrb.mxu3 %v9481_v32  ;;  %v9518_v12 = vld [vmem:[#allocation57_spill] sm:$0xff]  ;;  %v9519_v32 = vld [vmem:[#allocation23_spill] sm:$0xff] }
 0x619   :  { %v2914_v18 = vld [vmem:[#allocation1] sm:$0xff] }
 0x61a   :  { %3352 = vmatpush.msrb.mxu1 %v9482_v28  ;;  %3392 = vmatpush.msrb.mxu3 %v9483_v55  ;;  %3124 = vst [vmem:[#allocation1] ss:$9 sm:$0xff] %v7956_v10  ;;  %v9520_v28 = vld [vmem:[#allocation61_spill] sm:$0xff]  ;;  %v9521_v55 = vld [vmem:[#allocation24_spill] sm:$0xff] }
 0x61b   :  { %2932 = vmatmul.f32.vlgmr.msra.gmra.mxu0 %v2914_v18  ;;  %2972 = vmatmul.f32.vlgmr.msra.gmra.mxu2 %v2914_v18  ;;  %3126 = vst [vmem:[#allocation1 + $0x1] ss:$9 sm:$0xff] %v7960_v49 }
 0x61c   :  { %3129 = vmatpush.msra.mxu0 %v4482_v63  ;;  %3169 = vmatpush.msra.mxu2 %v4483_v25  ;;  %v4502_v63 = vld [vmem:[#allocation6 + $0x3e0] sm:$0xff]  ;;  %v9522_v25 = vld [vmem:[#allocation65_spill] sm:$0xff] }
 0x61d   :  { %3353 = vmatpush.msrb.mxu1 %v9484_v54  ;;  %3393 = vmatpush.msrb.mxu3 %v9485_v33  ;;  %v9523_v54 = vld [vmem:[#allocation25_spill] sm:$0xff]  ;;  %v4503_v33 = vld [vmem:[#allocation6 + $0x3c0] sm:$0xff] }
 0x61e   :  { %3130 = vmatpush.msra.mxu0 %v4484_v19  ;;  %3170 = vmatpush.msra.mxu2 %v4485_v38  ;;  %v9524_v19 = vld [vmem:[#allocation69_spill] sm:$0xff]  ;;  %v9525_v38 = vld [vmem:[#allocation26_spill] sm:$0xff] }
 0x61f   :  { %3354 = vmatpush.msrb.mxu1 %v9486_v3  ;;  %3394 = vmatpush.msrb.mxu3 %v9487_v59  ;;  %v4504_v3 = vld [vmem:[#allocation6 + $0x3a0] sm:$0xff]  ;;  %v9526_v59 = vld [vmem:[#allocation73_spill] sm:$0xff] }
 0x620   :  { %3131 = vmatpush.msra.mxu0 %v4486_v31  ;;  %3171 = vmatpush.msra.mxu2 %v4487_v15  ;;  %v9527_v31 = vld [vmem:[#allocation27_spill] sm:$0xff] }
 0x621   :  { %3355 = vmatpush.msrb.mxu1 %v9488_v42  ;;  %3395 = vmatpush.msrb.mxu3 %v9489_v1  ;;  %v4505_v15 = vld [vmem:[#allocation6 + $0x380] sm:$0xff]  ;;  %v9529_v1 = vld [vmem:[#allocation29_spill] sm:$0xff] }
 0x622   :  { %3132 = vmatpush.msra.mxu0 %v4488_v43  ;;  %3172 = vmatpush.msra.mxu2 %v4489_v56  ;;  %v3127_v6 = vld [vmem:[#allocation1] sm:$0xff]  ;;  %v4506_v43 = vld [vmem:[#allocation6 + $0x360] sm:$0xff] }
 0x623   :  { %3012 = vmatmul.f32.vlgmr.msrb.gmra.mxu0 %v2914_v18  ;;  %3052 = vmatmul.f32.vlgmr.msrb.gmra.mxu2 %v2914_v18  ;;  %v4501_v18 = vld [vmem:[#allocation3] sm:$0xff] }
 0x624   :  { %3133 = vmatpush.msra.mxu0 %v4490_v48  ;;  %3165 = vmatmul.f32.vlgmr.msra.gmra.mxu1 %v3127_v6  ;;  %v9528_v42 = vld [vmem:[#allocation76_spill] sm:$0xff]  ;;  %v9530_v56 = vld [vmem:[#allocation79_spill] sm:$0xff] }
 0x625   :  { %3173 = vmatpush.msra.mxu2 %v9490_v21  ;;  %3356 = vmatpush.msrb.mxu1 %v9491_v34  ;;  %v4507_v48 = vld [vmem:[#allocation6 + $0x340] sm:$0xff]  ;;  %v9532_v21 = vld [vmem:[#allocation82_spill] sm:$0xff]  ;;  %v9533_v34 = vld [vmem:[#allocation33_spill] sm:$0xff] }
 0x626   :  { %3134 = vmatpush.msra.mxu0 %v4491_v30  ;;  %3396 = vmatpush.msrb.mxu3 %v9492_v9  ;;  %v9534_v30 = vld [vmem:[#allocation85_spill] sm:$0xff]  ;;  %v9535_v9 = vld [vmem:[#allocation35_spill] sm:$0xff] }
 0x627   :  { %3174 = vmatpush.msra.mxu2 %v9493_v0  ;;  %3357 = vmatpush.msrb.mxu1 %v9494_v16  ;;  %v9536_v0 = vld [vmem:[#allocation88_spill] sm:$0xff] }
 0x628   :  { %3135 = vmatpush.msra.mxu0 %v4492_v36  ;;  %3397 = vmatpush.msrb.mxu3 %v9495_v40  ;;  %v4508_v16 = vld [vmem:[#allocation6 + $0x300] sm:$0xff]  ;;  %v9537_v36 = vld [vmem:[#allocation37_spill] sm:$0xff] }
 0x629   :  { %3175 = vmatpush.msra.mxu2 %v9496_v14  ;;  %3358 = vmatpush.msrb.mxu1 %v9497_v35  ;;  %v9538_v40 = vld [vmem:[#allocation91_spill] sm:$0xff] }
 0x62a   :  { %3136 = vmatpush.msra.mxu0 %v4493_v20  ;;  %3398 = vmatpush.msrb.mxu3 %v9498_v47  ;;  %v4509_v14 = vld [vmem:[#allocation6 + $0x2e0] sm:$0xff]  ;;  %v9540_v20 = vld [vmem:[#allocation94_spill] sm:$0xff] }
 0x62b   :  { %3176 = vmatpush.msra.mxu2 %v9499_v51  ;;  %3359 = vmatpush.msrb.mxu1 %v9500_v5  ;;  %v9539_v35 = vld [vmem:[#allocation39_spill] sm:$0xff]  ;;  %v9541_v51 = vld [vmem:[#allocation41_spill] sm:$0xff] }
 0x62c   :  { %3137 = vmatpush.msra.mxu0 %v4494_v26  ;;  %3399 = vmatpush.msrb.mxu3 %v9501_v22  ;;  %v4510_v47 = vld [vmem:[#allocation6 + $0x2c0] sm:$0xff]  ;;  %v9542_v5 = vld [vmem:[#allocation97_spill] sm:$0xff] }
 0x62d   :  { %3177 = vmatpush.msra.mxu2 %v9502_v2  ;;  %3360 = vmatpush.msrb.mxu1 %v9503_v11  ;;  %v4511_v26 = vld [vmem:[#allocation6 + $0x2a0] sm:$0xff]  ;;  %v9544_v2 = vld [vmem:[#allocation101_spill] sm:$0xff] }
 0x62e   :  { %3138 = vmatpush.msra.mxu0 %v4495_v50  ;;  %3400 = vmatpush.msrb.mxu3 %v9504_v41  ;;  %v9543_v22 = vld [vmem:[#allocation43_spill] sm:$0xff]  ;;  %v9545_v50 = vld [vmem:[#allocation46_spill] sm:$0xff] }
 0x62f   :  { %3178 = vmatpush.msra.mxu2 %v9505_v23  ;;  %3361 = vmatpush.msrb.mxu1 %v9506_v4  ;;  %v4512_v11 = vld [vmem:[#allocation6 + $0x280] sm:$0xff]  ;;  %v9546_v41 = vld [vmem:[#allocation102_spill] sm:$0xff] }
 0x630   :  { %3139 = vmatpush.msra.mxu0 %v4496_v45  ;;  %3401 = vmatpush.msrb.mxu3 %v9507_v46  ;;  %v9547_v23 = vld [vmem:[#allocation50_spill] sm:$0xff] }
 0x631   :  { %3179 = vmatpush.msra.mxu2 %v9508_v60  ;;  %3362 = vmatpush.msrb.mxu1 %v9509_v8  ;;  %v9548_v4 = vld [vmem:[#allocation54_spill] sm:$0xff] }
 0x632   :  { %3140 = vmatpush.msra.mxu0 %v4497_v24  ;;  %3402 = vmatpush.msrb.mxu3 %v9510_v17  ;;  %v9549_v45 = vld [vmem:[#allocation58_spill] sm:$0xff]  ;;  %v9554_v17 = vld [vmem:[#allocation44_spill] sm:$0xff] }
 0x633   :  { %3180 = vmatpush.msra.mxu2 %v9511_v62  ;;  %3363 = vmatpush.msrb.mxu1 %v9512_v57  ;;  %v9550_v46 = vld [vmem:[#allocation62_spill] sm:$0xff]  ;;  %v9555_v62 = vld [vmem:[#allocation48_spill] sm:$0xff] }
 0x634   :  { %3141 = vmatpush.msra.mxu0 %v4498_v61  ;;  %3403 = vmatpush.msrb.mxu3 %v9515_v44  ;;  %v9551_v60 = vld [vmem:[#allocation66_spill] sm:$0xff]  ;;  %v9556_v57 = vld [vmem:[#allocation104_spill] sm:$0xff]  ;;  %v9557_v61 = vld [vmem:[#allocation105_spill] sm:$0xff] }
 0x635   :  { %3428 = vmatpush.msra.mxu1 %v9513_v29  ;;  %3181 = vmatpush.msra.mxu2 %v9514_v39  ;;  %v9552_v8 = vld [vmem:[#allocation70_spill] sm:$0xff]  ;;  %v9559_v39 = vld [vmem:[#allocation107_spill] sm:$0xff]  ;;  %v9560_v44 = vld [vmem:[#allocation108_spill] sm:$0xff] }
 0x636   :  { %3142 = vmatpush.msra.mxu0 %v4499_v53  ;;  %v9553_v24 = vld [vmem:[#allocation98_spill] sm:$0xff]  ;;  %v9561_v53 = vld [vmem:[#allocation109_spill] sm:$0xff] }
 0x637   :  { %3429 = vmatpush.msra.mxu1 %v9516_v37  ;;  %3182 = vmatpush.msra.mxu2 %v9517_v52  ;;  %v9558_v29 = vld [vmem:[#allocation106_spill] sm:$0xff]  ;;  %v9563_v52 = vld [vmem:[#allocation111_spill] sm:$0xff] }
 0x638   :  { %3143 = vmatpush.msra.mxu0 %v4500_v27  ;;  %v9562_v37 = vld [vmem:[#allocation110_spill] sm:$0xff]  ;;  %v9564_v27 = vld [vmem:[#allocation112_spill] sm:$0xff] }
 0x639   :  { %3430 = vmatpush.msra.mxu1 %v9518_v12  ;;  %3183 = vmatpush.msra.mxu2 %v9519_v32  ;;  %v9565_v12 = vld [vmem:[#allocation113_spill] sm:$0xff]  ;;  %v9566_v32 = vld [vmem:[#allocation114_spill] sm:$0xff] }
 0x63a   :  { %3144 = vmatpush.msra.mxu0 %v4501_v18  ;;  %v9567_v18 = vld [vmem:[#allocation115_spill] sm:$0xff] }
 0x63b   :  { %3431 = vmatpush.msra.mxu1 %v9520_v28  ;;  %3184 = vmatpush.msra.mxu2 %v9521_v55  ;;  %v9568_v28 = vld [vmem:[#allocation116_spill] sm:$0xff]  ;;  %v9569_v55 = vld [vmem:[#allocation117_spill] sm:$0xff] }
 0x63c   :  { %3145 = vmatmul.f32.vlgmr.msra.gmra.mxu0 %v3127_v6  ;;  %3185 = vmatmul.f32.vlgmr.msra.gmra.mxu2 %v3127_v6  ;;  %v9531_v6 = vld [vmem:[#allocation31_spill] sm:$0xff] }
 0x63d   :  { %3328 = vmatpush.msrb.mxu0 %v4502_v63  ;;  %3368 = vmatpush.msrb.mxu2 %v9522_v25  ;;  %v9570_v63 = vld [vmem:[#allocation118_spill] sm:$0xff]  ;;  %v9571_v25 = vld [vmem:[#allocation119_spill] sm:$0xff] }
 0x63e   :  { %3432 = vmatpush.msra.mxu1 %v9523_v54  ;;  %v9572_v54 = vld [vmem:[#allocation120_spill] sm:$0xff] }
 0x63f   :  { %3329 = vmatpush.msrb.mxu0 %v4503_v33  ;;  %3369 = vmatpush.msrb.mxu2 %v9524_v19  ;;  %v9573_v33 = vld [vmem:[#allocation121_spill] sm:$0xff]  ;;  %v9574_v19 = vld [vmem:[#allocation122_spill] sm:$0xff] }
 0x640   :  { %3433 = vmatpush.msra.mxu1 %v9525_v38  ;;  %v9575_v38 = vld [vmem:[#allocation123_spill] sm:$0xff] }
 0x641   :  { %3330 = vmatpush.msrb.mxu0 %v4504_v3  ;;  %3370 = vmatpush.msrb.mxu2 %v9526_v59  ;;  %v9576_v3 = vld [vmem:[#allocation124_spill] sm:$0xff]  ;;  %v9577_v59 = vld [vmem:[#allocation125_spill] sm:$0xff] }
 0x642   :  { %3434 = vmatpush.msra.mxu1 %v9527_v31  ;;  %v9578_v31 = vld [vmem:[#allocation126_spill] sm:$0xff] }
 0x643   :  { %3331 = vmatpush.msrb.mxu0 %v4505_v15  ;;  %3371 = vmatpush.msrb.mxu2 %v9528_v42  ;;  %v9579_v15 = vld [vmem:[#allocation127_spill] sm:$0xff]  ;;  %v9580_v42 = vld [vmem:[#allocation128_spill] sm:$0xff] }
 0x644   :  { %3435 = vmatpush.msra.mxu1 %v9529_v1  ;;  %v9581_v1 = vld [vmem:[#allocation129_spill] sm:$0xff] }
 0x645   :  { %3332 = vmatpush.msrb.mxu0 %v4506_v43  ;;  %3372 = vmatpush.msrb.mxu2 %v9530_v56  ;;  %v9582_v43 = vld [vmem:[#allocation130_spill] sm:$0xff]  ;;  %v9583_v56 = vld [vmem:[#allocation131_spill] sm:$0xff] }
 0x646   :  { %3436 = vmatpush.msra.mxu1 %v9531_v6  ;;  %v9584_v6 = vld [vmem:[#allocation13_spill] sm:$0xff] }
 0x647   :  { %3333 = vmatpush.msrb.mxu0 %v4507_v48  ;;  %3373 = vmatpush.msrb.mxu2 %v9532_v21  ;;  %v9585_v48 = vld [vmem:[#allocation51_spill] sm:$0xff] }
 0x648   :  { %3437 = vmatpush.msra.mxu1 %v9533_v34  ;;  %v9586_v21 = vld [vmem:[#allocation55_spill] sm:$0xff] }
 0x649   :  { %3334 = vmatpush.msrb.mxu0 %v9534_v30  ;;  %3374 = vmatpush.msrb.mxu2 %v9535_v9  ;;  %v9587_v30 = vld [vmem:[#allocation47_spill] sm:$0xff] }
 0x64a   :  { %3438 = vmatpush.msra.mxu1 %v9536_v0 }
 0x64b   :  { %3335 = vmatpush.msrb.mxu0 %v4508_v16  ;;  %3375 = vmatpush.msrb.mxu2 %v9537_v36 }
 0x64c   :  { %3439 = vmatpush.msra.mxu1 %v9538_v40 }
 0x64d   :  { %3336 = vmatpush.msrb.mxu0 %v4509_v14  ;;  %3376 = vmatpush.msrb.mxu2 %v9539_v35  ;;  %v9588_v14 = vld [vmem:[#allocation12_spill] sm:$0xff] }
 0x64e   :  { %3440 = vmatpush.msra.mxu1 %v9540_v20 }
 0x64f   :  { %3337 = vmatpush.msrb.mxu0 %v4510_v47  ;;  %3377 = vmatpush.msrb.mxu2 %v9541_v51 }
 0x650   :  { %3441 = vmatpush.msra.mxu1 %v9542_v5 }
 0x651   :  { %3338 = vmatpush.msrb.mxu0 %v4511_v26  ;;  %3378 = vmatpush.msrb.mxu2 %v9543_v22 }
 0x652   :  { %3442 = vmatpush.msra.mxu1 %v9544_v2 }
 0x653   :  { %3339 = vmatpush.msrb.mxu0 %v4512_v11  ;;  %3379 = vmatpush.msrb.mxu2 %v9545_v50 }
 0x654   :  { %3443 = vmatpush.msra.mxu1 %v9546_v41 }
 0x655   :  { %3340 = vmatpush.msrb.mxu0 %v9547_v23  ;;  %3380 = vmatpush.msrb.mxu2 %v9548_v4  ;;  %v8086_v23 = vld [vmem:[#allocation2 + $0x7] ss:$8 sm:$0x7] }
 0x656   :  { %v8088_v4 = vld [vmem:[#allocation2 + $0x1f] ss:$8 sm:$0x7] }
 0x657   :  { %3341 = vmatpush.msrb.mxu0 %v9549_v45  ;;  %3381 = vmatpush.msrb.mxu2 %v9550_v46 }
 0x659   :  { %3342 = vmatpush.msrb.mxu0 %v9551_v60  ;;  %3382 = vmatpush.msrb.mxu2 %v9552_v8  ;;  %v3234_v8 = vrot.slane %v8086_v23, 1 }
 0x65b   :  { %3343 = vmatpush.msrb.mxu0 %v9553_v24  ;;  %3383 = vmatpush.msrb.mxu2 %v9554_v17  ;;  %v3235_v17 = vrot.slane %v8088_v4, 1 }
 0x65d   :  { %3408 = vmatpush.msra.mxu0 %v9555_v62  ;;  %3448 = vmatpush.msra.mxu2 %v9556_v57 }
 0x65f   :  { %3409 = vmatpush.msra.mxu0 %v9557_v61  ;;  %3449 = vmatpush.msra.mxu2 %v9558_v29 }
 0x661   :  { %3410 = vmatpush.msra.mxu0 %v9559_v39  ;;  %3450 = vmatpush.msra.mxu2 %v9560_v44  ;;  %v9589_v39 = vld [vmem:[#allocation52_spill] sm:$0xff] }
 0x663   :  { %3411 = vmatpush.msra.mxu0 %v9561_v53  ;;  %3451 = vmatpush.msra.mxu2 %v9562_v37 }
 0x665   :  { %3412 = vmatpush.msra.mxu0 %v9563_v52  ;;  %3452 = vmatpush.msra.mxu2 %v9564_v27 }
 0x667   :  { %3413 = vmatpush.msra.mxu0 %v9565_v12  ;;  %3453 = vmatpush.msra.mxu2 %v9566_v32 }
 0x669   :  { %3414 = vmatpush.msra.mxu0 %v9567_v18  ;;  %3454 = vmatpush.msra.mxu2 %v9568_v28 }
 0x66b   :  { %3415 = vmatpush.msra.mxu0 %v9569_v55  ;;  %3455 = vmatpush.msra.mxu2 %v9570_v63 }
 0x66d   :  { %3416 = vmatpush.msra.mxu0 %v9571_v25  ;;  %3456 = vmatpush.msra.mxu2 %v9572_v54 }
 0x66e   :  { %v2953_v0 = vpop.f32.mrf.mxu1 }
 0x66f   :  { %3417 = vmatpush.msra.mxu0 %v9573_v33  ;;  %3457 = vmatpush.msra.mxu2 %v9574_v19 }
 0x671   :  { %3418 = vmatpush.msra.mxu0 %v9575_v38  ;;  %3458 = vmatpush.msra.mxu2 %v9576_v3 }
 0x673   :  { %3419 = vmatpush.msra.mxu0 %v9577_v59  ;;  %3459 = vmatpush.msra.mxu2 %v9578_v31 }
 0x674   :  { %v2993_v20 = vpop.f32.mrf.mxu3 }
 0x675   :  { %3420 = vmatpush.msra.mxu0 %v9579_v15  ;;  %3460 = vmatpush.msra.mxu2 %v9580_v42 }
 0x676   :  { %v3033_v26 = vpop.f32.mrf.mxu1 }
 0x677   :  { %3421 = vmatpush.msra.mxu0 %v9581_v1  ;;  %3461 = vmatpush.msra.mxu2 %v9582_v43 }
 0x679   :  { %3422 = vmatpush.msra.mxu0 %v9583_v56  ;;  %3462 = vmatpush.msra.mxu2 %v9584_v6 }
 0x67b   :  { %3423 = vmatpush.msra.mxu0 %v9585_v48  ;;  %3463 = vmatpush.msra.mxu2 %v9586_v21 }
 0x67c   :  { %v3073_v28 = vpop.f32.mrf.mxu3 }
 0x698   :  { %v2933_v34 = vpop.f32.mrf.mxu0 }
 0x699   :  { %v2934_v9 = vadd.f32 %v2933_v34, %v9587_v30 }
 0x69b   :  { %v2954_v16 = vadd.f32 %v2953_v0, %v2934_v9 }
 0x69d   :  { %v3683_v36 = vmul.f32 -1.442695, %v2954_v16 }
 0x69e   :  { %v2973_v40 = vpop.f32.mrf.mxu2 }
 0x69f   :  { %3907 = vpow2.f32 %v3683_v36  ;;  %v2974_v35 = vadd.f32 %v2973_v40, %v9588_v14 }
 0x6a0   :  { %v3013_v45 = vpop.f32.mrf.mxu0 }
 0x6a1   :  { %v2994_v47 = vadd.f32 %v2993_v20, %v2974_v35  ;;  %v3166_v50 = vpop.f32.mrf.mxu1  ;;  %v3014_v12 = vadd.f32 %v3013_v45, %v5495_v58 }
 0x6a2   :  { %v3239_v46 = vrot.slane %v3166_v50, 1  ;;  %v3241_v62 = vadd.f32 %v3234_v8, %v3166_v50 }
 0x6a3   :  { %v3684_v51 = vmul.f32 -1.442695, %v2994_v47  ;;  %v3034_v31 = vadd.f32 %v3033_v26, %v3014_v12 }
 0x6a4   :  { %v3242_v29 = vadd.f32 %v3239_v46, %v3235_v17  ;;  %v3687_v32 = vmul.f32 -1.442695, %v3241_v62 }
 0x6a5   :  { %v3908_v5 = vpop.eup %3907  ;;  %3909 = vpow2.f32 %v3684_v51 }
 0x6a6   :  { %v3079_v22 = vadd.f32 1.0, %v3908_v5  ;;  %v3053_v24 = vpop.f32.mrf.mxu2  ;;  %v3688_v54 = vmul.f32 -1.442695, %v3242_v29 }
 0x6a7   :  { %v3054_v44 = vadd.f32 %v3053_v24, %v9589_v39 }
 0x6a8   :  { %3911 = vrcp.f32 %v3079_v22  ;;  %v3091_v53 = vand.u32 2147483648, %v3079_v22  ;;  %v3089_v27 = vand.u32 2147483647, %v3079_v22  ;;  %vm3085_vm3 = vweird.f32 %v3079_v22 }
 0x6a9   :  { %v3074_v33 = vadd.f32 %v3073_v28, %v3054_v44 }
 0x6aa   :  { %v3092_v63 = vor.u32 1.1754944e-38, %v3091_v53  ;;  %vm3090_vm5 = vcmp.eq.f32.partialorder %v3089_v27, 8.507059e+37 }
 0x6ab   :  { %v3910_v2 = vpop.eup %3909 }
 0x6ac   :  { %v8083_v11 = vadd.f32 1.0, %v3910_v2 }
 0x6ae   :  { %v3912_v41 = vpop.eup %3911  ;;  %3913 = vrcp.f32 %v8083_v11  ;;  %v3110_v34 = vand.u32 2147483648, %v8083_v11  ;;  %vm3104_vm7 = vweird.f32 %v8083_v11  ;;  %v3108_v9 = vand.u32 2147483647, %v8083_v11 }
 0x6af   :  { %v3081_v60 = vmul.f32 %v3912_v41, %v3079_v22  ;;  %vm3086_vm2 = vweird.f32 %v3912_v41  ;;  %3915 = vpow2.f32 %v3687_v32 }
 0x6b0   :  { %vm3087_vm4 = vmor %vm3085_vm3, %vm3086_vm2  ;;  %3917 = vpow2.f32 %v3688_v54  ;;  %v3111_v20 = vor.u32 1.1754944e-38, %v3110_v34  ;;  %vm3109_vm9 = vcmp.eq.f32.partialorder %v3108_v9, 8.507059e+37 }
 0x6b1   :  { %v3082_v57 = vsub.f32 1.0, %v3081_v60 }
 0x6b3   :  { %v3083_v52 = vmul.f32 %v3912_v41, %v3082_v57 }
 0x6b4   :  { %v3914_v61 = vpop.eup %3913 }
 0x6b5   :  { %v3100_v37 = vmul.f32 %v3914_v61, %v8083_v11  ;;  %v3084_v18 = vadd.f32 %v3912_v41, %v3083_v52  ;;  %vm3105_vm6 = vweird.f32 %v3914_v61  ;;  %v3916_v21 = vpop.eup %3915 }
 0x6b6   :  { %v3918_v0 = vpop.eup %3917  ;;  %vm3106_vm8 = vmor %vm3104_vm7, %vm3105_vm6  ;;  %v8100_v36 = vadd.f32 1.0, %v3916_v21 }
 0x6b7   :  { %v3101_v55 = vsub.f32 1.0, %v3100_v37  ;;  %v3088_v19 = vsel %vm3087_vm4, %v3912_v41, %v3084_v18  ;;  %v8102_v5 = vadd.f32 1.0, %v3918_v0 }
 0x6b8   :  { %v3093_v38 = vsel %vm3090_vm5, %v3092_v63, %v3088_v19  ;;  %vm3256_vm3 = vweird.f32 %v8100_v36 }
 0x6b9   :  { %v3146_v25 = vpop.f32.mrf.mxu0  ;;  %v3114_v15 = vmul.f32 %v3093_v38, %v3074_v33  ;;  %v3102_v42 = vmul.f32 %v3914_v61, %v3101_v55  ;;  %vm3271_vm6 = vweird.f32 %v8102_v5  ;;  %v3275_v34 = vand.u32 2147483647, %v8102_v5 }
 0x6ba   :  { %v3190_v3 = vrot.slane %v3146_v25, 1  ;;  %v3192_v59 = vadd.f32 %v3146_v25, %v8086_v23 }
 0x6bb   :  { %v3115_v56 = vadd.f32 %v3114_v15, %v3034_v31  ;;  %v3103_v48 = vadd.f32 %v3914_v61, %v3102_v42  ;;  %v3288_v42 = vrot.slane %v8088_v4, 2 }
 0x6bc   :  { %v3193_v1 = vadd.f32 %v3190_v3, %v8088_v4  ;;  %v3685_v43 = vmul.f32 -1.442695, %v3192_v59  ;;  %v3277_v4 = vand.u32 2147483648, %v8102_v5 }
 0x6bd   :  { %v3107_v40 = vsel %vm3106_vm8, %v3914_v61, %v3103_v48  ;;  %v3260_v48 = vand.u32 2147483647, %v8100_v36 }
 0x6be   :  { %3919 = vpow2.f32 %v3685_v43  ;;  %v3686_v6 = vmul.f32 -1.442695, %v3193_v1  ;;  %v3112_v2 = vsel %vm3109_vm9, %v3111_v20, %v3107_v40  ;;  %v3278_v20 = vor.u32 1.1754944e-38, %v3277_v4 }
 0x6bf   :  { %3921 = vtanh.f32 %v3115_v56  ;;  %v3186_v8 = vpop.f32.mrf.mxu2  ;;  %vm3261_vm8 = vcmp.eq.f32.partialorder %v3260_v48, 8.507059e+37  ;;  %vm3276_vm9 = vcmp.eq.f32.partialorder %v3275_v34, 8.507059e+37 }
 0x6c0   :  { %3923 = vpow2.f32 %v3686_v6  ;;  %v3281_v52 = vadd.f32 %v7908_v13, %v3186_v8  ;;  %v3287_v13 = vrot.slane %v8086_v23, 2  ;;  %v3262_v23 = vand.u32 2147483648, %v8100_v36 }
 0x6c2   :  { %v3283_v38 = vrot.slane %v3281_v52, 1 }
 0x6c4   :  { %v3920_v16 = vpop.eup %3919 }
 0x6c5   :  { %v3922_v35 = vpop.eup %3921  ;;  %v3200_v47 = vadd.f32 1.0, %v3920_v16  ;;  %v3263_v16 = vor.u32 1.1754944e-38, %v3262_v23 }
 0x6c6   :  { %v3924_v51 = vpop.eup %3923  ;;  %v3117_v26 = vsub.f32 %v7882_v7, %v3922_v35 }
 0x6c7   :  { %v3201_v22 = vadd.f32 1.0, %v3924_v51  ;;  %3925 = vrcp.f32 %v3200_v47  ;;  %v3213_v57 = vand.u32 2147483648, %v3200_v47  ;;  %v3211_v29 = vand.u32 2147483647, %v3200_v47 }
 0x6c8   :  { %3927 = vrcp.f32 %v8100_v36  ;;  %v3118_v11 = vmul.f32 %v3117_v26, %v3112_v2  ;;  %vm3207_vm11 = vweird.f32 %v3200_v47 }
 0x6c9   :  { %3929 = vrcp.f32 %v3201_v22  ;;  %v3228_v37 = vand.u32 2147483648, %v3201_v22  ;;  %v3226_v32 = vand.u32 2147483647, %v3201_v22  ;;  %v3214_v28 = vor.u32 1.1754944e-38, %v3213_v57 }
 0x6ca   :  { %3931 = vrcp.f32 %v8102_v5  ;;  %v8107_v50 = vadd.f32 %v3922_v35, %v3118_v11  ;;  %vm3212_vm14 = vcmp.eq.f32.partialorder %v3211_v29, 8.507059e+37  ;;  %vm3222_vm15 = vweird.f32 %v3201_v22 }
 0x6cb   :  { %v3229_v33 = vor.u32 1.1754944e-38, %v3228_v37  ;;  %vm3227_vm1 = vcmp.eq.f32.partialorder %v3226_v32, 8.507059e+37 }
 0x6cc   :  { %3344 = vmatmul.f32.vlgmr.msrb.gmra.mxu0 %v8107_v50  ;;  %3384 = vmatmul.f32.vlgmr.msrb.gmra.mxu2 %v8107_v50 }
 0x6cd   :  { %v3926_v41 = vpop.eup %3925 }
 0x6ce   :  { %v8111_v45 = vpop.eup %3927  ;;  %v3203_v7 = vmul.f32 %v3926_v41, %v3200_v47  ;;  %vm3208_vm10 = vweird.f32 %v3926_v41 }
 0x6cf   :  { %v3930_v46 = vpop.eup %3929  ;;  %v3252_v62 = vmul.f32 %v8111_v45, %v8100_v36  ;;  %vm3209_vm13 = vmor %vm3207_vm11, %vm3208_vm10  ;;  %vm3257_vm2 = vweird.f32 %v8111_v45 }
 0x6d0   :  { %v8113_v60 = vpop.eup %3931  ;;  %v3204_v24 = vsub.f32 1.0, %v3203_v7  ;;  %v3218_v17 = vmul.f32 %v3930_v46, %v3201_v22  ;;  %vm3223_vm12 = vweird.f32 %v3930_v46  ;;  %vm3258_vm5 = vmor %vm3256_vm3, %vm3257_vm2  ;;  %vm3512_vm2 = vcmask 254976  }
 0x6d1   :  { %v3267_v53 = vmul.f32 %v8113_v60, %v8102_v5  ;;  %v3253_v18 = vsub.f32 1.0, %v3252_v62  ;;  %vm3224_vm0 = vmor %vm3222_vm15, %vm3223_vm12  ;;  %vm3272_vm4 = vweird.f32 %v8113_v60 }
 0x6d2   :  { %v3205_v61 = vmul.f32 %v3926_v41, %v3204_v24  ;;  %v3219_v44 = vsub.f32 1.0, %v3218_v17  ;;  %vm3273_vm7 = vmor %vm3271_vm6, %vm3272_vm4 }
 0x6d3   :  { %v3268_v25 = vsub.f32 1.0, %v3267_v53  ;;  %v3254_v59 = vmul.f32 %v8111_v45, %v3253_v18 }
 0x6d4   :  { %v3206_v27 = vadd.f32 %v3926_v41, %v3205_v61  ;;  %v3220_v12 = vmul.f32 %v3930_v46, %v3219_v44  ;;  %3424 = vmatmul.f32.vlgmr.msra.gmra.mxu0 %v8107_v50  ;;  %3464 = vmatmul.f32.vlgmr.msra.gmra.mxu2 %v8107_v50 }
 0x6d5   :  { %v3269_v43 = vmul.f32 %v8113_v60, %v3268_v25  ;;  %v3255_v6 = vadd.f32 %v8111_v45, %v3254_v59 }
 0x6d6   :  { %v3210_v55 = vsel %vm3209_vm13, %v3926_v41, %v3206_v27  ;;  %v3221_v63 = vadd.f32 %v3930_v46, %v3220_v12 }
 0x6d7   :  { %v3215_v54 = vsel %vm3212_vm14, %v3214_v28, %v3210_v55  ;;  %v3270_v21 = vadd.f32 %v8113_v60, %v3269_v43  ;;  %v3259_v9 = vsel %vm3258_vm5, %v8111_v45, %v3255_v6 }
 0x6d8   :  { %v3225_v19 = vsel %vm3224_vm0, %v3930_v46, %v3221_v63  ;;  %v3285_v3 = vmul.f32 %v3281_v52, %v3215_v54  ;;  %v3264_v47 = vsel %vm3261_vm8, %v3263_v16, %v3259_v9  ;;  %vm3591_vm8 = vcmask 130048  }
 0x6d9   :  { %v3230_v31 = vsel %vm3227_vm1, %v3229_v33, %v3225_v19  ;;  %v3274_v40 = vsel %vm3273_vm7, %v8113_v60, %v3270_v21  ;;  %vm3560_vm7 = vcmask 261120  }
 0x6da   :  { %v3286_v15 = vmul.f32 %v3283_v38, %v3230_v31  ;;  %v3291_v1 = vadd.f32 %v3287_v13, %v3285_v3  ;;  %v3279_v22 = vsel %vm3276_vm9, %v3278_v20, %v3274_v40 }
 0x6dc   :  { %v3292_v56 = vadd.f32 %v3288_v42, %v3286_v15  ;;  %3933 = vtanh.f32 %v3291_v1 }
 0x6de   :  { %3935 = vtanh.f32 %v3292_v56 }
 0x6e2   :  { %v3934_v0 = vpop.eup %3933 }
 0x6e3   :  { %v3295_v36 = vsub.f32 %v7956_v10, %v3934_v0 }
 0x6e4   :  { %v3936_v35 = vpop.eup %3935 }
 0x6e5   :  { %v3296_v51 = vsub.f32 %v7960_v49, %v3936_v35  ;;  %v3297_v26 = vmul.f32 %v3295_v36, %v3264_v47 }
 0x6e7   :  { %v3298_v2 = vmul.f32 %v3296_v51, %v3279_v22  ;;  %v3299_v5 = vadd.f32 %v3934_v0, %v3297_v26  ;;  %v4598_v0 = vmov 32.0  }
 0x6e9   :  { %v3300_v11 = vadd.f32 %v3936_v35, %v3298_v2  ;;  %3303 = vst [vmem:[#allocation1] ss:$9 sm:$0xff] %v3299_v5  ;;  %v3555_v5 = vld [vmem:[%s8189_s9 + $0x18] sm:$0xff] }
 0x6eb   :  { %3305 = vst [vmem:[#allocation1 + $0x1] ss:$9 sm:$0xff] %v3300_v11  ;;  %v3554_v11 = vld [vmem:[%s8189_s9 + $0x10] sm:$0xff] }
 0x6f2   :  { %v3306_v41 = vld [vmem:[#allocation1] sm:$0xff] }
 0x6f3   :  { %3324 = vmatmul.f32.vlgmr.msra.gmra.mxu3 %v3306_v41  ;;  %3364 = vmatmul.f32.vlgmr.msrb.gmra.mxu1 %v3306_v41 }
 0x6f4   :  { %3576 = vmatpush.msra.mxu3 %v3555_v5 }
 0x6f6   :  { %3577 = vmatpush.msra.mxu3 %v3554_v11 }
 0x6fb   :  { %3404 = vmatmul.f32.vlgmr.msrb.gmra.mxu3 %v3306_v41  ;;  %3444 = vmatmul.f32.vlgmr.msra.gmra.mxu1 %v3306_v41  ;;  %v3553_v41 = vld [vmem:[%s8189_s9 + $0x8] sm:$0xff] }
 0x6fc   :  { %3578 = vmatpush.msra.mxu3 %v3553_v41 }
 0x749   :  { %v3345_v24 = vpop.f32.mrf.mxu0 }
 0x74f   :  { %v3385_v7 = vpop.f32.mrf.mxu2 }
 0x751   :  { %v3425_v3 = vpop.f32.mrf.mxu0 }
 0x757   :  { %v3465_v54 = vpop.f32.mrf.mxu2 }
 0x770   :  { %v3365_v45 = vpop.f32.mrf.mxu1 }
 0x771   :  { %v3366_v10 = vadd.f32 %v3365_v45, %v9588_v14  ;;  %v3552_v45 = vld [vmem:[%s8189_s9] sm:$0xff] }
 0x772   :  { %3579 = vmatpush.msra.mxu3 %v3552_v45 }
 0x773   :  { %v3386_v46 = vadd.f32 %v3385_v7, %v3366_v10  ;;  %v3586_v10 = vld [vmem:[%s8191_s11 + $0x8] sm:$0xff] }
 0x774   :  { %3609 = vmatpush.msrb.mxu0 %v3586_v10 }
 0x775   :  { %v3690_v60 = vmul.f32 -1.442695, %v3386_v46 }
 0x776   :  { %v3325_v8 = vpop.f32.mrf.mxu3 }
 0x777   :  { %v3326_v49 = vadd.f32 %v3325_v8, %v9587_v30  ;;  %3937 = vpow2.f32 %v3690_v60 }
 0x778   :  { %v3445_v52 = vpop.f32.mrf.mxu1 }
 0x779   :  { %v3346_v17 = vadd.f32 %v3345_v24, %v3326_v49  ;;  %v3446_v30 = vadd.f32 %v3445_v52, %v9589_v39  ;;  %v3585_v52 = vld [vmem:[%s8191_s11] sm:$0xff]  ;;  %s3623_s11 = sshll.u32 %s8193_s13, 4  ;;  %s3624_s11 = int_to_ptr.hbm [resolvable:$true] %s3623_s11 }
 0x77a   :  { %3610 = vmatpush.msrb.mxu0 %v3585_v52 }
 0x77b   :  { %v3689_v62 = vmul.f32 -1.442695, %v3346_v17  ;;  %v3466_v19 = vadd.f32 %v3465_v54, %v3446_v30  ;;  %v3706_v30 = vld [vmem:[%s8192_s12] ss:$0 sm:$0xff] }
 0x77d   :  { %3939 = vpow2.f32 %v3689_v62  ;;  %v3938_v57 = vpop.eup %3937 }
 0x77e   :  { %v3490_v29 = vadd.f32 1.0, %v3938_v57  ;;  %v3405_v32 = vpop.f32.mrf.mxu3 }
 0x77f   :  { %v3406_v25 = vadd.f32 %v3405_v32, %v5495_v58 }
 0x780   :  { %v3502_v43 = vand.u32 2147483648, %v3490_v29  ;;  %vm3496_vm15 = vweird.f32 %v3490_v29  ;;  %v3500_v56 = vand.u32 2147483647, %v3490_v29 }
 0x781   :  { %v3426_v15 = vadd.f32 %v3425_v3, %v3406_v25 }
 0x782   :  { %v3503_v23 = vor.u32 1.1754944e-38, %v3502_v43  ;;  %vm3501_vm1 = vcmp.eq.f32.partialorder %v3500_v56, 8.507059e+37 }
 0x783   :  { %v3940_v61 = vpop.eup %3939 }
 0x784   :  { %v3471_v44 = vadd.f32 1.0, %v3940_v61  ;;  %v3703_v61 = vld [vmem:[%s8187_s7] ss:$0 sm:$0xff] }
 0x786   :  { %3941 = vrcp.f32 %v3471_v44  ;;  %v3483_v12 = vand.u32 2147483648, %v3471_v44  ;;  %v3481_v55 = vand.u32 2147483647, %v3471_v44  ;;  %vm3477_vm11 = vweird.f32 %v3471_v44 }
 0x787   :  { %3943 = vrcp.f32 %v3490_v29 }
 0x788   :  { %v3484_v33 = vor.u32 1.1754944e-38, %v3483_v12  ;;  %vm3482_vm13 = vcmp.eq.f32.partialorder %v3481_v55, 8.507059e+37 }
 0x78c   :  { %v3942_v53 = vpop.eup %3941 }
 0x78d   :  { %v3944_v37 = vpop.eup %3943  ;;  %v3473_v14 = vmul.f32 %v3942_v53, %v3471_v44  ;;  %vm3478_vm10 = vweird.f32 %v3942_v53 }
 0x78e   :  { %v3492_v18 = vmul.f32 %v3944_v37, %v3490_v29  ;;  %vm3479_vm12 = vmor %vm3477_vm11, %vm3478_vm10  ;;  %vm3497_vm14 = vweird.f32 %v3944_v37 }
 0x78f   :  { %v3474_v27 = vsub.f32 1.0, %v3473_v14  ;;  %vm3498_vm0 = vmor %vm3496_vm15, %vm3497_vm14 }
 0x790   :  { %v3493_v13 = vsub.f32 1.0, %v3492_v18 }
 0x791   :  { %v3475_v28 = vmul.f32 %v3942_v53, %v3474_v27  ;;  %v3705_v27 = vld [vmem:[%s8190_s10] ss:$0 sm:$0xff] }
 0x792   :  { %v3494_v42 = vmul.f32 %v3944_v37, %v3493_v13 }
 0x793   :  { %v3476_v63 = vadd.f32 %v3942_v53, %v3475_v28 }
 0x794   :  { %v3495_v1 = vadd.f32 %v3944_v37, %v3494_v42 }
 0x795   :  { %v3480_v38 = vsel %vm3479_vm12, %v3942_v53, %v3476_v63  ;;  %v3704_v53 = vld [vmem:[%s8188_s8] ss:$0 sm:$0xff] }
 0x796   :  { %v3485_v59 = vsel %vm3482_vm13, %v3484_v33, %v3480_v38  ;;  %v3499_v58 = vsel %vm3498_vm0, %v3944_v37, %v3495_v1 }
 0x797   :  { %v3506_v31 = vmul.f32 %v3485_v59, %v3466_v19  ;;  %v3504_v21 = vsel %vm3501_vm1, %v3503_v23, %v3499_v58 }
 0x799   :  { %v3507_v39 = vadd.f32 %v3506_v31, %v3426_v15 }
 0x79b   :  { %3945 = vtanh.f32 %v3507_v39 }
 0x79c   :  { %3947 = vrcp.f32 %v4598_v0 }
 0x7a1   :  { %v3946_v6 = vpop.eup %3945 }
 0x7a2   :  { %v3509_v48 = vsub.f32 %v8107_v50, %v3946_v6  ;;  %v3948_v16 = vpop.eup %3947 }
 0x7a3   :  { %v3517_v40 = vmul.f32 32.0, %v3948_v16  ;;  %vm3521_vm3 = vweird.f32 %v3948_v16 }
 0x7a4   :  { %v3510_v4 = vmul.f32 %v3509_v48, %v3504_v21 }
 0x7a5   :  { %v3518_v36 = vsub.f32 1.0, %v3517_v40 }
 0x7a6   :  { %v3511_v34 = vadd.f32 %v3946_v6, %v3510_v4 }
 0x7a7   :  { %v3519_v35 = vmul.f32 %v3948_v16, %v3518_v36 }
 0x7a8   :  { %v3513_v9 = vsel %vm3512_vm2, %v3511_v34, 0.0 }
 0x7a9   :  { %3514 = vadd.xlane.f32.xlu0 %v3513_v9  ;;  %v3520_v20 = vadd.f32 %v3948_v16, %v3519_v35 }
 0x7ab   :  { %v3522_v47 = vsel %vm3521_vm3, %v3948_v16, %v3520_v20 }
 0x81c   :  { %v3515_v51 = vpop.xlane.xlu0 %3514 }
 0x81d   :  { %v3523_v26 = vmul.f32 %v3522_v47, %v3515_v51 }
 0x81f   :  { %v3524_v22 = vsub.f32 %v3511_v34, %v3523_v26 }
 0x821   :  { %v3525_v50 = vmul.f32 %v3524_v22, %v3524_v22 }
 0x823   :  { %v3526_v2 = vsel %vm3512_vm2, %v3525_v50, 0.0 }
 0x824   :  { %3527 = vadd.xlane.f32.xlu0 %v3526_v2 }
 0x897   :  { %v3528_v7 = vpop.xlane.xlu0 %3527 }
 0x898   :  { %v3529_v46 = vmul.f32 %v3528_v7, %v3522_v47 }
 0x89a   :  { %v3530_v60 = vadd.f32 1e-05, %v3529_v46 }
 0x89c   :  { %3949 = vrsqrt.f32 %v3530_v60  ;;  %vm3537_vm5 = vweird.f32 %v3530_v60 }
 0x8a2   :  { %v3950_v8 = vpop.eup %3949 }
 0x8a3   :  { %v3532_v49 = vmul.f32 %v3950_v8, %v3530_v60  ;;  %vm3538_vm4 = vweird.f32 %v3950_v8 }
 0x8a4   :  { %vm3539_vm6 = vmor %vm3537_vm5, %vm3538_vm4 }
 0x8a5   :  { %v3533_v24 = vmul.f32 %v3950_v8, %v3532_v49 }
 0x8a7   :  { %v3534_v17 = vmul.f32 0.5, %v3533_v24 }
 0x8a9   :  { %v3535_v62 = vsub.f32 1.5, %v3534_v17 }
 0x8ab   :  { %v3536_v57 = vmul.f32 %v3950_v8, %v3535_v62 }
 0x8ad   :  { %v3540_v29 = vsel %vm3539_vm6, %v3950_v8, %v3536_v57 }
 0x8ae   :  { %v3541_v44 = vmul.f32 %v3540_v29, %v3524_v22 }
 0x8b0   :  { %v3546_v37 = vmul.f32 %v3703_v61, %v3541_v44 }
 0x8b2   :  { %v3551_v14 = vadd.f32 %v3704_v53, %v3546_v37 }
 0x8b4   :  { %3691 = vmatmul.msk.f32.vlgmr.msra.gmra.mxu3 %vm3560_vm7, %v3551_v14 }
 0x937   :  { %v3581_v12 = vpop.f32.mrf.mxu3 }
 0x938   :  { %v3582_v32 = vadd.f32 %v3705_v27, %v3581_v12 }
 0x93a   :  { %v3584_v18 = vmax.f32 %v3582_v32, 0.0 }
 0x93c   :  { %3692 = vmatmul.msk.f32.vlgmr.msrb.gmra.mxu0 %vm3591_vm8, %v3584_v18 }
 0x9b9   :  { %v3612_v28 = vpop.f32.mrf.mxu0 }
 0x9ba   :  { %v3613_v55 = vadd.f32 %v3706_v30, %v3612_v28 }
 0x9bc   :  { %3615 = vst [vmem:[#allocation8] sm:$0x3] %v3613_v55 }
 0x9bd   :  { %3626 = dma.vmem_to_hbm [thread:$0]  %s3622_s6, 32, %s3624_s11, [#allocation5]  }
 0x9be   :  { %4589 = dma.done.wait [#allocation5], 32  }
 0x9bf   :  { %4590 = vsyncadd [#allocation5], 4294967264 }
 0x9c0   :  { %3631 = vsyncpa [#allocation4], 1 }
 0x9c1   :  { %3632 = vsyncpa [#allocation7], 1 }
 0x9c2   :  { %3633 = vsyncpa [#allocation5], 1 }

</bundles_post_ra>
